<compile_context>
chip_gen: v5e
topology: v5e:2x2
jax: 0.10.0
libtpu: 0.0.40
codegen_flags: <defaults>
</compile_context>

<pallas_src>
import functools

import numpy as np

import jax
import jax.numpy as jnp
from jax.experimental import pallas as pl
from jax.experimental.pallas import tpu as pltpu


def _round_up(n, m):
    return ((n + m - 1) // m) * m


def _geometry(H, W, C0):
    Hp, Wp = H + 2, W + 2                 # conv1/conv2 zero-padded grid
    H2, W2 = H // 2, W // 2               # conv2 output resolution
    Hp3, Wp3 = H2 + 2, W2 + 2             # conv3 zero-padded grid
    N1, N3 = Hp * Wp, Hp3 * Wp3
    G1 = _round_up(Wp + 1, 8)             # guard rows >= largest tap shift
    N1g = _round_up(G1 + N1 + Wp + 1, 8)  # guarded conv1-grid row count
    G3 = _round_up(Wp3 + 1, 8)
    N3g = _round_up(G3 + N3 + Wp3 + 1, 8)
    K1 = _round_up(9 * C0, 8)             # conv1 im2col feature width (padded)
    return dict(Hp=Hp, Wp=Wp, H2=H2, W2=W2, Hp3=Hp3, Wp3=Wp3, N1=N1, N3=N3,
                G1=G1, N1g=N1g, G3=G3, N3g=N3g, K1=K1)


# ---------------------------------------------------------------------------
# Fused forward pass (single pallas_call)
# ---------------------------------------------------------------------------
def small_encoder_forward(kp, x_nchw):
    B, C0, H, W = x_nchw.shape
    g = _geometry(H, W, C0)
    Hp, Wp, H2, W2, Wp3 = g["Hp"], g["Wp"], g["H2"], g["W2"], g["Wp3"]
    N1, N3 = g["N1"], g["N3"]
    G1, N1g, G3, N3g, K1 = g["G1"], g["N1g"], g["G3"], g["N3g"], g["K1"]

    C1 = kp["w1f"].shape[1]        # 32
    C2 = kp["w2f"].shape[1]        # 64
    C3 = kp["w3f"].shape[1]        # 64
    D = kp["w1p"].shape[1]         # 32  (linear_1 width)
    Kh = kp["w1p"].shape[0]        # H2*W2*C3 = intermediate_conv_size
    L2 = kp["wh"].shape[1]
    L = L2 // 2                    # latent dims

    shifts1 = [(kh - 1) * Wp + (kw - 1) for kh in range(3) for kw in range(3)]
    shifts3 = [(kh - 1) * Wp3 + (kw - 1) for kh in range(3) for kw in range(3)]

    # --- wrapper-side glue on the tiny raw input only: NCHW -> conv1 im2col
    # laid out on the guarded flat padded grid (rows = padded positions).
    x_nhwc = jnp.transpose(x_nchw, (0, 2, 3, 1)).astype(jnp.float32)
    x2 = jnp.pad(x_nhwc, ((0, 0), (2, 2), (2, 2), (0, 0)))
    cols = [x2[:, kh:kh + Hp, kw:kw + Wp, :]
            for kh in range(3) for kw in range(3)]
    xc = jnp.concatenate(cols, axis=-1).reshape(B, N1, 9 * C0)
    xc = jnp.pad(xc, ((0, 0), (G1, N1g - G1 - N1), (0, K1 - 9 * C0)))
    xc = xc.astype(jnp.bfloat16)                       # (B, N1g, K1)

    def kernel(xc_ref, mask_ref, w1_ref, b1_ref, w2_ref, b2_ref, selp_ref,
               w3_ref, b3_ref, w1p_ref, bl1_ref, wh_ref, bh_ref,
               mu_ref, sig_ref, lhs2_ref, lhs3_ref, flat_ref):
        f32 = jnp.float32
        bf16 = jnp.bfloat16

        # ---- conv1: one wide-K dot over the whole guarded padded grid.
        # mask zeroes the pad ring + guard rows (acts as conv2's zero padding).
        a1 = jnp.dot(xc_ref[0], w1_ref[...], preferred_element_type=f32)
        a1 = jnp.maximum(a1 + b1_ref[...], 0.0) * mask_ref[...]   # (N1g, C1)

        # ---- conv2 (stride 1 over padded grid): wide-K (9*C1) single dot.
        for t, s in enumerate(shifts1):
            lhs2_ref[:, t * C1:(t + 1) * C1] = a1[G1 + s:G1 + s + N1, :]
        a2 = jnp.dot(lhs2_ref[...].astype(bf16), w2_ref[...],
                     preferred_element_type=f32)
        a2 = jnp.maximum(a2 + b2_ref[...], 0.0).astype(bf16)      # (N1, C2)

        # ---- stride-2 subsample scattered straight into conv3's guarded,
        # zero-padded input grid with ONE selection matmul.
        p3 = jnp.dot(selp_ref[...], a2, preferred_element_type=f32)  # (N3g, C2)

        # ---- conv3: wide-K (9*C2) single dot over the (Hp3, Wp3) grid.
        for t, s in enumerate(shifts3):
            lhs3_ref[:, t * C2:(t + 1) * C2] = p3[G3 + s:G3 + s + N3, :]
        a3 = jnp.dot(lhs3_ref[...].astype(bf16), w3_ref[...],
                     preferred_element_type=f32)
        a3 = jnp.maximum(a3 + b3_ref[...], 0.0)                    # (N3, C3)

        # ---- flatten interior rows -> (1, Kh) row vector.  w1p rows were
        # permuted at prep time so this (position, channel) order matches
        # torch's NCHW flatten exactly.
        for i in range(H2):
            for j in range(W2):
                r = (i + 1) * Wp3 + (j + 1)
                q = (i * W2 + j) * C3
                flat_ref[:, q:q + C3] = a3[r:r + 1, :]

        # ---- linear_1 + relu + fused mean/std heads (std gets exp).
        h = jnp.dot(flat_ref[...].astype(bf16), w1p_ref[...],
                    preferred_element_type=f32)
        h = jnp.maximum(h + bl1_ref[...], 0.0)                     # (1, D)
        z = jnp.dot(h.astype(bf16), wh_ref[...],
                    preferred_element_type=f32) + bh_ref[...]      # (1, 2L)
        mu_ref[0] = z[:, :L]
        sig_ref[0] = jnp.exp(z[:, L:])

    mu, sig = pl.pallas_call(
        kernel,
        out_shape=(jax.ShapeDtypeStruct((B, 1, L), jnp.float32),
                   jax.ShapeDtypeStruct((B, 1, L), jnp.float32)),
        grid=(B,),
        in_specs=[
            pl.BlockSpec((1, N1g, K1), lambda b: (b, 0, 0)),   # conv1 im2col
            pl.BlockSpec((N1g, 1), lambda b: (0, 0)),          # interior mask
            pl.BlockSpec((K1, C1), lambda b: (0, 0)),          # conv1 weight
            pl.BlockSpec((1, C1), lambda b: (0, 0)),
            pl.BlockSpec((9 * C1, C2), lambda b: (0, 0)),      # conv2 weight
            pl.BlockSpec((1, C2), lambda b: (0, 0)),
            pl.BlockSpec((N3g, N1), lambda b: (0, 0)),         # sel_pad
            pl.BlockSpec((9 * C2, C3), lambda b: (0, 0)),      # conv3 weight
            pl.BlockSpec((1, C3), lambda b: (0, 0)),
            pl.BlockSpec((Kh, D), lambda b: (0, 0)),           # linear_1 (perm)
            pl.BlockSpec((1, D), lambda b: (0, 0)),
            pl.BlockSpec((D, L2), lambda b: (0, 0)),           # heads (fused)
            pl.BlockSpec((1, L2), lambda b: (0, 0)),
        ],
        out_specs=(pl.BlockSpec((1, 1, L), lambda b: (b, 0, 0)),
                   pl.BlockSpec((1, 1, L), lambda b: (b, 0, 0))),
        scratch_shapes=[
            pltpu.VMEM((N1, 9 * C1), jnp.float32),    # conv2 shifted-tap LHS
            pltpu.VMEM((N3, 9 * C2), jnp.float32),    # conv3 shifted-tap LHS
            pltpu.VMEM((1, Kh), jnp.float32),         # flattened conv3 output
        ],
        compiler_params=pltpu.CompilerParams(
            dimension_semantics=("parallel",)),
    )(xc, kp["mask"], kp["w1f"], kp["b1"], kp["w2f"], kp["b2"], kp["selp"],
      kp["w3f"], kp["b3"], kp["w1p"], kp["b_lin1"], kp["wh"], kp["bh"])

    return mu.reshape(B, L), sig.reshape(B, L)


# ---------------------------------------------------------------------------
# Parameters (torch-equivalent) and one-time kernel-ready repacking
# ---------------------------------------------------------------------------
def init_params(key, input_shape=(16, 16, 3), latent_dims=10):
    width, height, channels = input_shape
    inter = 64 * (width // 2) * (height // 2)    # intermediate_conv_size
    keys = jax.random.split(key, 12)

    def w(k, shape, scale=0.02):
        return (scale * jax.random.normal(k, shape)).astype(jnp.float32)

    return {
        "w_conv1": w(keys[0], (3, 3, channels, 32)),
        "b_conv1": w(keys[1], (32,)),
        "w_conv2": w(keys[2], (3, 3, 32, 64)),
        "b_conv2": w(keys[3], (64,)),
        "w_conv3": w(keys[4], (3, 3, 64, 64)),
        "b_conv3": w(keys[5], (64,)),
        "w_lin1":  w(keys[6], (inter, 32)),
        "b_lin1":  w(keys[7], (32,)),
        "w_mu":    w(keys[8], (32, latent_dims)),
        "b_mu":    w(keys[9], (latent_dims,)),
        "w_sigma": w(keys[10], (32, latent_dims)),
        "b_sigma": w(keys[11], (latent_dims,)),
    }


def prepare_params(params, input_shape):
    width, height, channels = input_shape
    H, W, C0 = height, width, channels
    g = _geometry(H, W, C0)
    Hp, Wp, H2, W2, Wp3 = g["Hp"], g["Wp"], g["H2"], g["W2"], g["Wp3"]
    N1, N3, G1, N1g, G3, N3g, K1 = (g["N1"], g["N3"], g["G1"], g["N1g"],
                                    g["G3"], g["N3g"], g["K1"])

    w1 = np.asarray(params["w_conv1"], np.float32)
    w2 = np.asarray(params["w_conv2"], np.float32)
    w3 = np.asarray(params["w_conv3"], np.float32)
    C1, C2, C3 = w1.shape[3], w2.shape[3], w3.shape[3]

    # conv1 weight as (9*C0 -> K1 padded, C1), tap-major (kh, kw, cin) rows.
    w1f = np.zeros((K1, C1), np.float32)
    w1f[:9 * C0] = w1.reshape(9 * C0, C1)

    # interior mask over the guarded+padded conv1/conv2 grid.
    mask = np.zeros((N1g, 1), np.float32)
    for r in range(N1):
        i3, j3 = divmod(r, Wp)
        if 1 <= i3 <= H and 1 <= j3 <= W:
            mask[G1 + r, 0] = 1.0

    # stride-2 subsample scattered directly into conv3's guarded padded grid.
    selp = np.zeros((N3g, N1), np.float32)
    for r3 in range(N3):
        i3, j3 = divmod(r3, Wp3)
        if 1 <= i3 <= H2 and 1 <= j3 <= W2:
            selp[G3 + r3, (2 * (i3 - 1) + 1) * Wp + (2 * (j3 - 1) + 1)] = 1.0

    # fold torch's NCHW flatten (c, h, w) into our (h*w, c) flat-row order.
    wl1 = np.asarray(params["w_lin1"], np.float32)       # (C3*H2*W2, D)
    D = wl1.shape[1]
    w1p = (wl1.reshape(C3, H2 * W2, D).transpose(1, 0, 2)
           .reshape(H2 * W2 * C3, D))

    bf16 = jnp.bfloat16
    f32 = jnp.float32
    return {
        "w1f": jnp.asarray(w1f, bf16),
        "b1": jnp.asarray(params["b_conv1"]).reshape(1, -1).astype(f32),
        "w2f": jnp.asarray(w2.reshape(9 * C1, C2), bf16),
        "b2": jnp.asarray(params["b_conv2"]).reshape(1, -1).astype(f32),
        "w3f": jnp.asarray(w3.reshape(9 * C2, C3), bf16),
        "b3": jnp.asarray(params["b_conv3"]).reshape(1, -1).astype(f32),
        "mask": jnp.asarray(mask, f32),
        "selp": jnp.asarray(selp, bf16),
        "w1p": jnp.asarray(w1p, bf16),
        "b_lin1": jnp.asarray(params["b_lin1"]).reshape(1, -1).astype(f32),
        "wh": jnp.concatenate([params["w_mu"], params["w_sigma"]],
                              axis=1).astype(bf16),
        "bh": jnp.concatenate([params["b_mu"], params["b_sigma"]]
                              ).reshape(1, -1).astype(f32),
    }


# ---------------------------------------------------------------------------
# Pure-JAX reference (PyTorch semantics) for the correctness check
# ---------------------------------------------------------------------------
def reference_forward(params, x_nchw):
    x = jnp.transpose(x_nchw, (0, 2, 3, 1))

    def conv(x, w, b, stride):
        y = jax.lax.conv_general_dilated(
            x, w, window_strides=(stride, stride), padding=((1, 1), (1, 1)),
            dimension_numbers=("NHWC", "HWIO", "NHWC"))
        return jax.nn.relu(y + b)

    x = conv(x, params["w_conv1"], params["b_conv1"], 1)
    x = conv(x, params["w_conv2"], params["b_conv2"], 2)
    x = conv(x, params["w_conv3"], params["b_conv3"], 1)
    B, H, W, C = x.shape
    flat = jnp.transpose(x, (0, 3, 1, 2)).reshape(B, C * H * W)   # NCHW flatten
    h = jax.nn.relu(flat @ params["w_lin1"] + params["b_lin1"])
    mu = h @ params["w_mu"] + params["b_mu"]
    sigma = jnp.exp(h @ params["w_sigma"] + params["b_sigma"])
    return mu, sigma


if __name__ == "__main__":
    key = jax.random.PRNGKey(0)
    pkey, xkey = jax.random.split(key)

    input_shape = (16, 16, 3)    # (width, height, channels), small variant
    latent_dims = 10
    batch = 2

    params = init_params(pkey, input_shape, latent_dims)
    kparams = prepare_params(params, input_shape)
    x = jax.random.normal(
        xkey, (batch, input_shape[2], input_shape[1], input_shape[0]),
        dtype=jnp.float32)       # NCHW, like PyTorch

    fwd = jax.jit(functools.partial(small_encoder_forward, kparams))
    mu, sigma = fwd(x)
    jax.block_until_ready((mu, sigma))

    mu_ref, sigma_ref = reference_forward(params, x)
    assert mu.shape == (batch, latent_dims)
    assert sigma.shape == (batch, latent_dims)
    # bf16 matmul operands (f32 accumulation) -> slightly looser tolerance.
    assert jnp.allclose(mu, mu_ref, atol=1e-2, rtol=1e-2), \
        float(jnp.max(jnp.abs(mu - mu_ref)))
    assert jnp.allclose(sigma, sigma_ref, atol=1e-2, rtol=1e-2), \
        float(jnp.max(jnp.abs(sigma - sigma_ref)))
    print("KERNEL_OK")
</pallas_src>

<mosaic_0001>
module attributes {stable_mosaic.version = 11 : i64} {
  func.func @kernel(%arg0: i32, %arg1: memref<1x368x32xbf16, #tpu.memory_space<vmem>>, %arg2: memref<368x1xf32, #tpu.memory_space<vmem>>, %arg3: memref<32x32xbf16, #tpu.memory_space<vmem>>, %arg4: memref<1x32xf32, #tpu.memory_space<vmem>>, %arg5: memref<288x64xbf16, #tpu.memory_space<vmem>>, %arg6: memref<1x64xf32, #tpu.memory_space<vmem>>, %arg7: memref<128x324xbf16, #tpu.memory_space<vmem>>, %arg8: memref<576x64xbf16, #tpu.memory_space<vmem>>, %arg9: memref<1x64xf32, #tpu.memory_space<vmem>>, %arg10: memref<4096x32xbf16, #tpu.memory_space<vmem>>, %arg11: memref<1x32xf32, #tpu.memory_space<vmem>>, %arg12: memref<32x20xbf16, #tpu.memory_space<vmem>>, %arg13: memref<1x20xf32, #tpu.memory_space<vmem>>, %arg14: memref<1x1x10xf32, #tpu.memory_space<vmem>>, %arg15: memref<1x1x10xf32, #tpu.memory_space<vmem>>, %arg16: memref<324x288xf32, #tpu.memory_space<vmem>>, %arg17: memref<100x576xf32, #tpu.memory_space<vmem>>, %arg18: memref<1x4096xf32, #tpu.memory_space<vmem>>) attributes {dimension_semantics = [#tpu.dimension_semantics<parallel>], iteration_bounds = array<i64: 2>, scalar_prefetch = 0 : i64, scratch_operands = 3 : i64, tpu.core_type = #tpu.core_type<tc>, window_params = [{transform_indices = @transform_0, window_bounds = array<i64: 1, 368, 32>}, {pipeline_mode = #tpu.pipeline_mode<synchronous>, transform_indices = @transform_1, window_bounds = array<i64: 368, 1>}, {pipeline_mode = #tpu.pipeline_mode<synchronous>, transform_indices = @transform_2, window_bounds = array<i64: 32, 32>}, {pipeline_mode = #tpu.pipeline_mode<synchronous>, transform_indices = @transform_3, window_bounds = array<i64: 1, 32>}, {pipeline_mode = #tpu.pipeline_mode<synchronous>, transform_indices = @transform_4, window_bounds = array<i64: 288, 64>}, {pipeline_mode = #tpu.pipeline_mode<synchronous>, transform_indices = @transform_5, window_bounds = array<i64: 1, 64>}, {pipeline_mode = #tpu.pipeline_mode<synchronous>, transform_indices = @transform_6, window_bounds = array<i64: 128, 324>}, {pipeline_mode = #tpu.pipeline_mode<synchronous>, transform_indices = @transform_7, window_bounds = array<i64: 576, 64>}, {pipeline_mode = #tpu.pipeline_mode<synchronous>, transform_indices = @transform_8, window_bounds = array<i64: 1, 64>}, {pipeline_mode = #tpu.pipeline_mode<synchronous>, transform_indices = @transform_9, window_bounds = array<i64: 4096, 32>}, {pipeline_mode = #tpu.pipeline_mode<synchronous>, transform_indices = @transform_10, window_bounds = array<i64: 1, 32>}, {pipeline_mode = #tpu.pipeline_mode<synchronous>, transform_indices = @transform_11, window_bounds = array<i64: 32, 20>}, {pipeline_mode = #tpu.pipeline_mode<synchronous>, transform_indices = @transform_12, window_bounds = array<i64: 1, 20>}, {transform_indices = @transform_13, window_bounds = array<i64: 1, 1, 10>}, {transform_indices = @transform_14, window_bounds = array<i64: 1, 1, 10>}]} {
    %c0 = arith.constant 0 : index
    %c0_0 = arith.constant 0 : index
    %c0_1 = arith.constant 0 : index
    %0 = vector.load %arg1[%c0, %c0_0, %c0_1] : memref<1x368x32xbf16, #tpu.memory_space<vmem>>, vector<1x368x32xbf16>
    %1 = vector.shape_cast %0 : vector<1x368x32xbf16> to vector<368x32xbf16>
    %c0_2 = arith.constant 0 : index
    %c0_3 = arith.constant 0 : index
    %2 = vector.load %arg3[%c0_2, %c0_3] : memref<32x32xbf16, #tpu.memory_space<vmem>>, vector<32x32xbf16>
    %cst = arith.constant dense<0.000000e+00> : vector<368x32xf32>
    %3 = tpu.matmul %1, %2, %cst {dimension_numbers = #tpu.dot_dimension_numbers<[1], [0], [0], [1], [0, 0, 1, 1], [], []>} : vector<368x32xbf16>, vector<32x32xbf16>, vector<368x32xf32> -> vector<368x32xf32>
    %c0_4 = arith.constant 0 : index
    %c0_5 = arith.constant 0 : index
    %4 = vector.load %arg4[%c0_4, %c0_5] : memref<1x32xf32, #tpu.memory_space<vmem>>, vector<1x32xf32>
    %5 = vector.broadcast %4 : vector<1x32xf32> to vector<368x32xf32>
    %6 = arith.addf %3, %5 : vector<368x32xf32>
    %cst_6 = arith.constant 0.000000e+00 : f32
    %7 = vector.broadcast %cst_6 : f32 to vector<368x32xf32>
    %8 = arith.maximumf %6, %7 : vector<368x32xf32>
    %c0_7 = arith.constant 0 : index
    %c0_8 = arith.constant 0 : index
    %9 = vector.load %arg2[%c0_7, %c0_8] : memref<368x1xf32, #tpu.memory_space<vmem>>, vector<368x1xf32>
    %10 = vector.broadcast %9 : vector<368x1xf32> to vector<368x32xf32>
    %11 = arith.mulf %8, %10 : vector<368x32xf32>
    %12 = vector.extract_strided_slice %11 {offsets = [5, 0], sizes = [324, 32], strides = [1, 1]} : vector<368x32xf32> to vector<324x32xf32>
    %c0_9 = arith.constant 0 : index
    %c0_10 = arith.constant 0 : index
    %13 = vector.load %arg16[%c0_9, %c0_10] : memref<324x288xf32, #tpu.memory_space<vmem>>, vector<324x32xf32>
    tpu.vector_store %arg16[%c0_9, %c0_10], %12 {strides = array<i32>} : memref<324x288xf32, #tpu.memory_space<vmem>>, vector<324x32xf32>,
    %14 = vector.extract_strided_slice %11 {offsets = [6, 0], sizes = [324, 32], strides = [1, 1]} : vector<368x32xf32> to vector<324x32xf32>
    %c0_11 = arith.constant 0 : index
    %c32 = arith.constant 32 : index
    %15 = vector.load %arg16[%c0_11, %c32] : memref<324x288xf32, #tpu.memory_space<vmem>>, vector<324x32xf32>
    tpu.vector_store %arg16[%c0_11, %c32], %14 {strides = array<i32>} : memref<324x288xf32, #tpu.memory_space<vmem>>, vector<324x32xf32>,
    %16 = vector.extract_strided_slice %11 {offsets = [7, 0], sizes = [324, 32], strides = [1, 1]} : vector<368x32xf32> to vector<324x32xf32>
    %c0_12 = arith.constant 0 : index
    %c64 = arith.constant 64 : index
    %17 = vector.load %arg16[%c0_12, %c64] : memref<324x288xf32, #tpu.memory_space<vmem>>, vector<324x32xf32>
    tpu.vector_store %arg16[%c0_12, %c64], %16 {strides = array<i32>} : memref<324x288xf32, #tpu.memory_space<vmem>>, vector<324x32xf32>,
    %18 = vector.extract_strided_slice %11 {offsets = [23, 0], sizes = [324, 32], strides = [1, 1]} : vector<368x32xf32> to vector<324x32xf32>
    %c0_13 = arith.constant 0 : index
    %c96 = arith.constant 96 : index
    %19 = vector.load %arg16[%c0_13, %c96] : memref<324x288xf32, #tpu.memory_space<vmem>>, vector<324x32xf32>
    tpu.vector_store %arg16[%c0_13, %c96], %18 {strides = array<i32>} : memref<324x288xf32, #tpu.memory_space<vmem>>, vector<324x32xf32>,
    %20 = vector.extract_strided_slice %11 {offsets = [24, 0], sizes = [324, 32], strides = [1, 1]} : vector<368x32xf32> to vector<324x32xf32>
    %c0_14 = arith.constant 0 : index
    %c128 = arith.constant 128 : index
    %21 = vector.load %arg16[%c0_14, %c128] : memref<324x288xf32, #tpu.memory_space<vmem>>, vector<324x32xf32>
    tpu.vector_store %arg16[%c0_14, %c128], %20 {strides = array<i32>} : memref<324x288xf32, #tpu.memory_space<vmem>>, vector<324x32xf32>,
    %22 = vector.extract_strided_slice %11 {offsets = [25, 0], sizes = [324, 32], strides = [1, 1]} : vector<368x32xf32> to vector<324x32xf32>
    %c0_15 = arith.constant 0 : index
    %c160 = arith.constant 160 : index
    %23 = vector.load %arg16[%c0_15, %c160] : memref<324x288xf32, #tpu.memory_space<vmem>>, vector<324x32xf32>
    tpu.vector_store %arg16[%c0_15, %c160], %22 {strides = array<i32>} : memref<324x288xf32, #tpu.memory_space<vmem>>, vector<324x32xf32>,
    %24 = vector.extract_strided_slice %11 {offsets = [41, 0], sizes = [324, 32], strides = [1, 1]} : vector<368x32xf32> to vector<324x32xf32>
    %c0_16 = arith.constant 0 : index
    %c192 = arith.constant 192 : index
    %25 = vector.load %arg16[%c0_16, %c192] : memref<324x288xf32, #tpu.memory_space<vmem>>, vector<324x32xf32>
    tpu.vector_store %arg16[%c0_16, %c192], %24 {strides = array<i32>} : memref<324x288xf32, #tpu.memory_space<vmem>>, vector<324x32xf32>,
    %26 = vector.extract_strided_slice %11 {offsets = [42, 0], sizes = [324, 32], strides = [1, 1]} : vector<368x32xf32> to vector<324x32xf32>
    %c0_17 = arith.constant 0 : index
    %c224 = arith.constant 224 : index
    %27 = vector.load %arg16[%c0_17, %c224] : memref<324x288xf32, #tpu.memory_space<vmem>>, vector<324x32xf32>
    tpu.vector_store %arg16[%c0_17, %c224], %26 {strides = array<i32>} : memref<324x288xf32, #tpu.memory_space<vmem>>, vector<324x32xf32>,
    %28 = vector.extract_strided_slice %11 {offsets = [43, 0], sizes = [324, 32], strides = [1, 1]} : vector<368x32xf32> to vector<324x32xf32>
    %c0_18 = arith.constant 0 : index
    %c256 = arith.constant 256 : index
    %29 = vector.load %arg16[%c0_18, %c256] : memref<324x288xf32, #tpu.memory_space<vmem>>, vector<324x32xf32>
    tpu.vector_store %arg16[%c0_18, %c256], %28 {strides = array<i32>} : memref<324x288xf32, #tpu.memory_space<vmem>>, vector<324x32xf32>,
    %c0_19 = arith.constant 0 : index
    %c0_20 = arith.constant 0 : index
    %30 = vector.load %arg16[%c0_19, %c0_20] : memref<324x288xf32, #tpu.memory_space<vmem>>, vector<324x288xf32>
    %31 = arith.truncf %30 : vector<324x288xf32> to vector<324x288xbf16>
    %c0_21 = arith.constant 0 : index
    %c0_22 = arith.constant 0 : index
    %32 = vector.load %arg5[%c0_21, %c0_22] : memref<288x64xbf16, #tpu.memory_space<vmem>>, vector<288x64xbf16>
    %cst_23 = arith.constant dense<0.000000e+00> : vector<324x64xf32>
    %33 = tpu.matmul %31, %32, %cst_23 {dimension_numbers = #tpu.dot_dimension_numbers<[1], [0], [0], [1], [0, 0, 1, 1], [], []>} : vector<324x288xbf16>, vector<288x64xbf16>, vector<324x64xf32> -> vector<324x64xf32>
    %c0_24 = arith.constant 0 : index
    %c0_25 = arith.constant 0 : index
    %34 = vector.load %arg6[%c0_24, %c0_25] : memref<1x64xf32, #tpu.memory_space<vmem>>, vector<1x64xf32>
    %35 = vector.broadcast %34 : vector<1x64xf32> to vector<324x64xf32>
    %36 = arith.addf %33, %35 : vector<324x64xf32>
    %cst_26 = arith.constant 0.000000e+00 : f32
    %37 = vector.broadcast %cst_26 : f32 to vector<324x64xf32>
    %38 = arith.maximumf %36, %37 : vector<324x64xf32>
    %39 = arith.truncf %38 : vector<324x64xf32> to vector<324x64xbf16>
    %c0_27 = arith.constant 0 : index
    %c0_28 = arith.constant 0 : index
    %40 = vector.load %arg7[%c0_27, %c0_28] : memref<128x324xbf16, #tpu.memory_space<vmem>>, vector<128x324xbf16>
    %cst_29 = arith.constant dense<0.000000e+00> : vector<128x64xf32>
    %41 = tpu.matmul %40, %39, %cst_29 {dimension_numbers = #tpu.dot_dimension_numbers<[1], [0], [0], [1], [0, 0, 1, 1], [], []>} : vector<128x324xbf16>, vector<324x64xbf16>, vector<128x64xf32> -> vector<128x64xf32>
    %42 = vector.extract_strided_slice %41 {offsets = [5, 0], sizes = [100, 64], strides = [1, 1]} : vector<128x64xf32> to vector<100x64xf32>
    %c0_30 = arith.constant 0 : index
    %c0_31 = arith.constant 0 : index
    %43 = vector.load %arg17[%c0_30, %c0_31] : memref<100x576xf32, #tpu.memory_space<vmem>>, vector<100x64xf32>
    tpu.vector_store %arg17[%c0_30, %c0_31], %42 {strides = array<i32>} : memref<100x576xf32, #tpu.memory_space<vmem>>, vector<100x64xf32>,
    %44 = vector.extract_strided_slice %41 {offsets = [6, 0], sizes = [100, 64], strides = [1, 1]} : vector<128x64xf32> to vector<100x64xf32>
    %c0_32 = arith.constant 0 : index
    %c64_33 = arith.constant 64 : index
    %45 = vector.load %arg17[%c0_32, %c64_33] : memref<100x576xf32, #tpu.memory_space<vmem>>, vector<100x64xf32>
    tpu.vector_store %arg17[%c0_32, %c64_33], %44 {strides = array<i32>} : memref<100x576xf32, #tpu.memory_space<vmem>>, vector<100x64xf32>,
    %46 = vector.extract_strided_slice %41 {offsets = [7, 0], sizes = [100, 64], strides = [1, 1]} : vector<128x64xf32> to vector<100x64xf32>
    %c0_34 = arith.constant 0 : index
    %c128_35 = arith.constant 128 : index
    %47 = vector.load %arg17[%c0_34, %c128_35] : memref<100x576xf32, #tpu.memory_space<vmem>>, vector<100x64xf32>
    tpu.vector_store %arg17[%c0_34, %c128_35], %46 {strides = array<i32>} : memref<100x576xf32, #tpu.memory_space<vmem>>, vector<100x64xf32>,
    %48 = vector.extract_strided_slice %41 {offsets = [15, 0], sizes = [100, 64], strides = [1, 1]} : vector<128x64xf32> to vector<100x64xf32>
    %c0_36 = arith.constant 0 : index
    %c192_37 = arith.constant 192 : index
    %49 = vector.load %arg17[%c0_36, %c192_37] : memref<100x576xf32, #tpu.memory_space<vmem>>, vector<100x64xf32>
    tpu.vector_store %arg17[%c0_36, %c192_37], %48 {strides = array<i32>} : memref<100x576xf32, #tpu.memory_space<vmem>>, vector<100x64xf32>,
    %50 = vector.extract_strided_slice %41 {offsets = [16, 0], sizes = [100, 64], strides = [1, 1]} : vector<128x64xf32> to vector<100x64xf32>
    %c0_38 = arith.constant 0 : index
    %c256_39 = arith.constant 256 : index
    %51 = vector.load %arg17[%c0_38, %c256_39] : memref<100x576xf32, #tpu.memory_space<vmem>>, vector<100x64xf32>
    tpu.vector_store %arg17[%c0_38, %c256_39], %50 {strides = array<i32>} : memref<100x576xf32, #tpu.memory_space<vmem>>, vector<100x64xf32>,
    %52 = vector.extract_strided_slice %41 {offsets = [17, 0], sizes = [100, 64], strides = [1, 1]} : vector<128x64xf32> to vector<100x64xf32>
    %c0_40 = arith.constant 0 : index
    %c320 = arith.constant 320 : index
    %53 = vector.load %arg17[%c0_40, %c320] : memref<100x576xf32, #tpu.memory_space<vmem>>, vector<100x64xf32>
    tpu.vector_store %arg17[%c0_40, %c320], %52 {strides = array<i32>} : memref<100x576xf32, #tpu.memory_space<vmem>>, vector<100x64xf32>,
    %54 = vector.extract_strided_slice %41 {offsets = [25, 0], sizes = [100, 64], strides = [1, 1]} : vector<128x64xf32> to vector<100x64xf32>
    %c0_41 = arith.constant 0 : index
    %c384 = arith.constant 384 : index
    %55 = vector.load %arg17[%c0_41, %c384] : memref<100x576xf32, #tpu.memory_space<vmem>>, vector<100x64xf32>
    tpu.vector_store %arg17[%c0_41, %c384], %54 {strides = array<i32>} : memref<100x576xf32, #tpu.memory_space<vmem>>, vector<100x64xf32>,
    %56 = vector.extract_strided_slice %41 {offsets = [26, 0], sizes = [100, 64], strides = [1, 1]} : vector<128x64xf32> to vector<100x64xf32>
    %c0_42 = arith.constant 0 : index
    %c448 = arith.constant 448 : index
    %57 = vector.load %arg17[%c0_42, %c448] : memref<100x576xf32, #tpu.memory_space<vmem>>, vector<100x64xf32>
    tpu.vector_store %arg17[%c0_42, %c448], %56 {strides = array<i32>} : memref<100x576xf32, #tpu.memory_space<vmem>>, vector<100x64xf32>,
    %58 = vector.extract_strided_slice %41 {offsets = [27, 0], sizes = [100, 64], strides = [1, 1]} : vector<128x64xf32> to vector<100x64xf32>
    %c0_43 = arith.constant 0 : index
    %c512 = arith.constant 512 : index
    %59 = vector.load %arg17[%c0_43, %c512] : memref<100x576xf32, #tpu.memory_space<vmem>>, vector<100x64xf32>
    tpu.vector_store %arg17[%c0_43, %c512], %58 {strides = array<i32>} : memref<100x576xf32, #tpu.memory_space<vmem>>, vector<100x64xf32>,
    %c0_44 = arith.constant 0 : index
    %c0_45 = arith.constant 0 : index
    %60 = vector.load %arg17[%c0_44, %c0_45] : memref<100x576xf32, #tpu.memory_space<vmem>>, vector<100x576xf32>
    %61 = arith.truncf %60 : vector<100x576xf32> to vector<100x576xbf16>
    %c0_46 = arith.constant 0 : index
    %c0_47 = arith.constant 0 : index
    %62 = vector.load %arg8[%c0_46, %c0_47] : memref<576x64xbf16, #tpu.memory_space<vmem>>, vector<576x64xbf16>
    %cst_48 = arith.constant dense<0.000000e+00> : vector<100x64xf32>
    %63 = tpu.matmul %61, %62, %cst_48 {dimension_numbers = #tpu.dot_dimension_numbers<[1], [0], [0], [1], [0, 0, 1, 1], [], []>} : vector<100x576xbf16>, vector<576x64xbf16>, vector<100x64xf32> -> vector<100x64xf32>
    %c0_49 = arith.constant 0 : index
    %c0_50 = arith.constant 0 : index
    %64 = vector.load %arg9[%c0_49, %c0_50] : memref<1x64xf32, #tpu.memory_space<vmem>>, vector<1x64xf32>
    %65 = vector.broadcast %64 : vector<1x64xf32> to vector<100x64xf32>
    %66 = arith.addf %63, %65 : vector<100x64xf32>
    %cst_51 = arith.constant 0.000000e+00 : f32
    %67 = vector.broadcast %cst_51 : f32 to vector<100x64xf32>
    %68 = arith.maximumf %66, %67 : vector<100x64xf32>
    %69 = vector.extract_strided_slice %68 {offsets = [11, 0], sizes = [1, 64], strides = [1, 1]} : vector<100x64xf32> to vector<1x64xf32>
    %c0_52 = arith.constant 0 : index
    %c0_53 = arith.constant 0 : index
    %70 = vector.load %arg18[%c0_52, %c0_53] : memref<1x4096xf32, #tpu.memory_space<vmem>>, vector<1x64xf32>
    tpu.vector_store %arg18[%c0_52, %c0_53], %69 {strides = array<i32>} : memref<1x4096xf32, #tpu.memory_space<vmem>>, vector<1x64xf32>,
    %71 = vector.extract_strided_slice %68 {offsets = [12, 0], sizes = [1, 64], strides = [1, 1]} : vector<100x64xf32> to vector<1x64xf32>
    %c0_54 = arith.constant 0 : index
    %c64_55 = arith.constant 64 : index
    %72 = vector.load %arg18[%c0_54, %c64_55] : memref<1x4096xf32, #tpu.memory_space<vmem>>, vector<1x64xf32>
    tpu.vector_store %arg18[%c0_54, %c64_55], %71 {strides = array<i32>} : memref<1x4096xf32, #tpu.memory_space<vmem>>, vector<1x64xf32>,
    %73 = vector.extract_strided_slice %68 {offsets = [13, 0], sizes = [1, 64], strides = [1, 1]} : vector<100x64xf32> to vector<1x64xf32>
    %c0_56 = arith.constant 0 : index
    %c128_57 = arith.constant 128 : index
    %74 = vector.load %arg18[%c0_56, %c128_57] : memref<1x4096xf32, #tpu.memory_space<vmem>>, vector<1x64xf32>
    tpu.vector_store %arg18[%c0_56, %c128_57], %73 {strides = array<i32>} : memref<1x4096xf32, #tpu.memory_space<vmem>>, vector<1x64xf32>,
    %75 = vector.extract_strided_slice %68 {offsets = [14, 0], sizes = [1, 64], strides = [1, 1]} : vector<100x64xf32> to vector<1x64xf32>
    %c0_58 = arith.constant 0 : index
    %c192_59 = arith.constant 192 : index
    %76 = vector.load %arg18[%c0_58, %c192_59] : memref<1x4096xf32, #tpu.memory_space<vmem>>, vector<1x64xf32>
    tpu.vector_store %arg18[%c0_58, %c192_59], %75 {strides = array<i32>} : memref<1x4096xf32, #tpu.memory_space<vmem>>, vector<1x64xf32>,
    %77 = vector.extract_strided_slice %68 {offsets = [15, 0], sizes = [1, 64], strides = [1, 1]} : vector<100x64xf32> to vector<1x64xf32>
    %c0_60 = arith.constant 0 : index
    %c256_61 = arith.constant 256 : index
    %78 = vector.load %arg18[%c0_60, %c256_61] : memref<1x4096xf32, #tpu.memory_space<vmem>>, vector<1x64xf32>
    tpu.vector_store %arg18[%c0_60, %c256_61], %77 {strides = array<i32>} : memref<1x4096xf32, #tpu.memory_space<vmem>>, vector<1x64xf32>,
    %79 = vector.extract_strided_slice %68 {offsets = [16, 0], sizes = [1, 64], strides = [1, 1]} : vector<100x64xf32> to vector<1x64xf32>
    %c0_62 = arith.constant 0 : index
    %c320_63 = arith.constant 320 : index
    %80 = vector.load %arg18[%c0_62, %c320_63] : memref<1x4096xf32, #tpu.memory_space<vmem>>, vector<1x64xf32>
    tpu.vector_store %arg18[%c0_62, %c320_63], %79 {strides = array<i32>} : memref<1x4096xf32, #tpu.memory_space<vmem>>, vector<1x64xf32>,
    %81 = vector.extract_strided_slice %68 {offsets = [17, 0], sizes = [1, 64], strides = [1, 1]} : vector<100x64xf32> to vector<1x64xf32>
    %c0_64 = arith.constant 0 : index
    %c384_65 = arith.constant 384 : index
    %82 = vector.load %arg18[%c0_64, %c384_65] : memref<1x4096xf32, #tpu.memory_space<vmem>>, vector<1x64xf32>
    tpu.vector_store %arg18[%c0_64, %c384_65], %81 {strides = array<i32>} : memref<1x4096xf32, #tpu.memory_space<vmem>>, vector<1x64xf32>,
    %83 = vector.extract_strided_slice %68 {offsets = [18, 0], sizes = [1, 64], strides = [1, 1]} : vector<100x64xf32> to vector<1x64xf32>
    %c0_66 = arith.constant 0 : index
    %c448_67 = arith.constant 448 : index
    %84 = vector.load %arg18[%c0_66, %c448_67] : memref<1x4096xf32, #tpu.memory_space<vmem>>, vector<1x64xf32>
    tpu.vector_store %arg18[%c0_66, %c448_67], %83 {strides = array<i32>} : memref<1x4096xf32, #tpu.memory_space<vmem>>, vector<1x64xf32>,
    %85 = vector.extract_strided_slice %68 {offsets = [21, 0], sizes = [1, 64], strides = [1, 1]} : vector<100x64xf32> to vector<1x64xf32>
    %c0_68 = arith.constant 0 : index
    %c512_69 = arith.constant 512 : index
    %86 = vector.load %arg18[%c0_68, %c512_69] : memref<1x4096xf32, #tpu.memory_space<vmem>>, vector<1x64xf32>
    tpu.vector_store %arg18[%c0_68, %c512_69], %85 {strides = array<i32>} : memref<1x4096xf32, #tpu.memory_space<vmem>>, vector<1x64xf32>,
    %87 = vector.extract_strided_slice %68 {offsets = [22, 0], sizes = [1, 64], strides = [1, 1]} : vector<100x64xf32> to vector<1x64xf32>
    %c0_70 = arith.constant 0 : index
    %c576 = arith.constant 576 : index
    %88 = vector.load %arg18[%c0_70, %c576] : memref<1x4096xf32, #tpu.memory_space<vmem>>, vector<1x64xf32>
    tpu.vector_store %arg18[%c0_70, %c576], %87 {strides = array<i32>} : memref<1x4096xf32, #tpu.memory_space<vmem>>, vector<1x64xf32>,
    %89 = vector.extract_strided_slice %68 {offsets = [23, 0], sizes = [1, 64], strides = [1, 1]} : vector<100x64xf32> to vector<1x64xf32>
    %c0_71 = arith.constant 0 : index
    %c640 = arith.constant 640 : index
    %90 = vector.load %arg18[%c0_71, %c640] : memref<1x4096xf32, #tpu.memory_space<vmem>>, vector<1x64xf32>
    tpu.vector_store %arg18[%c0_71, %c640], %89 {strides = array<i32>} : memref<1x4096xf32, #tpu.memory_space<vmem>>, vector<1x64xf32>,
    %91 = vector.extract_strided_slice %68 {offsets = [24, 0], sizes = [1, 64], strides = [1, 1]} : vector<100x64xf32> to vector<1x64xf32>
    %c0_72 = arith.constant 0 : index
    %c704 = arith.constant 704 : index
    %92 = vector.load %arg18[%c0_72, %c704] : memref<1x4096xf32, #tpu.memory_space<vmem>>, vector<1x64xf32>
    tpu.vector_store %arg18[%c0_72, %c704], %91 {strides = array<i32>} : memref<1x4096xf32, #tpu.memory_space<vmem>>, vector<1x64xf32>,
    %93 = vector.extract_strided_slice %68 {offsets = [25, 0], sizes = [1, 64], strides = [1, 1]} : vector<100x64xf32> to vector<1x64xf32>
    %c0_73 = arith.constant 0 : index
    %c768 = arith.constant 768 : index
    %94 = vector.load %arg18[%c0_73, %c768] : memref<1x4096xf32, #tpu.memory_space<vmem>>, vector<1x64xf32>
    tpu.vector_store %arg18[%c0_73, %c768], %93 {strides = array<i32>} : memref<1x4096xf32, #tpu.memory_space<vmem>>, vector<1x64xf32>,
    %95 = vector.extract_strided_slice %68 {offsets = [26, 0], sizes = [1, 64], strides = [1, 1]} : vector<100x64xf32> to vector<1x64xf32>
    %c0_74 = arith.constant 0 : index
    %c832 = arith.constant 832 : index
    %96 = vector.load %arg18[%c0_74, %c832] : memref<1x4096xf32, #tpu.memory_space<vmem>>, vector<1x64xf32>
    tpu.vector_store %arg18[%c0_74, %c832], %95 {strides = array<i32>} : memref<1x4096xf32, #tpu.memory_space<vmem>>, vector<1x64xf32>,
    %97 = vector.extract_strided_slice %68 {offsets = [27, 0], sizes = [1, 64], strides = [1, 1]} : vector<100x64xf32> to vector<1x64xf32>
    %c0_75 = arith.constant 0 : index
    %c896 = arith.constant 896 : index
    %98 = vector.load %arg18[%c0_75, %c896] : memref<1x4096xf32, #tpu.memory_space<vmem>>, vector<1x64xf32>
    tpu.vector_store %arg18[%c0_75, %c896], %97 {strides = array<i32>} : memref<1x4096xf32, #tpu.memory_space<vmem>>, vector<1x64xf32>,
    %99 = vector.extract_strided_slice %68 {offsets = [28, 0], sizes = [1, 64], strides = [1, 1]} : vector<100x64xf32> to vector<1x64xf32>
    %c0_76 = arith.constant 0 : index
    %c960 = arith.constant 960 : index
    %100 = vector.load %arg18[%c0_76, %c960] : memref<1x4096xf32, #tpu.memory_space<vmem>>, vector<1x64xf32>
    tpu.vector_store %arg18[%c0_76, %c960], %99 {strides = array<i32>} : memref<1x4096xf32, #tpu.memory_space<vmem>>, vector<1x64xf32>,
    %101 = vector.extract_strided_slice %68 {offsets = [31, 0], sizes = [1, 64], strides = [1, 1]} : vector<100x64xf32> to vector<1x64xf32>
    %c0_77 = arith.constant 0 : index
    %c1024 = arith.constant 1024 : index
    %102 = vector.load %arg18[%c0_77, %c1024] : memref<1x4096xf32, #tpu.memory_space<vmem>>, vector<1x64xf32>
    tpu.vector_store %arg18[%c0_77, %c1024], %101 {strides = array<i32>} : memref<1x4096xf32, #tpu.memory_space<vmem>>, vector<1x64xf32>,
    %103 = vector.extract_strided_slice %68 {offsets = [32, 0], sizes = [1, 64], strides = [1, 1]} : vector<100x64xf32> to vector<1x64xf32>
    %c0_78 = arith.constant 0 : index
    %c1088 = arith.constant 1088 : index
    %104 = vector.load %arg18[%c0_78, %c1088] : memref<1x4096xf32, #tpu.memory_space<vmem>>, vector<1x64xf32>
    tpu.vector_store %arg18[%c0_78, %c1088], %103 {strides = array<i32>} : memref<1x4096xf32, #tpu.memory_space<vmem>>, vector<1x64xf32>,
    %105 = vector.extract_strided_slice %68 {offsets = [33, 0], sizes = [1, 64], strides = [1, 1]} : vector<100x64xf32> to vector<1x64xf32>
    %c0_79 = arith.constant 0 : index
    %c1152 = arith.constant 1152 : index
    %106 = vector.load %arg18[%c0_79, %c1152] : memref<1x4096xf32, #tpu.memory_space<vmem>>, vector<1x64xf32>
    tpu.vector_store %arg18[%c0_79, %c1152], %105 {strides = array<i32>} : memref<1x4096xf32, #tpu.memory_space<vmem>>, vector<1x64xf32>,
    %107 = vector.extract_strided_slice %68 {offsets = [34, 0], sizes = [1, 64], strides = [1, 1]} : vector<100x64xf32> to vector<1x64xf32>
    %c0_80 = arith.constant 0 : index
    %c1216 = arith.constant 1216 : index
    %108 = vector.load %arg18[%c0_80, %c1216] : memref<1x4096xf32, #tpu.memory_space<vmem>>, vector<1x64xf32>
    tpu.vector_store %arg18[%c0_80, %c1216], %107 {strides = array<i32>} : memref<1x4096xf32, #tpu.memory_space<vmem>>, vector<1x64xf32>,
    %109 = vector.extract_strided_slice %68 {offsets = [35, 0], sizes = [1, 64], strides = [1, 1]} : vector<100x64xf32> to vector<1x64xf32>
    %c0_81 = arith.constant 0 : index
    %c1280 = arith.constant 1280 : index
    %110 = vector.load %arg18[%c0_81, %c1280] : memref<1x4096xf32, #tpu.memory_space<vmem>>, vector<1x64xf32>
    tpu.vector_store %arg18[%c0_81, %c1280], %109 {strides = array<i32>} : memref<1x4096xf32, #tpu.memory_space<vmem>>, vector<1x64xf32>,
    %111 = vector.extract_strided_slice %68 {offsets = [36, 0], sizes = [1, 64], strides = [1, 1]} : vector<100x64xf32> to vector<1x64xf32>
    %c0_82 = arith.constant 0 : index
    %c1344 = arith.constant 1344 : index
    %112 = vector.load %arg18[%c0_82, %c1344] : memref<1x4096xf32, #tpu.memory_space<vmem>>, vector<1x64xf32>
    tpu.vector_store %arg18[%c0_82, %c1344], %111 {strides = array<i32>} : memref<1x4096xf32, #tpu.memory_space<vmem>>, vector<1x64xf32>,
    %113 = vector.extract_strided_slice %68 {offsets = [37, 0], sizes = [1, 64], strides = [1, 1]} : vector<100x64xf32> to vector<1x64xf32>
    %c0_83 = arith.constant 0 : index
    %c1408 = arith.constant 1408 : index
    %114 = vector.load %arg18[%c0_83, %c1408] : memref<1x4096xf32, #tpu.memory_space<vmem>>, vector<1x64xf32>
    tpu.vector_store %arg18[%c0_83, %c1408], %113 {strides = array<i32>} : memref<1x4096xf32, #tpu.memory_space<vmem>>, vector<1x64xf32>,
    %115 = vector.extract_strided_slice %68 {offsets = [38, 0], sizes = [1, 64], strides = [1, 1]} : vector<100x64xf32> to vector<1x64xf32>
    %c0_84 = arith.constant 0 : index
    %c1472 = arith.constant 1472 : index
    %116 = vector.load %arg18[%c0_84, %c1472] : memref<1x4096xf32, #tpu.memory_space<vmem>>, vector<1x64xf32>
    tpu.vector_store %arg18[%c0_84, %c1472], %115 {strides = array<i32>} : memref<1x4096xf32, #tpu.memory_space<vmem>>, vector<1x64xf32>,
    %117 = vector.extract_strided_slice %68 {offsets = [41, 0], sizes = [1, 64], strides = [1, 1]} : vector<100x64xf32> to vector<1x64xf32>
    %c0_85 = arith.constant 0 : index
    %c1536 = arith.constant 1536 : index
    %118 = vector.load %arg18[%c0_85, %c1536] : memref<1x4096xf32, #tpu.memory_space<vmem>>, vector<1x64xf32>
    tpu.vector_store %arg18[%c0_85, %c1536], %117 {strides = array<i32>} : memref<1x4096xf32, #tpu.memory_space<vmem>>, vector<1x64xf32>,
    %119 = vector.extract_strided_slice %68 {offsets = [42, 0], sizes = [1, 64], strides = [1, 1]} : vector<100x64xf32> to vector<1x64xf32>
    %c0_86 = arith.constant 0 : index
    %c1600 = arith.constant 1600 : index
    %120 = vector.load %arg18[%c0_86, %c1600] : memref<1x4096xf32, #tpu.memory_space<vmem>>, vector<1x64xf32>
    tpu.vector_store %arg18[%c0_86, %c1600], %119 {strides = array<i32>} : memref<1x4096xf32, #tpu.memory_space<vmem>>, vector<1x64xf32>,
    %121 = vector.extract_strided_slice %68 {offsets = [43, 0], sizes = [1, 64], strides = [1, 1]} : vector<100x64xf32> to vector<1x64xf32>
    %c0_87 = arith.constant 0 : index
    %c1664 = arith.constant 1664 : index
    %122 = vector.load %arg18[%c0_87, %c1664] : memref<1x4096xf32, #tpu.memory_space<vmem>>, vector<1x64xf32>
    tpu.vector_store %arg18[%c0_87, %c1664], %121 {strides = array<i32>} : memref<1x4096xf32, #tpu.memory_space<vmem>>, vector<1x64xf32>,
    %123 = vector.extract_strided_slice %68 {offsets = [44, 0], sizes = [1, 64], strides = [1, 1]} : vector<100x64xf32> to vector<1x64xf32>
    %c0_88 = arith.constant 0 : index
    %c1728 = arith.constant 1728 : index
    %124 = vector.load %arg18[%c0_88, %c1728] : memref<1x4096xf32, #tpu.memory_space<vmem>>, vector<1x64xf32>
    tpu.vector_store %arg18[%c0_88, %c1728], %123 {strides = array<i32>} : memref<1x4096xf32, #tpu.memory_space<vmem>>, vector<1x64xf32>,
    %125 = vector.extract_strided_slice %68 {offsets = [45, 0], sizes = [1, 64], strides = [1, 1]} : vector<100x64xf32> to vector<1x64xf32>
    %c0_89 = arith.constant 0 : index
    %c1792 = arith.constant 1792 : index
    %126 = vector.load %arg18[%c0_89, %c1792] : memref<1x4096xf32, #tpu.memory_space<vmem>>, vector<1x64xf32>
    tpu.vector_store %arg18[%c0_89, %c1792], %125 {strides = array<i32>} : memref<1x4096xf32, #tpu.memory_space<vmem>>, vector<1x64xf32>,
    %127 = vector.extract_strided_slice %68 {offsets = [46, 0], sizes = [1, 64], strides = [1, 1]} : vector<100x64xf32> to vector<1x64xf32>
    %c0_90 = arith.constant 0 : index
    %c1856 = arith.constant 1856 : index
    %128 = vector.load %arg18[%c0_90, %c1856] : memref<1x4096xf32, #tpu.memory_space<vmem>>, vector<1x64xf32>
    tpu.vector_store %arg18[%c0_90, %c1856], %127 {strides = array<i32>} : memref<1x4096xf32, #tpu.memory_space<vmem>>, vector<1x64xf32>,
    %129 = vector.extract_strided_slice %68 {offsets = [47, 0], sizes = [1, 64], strides = [1, 1]} : vector<100x64xf32> to vector<1x64xf32>
    %c0_91 = arith.constant 0 : index
    %c1920 = arith.constant 1920 : index
    %130 = vector.load %arg18[%c0_91, %c1920] : memref<1x4096xf32, #tpu.memory_space<vmem>>, vector<1x64xf32>
    tpu.vector_store %arg18[%c0_91, %c1920], %129 {strides = array<i32>} : memref<1x4096xf32, #tpu.memory_space<vmem>>, vector<1x64xf32>,
    %131 = vector.extract_strided_slice %68 {offsets = [48, 0], sizes = [1, 64], strides = [1, 1]} : vector<100x64xf32> to vector<1x64xf32>
    %c0_92 = arith.constant 0 : index
    %c1984 = arith.constant 1984 : index
    %132 = vector.load %arg18[%c0_92, %c1984] : memref<1x4096xf32, #tpu.memory_space<vmem>>, vector<1x64xf32>
    tpu.vector_store %arg18[%c0_92, %c1984], %131 {strides = array<i32>} : memref<1x4096xf32, #tpu.memory_space<vmem>>, vector<1x64xf32>,
    %133 = vector.extract_strided_slice %68 {offsets = [51, 0], sizes = [1, 64], strides = [1, 1]} : vector<100x64xf32> to vector<1x64xf32>
    %c0_93 = arith.constant 0 : index
    %c2048 = arith.constant 2048 : index
    %134 = vector.load %arg18[%c0_93, %c2048] : memref<1x4096xf32, #tpu.memory_space<vmem>>, vector<1x64xf32>
    tpu.vector_store %arg18[%c0_93, %c2048], %133 {strides = array<i32>} : memref<1x4096xf32, #tpu.memory_space<vmem>>, vector<1x64xf32>,
    %135 = vector.extract_strided_slice %68 {offsets = [52, 0], sizes = [1, 64], strides = [1, 1]} : vector<100x64xf32> to vector<1x64xf32>
    %c0_94 = arith.constant 0 : index
    %c2112 = arith.constant 2112 : index
    %136 = vector.load %arg18[%c0_94, %c2112] : memref<1x4096xf32, #tpu.memory_space<vmem>>, vector<1x64xf32>
    tpu.vector_store %arg18[%c0_94, %c2112], %135 {strides = array<i32>} : memref<1x4096xf32, #tpu.memory_space<vmem>>, vector<1x64xf32>,
    %137 = vector.extract_strided_slice %68 {offsets = [53, 0], sizes = [1, 64], strides = [1, 1]} : vector<100x64xf32> to vector<1x64xf32>
    %c0_95 = arith.constant 0 : index
    %c2176 = arith.constant 2176 : index
    %138 = vector.load %arg18[%c0_95, %c2176] : memref<1x4096xf32, #tpu.memory_space<vmem>>, vector<1x64xf32>
    tpu.vector_store %arg18[%c0_95, %c2176], %137 {strides = array<i32>} : memref<1x4096xf32, #tpu.memory_space<vmem>>, vector<1x64xf32>,
    %139 = vector.extract_strided_slice %68 {offsets = [54, 0], sizes = [1, 64], strides = [1, 1]} : vector<100x64xf32> to vector<1x64xf32>
    %c0_96 = arith.constant 0 : index
    %c2240 = arith.constant 2240 : index
    %140 = vector.load %arg18[%c0_96, %c2240] : memref<1x4096xf32, #tpu.memory_space<vmem>>, vector<1x64xf32>
    tpu.vector_store %arg18[%c0_96, %c2240], %139 {strides = array<i32>} : memref<1x4096xf32, #tpu.memory_space<vmem>>, vector<1x64xf32>,
    %141 = vector.extract_strided_slice %68 {offsets = [55, 0], sizes = [1, 64], strides = [1, 1]} : vector<100x64xf32> to vector<1x64xf32>
    %c0_97 = arith.constant 0 : index
    %c2304 = arith.constant 2304 : index
    %142 = vector.load %arg18[%c0_97, %c2304] : memref<1x4096xf32, #tpu.memory_space<vmem>>, vector<1x64xf32>
    tpu.vector_store %arg18[%c0_97, %c2304], %141 {strides = array<i32>} : memref<1x4096xf32, #tpu.memory_space<vmem>>, vector<1x64xf32>,
    %143 = vector.extract_strided_slice %68 {offsets = [56, 0], sizes = [1, 64], strides = [1, 1]} : vector<100x64xf32> to vector<1x64xf32>
    %c0_98 = arith.constant 0 : index
    %c2368 = arith.constant 2368 : index
    %144 = vector.load %arg18[%c0_98, %c2368] : memref<1x4096xf32, #tpu.memory_space<vmem>>, vector<1x64xf32>
    tpu.vector_store %arg18[%c0_98, %c2368], %143 {strides = array<i32>} : memref<1x4096xf32, #tpu.memory_space<vmem>>, vector<1x64xf32>,
    %145 = vector.extract_strided_slice %68 {offsets = [57, 0], sizes = [1, 64], strides = [1, 1]} : vector<100x64xf32> to vector<1x64xf32>
    %c0_99 = arith.constant 0 : index
    %c2432 = arith.constant 2432 : index
    %146 = vector.load %arg18[%c0_99, %c2432] : memref<1x4096xf32, #tpu.memory_space<vmem>>, vector<1x64xf32>
    tpu.vector_store %arg18[%c0_99, %c2432], %145 {strides = array<i32>} : memref<1x4096xf32, #tpu.memory_space<vmem>>, vector<1x64xf32>,
    %147 = vector.extract_strided_slice %68 {offsets = [58, 0], sizes = [1, 64], strides = [1, 1]} : vector<100x64xf32> to vector<1x64xf32>
    %c0_100 = arith.constant 0 : index
    %c2496 = arith.constant 2496 : index
    %148 = vector.load %arg18[%c0_100, %c2496] : memref<1x4096xf32, #tpu.memory_space<vmem>>, vector<1x64xf32>
    tpu.vector_store %arg18[%c0_100, %c2496], %147 {strides = array<i32>} : memref<1x4096xf32, #tpu.memory_space<vmem>>, vector<1x64xf32>,
    %149 = vector.extract_strided_slice %68 {offsets = [61, 0], sizes = [1, 64], strides = [1, 1]} : vector<100x64xf32> to vector<1x64xf32>
    %c0_101 = arith.constant 0 : index
    %c2560 = arith.constant 2560 : index
    %150 = vector.load %arg18[%c0_101, %c2560] : memref<1x4096xf32, #tpu.memory_space<vmem>>, vector<1x64xf32>
    tpu.vector_store %arg18[%c0_101, %c2560], %149 {strides = array<i32>} : memref<1x4096xf32, #tpu.memory_space<vmem>>, vector<1x64xf32>,
    %151 = vector.extract_strided_slice %68 {offsets = [62, 0], sizes = [1, 64], strides = [1, 1]} : vector<100x64xf32> to vector<1x64xf32>
    %c0_102 = arith.constant 0 : index
    %c2624 = arith.constant 2624 : index
    %152 = vector.load %arg18[%c0_102, %c2624] : memref<1x4096xf32, #tpu.memory_space<vmem>>, vector<1x64xf32>
    tpu.vector_store %arg18[%c0_102, %c2624], %151 {strides = array<i32>} : memref<1x4096xf32, #tpu.memory_space<vmem>>, vector<1x64xf32>,
    %153 = vector.extract_strided_slice %68 {offsets = [63, 0], sizes = [1, 64], strides = [1, 1]} : vector<100x64xf32> to vector<1x64xf32>
    %c0_103 = arith.constant 0 : index
    %c2688 = arith.constant 2688 : index
    %154 = vector.load %arg18[%c0_103, %c2688] : memref<1x4096xf32, #tpu.memory_space<vmem>>, vector<1x64xf32>
    tpu.vector_store %arg18[%c0_103, %c2688], %153 {strides = array<i32>} : memref<1x4096xf32, #tpu.memory_space<vmem>>, vector<1x64xf32>,
    %155 = vector.extract_strided_slice %68 {offsets = [64, 0], sizes = [1, 64], strides = [1, 1]} : vector<100x64xf32> to vector<1x64xf32>
    %c0_104 = arith.constant 0 : index
    %c2752 = arith.constant 2752 : index
    %156 = vector.load %arg18[%c0_104, %c2752] : memref<1x4096xf32, #tpu.memory_space<vmem>>, vector<1x64xf32>
    tpu.vector_store %arg18[%c0_104, %c2752], %155 {strides = array<i32>} : memref<1x4096xf32, #tpu.memory_space<vmem>>, vector<1x64xf32>,
    %157 = vector.extract_strided_slice %68 {offsets = [65, 0], sizes = [1, 64], strides = [1, 1]} : vector<100x64xf32> to vector<1x64xf32>
    %c0_105 = arith.constant 0 : index
    %c2816 = arith.constant 2816 : index
    %158 = vector.load %arg18[%c0_105, %c2816] : memref<1x4096xf32, #tpu.memory_space<vmem>>, vector<1x64xf32>
    tpu.vector_store %arg18[%c0_105, %c2816], %157 {strides = array<i32>} : memref<1x4096xf32, #tpu.memory_space<vmem>>, vector<1x64xf32>,
    %159 = vector.extract_strided_slice %68 {offsets = [66, 0], sizes = [1, 64], strides = [1, 1]} : vector<100x64xf32> to vector<1x64xf32>
    %c0_106 = arith.constant 0 : index
    %c2880 = arith.constant 2880 : index
    %160 = vector.load %arg18[%c0_106, %c2880] : memref<1x4096xf32, #tpu.memory_space<vmem>>, vector<1x64xf32>
    tpu.vector_store %arg18[%c0_106, %c2880], %159 {strides = array<i32>} : memref<1x4096xf32, #tpu.memory_space<vmem>>, vector<1x64xf32>,
    %161 = vector.extract_strided_slice %68 {offsets = [67, 0], sizes = [1, 64], strides = [1, 1]} : vector<100x64xf32> to vector<1x64xf32>
    %c0_107 = arith.constant 0 : index
    %c2944 = arith.constant 2944 : index
    %162 = vector.load %arg18[%c0_107, %c2944] : memref<1x4096xf32, #tpu.memory_space<vmem>>, vector<1x64xf32>
    tpu.vector_store %arg18[%c0_107, %c2944], %161 {strides = array<i32>} : memref<1x4096xf32, #tpu.memory_space<vmem>>, vector<1x64xf32>,
    %163 = vector.extract_strided_slice %68 {offsets = [68, 0], sizes = [1, 64], strides = [1, 1]} : vector<100x64xf32> to vector<1x64xf32>
    %c0_108 = arith.constant 0 : index
    %c3008 = arith.constant 3008 : index
    %164 = vector.load %arg18[%c0_108, %c3008] : memref<1x4096xf32, #tpu.memory_space<vmem>>, vector<1x64xf32>
    tpu.vector_store %arg18[%c0_108, %c3008], %163 {strides = array<i32>} : memref<1x4096xf32, #tpu.memory_space<vmem>>, vector<1x64xf32>,
    %165 = vector.extract_strided_slice %68 {offsets = [71, 0], sizes = [1, 64], strides = [1, 1]} : vector<100x64xf32> to vector<1x64xf32>
    %c0_109 = arith.constant 0 : index
    %c3072 = arith.constant 3072 : index
    %166 = vector.load %arg18[%c0_109, %c3072] : memref<1x4096xf32, #tpu.memory_space<vmem>>, vector<1x64xf32>
    tpu.vector_store %arg18[%c0_109, %c3072], %165 {strides = array<i32>} : memref<1x4096xf32, #tpu.memory_space<vmem>>, vector<1x64xf32>,
    %167 = vector.extract_strided_slice %68 {offsets = [72, 0], sizes = [1, 64], strides = [1, 1]} : vector<100x64xf32> to vector<1x64xf32>
    %c0_110 = arith.constant 0 : index
    %c3136 = arith.constant 3136 : index
    %168 = vector.load %arg18[%c0_110, %c3136] : memref<1x4096xf32, #tpu.memory_space<vmem>>, vector<1x64xf32>
    tpu.vector_store %arg18[%c0_110, %c3136], %167 {strides = array<i32>} : memref<1x4096xf32, #tpu.memory_space<vmem>>, vector<1x64xf32>,
    %169 = vector.extract_strided_slice %68 {offsets = [73, 0], sizes = [1, 64], strides = [1, 1]} : vector<100x64xf32> to vector<1x64xf32>
    %c0_111 = arith.constant 0 : index
    %c3200 = arith.constant 3200 : index
    %170 = vector.load %arg18[%c0_111, %c3200] : memref<1x4096xf32, #tpu.memory_space<vmem>>, vector<1x64xf32>
    tpu.vector_store %arg18[%c0_111, %c3200], %169 {strides = array<i32>} : memref<1x4096xf32, #tpu.memory_space<vmem>>, vector<1x64xf32>,
    %171 = vector.extract_strided_slice %68 {offsets = [74, 0], sizes = [1, 64], strides = [1, 1]} : vector<100x64xf32> to vector<1x64xf32>
    %c0_112 = arith.constant 0 : index
    %c3264 = arith.constant 3264 : index
    %172 = vector.load %arg18[%c0_112, %c3264] : memref<1x4096xf32, #tpu.memory_space<vmem>>, vector<1x64xf32>
    tpu.vector_store %arg18[%c0_112, %c3264], %171 {strides = array<i32>} : memref<1x4096xf32, #tpu.memory_space<vmem>>, vector<1x64xf32>,
    %173 = vector.extract_strided_slice %68 {offsets = [75, 0], sizes = [1, 64], strides = [1, 1]} : vector<100x64xf32> to vector<1x64xf32>
    %c0_113 = arith.constant 0 : index
    %c3328 = arith.constant 3328 : index
    %174 = vector.load %arg18[%c0_113, %c3328] : memref<1x4096xf32, #tpu.memory_space<vmem>>, vector<1x64xf32>
    tpu.vector_store %arg18[%c0_113, %c3328], %173 {strides = array<i32>} : memref<1x4096xf32, #tpu.memory_space<vmem>>, vector<1x64xf32>,
    %175 = vector.extract_strided_slice %68 {offsets = [76, 0], sizes = [1, 64], strides = [1, 1]} : vector<100x64xf32> to vector<1x64xf32>
    %c0_114 = arith.constant 0 : index
    %c3392 = arith.constant 3392 : index
    %176 = vector.load %arg18[%c0_114, %c3392] : memref<1x4096xf32, #tpu.memory_space<vmem>>, vector<1x64xf32>
    tpu.vector_store %arg18[%c0_114, %c3392], %175 {strides = array<i32>} : memref<1x4096xf32, #tpu.memory_space<vmem>>, vector<1x64xf32>,
    %177 = vector.extract_strided_slice %68 {offsets = [77, 0], sizes = [1, 64], strides = [1, 1]} : vector<100x64xf32> to vector<1x64xf32>
    %c0_115 = arith.constant 0 : index
    %c3456 = arith.constant 3456 : index
    %178 = vector.load %arg18[%c0_115, %c3456] : memref<1x4096xf32, #tpu.memory_space<vmem>>, vector<1x64xf32>
    tpu.vector_store %arg18[%c0_115, %c3456], %177 {strides = array<i32>} : memref<1x4096xf32, #tpu.memory_space<vmem>>, vector<1x64xf32>,
    %179 = vector.extract_strided_slice %68 {offsets = [78, 0], sizes = [1, 64], strides = [1, 1]} : vector<100x64xf32> to vector<1x64xf32>
    %c0_116 = arith.constant 0 : index
    %c3520 = arith.constant 3520 : index
    %180 = vector.load %arg18[%c0_116, %c3520] : memref<1x4096xf32, #tpu.memory_space<vmem>>, vector<1x64xf32>
    tpu.vector_store %arg18[%c0_116, %c3520], %179 {strides = array<i32>} : memref<1x4096xf32, #tpu.memory_space<vmem>>, vector<1x64xf32>,
    %181 = vector.extract_strided_slice %68 {offsets = [81, 0], sizes = [1, 64], strides = [1, 1]} : vector<100x64xf32> to vector<1x64xf32>
    %c0_117 = arith.constant 0 : index
    %c3584 = arith.constant 3584 : index
    %182 = vector.load %arg18[%c0_117, %c3584] : memref<1x4096xf32, #tpu.memory_space<vmem>>, vector<1x64xf32>
    tpu.vector_store %arg18[%c0_117, %c3584], %181 {strides = array<i32>} : memref<1x4096xf32, #tpu.memory_space<vmem>>, vector<1x64xf32>,
    %183 = vector.extract_strided_slice %68 {offsets = [82, 0], sizes = [1, 64], strides = [1, 1]} : vector<100x64xf32> to vector<1x64xf32>
    %c0_118 = arith.constant 0 : index
    %c3648 = arith.constant 3648 : index
    %184 = vector.load %arg18[%c0_118, %c3648] : memref<1x4096xf32, #tpu.memory_space<vmem>>, vector<1x64xf32>
    tpu.vector_store %arg18[%c0_118, %c3648], %183 {strides = array<i32>} : memref<1x4096xf32, #tpu.memory_space<vmem>>, vector<1x64xf32>,
    %185 = vector.extract_strided_slice %68 {offsets = [83, 0], sizes = [1, 64], strides = [1, 1]} : vector<100x64xf32> to vector<1x64xf32>
    %c0_119 = arith.constant 0 : index
    %c3712 = arith.constant 3712 : index
    %186 = vector.load %arg18[%c0_119, %c3712] : memref<1x4096xf32, #tpu.memory_space<vmem>>, vector<1x64xf32>
    tpu.vector_store %arg18[%c0_119, %c3712], %185 {strides = array<i32>} : memref<1x4096xf32, #tpu.memory_space<vmem>>, vector<1x64xf32>,
    %187 = vector.extract_strided_slice %68 {offsets = [84, 0], sizes = [1, 64], strides = [1, 1]} : vector<100x64xf32> to vector<1x64xf32>
    %c0_120 = arith.constant 0 : index
    %c3776 = arith.constant 3776 : index
    %188 = vector.load %arg18[%c0_120, %c3776] : memref<1x4096xf32, #tpu.memory_space<vmem>>, vector<1x64xf32>
    tpu.vector_store %arg18[%c0_120, %c3776], %187 {strides = array<i32>} : memref<1x4096xf32, #tpu.memory_space<vmem>>, vector<1x64xf32>,
    %189 = vector.extract_strided_slice %68 {offsets = [85, 0], sizes = [1, 64], strides = [1, 1]} : vector<100x64xf32> to vector<1x64xf32>
    %c0_121 = arith.constant 0 : index
    %c3840 = arith.constant 3840 : index
    %190 = vector.load %arg18[%c0_121, %c3840] : memref<1x4096xf32, #tpu.memory_space<vmem>>, vector<1x64xf32>
    tpu.vector_store %arg18[%c0_121, %c3840], %189 {strides = array<i32>} : memref<1x4096xf32, #tpu.memory_space<vmem>>, vector<1x64xf32>,
    %191 = vector.extract_strided_slice %68 {offsets = [86, 0], sizes = [1, 64], strides = [1, 1]} : vector<100x64xf32> to vector<1x64xf32>
    %c0_122 = arith.constant 0 : index
    %c3904 = arith.constant 3904 : index
    %192 = vector.load %arg18[%c0_122, %c3904] : memref<1x4096xf32, #tpu.memory_space<vmem>>, vector<1x64xf32>
    tpu.vector_store %arg18[%c0_122, %c3904], %191 {strides = array<i32>} : memref<1x4096xf32, #tpu.memory_space<vmem>>, vector<1x64xf32>,
    %193 = vector.extract_strided_slice %68 {offsets = [87, 0], sizes = [1, 64], strides = [1, 1]} : vector<100x64xf32> to vector<1x64xf32>
    %c0_123 = arith.constant 0 : index
    %c3968 = arith.constant 3968 : index
    %194 = vector.load %arg18[%c0_123, %c3968] : memref<1x4096xf32, #tpu.memory_space<vmem>>, vector<1x64xf32>
    tpu.vector_store %arg18[%c0_123, %c3968], %193 {strides = array<i32>} : memref<1x4096xf32, #tpu.memory_space<vmem>>, vector<1x64xf32>,
    %195 = vector.extract_strided_slice %68 {offsets = [88, 0], sizes = [1, 64], strides = [1, 1]} : vector<100x64xf32> to vector<1x64xf32>
    %c0_124 = arith.constant 0 : index
    %c4032 = arith.constant 4032 : index
    %196 = vector.load %arg18[%c0_124, %c4032] : memref<1x4096xf32, #tpu.memory_space<vmem>>, vector<1x64xf32>
    tpu.vector_store %arg18[%c0_124, %c4032], %195 {strides = array<i32>} : memref<1x4096xf32, #tpu.memory_space<vmem>>, vector<1x64xf32>,
    %c0_125 = arith.constant 0 : index
    %c0_126 = arith.constant 0 : index
    %197 = vector.load %arg18[%c0_125, %c0_126] : memref<1x4096xf32, #tpu.memory_space<vmem>>, vector<1x4096xf32>
    %198 = arith.truncf %197 : vector<1x4096xf32> to vector<1x4096xbf16>
    %c0_127 = arith.constant 0 : index
    %c0_128 = arith.constant 0 : index
    %199 = vector.load %arg10[%c0_127, %c0_128] : memref<4096x32xbf16, #tpu.memory_space<vmem>>, vector<4096x32xbf16>
    %cst_129 = arith.constant dense<0.000000e+00> : vector<1x32xf32>
    %200 = tpu.matmul %198, %199, %cst_129 {dimension_numbers = #tpu.dot_dimension_numbers<[1], [0], [0], [1], [0, 0, 1, 1], [], []>} : vector<1x4096xbf16>, vector<4096x32xbf16>, vector<1x32xf32> -> vector<1x32xf32>
    %c0_130 = arith.constant 0 : index
    %c0_131 = arith.constant 0 : index
    %201 = vector.load %arg11[%c0_130, %c0_131] : memref<1x32xf32, #tpu.memory_space<vmem>>, vector<1x32xf32>
    %202 = arith.addf %200, %201 : vector<1x32xf32>
    %cst_132 = arith.constant 0.000000e+00 : f32
    %203 = vector.broadcast %cst_132 : f32 to vector<1x32xf32>
    %204 = arith.maximumf %202, %203 : vector<1x32xf32>
    %205 = arith.truncf %204 : vector<1x32xf32> to vector<1x32xbf16>
    %c0_133 = arith.constant 0 : index
    %c0_134 = arith.constant 0 : index
    %206 = vector.load %arg12[%c0_133, %c0_134] : memref<32x20xbf16, #tpu.memory_space<vmem>>, vector<32x20xbf16>
    %cst_135 = arith.constant dense<0.000000e+00> : vector<1x20xf32>
    %207 = tpu.matmul %205, %206, %cst_135 {dimension_numbers = #tpu.dot_dimension_numbers<[1], [0], [0], [1], [0, 0, 1, 1], [], []>} : vector<1x32xbf16>, vector<32x20xbf16>, vector<1x20xf32> -> vector<1x20xf32>
    %c0_136 = arith.constant 0 : index
    %c0_137 = arith.constant 0 : index
    %208 = vector.load %arg13[%c0_136, %c0_137] : memref<1x20xf32, #tpu.memory_space<vmem>>, vector<1x20xf32>
    %209 = arith.addf %207, %208 : vector<1x20xf32>
    %210 = vector.extract_strided_slice %209 {offsets = [0, 0], sizes = [1, 10], strides = [1, 1]} : vector<1x20xf32> to vector<1x10xf32>
    %c0_138 = arith.constant 0 : index
    %c0_139 = arith.constant 0 : index
    %c0_140 = arith.constant 0 : index
    %211 = vector.load %arg14[%c0_138, %c0_139, %c0_140] : memref<1x1x10xf32, #tpu.memory_space<vmem>>, vector<1x1x10xf32>
    %212 = vector.shape_cast %211 : vector<1x1x10xf32> to vector<1x10xf32>
    %213 = vector.shape_cast %210 : vector<1x10xf32> to vector<1x1x10xf32>
    tpu.vector_store %arg14[%c0_138, %c0_139, %c0_140], %213 {strides = array<i32>} : memref<1x1x10xf32, #tpu.memory_space<vmem>>, vector<1x1x10xf32>,
    %214 = vector.extract_strided_slice %209 {offsets = [0, 10], sizes = [1, 10], strides = [1, 1]} : vector<1x20xf32> to vector<1x10xf32>
    %215 = math.exp %214 : vector<1x10xf32>
    %c0_141 = arith.constant 0 : index
    %c0_142 = arith.constant 0 : index
    %c0_143 = arith.constant 0 : index
    %216 = vector.load %arg15[%c0_141, %c0_142, %c0_143] : memref<1x1x10xf32, #tpu.memory_space<vmem>>, vector<1x1x10xf32>
    %217 = vector.shape_cast %216 : vector<1x1x10xf32> to vector<1x10xf32>
    %218 = vector.shape_cast %215 : vector<1x10xf32> to vector<1x1x10xf32>
    tpu.vector_store %arg15[%c0_141, %c0_142, %c0_143], %218 {strides = array<i32>} : memref<1x1x10xf32, #tpu.memory_space<vmem>>, vector<1x1x10xf32>,
    return
  }
  func.func @transform_0(%arg0: i32) -> (i32, i32, i32) {
    %c0_i32 = arith.constant 0 : i32
    %c0_i32_0 = arith.constant 0 : i32
    %c0_i32_1 = arith.constant 0 : i32
    return %arg0, %c0_i32, %c0_i32_0 : i32, i32, i32
  }
  func.func @transform_1(%arg0: i32) -> (i32, i32) {
    %c0_i32 = arith.constant 0 : i32
    %c0_i32_0 = arith.constant 0 : i32
    %c0_i32_1 = arith.constant 0 : i32
    return %c0_i32, %c0_i32_0 : i32, i32
  }
  func.func @transform_2(%arg0: i32) -> (i32, i32) {
    %c0_i32 = arith.constant 0 : i32
    %c0_i32_0 = arith.constant 0 : i32
    %c0_i32_1 = arith.constant 0 : i32
    return %c0_i32, %c0_i32_0 : i32, i32
  }
  func.func @transform_3(%arg0: i32) -> (i32, i32) {
    %c0_i32 = arith.constant 0 : i32
    %c0_i32_0 = arith.constant 0 : i32
    %c0_i32_1 = arith.constant 0 : i32
    return %c0_i32, %c0_i32_0 : i32, i32
  }
  func.func @transform_4(%arg0: i32) -> (i32, i32) {
    %c0_i32 = arith.constant 0 : i32
    %c0_i32_0 = arith.constant 0 : i32
    %c0_i32_1 = arith.constant 0 : i32
    return %c0_i32, %c0_i32_0 : i32, i32
  }
  func.func @transform_5(%arg0: i32) -> (i32, i32) {
    %c0_i32 = arith.constant 0 : i32
    %c0_i32_0 = arith.constant 0 : i32
    %c0_i32_1 = arith.constant 0 : i32
    return %c0_i32, %c0_i32_0 : i32, i32
  }
  func.func @transform_6(%arg0: i32) -> (i32, i32) {
    %c0_i32 = arith.constant 0 : i32
    %c0_i32_0 = arith.constant 0 : i32
    %c0_i32_1 = arith.constant 0 : i32
    return %c0_i32, %c0_i32_0 : i32, i32
  }
  func.func @transform_7(%arg0: i32) -> (i32, i32) {
    %c0_i32 = arith.constant 0 : i32
    %c0_i32_0 = arith.constant 0 : i32
    %c0_i32_1 = arith.constant 0 : i32
    return %c0_i32, %c0_i32_0 : i32, i32
  }
  func.func @transform_8(%arg0: i32) -> (i32, i32) {
    %c0_i32 = arith.constant 0 : i32
    %c0_i32_0 = arith.constant 0 : i32
    %c0_i32_1 = arith.constant 0 : i32
    return %c0_i32, %c0_i32_0 : i32, i32
  }
  func.func @transform_9(%arg0: i32) -> (i32, i32) {
    %c0_i32 = arith.constant 0 : i32
    %c0_i32_0 = arith.constant 0 : i32
    %c0_i32_1 = arith.constant 0 : i32
    return %c0_i32, %c0_i32_0 : i32, i32
  }
  func.func @transform_10(%arg0: i32) -> (i32, i32) {
    %c0_i32 = arith.constant 0 : i32
    %c0_i32_0 = arith.constant 0 : i32
    %c0_i32_1 = arith.constant 0 : i32
    return %c0_i32, %c0_i32_0 : i32, i32
  }
  func.func @transform_11(%arg0: i32) -> (i32, i32) {
    %c0_i32 = arith.constant 0 : i32
    %c0_i32_0 = arith.constant 0 : i32
    %c0_i32_1 = arith.constant 0 : i32
    return %c0_i32, %c0_i32_0 : i32, i32
  }
  func.func @transform_12(%arg0: i32) -> (i32, i32) {
    %c0_i32 = arith.constant 0 : i32
    %c0_i32_0 = arith.constant 0 : i32
    %c0_i32_1 = arith.constant 0 : i32
    return %c0_i32, %c0_i32_0 : i32, i32
  }
  func.func @transform_13(%arg0: i32) -> (i32, i32, i32) {
    %c0_i32 = arith.constant 0 : i32
    %c0_i32_0 = arith.constant 0 : i32
    %c0_i32_1 = arith.constant 0 : i32
    return %arg0, %c0_i32, %c0_i32_0 : i32, i32, i32
  }
  func.func @transform_14(%arg0: i32) -> (i32, i32, i32) {
    %c0_i32 = arith.constant 0 : i32
    %c0_i32_0 = arith.constant 0 : i32
    %c0_i32_1 = arith.constant 0 : i32
    return %arg0, %c0_i32, %c0_i32_0 : i32, i32, i32
  }
}

</mosaic_0001>

<bundles_post_ra>
// kernel: small_encoder_forward.1
= control target key start
LH: loop header
LB: loop body
LE: loop exit
PB: predicated region body
PF: predicated region fallthrough
CT: control target
= control target key end

     0   :  { %20 = vsyncpa [#allocation6], 0  ;;  %s14902_s0 = inlined_call_operand.vmem [shape: bf16[2,368,32], index: 0, kind: input, shape index: {}]   ;;  %s14903_s1 = inlined_call_operand.vmem [shape: f32[368,1], index: 1, kind: input, shape index: {}]   ;;  %s14904_s2 = inlined_call_operand.vmem [shape: bf16[32,32], index: 2, kind: input, shape index: {}]   ;;  %s14905_s3 = inlined_call_operand.vmem [shape: f32[1,32], index: 3, kind: input, shape index: {}]   ;;  %s14906_s4 = inlined_call_operand.vmem [shape: bf16[288,64], index: 4, kind: input, shape index: {}]   ;;  %s14907_s5 = inlined_call_operand.vmem [shape: f32[1,64], index: 5, kind: input, shape index: {}]   ;;  %s14908_s6 = inlined_call_operand.vmem [shape: bf16[128,324], index: 6, kind: input, shape index: {}]   ;;  %s14909_s7 = inlined_call_operand.vmem [shape: bf16[576,64], index: 7, kind: input, shape index: {}]   ;;  %s14910_s8 = inlined_call_operand.vmem [shape: f32[1,64], index: 8, kind: input, shape index: {}]   ;;  %s14911_s9 = inlined_call_operand.vmem [shape: bf16[4096,32], index: 9, kind: input, shape index: {}]   ;;  %s14912_s10 = inlined_call_operand.vmem [shape: f32[1,32], index: 10, kind: input, shape index: {}]   ;;  %s14913_s11 = inlined_call_operand.vmem [shape: bf16[32,20], index: 11, kind: input, shape index: {}]   ;;  %s14914_s12 = inlined_call_operand.vmem [shape: f32[1,20], index: 12, kind: input, shape index: {}]   ;;  %s14915_s13 = inlined_call_operand.hbm [shape: f32[2,1,10], index: 13, kind: output, shape index: {0}]   ;;  %s14916_s14 = inlined_call_operand.hbm [shape: f32[2,1,10], index: 14, kind: output, shape index: {1}]  }
   0x1   :  { %22 = vsyncpa [#allocation6 + $0x1], 0 }
   0x2   :  { %23 = vsyncpa [#allocation8], 0 }
   0x3   :  { %25 = vsyncpa [#allocation8 + $0x1], 0  ;;  %s10441_s29 = smov 0   ;;  %s10443_s30 = smov 0  }
   0x4   :  { %s10445_s15 = smov 0   ;;  %s10447_s16 = smov 0  }
   0x5 LB: > { %14936 = sst [smem:[#allocation11_spill]] %s10347_s29  ;;  %s10462_s17 = sadd.s32 4294967295, %s10359_s16   ;;  %s10359_s16 = sphi %s10447_s16, %s14980_s16   ;;  %s10355_s15 = sphi %s10445_s15, %s14982_s15   ;;  %s10351_s30 = sphi %s10443_s30, %s14984_s30   ;;  %s10347_s29 = sphi %s10441_s29, %s14983_s29  }
   0x6   : > { %14937 = sst [smem:[#allocation12_spill]] %s10355_s15  ;;  %s8330_s18 = sadd.s32 4294967294, %s10359_s16  }
   0x7   : > { %14938 = sst [smem:[#allocation13_spill]] %s10359_s16  ;;  %s10466_s19 = sadd.s32 1, %s10359_s16  }
   0x8   : > { %14939 = sst [smem:[#allocation14_spill]] %s10466_s19  ;;  %s316_s20 = sadd.s32 1, %s10355_s15 }
   0x9   : > { %s313_s21 = ssub.s32 %s10359_s16, %s10466_s19  ;;  %p326_p0 = scmp.ne.s32.totalorder %s10355_s15, %s10351_s30 }
   0xa   : > { %p314_p1 = scmp.eq.s32.totalorder %s313_s21, 0  ;;  %p327_p2 = scmp.eq.s32.totalorder %s10462_s17, 1 }
   0xb   : > { %p332_p3 = scmp.ne.s32.totalorder %s10351_s30, %s10347_s29  ;;  %p333_p4 = scmp.eq.s32.totalorder %s8330_s18, 1 }
   0xc   : > { %s10477_s22 = scalar_select %p314_p1, %s10355_s15, %s316_s20  }
   0xd   : > { %p10479_p5 = por %p327_p2, %p326_p0  ;;  %p10483_p6 = por %p333_p4, %p332_p3 }
   0xe   : > { %14940 = sst [smem:[#allocation15_spill]] %s10477_s22  ;;  %p8333_p7 = scmp.ge.s32.totalorder %s10359_s16, 1 }
   0xf   : > { %s14942_s24 = scalar_select %p10483_p6, 1, 0 }
  0x10   : > { %p421_p8 = scmp.lt.s32.totalorder %s10359_s16, 3 }
  0x11   : > { %14943 = sst [smem:[#allocation16_spill]] %s14942_s24 }
  0x12   : > { %p422_p9 = pnand %p8333_p7, %p421_p8 }
  0x14   : > { %425 = sbr.rel (%p422_p9) target bundleno = 2793 (0xae9), region = 72 }
  0x19   : > { %v904_v0 = vld [vmem:[%s14903_s1 + $0x38] sm:$0xff]  ;;  %v902_v1 = vld [vmem:[%s14903_s1 + $0x28] sm:$0xff]  ;;  %p470_p10 = scmp.lt.s32.totalorder %s10462_s17, 1  ;;  %v10361_v3 = vmov 0   ;;  %v9864_v5 = vld [vmem:[%s14904_s2] sm:$0xff]  ;;  %vm657_vm0 = vcmask 261120  }
  0x1a   : > { %v900_v2 = vld [vmem:[%s14903_s1 + $0x18] sm:$0xff]  ;;  %10254 = vset.pattern.permute.xlu2 %v10361_v3  ;;  %10253 = vset.pattern.permute.xlu1 %v10361_v3  ;;  %v9865_v4 = vld [vmem:[%s14904_s2 + $0x8] sm:$0xff]  ;;  %v897_v6 = vld [vmem:[%s14903_s1] sm:$0xff]  ;;  %vm1678_vm1 = vcmask 1040384   ;;  %vm1428_vm2 = vcmask 1041408   ;;  %vm1261_vm3 = vcmask 1042432  }
  0x1b   : > { %10252 = vset.pattern.permute.xlu0 %v10361_v3  ;;  %980 = vperm.xlu2 %10254, %v904_v0   ;;  %s471_s25 = scalar_select %p470_p10, %s10462_s17, 1  ;;  %v903_v7 = vld [vmem:[%s14903_s1 + $0x30] sm:$0xff]  ;;  %v901_v8 = vld [vmem:[%s14903_s1 + $0x20] sm:$0xff]  ;;  %v898_v12 = vld [vmem:[%s14903_s1 + $0x8] sm:$0xff]  ;;  %vm2141_vm4 = vcmask 1046528   ;;  %vm2803_vm5 = vcmask 1044480  }
  0x1c   : > { %970 = vperm.xlu1 %10253, %v902_v1   ;;  %960 = vperm.xlu0 %10252, %v900_v2   ;;  %v905_v10 = vld [vmem:[%s14903_s1 + $0x40] sm:$0xff]  ;;  %v899_v11 = vld [vmem:[%s14903_s1 + $0x10] sm:$0xff]  ;;  %v908_v13 = vld [vmem:[%s14903_s1 + $0x58] sm:$0xff]  ;;  %s10362_s29 = smov 64   ;;  %s10363_s16 = smov 32   ;;  %vm2557_vm6 = vcmask 1045504  }
  0x1d   : > { %733 = vmatpush.bf16.msra.mxu0 %v9865_v4  ;;  %s10202_s28 = smul.u32 184, %s471_s25  ;;  %v907_v14 = vld [vmem:[%s14903_s1 + $0x50] sm:$0xff]  ;;  %v906_v15 = vld [vmem:[%s14903_s1 + $0x48] sm:$0xff]  ;;  %v909_v17 = vld [vmem:[%s14903_s1 + $0x60] sm:$0xff]  ;;  %s10364_s18 = smov 96   ;;  %vm1635_vm7 = vcmask 523520  }
  0x1e   : > { %v911_v18 = vld [vmem:[%s14903_s1 + $0x70] sm:$0xff]  ;;  %v910_v19 = vld [vmem:[%s14903_s1 + $0x68] sm:$0xff]  ;;  %v912_v20 = vld [vmem:[%s14903_s1 + $0x78] sm:$0xff]  ;;  %vm1885_vm8 = vcmask 785920   ;;  %vm2057_vm9 = vcmask 1048320   ;;  %vm1426_vm10 = vcmask 257024  }
  0x1f   : > { %s10509_s15 = scalar_lea.vmem %s14902_s0, %s10202_s28  ;;  %v914_v21 = vld [vmem:[%s14903_s1 + $0x88] sm:$0xff]  ;;  %v913_v22 = vld [vmem:[%s14903_s1 + $0x80] sm:$0xff]  ;;  %v915_v24 = vld [vmem:[%s14903_s1 + $0x90] sm:$0xff]  ;;  %vm1676_vm11 = vcmask 519424   ;;  %vm1926_vm12 = vcmask 781824   ;;  %vm2098_vm13 = vcmask 1044224  }
  0x20   : > { %v9841_v9 = vld [vmem:[%s10509_s15] sm:$0xff]  ;;  %v9842_v16 = vld [vmem:[%s10509_s15 + $0x8] sm:$0xff]  ;;  %v9843_v23 = vld [vmem:[%s10509_s15 + $0x10] sm:$0xff]  ;;  %vm3917_vm14 = vcmask 556032   ;;  %vm4146_vm15 = vcmask 523264   ;;  %s14846_s28 = sand.u32 1, %s10351_s30  }
  0x21   : > { %734 = vmatpush.bf16.msra.mxu0 %v9864_v5  ;;  %v917_v25 = vld [vmem:[%s14903_s1 + $0xa0] sm:$0xff]  ;;  %v916_v26 = vld [vmem:[%s14903_s1 + $0x98] sm:$0xff]  ;;  %v918_v27 = vld [vmem:[%s14903_s1 + $0xa8] sm:$0xff]  ;;  %s8218_s25 = scalar_lea.sflag [#allocation6], %s14846_s28  ;;  %s10285_s22 = scalar_lea.hbm %s14915_s13, 2 }
  0x22   : > { %v920_v28 = vld [vmem:[%s14903_s1 + $0xb8] sm:$0xff]  ;;  %v919_v29 = vld [vmem:[%s14903_s1 + $0xb0] sm:$0xff]  ;;  %v921_v31 = vld [vmem:[%s14903_s1 + $0xc0] sm:$0xff] }
  0x23   : > { %945 = vperm.xlu2 %10254, %v897_v6   ;;  %v9844_v30 = vld [vmem:[%s10509_s15 + $0x18] sm:$0xff]  ;;  %v922_v32 = vld [vmem:[%s14903_s1 + $0xc8] sm:$0xff]  ;;  %v9845_v33 = vld [vmem:[%s10509_s15 + $0x20] sm:$0xff] }
  0x24   : > { %975 = vperm.xlu1 %10253, %v903_v7   ;;  %965 = vperm.xlu0 %10252, %v901_v8   ;;  %v9846_v34 = vld [vmem:[%s10509_s15 + $0x28] sm:$0xff]  ;;  %v9847_v35 = vld [vmem:[%s10509_s15 + $0x30] sm:$0xff]  ;;  %v9848_v36 = vld [vmem:[%s10509_s15 + $0x38] sm:$0xff] }
  0x25   : > { %8435 = vmatmul.msk.bf16.vlgmr.msra.gmra.mxu0 %vm657_vm0, %v9841_v9  ;;  %v10599_v38 = vld [vmem:[%s14905_s3] ss:$0 sm:$0xff]  ;;  %v9850_v60 = vld [vmem:[%s10509_s15 + $0x48] sm:$0xff] }
  0x26   : > { %v9849_v40 = vld [vmem:[%s10509_s15 + $0x40] sm:$0xff] }
  0x2b   : > { %985 = vperm.xlu2 %10254, %v905_v10  }
  0x2c   : > { %955 = vperm.xlu1 %10253, %v899_v11   ;;  %950 = vperm.xlu0 %10252, %v898_v12  }
  0x33   : > { %1000 = vperm.xlu2 %10254, %v908_v13  }
  0x34   : > { %995 = vperm.xlu1 %10253, %v907_v14   ;;  %990 = vperm.xlu0 %10252, %v906_v15  }
  0x35   : > { %8436 = vmatmul.msk.bf16.gmra.mxu0 %vm657_vm0, %v9842_v16 }
  0x3b   : > { %1005 = vperm.xlu2 %10254, %v909_v17   ;;  %v9851_v17 = vld [vmem:[%s10509_s15 + $0x50] sm:$0xff] }
  0x3c   : > { %1015 = vperm.xlu1 %10253, %v911_v18   ;;  %1010 = vperm.xlu0 %10252, %v910_v19  }
  0x43   : > { %1020 = vperm.xlu2 %10254, %v912_v20  }
  0x44   : > { %1030 = vperm.xlu1 %10253, %v914_v21   ;;  %1025 = vperm.xlu0 %10252, %v913_v22  }
  0x45   : > { %8437 = vmatmul.msk.bf16.gmra.mxu0 %vm657_vm0, %v9843_v23 }
  0x4b   : > { %1035 = vperm.xlu2 %10254, %v915_v24  }
  0x4c   : > { %1045 = vperm.xlu1 %10253, %v917_v25   ;;  %1040 = vperm.xlu0 %10252, %v916_v26   ;;  %v9883_v25 = vld [vmem:[%s14906_s4 + $0x88] sm:$0xff] }
  0x4d   : > { %3596 = vmatpush.bf16.msra.mxu3 %v9883_v25 }
  0x53   : > { %1050 = vperm.xlu2 %10254, %v918_v27  }
  0x54   : > { %1060 = vperm.xlu1 %10253, %v920_v28   ;;  %1055 = vperm.xlu0 %10252, %v919_v29  }
  0x55   : > { %8438 = vmatmul.msk.bf16.gmra.mxu0 %vm657_vm0, %v9844_v30  ;;  %v9882_v30 = vld [vmem:[%s14906_s4 + $0x80] sm:$0xff] }
  0x56   : > { %3597 = vmatpush.bf16.msra.mxu3 %v9882_v30 }
  0x5b   : > { %1065 = vperm.xlu2 %10254, %v921_v31  }
  0x5c   : > { %1070 = vperm.xlu0 %10252, %v922_v32  }
  0x65   : > { %8439 = vmatmul.msk.bf16.gmra.mxu0 %vm657_vm0, %v9845_v33 }
  0x75   : > { %8440 = vmatmul.msk.bf16.gmra.mxu0 %vm657_vm0, %v9846_v34  ;;  %v10601_v39 = vpop.permute.xlu2 %980 }
  0x7d   : > { %v946_v47 = vpop.permute.xlu2 %945 }
  0x85   : > { %8441 = vmatmul.msk.bf16.gmra.mxu0 %vm657_vm0, %v9847_v35 }
  0x8e   : > { %v961_v37 = vpop.permute.xlu0 %960  ;;  %v10604_v41 = vpop.permute.xlu1 %970 }
  0x95   : > { %8442 = vmatmul.msk.bf16.gmra.mxu0 %vm657_vm0, %v9848_v36 }
  0x96   : > { %v10606_v43 = vpop.permute.xlu0 %965  ;;  %v10611_v49 = vpop.permute.xlu1 %975 }
  0x9e   : > { %v951_v52 = vpop.permute.xlu0 %950  ;;  %v956_v3 = vpop.permute.xlu1 %955 }
  0xa2   : > { %v736_v42 = vpop.f32.mrf.mxu0 }
  0xa3   : > { %v737_v44 = vadd.f32 %v10599_v38, %v736_v42  ;;  %v986_v42 = vpop.permute.xlu2 %985 }
  0xa5   : > { %8443 = vmatmul.msk.bf16.gmra.mxu0 %vm657_vm0, %v9849_v40  ;;  %v851_v45 = vmax.f32 %v737_v44, 0.0  ;;  %v9852_v40 = vld [vmem:[%s10509_s15 + $0x58] sm:$0xff] }
  0xa7   : > { %v1173_v50 = vmul.f32 %v946_v47, %v851_v45 }
  0xa9   : > { %v1262_v54 = vrot.slane %v1173_v50, 5  ;;  %v1679_v55 = vrot.slane %v1173_v50, 7  ;;  %v1429_v58 = vrot.slane %v1173_v50, 6 }
  0xaa   : > { %v738_v46 = vpop.f32.mrf.mxu0 }
  0xab   : > { %v739_v48 = vadd.f32 %v10599_v38, %v738_v46 }
  0xad   : > { %v852_v51 = vmax.f32 %v739_v48, 0.0 }
  0xaf   : > { %v1174_v53 = vmul.f32 %v951_v52, %v852_v51 }
  0xb1   : > { %v1263_v56 = vrot.slane %v1174_v53, 5  ;;  %v1680_v57 = vrot.slane %v1174_v53, 7  ;;  %v1430_v59 = vrot.slane %v1174_v53, 6 }
  0xb2   : > { %v741_v61 = vpop.f32.mrf.mxu0 }
  0xb3   : > { %v742_v62 = vadd.f32 %v10599_v38, %v741_v61  ;;  %v1681_v63 = vsel %vm1678_vm1, %v1679_v55, %v1680_v57  ;;  %v1431_v0 = vsel %vm1428_vm2, %v1429_v58, %v1430_v59  ;;  %v1264_v1 = vsel %vm1261_vm3, %v1262_v54, %v1263_v56 }
  0xb4   : > { %1762 = vrot.lane.b32.xlu1 %v1681_v63, %s10362_s29  ;;  %1512 = vrot.lane.b32.xlu0 %v1431_v0, %s10363_s16  ;;  %1386 = vst.msk [vmem:[#allocation2] sm:$0xff] %vm657_vm0, %v1264_v1 }
  0xb5   : > { %v853_v2 = vmax.f32 %v742_v62, 0.0  ;;  %8444 = vmatmul.msk.bf16.gmra.mxu0 %vm657_vm0, %v9850_v60  ;;  %v10698_v60 = vpop.permute.xlu2 %1000 }
  0xb7   : > { %v1175_v4 = vmul.f32 %v956_v3, %v853_v2 }
  0xb9   : > { %v1265_v5 = vrot.slane %v1175_v4, 5  ;;  %v1682_v6 = vrot.slane %v1175_v4, 7  ;;  %v1432_v7 = vrot.slane %v1175_v4, 6 }
  0xba   : > { %v743_v8 = vpop.f32.mrf.mxu0 }
  0xbb   : > { %v744_v9 = vadd.f32 %v10599_v38, %v743_v8  ;;  %v1683_v10 = vsel %vm1678_vm1, %v1680_v57, %v1682_v6  ;;  %v1433_v11 = vsel %vm1428_vm2, %v1430_v59, %v1432_v7  ;;  %v1266_v12 = vsel %vm1261_vm3, %v1263_v56, %v1265_v5 }
  0xbc   : > { %1764 = vrot.lane.b32.xlu2 %v1683_v10, %s10362_s29  ;;  %1514 = vrot.lane.b32.xlu1 %v1433_v11, %s10363_s16  ;;  %1387 = vst.msk [vmem:[#allocation2 + $0x18] sm:$0xff] %vm657_vm0, %v1266_v12 }
  0xbd   : > { %v854_v13 = vmax.f32 %v744_v9, 0.0 }
  0xbf   : > { %v10629_v14 = vmul.f32 %v961_v37, %v854_v13 }
  0xc1   : > { %2100 = vst.msk [vmem:[#allocation2 + $0x8] sm:$0xff] %vm657_vm0, %v10629_v14  ;;  %v1434_v15 = vrot.slane %v10629_v14, 6  ;;  %v1684_v16 = vrot.slane %v10629_v14, 7  ;;  %v1267_v18 = vrot.slane %v10629_v14, 5  ;;  %v2142_v44 = vrot.slane %v10629_v14, 1  ;;  %v10732_v14 = vpop.permute.xlu2 %1005 }
  0xc2   : > { %v746_v19 = vpop.f32.mrf.mxu0 }
  0xc3   : > { %v747_v20 = vadd.f32 %v10599_v38, %v746_v19  ;;  %v1435_v21 = vsel %vm1428_vm2, %v1432_v7, %v1434_v15  ;;  %v1685_v22 = vsel %vm1678_vm1, %v1682_v6, %v1684_v16  ;;  %v1268_v23 = vsel %vm1261_vm3, %v1265_v5, %v1267_v18  ;;  %v9853_v5 = vld [vmem:[%s10509_s15 + $0x60] sm:$0xff] }
  0xc4   : > { %1516 = vrot.lane.b32.xlu2 %v1435_v21, %s10363_s16  ;;  %1934 = vrot.lane.b32.xlu0 %v1685_v22, %s10364_s18  ;;  %1388 = vst.msk [vmem:[#allocation2 + $0x30] sm:$0xff] %vm657_vm0, %v1268_v23 }
  0xc5   : > { %v855_v24 = vmax.f32 %v747_v20, 0.0  ;;  %8445 = vmatmul.msk.bf16.gmra.mxu0 %vm657_vm0, %v9851_v17 }
  0xc7   : > { %v10651_v26 = vmul.f32 %v10606_v43, %v855_v24 }
  0xc9   : > { %2101 = vst.msk [vmem:[#allocation2 + $0x20] sm:$0xff] %vm657_vm0, %v10651_v26  ;;  %v1686_v27 = vrot.slane %v10651_v26, 7  ;;  %v1269_v28 = vrot.slane %v10651_v26, 5  ;;  %v2143_v36 = vrot.slane %v10651_v26, 1  ;;  %v1436_v53 = vrot.slane %v10651_v26, 6  ;;  %v991_v26 = vpop.permute.xlu0 %990 }
  0xca   : > { %v748_v29 = vpop.f32.mrf.mxu0 }
  0xcb   : > { %v749_v31 = vadd.f32 %v10599_v38, %v748_v29  ;;  %v1687_v32 = vsel %vm1678_vm1, %v1684_v16, %v1686_v27  ;;  %v1270_v33 = vsel %vm1261_vm3, %v1267_v18, %v1269_v28  ;;  %v2144_v47 = vsel %vm2141_vm4, %v2142_v44, %v2143_v36 }
  0xcc   : > { %1936 = vrot.lane.b32.xlu1 %v1687_v32, %s10364_s18  ;;  %1766 = vrot.lane.b32.xlu0 %v1685_v22, %s10362_s29  ;;  %1389 = vst.msk [vmem:[#allocation2 + $0x48] sm:$0xff] %vm657_vm0, %v1270_v33  ;;  %v1437_v61 = vsel %vm1428_vm2, %v1434_v15, %v1436_v53  ;;  %v10756_v33 = vpop.permute.xlu2 %1020 }
  0xcd   : > { %v856_v34 = vmax.f32 %v749_v31, 0.0 }
  0xcf   : > { %v10667_v35 = vmul.f32 %v10604_v41, %v856_v34 }
  0xd1   : > { %2102 = vst.msk [vmem:[#allocation2 + $0x38] sm:$0xff] %vm657_vm0, %v10667_v35  ;;  %v1688_v37 = vrot.slane %v10667_v35, 7  ;;  %v1271_v45 = vrot.slane %v10667_v35, 5  ;;  %v2145_v52 = vrot.slane %v10667_v35, 1  ;;  %v2804_v54 = vrot.slane %v10667_v35, 3 }
  0xd2   : > { %v751_v43 = vpop.f32.mrf.mxu0  ;;  %v1438_v2 = vrot.slane %v10667_v35, 6  ;;  %v2558_v18 = vrot.slane %v10667_v35, 2 }
  0xd3   : > { %v752_v46 = vadd.f32 %v10599_v38, %v751_v43  ;;  %v1689_v41 = vsel %vm1678_vm1, %v1686_v27, %v1688_v37  ;;  %v1272_v48 = vsel %vm1261_vm3, %v1269_v28, %v1271_v45  ;;  %v2146_v59 = vsel %vm2141_vm4, %v2143_v36, %v2145_v52 }
  0xd4   : > { %1938 = vrot.lane.b32.xlu2 %v1689_v41, %s10364_s18  ;;  %1768 = vrot.lane.b32.xlu1 %v1687_v32, %s10362_s29  ;;  %1390 = vst.msk [vmem:[#allocation2 + $0x60] sm:$0xff] %vm657_vm0, %v1272_v48  ;;  %v1439_v10 = vsel %vm1428_vm2, %v1436_v53, %v1438_v2  ;;  %v10774_v48 = vpop.permute.xlu0 %1010  ;;  %v10782_v53 = vpop.permute.xlu2 %1035 }
  0xd5   : > { %v857_v50 = vmax.f32 %v752_v46, 0.0  ;;  %2223 = vrot.lane.b32.xlu0 %v2144_v47, %s10363_s16  ;;  %8446 = vmatmul.msk.bf16.gmra.mxu0 %vm657_vm0, %v9852_v40 }
  0xd7   : > { %v10686_v51 = vmul.f32 %v10611_v49, %v857_v50 }
  0xd9   : > { %v2805_v55 = vrot.slane %v10686_v51, 3  ;;  %2103 = vst.msk [vmem:[#allocation2 + $0x50] sm:$0xff] %vm657_vm0, %v10686_v51  ;;  %v1273_v57 = vrot.slane %v10686_v51, 5  ;;  %v2147_v1 = vrot.slane %v10686_v51, 1  ;;  %v1690_v3 = vrot.slane %v10686_v51, 7 }
  0xda   : > { %v753_v56 = vpop.f32.mrf.mxu0  ;;  %v2559_v16 = vrot.slane %v10686_v51, 2  ;;  %v1440_v31 = vrot.slane %v10686_v51, 6 }
  0xdb   : > { %v2806_v58 = vsel %vm2803_vm5, %v2804_v54, %v2805_v55  ;;  %v754_v49 = vadd.f32 %v10599_v38, %v753_v56  ;;  %v1274_v62 = vsel %vm1261_vm3, %v1271_v45, %v1273_v57  ;;  %v2148_v9 = vsel %vm2141_vm4, %v2145_v52, %v2147_v1 }
  0xdc   : > { %2926 = vst.msk [vmem:[#allocation2 + $0x10] sm:$0xff] %vm657_vm0, %v2806_v58  ;;  %1770 = vrot.lane.b32.xlu2 %v1689_v41, %s10362_s29  ;;  %2225 = vrot.lane.b32.xlu1 %v2146_v59, %s10363_s16  ;;  %v1691_v11 = vsel %vm1678_vm1, %v1688_v37, %v1690_v3  ;;  %v2560_v23 = vsel %vm2557_vm6, %v2558_v18, %v2559_v16  ;;  %v996_v41 = vpop.permute.xlu1 %995 }
  0xdd   : > { %v858_v63 = vmax.f32 %v754_v49, 0.0  ;;  %1518 = vrot.lane.b32.xlu0 %v1437_v61, %s10363_s16  ;;  %1391 = vst.msk [vmem:[#allocation2 + $0x78] sm:$0xff] %vm657_vm0, %v1274_v62  ;;  %v1441_v43 = vsel %vm1428_vm2, %v1438_v2, %v1440_v31 }
  0xdf   : > { %v10710_v0 = vmul.f32 %v10601_v39, %v858_v63 }
  0xe1   : > { %v2807_v4 = vrot.slane %v10710_v0, 3  ;;  %2104 = vst.msk [vmem:[#allocation2 + $0x68] sm:$0xff] %vm657_vm0, %v10710_v0  ;;  %v1275_v7 = vrot.slane %v10710_v0, 5  ;;  %v1692_v32 = vrot.slane %v10710_v0, 7  ;;  %v2149_v34 = vrot.slane %v10710_v0, 1 }
  0xe2   : > { %v756_v6 = vpop.f32.mrf.mxu0  ;;  %v2561_v51 = vrot.slane %v10710_v0, 2 }
  0xe3   : > { %v2808_v8 = vsel %vm2803_vm5, %v2805_v55, %v2807_v4  ;;  %v757_v39 = vadd.f32 %v10599_v38, %v756_v6  ;;  %v1276_v12 = vsel %vm1261_vm3, %v1273_v57, %v1275_v7  ;;  %v2969_v24 = vld [vmem:[#allocation2 + $0x10] sm:$0xff]  ;;  %v1693_v44 = vsel %vm1678_vm1, %v1690_v3, %v1692_v32 }
  0xe4   : > { %2927 = vst.msk [vmem:[#allocation2 + $0x28] sm:$0xff] %vm657_vm0, %v2808_v8  ;;  %2393 = vrot.lane.b32.xlu2 %v2148_v9, %s10362_s29  ;;  %1520 = vrot.lane.b32.xlu1 %v1439_v10, %s10363_s16  ;;  %v2150_v45 = vsel %vm2141_vm4, %v2147_v1, %v2149_v34  ;;  %v2562_v58 = vsel %vm2557_vm6, %v2559_v16, %v2561_v51  ;;  %v10797_v1 = vpop.permute.xlu1 %1015  ;;  %v1442_v6 = vrot.slane %v10710_v0, 6 }
  0xe5   : > { %v859_v13 = vmax.f32 %v757_v39, 0.0  ;;  %1940 = vrot.lane.b32.xlu0 %v1691_v11, %s10364_s18  ;;  %8447 = vmatmul.msk.bf16.gmra.mxu0 %vm657_vm0, %v9853_v5  ;;  %1392 = vst.msk [vmem:[#allocation2 + $0x90] sm:$0xff] %vm657_vm0, %v1276_v12  ;;  %v10804_v5 = vpop.permute.xlu0 %1025  ;;  %v10819_v12 = vpop.permute.xlu2 %1050 }
  0xe7   : > { %v10734_v15 = vmul.f32 %v986_v42, %v859_v13  ;;  %v1443_v13 = vsel %vm1428_vm2, %v1440_v31, %v1442_v6 }
  0xe9   : > { %v2809_v17 = vrot.slane %v10734_v15, 3  ;;  %2105 = vst.msk [vmem:[#allocation2 + $0x80] sm:$0xff] %vm657_vm0, %v10734_v15  ;;  %v1277_v20 = vrot.slane %v10734_v15, 5  ;;  %v1694_v3 = vrot.slane %v10734_v15, 7  ;;  %v1444_v0 = vrot.slane %v10734_v15, 6 }
  0xea   : > { %v758_v19 = vpop.f32.mrf.mxu0 }
  0xeb   : > { %v2810_v21 = vsel %vm2803_vm5, %v2807_v4, %v2809_v17  ;;  %v759_v22 = vadd.f32 %v10599_v38, %v758_v19  ;;  %v2972_v25 = vld [vmem:[#allocation2 + $0x28] sm:$0xff]  ;;  %v1278_v29 = vsel %vm1261_vm3, %v1275_v7, %v1277_v20  ;;  %v2151_v4 = vrot.slane %v10734_v15, 1 }
  0xec   : > { %2928 = vst.msk [vmem:[#allocation2 + $0x40] sm:$0xff] %vm657_vm0, %v2810_v21  ;;  %2227 = vrot.lane.b32.xlu2 %v2148_v9, %s10363_s16  ;;  %2639 = vrot.lane.b32.xlu1 %v2560_v23, %s10364_s18  ;;  %v3092_v27 = vpack.c.bf16 %v2972_v25, %v2969_v24  ;;  %v1695_v10 = vsel %vm1678_vm1, %v1692_v32, %v1694_v3  ;;  %v2563_v19 = vrot.slane %v10734_v15, 2 }
  0xed   : > { %v860_v28 = vmax.f32 %v759_v22, 0.0  ;;  %1772 = vrot.lane.b32.xlu0 %v1691_v11, %s10362_s29  ;;  %1393 = vst.msk [vmem:[#allocation2 + $0xa8] sm:$0xff] %vm657_vm0, %v1278_v29  ;;  %v2152_v11 = vsel %vm2141_vm4, %v2149_v34, %v2151_v4  ;;  %v9873_v22 = vld [vmem:[%s14906_s4 + $0x38] sm:$0xff]  ;;  %v10840_v23 = vpop.permute.xlu0 %1040 }
  0xee   : > { %8530 = vmatmul.msk.bf16.vlgmr.msra.gmra.mxu3 %vm657_vm0, %v3092_v27  ;;  %3364 = vmatpush.bf16.msra.mxu1 %v9873_v22  ;;  %v2564_v32 = vsel %vm2557_vm6, %v2561_v51, %v2563_v19 }
  0xef   : > { %v10752_v30 = vmul.f32 %v991_v26, %v860_v28 }
  0xf1   : > { %v2811_v35 = vrot.slane %v10752_v30, 3  ;;  %2106 = vst.msk [vmem:[#allocation2 + $0x98] sm:$0xff] %vm657_vm0, %v10752_v30  ;;  %v1279_v37 = vrot.slane %v10752_v30, 5  ;;  %v1446_v22 = vrot.slane %v10752_v30, 6 }
  0xf2   : > { %v761_v36 = vpop.f32.mrf.mxu0 }
  0xf3   : > { %v2812_v40 = vsel %vm2803_vm5, %v2809_v17, %v2811_v35  ;;  %v762_v42 = vadd.f32 %v10599_v38, %v761_v36  ;;  %v1280_v46 = vsel %vm1261_vm3, %v1277_v20, %v1279_v37  ;;  %v2975_v49 = vld [vmem:[#allocation2 + $0x40] sm:$0xff]  ;;  %v10832_v20 = vpop.permute.xlu1 %1030 }
  0xf4   : > { %2929 = vst.msk [vmem:[#allocation2 + $0x58] sm:$0xff] %vm657_vm0, %v2812_v40  ;;  %1522 = vrot.lane.b32.xlu2 %v1441_v43, %s10363_s16  ;;  %1942 = vrot.lane.b32.xlu1 %v1693_v44, %s10364_s18 }
  0xf5   : > { %v861_v47 = vmax.f32 %v762_v42, 0.0  ;;  %2395 = vrot.lane.b32.xlu0 %v2150_v45, %s10362_s29  ;;  %1394 = vst.msk [vmem:[#allocation2 + $0xc0] sm:$0xff] %vm657_vm0, %v1280_v46  ;;  %v10865_v42 = vpop.permute.xlu2 %1065 }
  0xf7   : > { %v10776_v50 = vmul.f32 %v996_v41, %v861_v47  ;;  %v9871_v41 = vld [vmem:[%s14906_s4 + $0x28] sm:$0xff] }
  0xf9   : > { %v2813_v52 = vrot.slane %v10776_v50, 3  ;;  %2107 = vst.msk [vmem:[#allocation2 + $0xb0] sm:$0xff] %vm657_vm0, %v10776_v50  ;;  %v1281_v55 = vrot.slane %v10776_v50, 5 }
  0xfa   : > { %v763_v54 = vpop.f32.mrf.mxu0 }
  0xfb   : > { %v2814_v56 = vsel %vm2803_vm5, %v2811_v35, %v2813_v52  ;;  %v764_v57 = vadd.f32 %v10599_v38, %v763_v54  ;;  %v2978_v59 = vld [vmem:[#allocation2 + $0x58] sm:$0xff]  ;;  %v1282_v63 = vsel %vm1261_vm3, %v1279_v37, %v1281_v55  ;;  %v9872_v37 = vld [vmem:[%s14906_s4 + $0x30] sm:$0xff] }
  0xfc   : > { %2930 = vst.msk [vmem:[#allocation2 + $0x70] sm:$0xff] %vm657_vm0, %v2814_v56  ;;  %2641 = vrot.lane.b32.xlu2 %v2562_v58, %s10364_s18  ;;  %1774 = vrot.lane.b32.xlu1 %v1693_v44, %s10362_s29  ;;  %v3095_v61 = vpack.c.bf16 %v2978_v59, %v2975_v49  ;;  %v2153_v44 = vrot.slane %v10752_v30, 1  ;;  %v10888_v56 = vpop.permute.xlu1 %1045 }
  0xfd   : > { %v862_v62 = vmax.f32 %v764_v57, 0.0  ;;  %2229 = vrot.lane.b32.xlu0 %v2150_v45, %s10363_s16  ;;  %1395 = vst.msk [vmem:[#allocation2 + $0xd8] sm:$0xff] %vm657_vm0, %v1282_v63  ;;  %v1696_v45 = vrot.slane %v10752_v30, 7  ;;  %3365 = vmatpush.bf16.msra.mxu1 %v9872_v37 }
  0xfe   : > { %8531 = vmatmul.msk.bf16.gmra.mxu3 %vm657_vm0, %v3095_v61  ;;  %v2154_v49 = vsel %vm2141_vm4, %v2151_v4, %v2153_v44  ;;  %v10902_v61 = vpop.permute.xlu0 %1055 }
  0xff   : > { %v10800_v2 = vmul.f32 %v10698_v60, %v862_v62  ;;  %v1697_v59 = vsel %vm1678_vm1, %v1694_v3, %v1696_v45 }
 0x101   : > { %v2815_v7 = vrot.slane %v10800_v2, 3  ;;  %2108 = vst.msk [vmem:[#allocation2 + $0xc8] sm:$0xff] %vm657_vm0, %v10800_v2  ;;  %v1283_v39 = vrot.slane %v10800_v2, 5  ;;  %v1450_v25 = vrot.slane %v10800_v2, 6  ;;  %3366 = vmatpush.bf16.msra.mxu1 %v9871_v41 }
 0x102   : > { %v766_v8 = vpop.f32.mrf.mxu0 }
 0x103   : > { %v2816_v9 = vsel %vm2803_vm5, %v2813_v52, %v2815_v7  ;;  %v767_v60 = vadd.f32 %v10599_v38, %v766_v8  ;;  %v1284_v16 = vsel %vm1261_vm3, %v1281_v55, %v1283_v39  ;;  %v2981_v29 = vld [vmem:[#allocation2 + $0x70] sm:$0xff]  ;;  %v2565_v8 = vrot.slane %v10752_v30, 2 }
 0x104   : > { %2931 = vst.msk [vmem:[#allocation2 + $0x88] sm:$0xff] %vm657_vm0, %v2816_v9  ;;  %1944 = vrot.lane.b32.xlu2 %v1695_v10, %s10364_s18  ;;  %2397 = vrot.lane.b32.xlu1 %v2152_v11, %s10362_s29  ;;  %v10967_v37 = vpop.permute.xlu1 %1060 }
 0x105   : > { %v863_v17 = vmax.f32 %v767_v60, 0.0  ;;  %1524 = vrot.lane.b32.xlu0 %v1443_v13, %s10363_s16  ;;  %1396 = vst.msk [vmem:[#allocation2 + $0xf0] sm:$0xff] %vm657_vm0, %v1284_v16 }
 0x107   : > { %v10829_v18 = vmul.f32 %v10732_v14, %v863_v17 }
 0x109   : > { %v2817_v21 = vrot.slane %v10829_v18, 3  ;;  %2109 = vst.msk [vmem:[#allocation2 + $0xe0] sm:$0xff] %vm657_vm0, %v10829_v18  ;;  %v1452_v14 = vrot.slane %v10829_v18, 6  ;;  %v1285_v26 = vrot.slane %v10829_v18, 5  ;;  %v2571_v52 = vrot.slane %v10829_v18, 2 }
 0x10a   : > { %v768_v24 = vpop.f32.mrf.mxu0 }
 0x10b   : > { %v2818_v27 = vsel %vm2803_vm5, %v2815_v7, %v2817_v21  ;;  %v769_v28 = vadd.f32 %v10599_v38, %v768_v24  ;;  %v2984_v31 = vld [vmem:[#allocation2 + $0x88] sm:$0xff]  ;;  %v10858_v35 = vsel %vm1428_vm2, %v1450_v25, %v1452_v14  ;;  %v1286_v40 = vsel %vm1261_vm3, %v1283_v39, %v1285_v26 }
 0x10c   : > { %2932 = vst.msk [vmem:[#allocation2 + $0xa0] sm:$0xff] %vm657_vm0, %v2818_v27  ;;  %1776 = vrot.lane.b32.xlu2 %v1695_v10, %s10362_s29  ;;  %2231 = vrot.lane.b32.xlu1 %v2152_v11, %s10363_s16  ;;  %v3098_v34 = vpack.c.bf16 %v2984_v31, %v2981_v29  ;;  %v9869_v11 = vld [vmem:[%s14906_s4 + $0x18] sm:$0xff] }
 0x10d   : > { %v864_v36 = vmax.f32 %v769_v28, 0.0  ;;  %2643 = vrot.lane.b32.xlu0 %v2564_v32, %s10364_s18  ;;  %1397 = vst.msk [vmem:[#allocation2 + $0x108] sm:$0xff] %vm657_vm0, %v1286_v40 }
 0x10e   : > { %8532 = vmatmul.msk.bf16.gmra.mxu3 %vm657_vm0, %v3098_v34 }
 0x10f   : > { %v10871_v43 = vmul.f32 %v10774_v48, %v864_v36  ;;  %v1445_v48 = vsel %vm1428_vm2, %v1442_v6, %v1444_v0  ;;  %v9870_v6 = vld [vmem:[%s14906_s4 + $0x20] sm:$0xff] }
 0x110   : > { %3367 = vmatpush.bf16.msra.mxu1 %v9870_v6 }
 0x111   : > { %v2819_v46 = vrot.slane %v10871_v43, 3  ;;  %2110 = vst.msk [vmem:[#allocation2 + $0xf8] sm:$0xff] %vm657_vm0, %v10871_v43  ;;  %v2573_v47 = vrot.slane %v10871_v43, 2  ;;  %v1454_v54 = vrot.slane %v10871_v43, 6  ;;  %v1287_v55 = vrot.slane %v10871_v43, 5 }
 0x112   : > { %v771_v51 = vpop.f32.mrf.mxu0  ;;  %v14924_v9 = vrot.slane %v10871_v43, 7  ;;  %v14923_v60 = vrot.slane %v10871_v43, 1 }
 0x113   : > { %v2820_v57 = vsel %vm2803_vm5, %v2817_v21, %v2819_v46  ;;  %v772_v58 = vadd.f32 %v10599_v38, %v771_v51  ;;  %v10910_v62 = vsel %vm2557_vm6, %v2571_v52, %v2573_v47  ;;  %v10913_v63 = vsel %vm1428_vm2, %v1452_v14, %v1454_v54  ;;  %v2987_v28 = vld [vmem:[#allocation2 + $0xa0] sm:$0xff]  ;;  %v10974_v51 = vpop.permute.xlu0 %1070 }
 0x114   : > { %2933 = vst.msk [vmem:[#allocation2 + $0xb8] sm:$0xff] %vm657_vm0, %v2820_v57  ;;  %2399 = vrot.lane.b32.xlu2 %v2154_v49, %s10362_s29  ;;  %1526 = vrot.lane.b32.xlu1 %v1445_v48, %s10363_s16  ;;  %v1288_v4 = vsel %vm1261_vm3, %v1285_v26, %v1287_v55  ;;  %v2566_v21 = vsel %vm2557_vm6, %v2563_v19, %v2565_v8  ;;  %v1698_v48 = vrot.slane %v10776_v50, 7 }
 0x115   : > { %v865_v3 = vmax.f32 %v772_v58, 0.0  ;;  %1946 = vrot.lane.b32.xlu0 %v1697_v59, %s10364_s18  ;;  %1398 = vst.msk [vmem:[#allocation2 + $0x120] sm:$0xff] %vm657_vm0, %v1288_v4  ;;  %3368 = vmatpush.bf16.msra.mxu1 %v9869_v11 }
 0x116   : > { %v10921_v7 = vpop.permute.xlu2 %1764  ;;  %v1699_v15 = vsel %vm1678_vm1, %v1696_v45, %v1698_v48 }
 0x117   : > { %v10925_v39 = vmul.f32 %v10797_v1, %v865_v3  ;;  %v9867_v3 = vld [vmem:[%s14906_s4 + $0x8] sm:$0xff] }
 0x119   : > { %v2821_v10 = vrot.slane %v10925_v39, 3  ;;  %2111 = vst.msk [vmem:[#allocation2 + $0x110] sm:$0xff] %vm657_vm0, %v10925_v39  ;;  %v1706_v13 = vrot.slane %v10925_v39, 7  ;;  %v2163_v16 = vrot.slane %v10925_v39, 1  ;;  %v2575_v1 = vrot.slane %v10925_v39, 2 }
 0x11a   : > { %v773_v17 = vpop.f32.mrf.mxu0  ;;  %v1456_v24 = vrot.slane %v10925_v39, 6  ;;  %v1289_v14 = vrot.slane %v10925_v39, 5 }
 0x11b   : > { %v2822_v26 = vsel %vm2803_vm5, %v2819_v46, %v2821_v10  ;;  %v774_v27 = vadd.f32 %v10599_v38, %v773_v17  ;;  %v2990_v29 = vld [vmem:[#allocation2 + $0xb8] sm:$0xff]  ;;  %v10951_v31 = vsel %vm1678_vm1, %v14924_v9, %v1706_v13  ;;  %v10956_v19 = vsel %vm2141_vm4, %v14923_v60, %v2163_v16  ;;  %v9868_v46 = vld [vmem:[%s14906_s4 + $0x10] sm:$0xff] }
 0x11c   : > { %2934 = vst.msk [vmem:[#allocation2 + $0xd0] sm:$0xff] %vm657_vm0, %v2822_v26  ;;  %2233 = vrot.lane.b32.xlu2 %v2154_v49, %s10363_s16  ;;  %2645 = vrot.lane.b32.xlu1 %v2566_v21, %s10364_s18  ;;  %v3101_v32 = vpack.c.bf16 %v2990_v29, %v2987_v28  ;;  %v10962_v34 = vsel %vm2557_vm6, %v2573_v47, %v2575_v1  ;;  %v2567_v28 = vrot.slane %v10776_v50, 2 }
 0x11d   : > { %v10965_v36 = vsel %vm1428_vm2, %v1454_v54, %v1456_v24  ;;  %v866_v40 = vmax.f32 %v774_v27, 0.0  ;;  %1778 = vrot.lane.b32.xlu0 %v1697_v59, %s10362_s29  ;;  %v1290_v41 = vsel %vm1261_vm3, %v1287_v55, %v1289_v14  ;;  %v2155_v54 = vrot.slane %v10776_v50, 1  ;;  %3369 = vmatpush.bf16.msra.mxu1 %v9868_v46 }
 0x11e   : > { %8533 = vmatmul.msk.bf16.gmra.mxu3 %vm657_vm0, %v3101_v32  ;;  %v1517_v47 = vpop.permute.xlu2 %1516  ;;  %1399 = vst.msk [vmem:[#allocation2 + $0x138] sm:$0xff] %vm657_vm0, %v1290_v41  ;;  %v1447_v55 = vsel %vm1428_vm2, %v1444_v0, %v1446_v22  ;;  %v2568_v41 = vsel %vm2557_vm6, %v2565_v8, %v2567_v28 }
 0x11f   : > { %v10981_v57 = vmul.f32 %v10756_v33, %v866_v40  ;;  %1638 = vst.msk [vmem:[#allocation2 + $0x30] sm:$0xff] %vm1635_vm7, %v1517_v47  ;;  %v2156_v0 = vsel %vm2141_vm4, %v2153_v44, %v2155_v54 }
 0x121   : > { %v2823_v58 = vrot.slane %v10981_v57, 3  ;;  %2112 = vst.msk [vmem:[#allocation2 + $0x128] sm:$0xff] %vm657_vm0, %v10981_v57  ;;  %v2165_v49 = vrot.slane %v10981_v57, 1  ;;  %v1708_v59 = vrot.slane %v10981_v57, 7  ;;  %v2577_v33 = vrot.slane %v10981_v57, 2  ;;  %3370 = vmatpush.bf16.msra.mxu1 %v9867_v3 }
 0x122   : > { %v776_v4 = vpop.f32.mrf.mxu0  ;;  %v1458_v6 = vrot.slane %v10981_v57, 6  ;;  %v1291_v39 = vrot.slane %v10981_v57, 5 }
 0x123   : > { %v2824_v11 = vsel %vm2803_vm5, %v2821_v10, %v2823_v58  ;;  %v777_v17 = vadd.f32 %v10599_v38, %v776_v4  ;;  %v11013_v45 = vsel %vm2141_vm4, %v2163_v16, %v2165_v49  ;;  %v11016_v21 = vsel %vm1678_vm1, %v1706_v13, %v1708_v59  ;;  %v2993_v3 = vld [vmem:[#allocation2 + $0xd0] sm:$0xff] }
 0x124   : > { %2935 = vst.msk [vmem:[#allocation2 + $0xe8] sm:$0xff] %vm657_vm0, %v2824_v11  ;;  %1528 = vrot.lane.b32.xlu2 %v1447_v55, %s10363_s16  ;;  %1948 = vrot.lane.b32.xlu1 %v1699_v15, %s10364_s18  ;;  %v11022_v44 = vsel %vm2557_vm6, %v2575_v1, %v2577_v33  ;;  %v11025_v26 = vsel %vm1428_vm2, %v1456_v24, %v1458_v6  ;;  %v9866_v1 = vld [vmem:[%s14906_s4] sm:$0xff] }
 0x125   : > { %v1292_v10 = vsel %vm1261_vm3, %v1289_v14, %v1291_v39  ;;  %v867_v27 = vmax.f32 %v777_v17, 0.0  ;;  %2401 = vrot.lane.b32.xlu0 %v2156_v0, %s10362_s29  ;;  %3371 = vmatpush.bf16.msra.mxu1 %v9866_v1  ;;  %v1700_v1 = vrot.slane %v10800_v2, 7 }
 0x126   : > { %1400 = vst.msk [vmem:[#allocation2 + $0x150] sm:$0xff] %vm657_vm0, %v1292_v10  ;;  %v1763_v13 = vpop.permute.xlu1 %1762  ;;  %v1513_v16 = vpop.permute.xlu0 %1512 }
 0x127   : > { %v1189_v24 = vmul.f32 %v10804_v5, %v867_v27  ;;  %1636 = vst.msk [vmem:[#allocation2] sm:$0xff] %vm1635_vm7, %v1513_v16  ;;  %v1448_v5 = vrot.slane %v10776_v50, 6  ;;  %v1701_v30 = vsel %vm1678_vm1, %v1698_v48, %v1700_v1  ;;  %v9881_v48 = vld [vmem:[%s14906_s4 + $0x78] sm:$0xff] }
 0x128   : > { %1886 = vst.msk [vmem:[#allocation2] sm:$0xff] %vm1885_vm8, %v1763_v13  ;;  %3477 = vmatpush.bf16.msra.mxu2 %v9881_v48 }
 0x129   : > { %v2825_v14 = vrot.slane %v1189_v24, 3  ;;  %2113 = vst.msk [vmem:[#allocation2 + $0x140] sm:$0xff] %vm657_vm0, %v1189_v24  ;;  %v2167_v29 = vrot.slane %v1189_v24, 1  ;;  %v1710_v32 = vrot.slane %v1189_v24, 7  ;;  %v2579_v40 = vrot.slane %v1189_v24, 2 }
 0x12a   : > { %v778_v46 = vpop.f32.mrf.mxu0  ;;  %v1460_v47 = vrot.slane %v1189_v24, 6  ;;  %v1293_v57 = vrot.slane %v1189_v24, 5 }
 0x12b   : > { %v2826_v55 = vsel %vm2803_vm5, %v2823_v58, %v2825_v14  ;;  %v779_v4 = vadd.f32 %v10599_v38, %v778_v46  ;;  %v2996_v11 = vld [vmem:[#allocation2 + $0xe8] sm:$0xff]  ;;  %v11047_v17 = vsel %vm2141_vm4, %v2165_v49, %v2167_v29  ;;  %v11050_v10 = vsel %vm1678_vm1, %v1708_v59, %v1710_v32 }
 0x12c   : > { %2936 = vst.msk [vmem:[#allocation2 + $0x100] sm:$0xff] %vm657_vm0, %v2826_v55  ;;  %2647 = vrot.lane.b32.xlu2 %v2568_v41, %s10364_s18  ;;  %1780 = vrot.lane.b32.xlu1 %v1699_v15, %s10362_s29  ;;  %v3104_v8 = vpack.c.bf16 %v2996_v11, %v2993_v3  ;;  %v11056_v27 = vsel %vm2557_vm6, %v2577_v33, %v2579_v40  ;;  %v2157_v15 = vrot.slane %v10800_v2, 1 }
 0x12d   : > { %v11059_v58 = vsel %vm1428_vm2, %v1458_v6, %v1460_v47  ;;  %v868_v13 = vmax.f32 %v779_v4, 0.0  ;;  %2235 = vrot.lane.b32.xlu0 %v2156_v0, %s10363_s16  ;;  %v1294_v49 = vsel %vm1261_vm3, %v1291_v39, %v1293_v57  ;;  %v1449_v0 = vsel %vm1428_vm2, %v1446_v22, %v1448_v5 }
 0x12e   : > { %8534 = vmatmul.msk.bf16.gmra.mxu3 %vm657_vm0, %v3104_v8  ;;  %v11064_v59 = vpop.permute.xlu2 %1938  ;;  %v1515_v16 = vpop.permute.xlu1 %1514  ;;  %1401 = vst.msk [vmem:[#allocation2 + $0x168] sm:$0xff] %vm657_vm0, %v1294_v49  ;;  %v2569_v49 = vrot.slane %v10800_v2, 2 }
 0x12f   : > { %v11070_v33 = vmul.f32 %v10832_v20, %v868_v13  ;;  %1637 = vst.msk [vmem:[#allocation2 + $0x18] sm:$0xff] %vm1635_vm7, %v1515_v16 }
 0x130   : > { %1887 = vst.msk [vmem:[#allocation2 + $0x18] sm:$0xff] %vm1885_vm8, %v10921_v7  ;;  %v2158_v7 = vsel %vm2141_vm4, %v2155_v54, %v2157_v15 }
 0x131   : > { %v2827_v6 = vrot.slane %v11070_v33, 3  ;;  %2114 = vst.msk [vmem:[#allocation2 + $0x158] sm:$0xff] %vm657_vm0, %v11070_v33  ;;  %v2169_v39 = vrot.slane %v11070_v33, 1  ;;  %v2581_v20 = vrot.slane %v11070_v33, 2  ;;  %v1712_v24 = vrot.slane %v11070_v33, 7 }
 0x132   : > { %v781_v46 = vpop.f32.mrf.mxu0  ;;  %v1462_v22 = vrot.slane %v11070_v33, 6  ;;  %v1295_v41 = vrot.slane %v11070_v33, 5 }
 0x133   : > { %v2828_v55 = vsel %vm2803_vm5, %v2825_v14, %v2827_v6  ;;  %v782_v4 = vadd.f32 %v10599_v38, %v781_v46  ;;  %v11101_v3 = vsel %vm2141_vm4, %v2167_v29, %v2169_v39  ;;  %v11104_v11 = vsel %vm2557_vm6, %v2579_v40, %v2581_v20 }
 0x134   : > { %2937 = vst.msk [vmem:[#allocation2 + $0x118] sm:$0xff] %vm657_vm0, %v2828_v55  ;;  %1950 = vrot.lane.b32.xlu2 %v1701_v30, %s10364_s18  ;;  %2403 = vrot.lane.b32.xlu1 %v2158_v7, %s10362_s29  ;;  %v11113_v54 = vsel %vm1678_vm1, %v1710_v32, %v1712_v24  ;;  %v11116_v14 = vsel %vm1428_vm2, %v1460_v47, %v1462_v22  ;;  %v9880_v32 = vld [vmem:[%s14906_s4 + $0x70] sm:$0xff] }
 0x135   : > { %v1296_v29 = vsel %vm1261_vm3, %v1293_v57, %v1295_v41  ;;  %v869_v40 = vmax.f32 %v782_v4, 0.0  ;;  %1530 = vrot.lane.b32.xlu0 %v1449_v0, %s10363_s16  ;;  %3478 = vmatpush.bf16.msra.mxu2 %v9880_v32 }
 0x136   : > { %1402 = vst.msk [vmem:[#allocation2 + $0x180] sm:$0xff] %vm657_vm0, %v1296_v29  ;;  %v11121_v8 = vpop.permute.xlu2 %1770  ;;  %v1935_v13 = vpop.permute.xlu0 %1934 }
 0x137   : > { %v11125_v16 = vmul.f32 %v10782_v53, %v869_v40  ;;  %2058 = vst.msk [vmem:[#allocation2] sm:$0xff] %vm2057_vm9, %v1935_v13  ;;  %v2570_v53 = vsel %vm2557_vm6, %v2567_v28, %v2569_v49  ;;  %v2999_v40 = vld [vmem:[#allocation2 + $0x100] sm:$0xff] }
 0x139   : > { %v2829_v47 = vrot.slane %v11125_v16, 3  ;;  %2115 = vst.msk [vmem:[#allocation2 + $0x170] sm:$0xff] %vm657_vm0, %v11125_v16  ;;  %v2171_v57 = vrot.slane %v11125_v16, 1  ;;  %v2583_v33 = vrot.slane %v11125_v16, 2  ;;  %v1714_v0 = vrot.slane %v11125_v16, 7 }
 0x13a   : > { %v783_v46 = vpop.f32.mrf.mxu0  ;;  %v1464_v55 = vrot.slane %v11125_v16, 6  ;;  %v1297_v4 = vrot.slane %v11125_v16, 5 }
 0x13b   : > { %v2830_v48 = vsel %vm2803_vm5, %v2827_v6, %v2829_v47  ;;  %v784_v29 = vadd.f32 %v10599_v38, %v783_v46  ;;  %v3002_v13 = vld [vmem:[#allocation2 + $0x118] sm:$0xff]  ;;  %v11147_v60 = vsel %vm2141_vm4, %v2169_v39, %v2171_v57  ;;  %v11150_v9 = vsel %vm2557_vm6, %v2581_v20, %v2583_v33  ;;  %v9879_v6 = vld [vmem:[%s14906_s4 + $0x68] sm:$0xff] }
 0x13c   : > { %2938 = vst.msk [vmem:[#allocation2 + $0x130] sm:$0xff] %vm657_vm0, %v2830_v48  ;;  %1782 = vrot.lane.b32.xlu2 %v1701_v30, %s10362_s29  ;;  %2237 = vrot.lane.b32.xlu1 %v2158_v7, %s10363_s16  ;;  %v3107_v28 = vpack.c.bf16 %v3002_v13, %v2999_v40  ;;  %v11159_v16 = vsel %vm1678_vm1, %v1712_v24, %v1714_v0  ;;  %v2159_v46 = vrot.slane %v10829_v18, 1  ;;  %v1702_v48 = vrot.slane %v10829_v18, 7 }
 0x13d   : > { %v11162_v39 = vsel %vm1428_vm2, %v1462_v22, %v1464_v55  ;;  %v870_v32 = vmax.f32 %v784_v29, 0.0  ;;  %2649 = vrot.lane.b32.xlu0 %v2570_v53, %s10364_s18  ;;  %v1298_v20 = vsel %vm1261_vm3, %v1295_v41, %v1297_v4  ;;  %3479 = vmatpush.bf16.msra.mxu2 %v9879_v6  ;;  %v1451_v41 = vsel %vm1428_vm2, %v1448_v5, %v1450_v25  ;;  %v9878_v53 = vld [vmem:[%s14906_s4 + $0x60] sm:$0xff] }
 0x13e   : > { %8535 = vmatmul.msk.bf16.gmra.mxu3 %vm657_vm0, %v3107_v28  ;;  %v2394_v30 = vpop.permute.xlu2 %2393  ;;  %v1937_v7 = vpop.permute.xlu1 %1936  ;;  %1403 = vst.msk [vmem:[#allocation2 + $0x198] sm:$0xff] %vm657_vm0, %v1298_v20  ;;  %v2160_v25 = vsel %vm2141_vm4, %v2157_v15, %v2159_v46  ;;  %v1703_v5 = vsel %vm1678_vm1, %v1700_v1, %v1702_v48  ;;  %v9877_v1 = vld [vmem:[%s14906_s4 + $0x58] sm:$0xff] }
 0x13f   : > { %v11171_v24 = vmul.f32 %v10840_v23, %v870_v32  ;;  %2059 = vst.msk [vmem:[#allocation2 + $0x18] sm:$0xff] %vm2057_vm9, %v1937_v7  ;;  %v1767_v22 = vpop.permute.xlu0 %1766 }
 0x140   : > { %1888 = vst.msk [vmem:[#allocation2 + $0x30] sm:$0xff] %vm1885_vm8, %v1767_v22  ;;  %v2967_v22 = vld [vmem:[#allocation2] sm:$0xff] }
 0x141   : > { %v2831_v29 = vrot.slane %v11171_v24, 3  ;;  %2116 = vst.msk [vmem:[#allocation2 + $0x188] sm:$0xff] %vm657_vm0, %v11171_v24  ;;  %v2173_v23 = vrot.slane %v11171_v24, 1  ;;  %v2585_v40 = vrot.slane %v11171_v24, 2  ;;  %v1716_v13 = vrot.slane %v11171_v24, 7  ;;  %3480 = vmatpush.bf16.msra.mxu2 %v9878_v53 }
 0x142   : > { %2060 = vst.msk [vmem:[#allocation2 + $0x30] sm:$0xff] %vm2057_vm9, %v11064_v59  ;;  %v786_v50 = vpop.f32.mrf.mxu0  ;;  %v1466_v28 = vrot.slane %v11171_v24, 6  ;;  %v1299_v6 = vrot.slane %v11171_v24, 5 }
 0x143   : > { %v2832_v59 = vsel %vm2803_vm5, %v2829_v47, %v2831_v29  ;;  %v787_v32 = vadd.f32 %v10599_v38, %v786_v50  ;;  %v11206_v20 = vsel %vm2141_vm4, %v2171_v57, %v2173_v23  ;;  %v11209_v15 = vsel %vm2557_vm6, %v2583_v33, %v2585_v40 }
 0x144   : > { %2939 = vst.msk [vmem:[#allocation2 + $0x148] sm:$0xff] %vm657_vm0, %v2832_v59  ;;  %2405 = vrot.lane.b32.xlu2 %v2160_v25, %s10362_s29  ;;  %1532 = vrot.lane.b32.xlu1 %v1451_v41, %s10363_s16  ;;  %v11218_v47 = vsel %vm1678_vm1, %v1714_v0, %v1716_v13  ;;  %v11221_v38 = vsel %vm1428_vm2, %v1464_v55, %v1466_v28 }
 0x145   : > { %v1300_v57 = vsel %vm1261_vm3, %v1297_v4, %v1299_v6  ;;  %v871_v33 = vmax.f32 %v787_v32, 0.0  ;;  %1952 = vrot.lane.b32.xlu0 %v1703_v5, %s10364_s18  ;;  %3481 = vmatpush.bf16.msra.mxu2 %v9877_v1  ;;  %v9876_v4 = vld [vmem:[%s14906_s4 + $0x50] sm:$0xff] }
 0x146   : > { %1404 = vst.msk [vmem:[#allocation2 + $0x1b0] sm:$0xff] %vm657_vm0, %v1300_v57  ;;  %v2228_v7 = vpop.permute.xlu2 %2227  ;;  %v11226_v24 = vpop.permute.xlu1 %1768  ;;  %v2970_v41 = vld [vmem:[#allocation2 + $0x18] sm:$0xff]  ;;  %v2572_v57 = vsel %vm2557_vm6, %v2569_v49, %v2571_v52 }
 0x147   : > { %v11229_v53 = vmul.f32 %v10888_v56, %v871_v33  ;;  %2348 = vst.msk [vmem:[#allocation2 + $0x38] sm:$0xff] %vm1635_vm7, %v2228_v7  ;;  %v2224_v0 = vpop.permute.xlu0 %2223  ;;  %v3090_v55 = vpack.c.bf16 %v2970_v41, %v2967_v22  ;;  %v11254_v41 = vld [vmem:[%s14905_s3] ss:$0 sm:$0xff] }
 0x148   : > { %2346 = vst.msk [vmem:[#allocation2 + $0x8] sm:$0xff] %vm1635_vm7, %v2224_v0  ;;  %v3005_v0 = vld [vmem:[#allocation2 + $0x130] sm:$0xff] }
 0x149   : > { %v2833_v50 = vrot.slane %v11229_v53, 3  ;;  %2117 = vst.msk [vmem:[#allocation2 + $0x1a0] sm:$0xff] %vm657_vm0, %v11229_v53  ;;  %3372 = vmatmul.bf16.vlgmr.msra.gmra.mxu1 %v3090_v55  ;;  %v2175_v59 = vrot.slane %v11229_v53, 1  ;;  %v2587_v56 = vrot.slane %v11229_v53, 2  ;;  %v1718_v32 = vrot.slane %v11229_v53, 7  ;;  %3482 = vmatpush.bf16.msra.mxu2 %v9876_v4 }
 0x14a   : > { %2516 = vst.msk [vmem:[#allocation2 + $0x8] sm:$0xff] %vm1885_vm8, %v2394_v30  ;;  %v788_v1 = vpop.f32.mrf.mxu0  ;;  %v1468_v33 = vrot.slane %v11229_v53, 6  ;;  %v1301_v7 = vrot.slane %v11229_v53, 5 }
 0x14b   : > { %v2834_v22 = vsel %vm2803_vm5, %v2831_v29, %v2833_v50  ;;  %v789_v30 = vadd.f32 %v11254_v41, %v788_v1  ;;  %v3008_v55 = vld [vmem:[#allocation2 + $0x148] sm:$0xff]  ;;  %v11258_v2 = vsel %vm2141_vm4, %v2173_v23, %v2175_v59  ;;  %v11261_v52 = vsel %vm2557_vm6, %v2585_v40, %v2587_v56  ;;  %v9875_v29 = vld [vmem:[%s14906_s4 + $0x48] sm:$0xff] }
 0x14c   : > { %2940 = vst.msk [vmem:[#allocation2 + $0x160] sm:$0xff] %vm657_vm0, %v2834_v22  ;;  %2239 = vrot.lane.b32.xlu2 %v2160_v25, %s10363_s16  ;;  %2651 = vrot.lane.b32.xlu1 %v2572_v57, %s10364_s18  ;;  %v3110_v49 = vpack.c.bf16 %v3008_v55, %v3005_v0  ;;  %v11270_v53 = vsel %vm1678_vm1, %v1716_v13, %v1718_v32 }
 0x14d   : > { %v11273_v23 = vsel %vm1428_vm2, %v1466_v28, %v1468_v33  ;;  %v872_v4 = vmax.f32 %v789_v30, 0.0  ;;  %1784 = vrot.lane.b32.xlu0 %v1703_v5, %s10362_s29  ;;  %v1302_v40 = vsel %vm1261_vm3, %v1299_v6, %v1301_v7  ;;  %3483 = vmatpush.bf16.msra.mxu2 %v9875_v29  ;;  %v9874_v5 = vld [vmem:[%s14906_s4 + $0x40] sm:$0xff] }
 0x14e   : > { %8536 = vmatmul.msk.bf16.gmra.mxu3 %vm657_vm0, %v3110_v49  ;;  %v1523_v25 = vpop.permute.xlu2 %1522  ;;  %v2226_v1 = vpop.permute.xlu1 %2225  ;;  %1405 = vst.msk [vmem:[#allocation2 + $0x1c8] sm:$0xff] %vm657_vm0, %v1302_v40  ;;  %v14945_v49 = vrot.slane %v10871_v43, 1 }
 0x14f   : > { %v1194_v57 = vmul.f32 %v10819_v12, %v872_v4  ;;  %1641 = vst.msk [vmem:[#allocation2 + $0x78] sm:$0xff] %vm1635_vm7, %v1523_v25  ;;  %v1519_v13 = vpop.permute.xlu0 %1518  ;;  %v14944_v12 = vrot.slane %v10871_v43, 7 }
 0x150   : > { %2347 = vst.msk [vmem:[#allocation2 + $0x20] sm:$0xff] %vm1635_vm7, %v2226_v1  ;;  %v2162_v29 = vsel %vm2141_vm4, %v2159_v46, %v14945_v49 }
 0x151   : > { %v2835_v28 = vrot.slane %v1194_v57, 3  ;;  %2118 = vst.msk [vmem:[#allocation2 + $0x1b8] sm:$0xff] %vm657_vm0, %v1194_v57  ;;  %v2177_v6 = vrot.slane %v1194_v57, 1  ;;  %v2589_v22 = vrot.slane %v1194_v57, 2  ;;  %v1720_v30 = vrot.slane %v1194_v57, 7  ;;  %3484 = vmatpush.bf16.msra.mxu2 %v9874_v5 }
 0x152   : > { %1639 = vst.msk [vmem:[#allocation2 + $0x48] sm:$0xff] %vm1635_vm7, %v1519_v13  ;;  %v791_v0 = vpop.f32.mrf.mxu0  ;;  %v1705_v55 = vsel %vm1678_vm1, %v1702_v48, %v14944_v12  ;;  %v1470_v4 = vrot.slane %v1194_v57, 6  ;;  %v1303_v40 = vrot.slane %v1194_v57, 5 }
 0x153   : > { %v2836_v25 = vsel %vm2803_vm5, %v2833_v50, %v2835_v28  ;;  %1889 = vst.msk [vmem:[#allocation2 + $0x48] sm:$0xff] %vm1885_vm8, %v11226_v24  ;;  %v792_v1 = vadd.f32 %v11254_v41, %v791_v0  ;;  %v11302_v13 = vsel %vm2141_vm4, %v2175_v59, %v2177_v6  ;;  %v11305_v48 = vsel %vm2557_vm6, %v2587_v56, %v2589_v22 }
 0x154   : > { %2941 = vst.msk [vmem:[#allocation2 + $0x178] sm:$0xff] %vm657_vm0, %v2836_v25  ;;  %1534 = vrot.lane.b32.xlu2 %v10858_v35, %s10363_s16  ;;  %1954 = vrot.lane.b32.xlu1 %v1705_v55, %s10364_s18  ;;  %v11312_v18 = vsel %vm1678_vm1, %v1718_v32, %v1720_v30  ;;  %v11315_v43 = vsel %vm1428_vm2, %v1468_v33, %v1470_v4  ;;  %v3011_v25 = vld [vmem:[#allocation2 + $0x160] sm:$0xff] }
 0x155   : > { %v1304_v46 = vsel %vm1261_vm3, %v1301_v7, %v1303_v40  ;;  %v873_v24 = vmax.f32 %v792_v1, 0.0  ;;  %2407 = vrot.lane.b32.xlu0 %v2162_v29, %s10362_s29 }
 0x156   : > { %1406 = vst.msk [vmem:[#allocation2 + $0x1e0] sm:$0xff] %vm657_vm0, %v1304_v46  ;;  %v11320_v50 = vpop.permute.xlu2 %2641  ;;  %v1521_v59 = vpop.permute.xlu1 %1520 }
 0x157   : > { %v1195_v35 = vmul.f32 %v10902_v61, %v873_v24  ;;  %1640 = vst.msk [vmem:[#allocation2 + $0x60] sm:$0xff] %vm1635_vm7, %v1521_v59  ;;  %v1941_v56 = vpop.permute.xlu0 %1940 }
 0x158   : > { %1890 = vst.msk [vmem:[#allocation2 + $0x60] sm:$0xff] %vm1885_vm8, %v11121_v8 }
 0x159   : > { %v2837_v32 = vrot.slane %v1195_v35, 3  ;;  %2119 = vst.msk [vmem:[#allocation2 + $0x1d0] sm:$0xff] %vm657_vm0, %v1195_v35  ;;  %v2179_v33 = vrot.slane %v1195_v35, 1  ;;  %v2591_v7 = vrot.slane %v1195_v35, 2  ;;  %v1722_v57 = vrot.slane %v1195_v35, 7 }
 0x15a   : > { %2061 = vst.msk [vmem:[#allocation2 + $0x48] sm:$0xff] %vm2057_vm9, %v1941_v56  ;;  %v793_v5 = vpop.f32.mrf.mxu0  ;;  %v1472_v0 = vrot.slane %v1195_v35, 6  ;;  %v1305_v12 = vrot.slane %v1195_v35, 5 }
 0x15b   : > { %v2838_v49 = vsel %vm2803_vm5, %v2835_v28, %v2837_v32  ;;  %v794_v61 = vadd.f32 %v11254_v41, %v793_v5  ;;  %v3014_v1 = vld [vmem:[#allocation2 + $0x178] sm:$0xff]  ;;  %v11331_v8 = vsel %vm2141_vm4, %v2177_v6, %v2179_v33  ;;  %v11334_v46 = vsel %vm2557_vm6, %v2589_v22, %v2591_v7  ;;  %v9854_v5 = vld [vmem:[%s10509_s15 + $0x68] sm:$0xff] }
 0x15c   : > { %2942 = vst.msk [vmem:[#allocation2 + $0x190] sm:$0xff] %vm657_vm0, %v2838_v49  ;;  %2653 = vrot.lane.b32.xlu2 %v10910_v62, %s10364_s18  ;;  %1786 = vrot.lane.b32.xlu1 %v1705_v55, %s10362_s29  ;;  %v3113_v24 = vpack.c.bf16 %v3014_v1, %v3011_v25  ;;  %v11341_v28 = vsel %vm1678_vm1, %v1720_v30, %v1722_v57  ;;  %v2973_v55 = vld [vmem:[#allocation2 + $0x30] sm:$0xff] }
 0x15d   : > { %v11344_v59 = vsel %vm1428_vm2, %v1470_v4, %v1472_v0  ;;  %v874_v35 = vmax.f32 %v794_v61, 0.0  ;;  %2241 = vrot.lane.b32.xlu0 %v2162_v29, %s10363_s16  ;;  %v1306_v6 = vsel %vm1261_vm3, %v1303_v40, %v1305_v12  ;;  %8448 = vmatmul.msk.bf16.gmra.mxu0 %vm657_vm0, %v9854_v5 }
 0x15e   : > { %8537 = vmatmul.msk.bf16.gmra.mxu3 %vm657_vm0, %v3113_v24  ;;  %v1945_v22 = vpop.permute.xlu2 %1944  ;;  %v2640_v56 = vpop.permute.xlu1 %2639  ;;  %1407 = vst.msk [vmem:[#allocation2 + $0x1f8] sm:$0xff] %vm657_vm0, %v1306_v6 }
 0x15f   : > { %v1196_v62 = vmul.f32 %v10967_v37, %v874_v35  ;;  %2762 = vst.msk [vmem:[#allocation2 + $0x8] sm:$0xff] %vm2057_vm9, %v2640_v56  ;;  %v1773_v30 = vpop.permute.xlu0 %1772 }
 0x160   : > { %1891 = vst.msk [vmem:[#allocation2 + $0x78] sm:$0xff] %vm1885_vm8, %v1773_v30 }
 0x161   : > { %v2839_v29 = vrot.slane %v1196_v62, 3  ;;  %2120 = vst.msk [vmem:[#allocation2 + $0x1e8] sm:$0xff] %vm657_vm0, %v1196_v62  ;;  %v2976_v4 = vld [vmem:[#allocation2 + $0x48] sm:$0xff]  ;;  %v2181_v40 = vrot.slane %v1196_v62, 1  ;;  %v2593_v49 = vrot.slane %v1196_v62, 2  ;;  %v1724_v61 = vrot.slane %v1196_v62, 7 }
 0x162   : > { %2063 = vst.msk [vmem:[#allocation2 + $0x78] sm:$0xff] %vm2057_vm9, %v1945_v22  ;;  %v3093_v25 = vpack.c.bf16 %v2976_v4, %v2973_v55  ;;  %v796_v1 = vpop.f32.mrf.mxu0  ;;  %v1474_v37 = vrot.slane %v1196_v62, 6  ;;  %v1307_v24 = vrot.slane %v1196_v62, 5 }
 0x163   : > { %v2840_v35 = vsel %vm2803_vm5, %v2837_v32, %v2839_v29  ;;  %v797_v6 = vadd.f32 %v11254_v41, %v796_v1  ;;  %v11360_v56 = vsel %vm2141_vm4, %v2179_v33, %v2181_v40  ;;  %v11363_v5 = vsel %vm2557_vm6, %v2591_v7, %v2593_v49 }
 0x164   : > { %2943 = vst.msk [vmem:[#allocation2 + $0x1a8] sm:$0xff] %vm657_vm0, %v2840_v35  ;;  %3377 = vmatmul.bf16.gmra.mxu1 %v3093_v25  ;;  %1956 = vrot.lane.b32.xlu2 %v10951_v31, %s10364_s18  ;;  %v11369_v22 = vsel %vm1678_vm1, %v1722_v57, %v1724_v61  ;;  %v11372_v62 = vsel %vm1428_vm2, %v1472_v0, %v1474_v37 }
 0x165   : > { %v1308_v32 = vsel %vm1261_vm3, %v1305_v12, %v1307_v24  ;;  %v875_v30 = vmax.f32 %v797_v6, 0.0  ;;  %2409 = vrot.lane.b32.xlu1 %v10956_v19, %s10362_s29  ;;  %1536 = vrot.lane.b32.xlu0 %v10913_v63, %s10363_s16 }
 0x166   : > { %1408 = vst.msk [vmem:[#allocation2 + $0x210] sm:$0xff] %vm657_vm0, %v1308_v32  ;;  %v11380_v33 = vpop.permute.xlu2 %1776  ;;  %v1943_v7 = vpop.permute.xlu1 %1942  ;;  %v3017_v32 = vld [vmem:[#allocation2 + $0x190] sm:$0xff] }
 0x167   : > { %v1197_v57 = vmul.f32 %v10865_v42, %v875_v30  ;;  %2062 = vst.msk [vmem:[#allocation2 + $0x60] sm:$0xff] %vm2057_vm9, %v1943_v7  ;;  %v2396_v0 = vpop.permute.xlu0 %2395 }
 0x168   : > { %2517 = vst.msk [vmem:[#allocation2 + $0x20] sm:$0xff] %vm1885_vm8, %v2396_v0 }
 0x169   : > { %v2841_v12 = vrot.slane %v1197_v57, 3  ;;  %2121 = vst.msk [vmem:[#allocation2 + $0x200] sm:$0xff] %vm657_vm0, %v1197_v57  ;;  %v2183_v55 = vrot.slane %v1197_v57, 1  ;;  %v2595_v4 = vrot.slane %v1197_v57, 2  ;;  %v1726_v25 = vrot.slane %v1197_v57, 7 }
 0x16a   : > { %2763 = vst.msk [vmem:[#allocation2 + $0x20] sm:$0xff] %vm2057_vm9, %v11320_v50  ;;  %v798_v63 = vpop.f32.mrf.mxu0  ;;  %v1476_v1 = vrot.slane %v1197_v57, 6  ;;  %v1309_v35 = vrot.slane %v1197_v57, 5 }
 0x16b   : > { %v2842_v6 = vsel %vm2803_vm5, %v2839_v29, %v2841_v12  ;;  %v799_v42 = vadd.f32 %v11254_v41, %v798_v63  ;;  %v3020_v30 = vld [vmem:[#allocation2 + $0x1a8] sm:$0xff]  ;;  %v11391_v7 = vsel %vm2141_vm4, %v2181_v40, %v2183_v55  ;;  %v11394_v0 = vsel %vm2557_vm6, %v2593_v49, %v2595_v4 }
 0x16c   : > { %2944 = vst.msk [vmem:[#allocation2 + $0x1c0] sm:$0xff] %vm657_vm0, %v2842_v6  ;;  %1788 = vrot.lane.b32.xlu2 %v10951_v31, %s10362_s29  ;;  %v3116_v50 = vpack.c.bf16 %v3020_v30, %v3017_v32  ;;  %v11400_v57 = vsel %vm1678_vm1, %v1724_v61, %v1726_v25  ;;  %v11403_v29 = vsel %vm1428_vm2, %v1474_v37, %v1476_v1  ;;  %v2968_v32 = vld [vmem:[#allocation2 + $0x8] sm:$0xff] }
 0x16d   : > { %v876_v63 = vmax.f32 %v799_v42, 0.0  ;;  %2243 = vrot.lane.b32.xlu1 %v10956_v19, %s10363_s16  ;;  %2655 = vrot.lane.b32.xlu0 %v10962_v34, %s10364_s18  ;;  %v1310_v40 = vsel %vm1261_vm3, %v1307_v24, %v1309_v35  ;;  %v2982_v42 = vld [vmem:[#allocation2 + $0x78] sm:$0xff] }
 0x16e   : > { %8538 = vmatmul.msk.bf16.gmra.mxu3 %vm657_vm0, %v3116_v50  ;;  %v2400_v49 = vpop.permute.xlu2 %2399  ;;  %v1775_v31 = vpop.permute.xlu1 %1774  ;;  %v2979_v6 = vld [vmem:[#allocation2 + $0x60] sm:$0xff]  ;;  %1409 = vst.msk [vmem:[#allocation2 + $0x228] sm:$0xff] %vm657_vm0, %v1310_v40 }
 0x16f   : > { %v11413_v61 = vmul.f32 %v10974_v51, %v876_v63  ;;  %v2230_v37 = vpop.permute.xlu0 %2229  ;;  %v3096_v19 = vpack.c.bf16 %v2982_v42, %v2979_v6 }
 0x170   : > { %2349 = vst.msk [vmem:[#allocation2 + $0x50] sm:$0xff] %vm1635_vm7, %v2230_v37 }
 0x171   : > { %v2843_v34 = vrot.slane %v11413_v61, 3  ;;  %2122 = vst.msk [vmem:[#allocation2 + $0x218] sm:$0xff] %vm657_vm0, %v11413_v61  ;;  %v2971_v24 = vld [vmem:[#allocation2 + $0x20] sm:$0xff]  ;;  %v2185_v30 = vrot.slane %v11413_v61, 1  ;;  %v2597_v50 = vrot.slane %v11413_v61, 2  ;;  %v1478_v63 = vrot.slane %v11413_v61, 6 }
 0x172   : > { %2519 = vst.msk [vmem:[#allocation2 + $0x50] sm:$0xff] %vm1885_vm8, %v2400_v49  ;;  %v3091_v51 = vpack.c.bf16 %v2971_v24, %v2968_v32  ;;  %v1311_v6 = vrot.slane %v11413_v61, 5  ;;  %v14946_v49 = vrot.slane %v11413_v61, 7 }
 0x173   : > { %v2844_v37 = vsel %vm2803_vm5, %v2841_v12, %v2843_v34  ;;  %v11431_v42 = vsel %vm2141_vm4, %v2183_v55, %v2185_v30  ;;  %v11436_v40 = vsel %vm2557_vm6, %v2595_v4, %v2597_v50  ;;  %v11447_v12 = vsel %vm1428_vm2, %v1476_v1, %v1478_v63 }
 0x174   : > { %v11441_v32 = vsel %vm1678_vm1, %v1726_v25, %v14946_v49  ;;  %2945 = vst.msk [vmem:[#allocation2 + $0x1d8] sm:$0xff] %vm657_vm0, %v2844_v37  ;;  %3382 = vmatmul.bf16.gmra.mxu1 %v3096_v19  ;;  %3485 = vmatmul.bf16.vlgmr.msra.gmra.mxu2 %v3091_v51  ;;  %v1312_v55 = vsel %vm1261_vm3, %v1309_v35, %v1311_v6  ;;  %v3023_v35 = vld [vmem:[#allocation2 + $0x1c0] sm:$0xff] }
 0x175   : > { %2411 = vrot.lane.b32.xlu2 %v11013_v45, %s10362_s29  ;;  %1538 = vrot.lane.b32.xlu1 %v10965_v36, %s10363_s16  ;;  %1410 = vst.msk [vmem:[#allocation2 + $0x240] sm:$0xff] %vm657_vm0, %v1312_v55 }
 0x176   : > { %1958 = vrot.lane.b32.xlu0 %v11016_v21, %s10364_s18  ;;  %v2234_v4 = vpop.permute.xlu2 %2233  ;;  %v2398_v25 = vpop.permute.xlu1 %2397 }
 0x177   : > { %2351 = vst.msk [vmem:[#allocation2 + $0x80] sm:$0xff] %vm1635_vm7, %v2234_v4  ;;  %v1525_v1 = vpop.permute.xlu0 %1524 }
 0x178   : > { %2518 = vst.msk [vmem:[#allocation2 + $0x38] sm:$0xff] %vm1885_vm8, %v2398_v25 }
 0x179   : > { %1642 = vst.msk [vmem:[#allocation2 + $0x90] sm:$0xff] %vm1635_vm7, %v1525_v1 }
 0x17a   : > { %1892 = vst.msk [vmem:[#allocation2 + $0x90] sm:$0xff] %vm1885_vm8, %v1775_v31 }
 0x17b   : > { %v3026_v19 = vld [vmem:[#allocation2 + $0x1d8] sm:$0xff] }
 0x17c   : > { %v3119_v24 = vpack.c.bf16 %v3026_v19, %v3023_v35 }
 0x17d   : > { %2245 = vrot.lane.b32.xlu2 %v11013_v45, %s10363_s16  ;;  %2657 = vrot.lane.b32.xlu1 %v11022_v44, %s10364_s18 }
 0x17e   : > { %2413 = vrot.lane.b32.xlu0 %v11047_v17, %s10362_s29  ;;  %8539 = vmatmul.msk.bf16.gmra.mxu3 %vm657_vm0, %v3119_v24  ;;  %v1529_v36 = vpop.permute.xlu2 %1528  ;;  %v2232_v51 = vpop.permute.xlu1 %2231 }
 0x17f   : > { %1644 = vst.msk [vmem:[#allocation2 + $0xc0] sm:$0xff] %vm1635_vm7, %v1529_v36  ;;  %v2644_v37 = vpop.permute.xlu0 %2643 }
 0x180   : > { %2350 = vst.msk [vmem:[#allocation2 + $0x68] sm:$0xff] %vm1635_vm7, %v2232_v51 }
 0x181   : > { %2764 = vst.msk [vmem:[#allocation2 + $0x38] sm:$0xff] %vm2057_vm9, %v2644_v37 }
 0x185   : > { %1540 = vrot.lane.b32.xlu2 %v11025_v26, %s10363_s16  ;;  %1960 = vrot.lane.b32.xlu1 %v11050_v10, %s10364_s18 }
 0x186   : > { %2247 = vrot.lane.b32.xlu0 %v11047_v17, %s10363_s16  ;;  %v2648_v45 = vpop.permute.xlu2 %2647  ;;  %v1527_v44 = vpop.permute.xlu1 %1526 }
 0x187   : > { %1643 = vst.msk [vmem:[#allocation2 + $0xa8] sm:$0xff] %vm1635_vm7, %v1527_v44  ;;  %v1947_v31 = vpop.permute.xlu0 %1946 }
 0x188   : > { %1893 = vst.msk [vmem:[#allocation2 + $0xa8] sm:$0xff] %vm1885_vm8, %v11380_v33  ;;  %v2974_v33 = vld [vmem:[#allocation2 + $0x38] sm:$0xff] }
 0x189   : > { %2064 = vst.msk [vmem:[#allocation2 + $0x90] sm:$0xff] %vm2057_vm9, %v1947_v31 }
 0x18d   : > { %2659 = vrot.lane.b32.xlu2 %v11056_v27, %s10364_s18  ;;  %2415 = vrot.lane.b32.xlu1 %v11101_v3, %s10362_s29 }
 0x18e   : > { %2661 = vrot.lane.b32.xlu0 %v11104_v11, %s10364_s18  ;;  %v1951_v26 = vpop.permute.xlu2 %1950  ;;  %v2646_v17 = vpop.permute.xlu1 %2645 }
 0x18f   : > { %2765 = vst.msk [vmem:[#allocation2 + $0x50] sm:$0xff] %vm2057_vm9, %v2646_v17  ;;  %v1779_v49 = vpop.permute.xlu0 %1778 }
 0x190   : > { %1894 = vst.msk [vmem:[#allocation2 + $0xc0] sm:$0xff] %vm1885_vm8, %v1779_v49  ;;  %v2985_v35 = vld [vmem:[#allocation2 + $0x90] sm:$0xff] }
 0x191   : > { %2066 = vst.msk [vmem:[#allocation2 + $0xc0] sm:$0xff] %vm2057_vm9, %v1951_v26  ;;  %v9856_v26 = vld [vmem:[%s10509_s15 + $0x78] sm:$0xff] }
 0x195   : > { %2417 = vrot.lane.b32.xlu2 %v11147_v60, %s10362_s29  ;;  %2249 = vrot.lane.b32.xlu1 %v11101_v3, %s10363_s16 }
 0x196   : > { %2419 = vrot.lane.b32.xlu0 %v11206_v20, %s10362_s29  ;;  %v1783_v27 = vpop.permute.xlu2 %1782  ;;  %v1949_v11 = vpop.permute.xlu1 %1948  ;;  %v2977_v55 = vld [vmem:[#allocation2 + $0x50] sm:$0xff] }
 0x197   : > { %2065 = vst.msk [vmem:[#allocation2 + $0xa8] sm:$0xff] %vm2057_vm9, %v1949_v11  ;;  %v2402_v4 = vpop.permute.xlu0 %2401  ;;  %v3094_v25 = vpack.c.bf16 %v2977_v55, %v2974_v33 }
 0x198   : > { %2520 = vst.msk [vmem:[#allocation2 + $0x68] sm:$0xff] %vm1885_vm8, %v2402_v4  ;;  %v2991_v55 = vld [vmem:[#allocation2 + $0xc0] sm:$0xff] }
 0x199   : > { %2766 = vst.msk [vmem:[#allocation2 + $0x68] sm:$0xff] %vm2057_vm9, %v2648_v45  ;;  %3490 = vmatmul.bf16.gmra.mxu2 %v3094_v25 }
 0x19d   : > { %2251 = vrot.lane.b32.xlu2 %v11147_v60, %s10363_s16  ;;  %2663 = vrot.lane.b32.xlu1 %v11150_v9, %s10364_s18 }
 0x19e   : > { %2253 = vrot.lane.b32.xlu0 %v11206_v20, %s10363_s16  ;;  %v2406_v3 = vpop.permute.xlu2 %2405  ;;  %v1781_v1 = vpop.permute.xlu1 %1780  ;;  %v2988_v19 = vld [vmem:[#allocation2 + $0xa8] sm:$0xff] }
 0x19f   : > { %v2236_v24 = vpop.permute.xlu0 %2235  ;;  %v3099_v36 = vpack.c.bf16 %v2988_v19, %v2985_v35  ;;  %v9855_v20 = vld [vmem:[%s10509_s15 + $0x70] sm:$0xff] }
 0x1a0   : > { %2352 = vst.msk [vmem:[#allocation2 + $0x98] sm:$0xff] %vm1635_vm7, %v2236_v24  ;;  %8449 = vmatmul.msk.bf16.gmra.mxu0 %vm657_vm0, %v9855_v20  ;;  %v2980_v49 = vld [vmem:[#allocation2 + $0x68] sm:$0xff] }
 0x1a1   : > { %2522 = vst.msk [vmem:[#allocation2 + $0x98] sm:$0xff] %vm1885_vm8, %v2406_v3  ;;  %3387 = vmatmul.bf16.gmra.mxu1 %v3099_v36 }
 0x1a5   : > { %2665 = vrot.lane.b32.xlu2 %v11209_v15, %s10364_s18  ;;  %2421 = vrot.lane.b32.xlu1 %v11258_v2, %s10362_s29  ;;  %v924_v15 = vld [vmem:[%s14903_s1 + $0xd8] sm:$0xff] }
 0x1a6   : > { %2667 = vrot.lane.b32.xlu0 %v11261_v52, %s10364_s18  ;;  %v2240_v9 = vpop.permute.xlu2 %2239  ;;  %v2404_v60 = vpop.permute.xlu1 %2403  ;;  %v923_v52 = vld [vmem:[%s14903_s1 + $0xd0] sm:$0xff] }
 0x1a7   : > { %2354 = vst.msk [vmem:[#allocation2 + $0xc8] sm:$0xff] %vm1635_vm7, %v2240_v9  ;;  %v1531_v51 = vpop.permute.xlu0 %1530 }
 0x1a8   : > { %2521 = vst.msk [vmem:[#allocation2 + $0x80] sm:$0xff] %vm1885_vm8, %v2404_v60 }
 0x1a9   : > { %1645 = vst.msk [vmem:[#allocation2 + $0xd8] sm:$0xff] %vm1635_vm7, %v1531_v51 }
 0x1aa   : > { %1895 = vst.msk [vmem:[#allocation2 + $0xd8] sm:$0xff] %vm1885_vm8, %v1781_v1 }
 0x1ad   : > { %1080 = vperm.xlu2 %10254, %v924_v15   ;;  %1075 = vperm.xlu1 %10253, %v923_v52   ;;  %v926_v52 = vld [vmem:[%s14903_s1 + $0xe8] sm:$0xff] }
 0x1ae   : > { %1542 = vrot.lane.b32.xlu0 %v11059_v58, %s10363_s16  ;;  %v1535_v37 = vpop.permute.xlu2 %1534  ;;  %v2238_v45 = vpop.permute.xlu1 %2237 }
 0x1af   : > { %1647 = vst.msk [vmem:[#allocation2 + $0x108] sm:$0xff] %vm1635_vm7, %v1535_v37  ;;  %v2650_v44 = vpop.permute.xlu0 %2649 }
 0x1b0   : > { %2353 = vst.msk [vmem:[#allocation2 + $0xb0] sm:$0xff] %vm1635_vm7, %v2238_v45  ;;  %8450 = vmatmul.msk.bf16.gmra.mxu0 %vm657_vm0, %v9856_v26  ;;  %v11612_v26 = vld [vmem:[%s14907_s5] ss:$0 sm:$0xff] }
 0x1b1   : > { %2767 = vst.msk [vmem:[#allocation2 + $0x80] sm:$0xff] %vm2057_vm9, %v2650_v44 }
 0x1b5   : > { %2423 = vrot.lane.b32.xlu2 %v11302_v13, %s10362_s29  ;;  %2669 = vrot.lane.b32.xlu1 %v11305_v48, %s10364_s18 }
 0x1b6   : > { %1790 = vrot.lane.b32.xlu0 %v11016_v21, %s10362_s29  ;;  %v2654_v31 = vpop.permute.xlu2 %2653  ;;  %v1533_v58 = vpop.permute.xlu1 %1532 }
 0x1b7   : > { %1646 = vst.msk [vmem:[#allocation2 + $0xf0] sm:$0xff] %vm1635_vm7, %v1533_v58  ;;  %v1953_v17 = vpop.permute.xlu0 %1952 }
 0x1b8   : > { %1896 = vst.msk [vmem:[#allocation2 + $0xf0] sm:$0xff] %vm1885_vm8, %v1783_v27  ;;  %v2983_v11 = vld [vmem:[#allocation2 + $0x80] sm:$0xff] }
 0x1b9   : > { %2067 = vst.msk [vmem:[#allocation2 + $0xd8] sm:$0xff] %vm2057_vm9, %v1953_v17  ;;  %v3097_v33 = vpack.c.bf16 %v2983_v11, %v2980_v49 }
 0x1bb   : > { %3495 = vmatmul.bf16.gmra.mxu2 %v3097_v33 }
 0x1bd   : > { %1962 = vrot.lane.b32.xlu2 %v11113_v54, %s10364_s18  ;;  %1792 = vrot.lane.b32.xlu1 %v11050_v10, %s10362_s29 }
 0x1be   : > { %1964 = vrot.lane.b32.xlu0 %v11159_v16, %s10364_s18  ;;  %v1957_v21 = vpop.permute.xlu2 %1956  ;;  %v2652_v48 = vpop.permute.xlu1 %2651 }
 0x1bf   : > { %2768 = vst.msk [vmem:[#allocation2 + $0x98] sm:$0xff] %vm2057_vm9, %v2652_v48  ;;  %v1785_v27 = vpop.permute.xlu0 %1784 }
 0x1c0   : > { %1897 = vst.msk [vmem:[#allocation2 + $0x108] sm:$0xff] %vm1885_vm8, %v1785_v27  ;;  %v2994_v4 = vld [vmem:[#allocation2 + $0xd8] sm:$0xff] }
 0x1c1   : > { %2069 = vst.msk [vmem:[#allocation2 + $0x108] sm:$0xff] %vm2057_vm9, %v1957_v21  ;;  %v3102_v25 = vpack.c.bf16 %v2994_v4, %v2991_v55 }
 0x1c3   : > { %3392 = vmatmul.bf16.gmra.mxu1 %v3102_v25 }
 0x1c5   : > { %2257 = vrot.lane.b32.xlu2 %v11302_v13, %s10363_s16  ;;  %2255 = vrot.lane.b32.xlu1 %v11258_v2, %s10363_s16 }
 0x1c6   : > { %2425 = vrot.lane.b32.xlu0 %v11331_v8, %s10362_s29  ;;  %v1789_v10 = vpop.permute.xlu2 %1788  ;;  %v1955_v3 = vpop.permute.xlu1 %1954  ;;  %v2986_v9 = vld [vmem:[#allocation2 + $0x98] sm:$0xff] }
 0x1c7   : > { %2068 = vst.msk [vmem:[#allocation2 + $0xf0] sm:$0xff] %vm2057_vm9, %v1955_v3  ;;  %v2408_v1 = vpop.permute.xlu0 %2407  ;;  %v3373_v17 = vpop.f32.mrf.mxu1 }
 0x1c8   : > { %2523 = vst.msk [vmem:[#allocation2 + $0xb0] sm:$0xff] %vm1885_vm8, %v2408_v1  ;;  %v3000_v35 = vld [vmem:[#allocation2 + $0x108] sm:$0xff] }
 0x1c9   : > { %2769 = vst.msk [vmem:[#allocation2 + $0xb0] sm:$0xff] %vm2057_vm9, %v2654_v31 }
 0x1cd   : > { %2671 = vrot.lane.b32.xlu2 %v11334_v46, %s10364_s18  ;;  %2427 = vrot.lane.b32.xlu1 %v11360_v56, %s10362_s29  ;;  %v925_v46 = vld [vmem:[%s14903_s1 + $0xe0] sm:$0xff] }
 0x1ce   : > { %2673 = vrot.lane.b32.xlu0 %v11363_v5, %s10364_s18  ;;  %v1787_v2 = vpop.permute.xlu1 %1786  ;;  %v2997_v13 = vld [vmem:[#allocation2 + $0xf0] sm:$0xff] }
 0x1cf   : > { %v2412_v19 = vpop.permute.xlu2 %2411  ;;  %v2242_v24 = vpop.permute.xlu0 %2241  ;;  %v3105_v36 = vpack.c.bf16 %v3000_v35, %v2997_v13 }
 0x1d0   : > { %2355 = vst.msk [vmem:[#allocation2 + $0xe0] sm:$0xff] %vm1635_vm7, %v2242_v24  ;;  %v2989_v60 = vld [vmem:[#allocation2 + $0xb0] sm:$0xff] }
 0x1d1   : > { %2525 = vst.msk [vmem:[#allocation2 + $0xe0] sm:$0xff] %vm1885_vm8, %v2412_v19  ;;  %v3100_v20 = vpack.c.bf16 %v2989_v60, %v2986_v9 }
 0x1d3   : > { %3397 = vmatmul.bf16.gmra.mxu1 %v3105_v36  ;;  %3500 = vmatmul.bf16.gmra.mxu2 %v3100_v20 }
 0x1d5   : > { %1546 = vrot.lane.b32.xlu2 %v11162_v39, %s10363_s16  ;;  %1544 = vrot.lane.b32.xlu1 %v11116_v14, %s10363_s16 }
 0x1d6   : > { %1085 = vperm.xlu0 %10252, %v925_v46  }
 0x1d7   : > { %v2246_v5 = vpop.permute.xlu2 %2245  ;;  %v2410_v51 = vpop.permute.xlu1 %2409 }
 0x1d8   : > { %2357 = vst.msk [vmem:[#allocation2 + $0x110] sm:$0xff] %vm1635_vm7, %v2246_v5  ;;  %v1537_v15 = vpop.permute.xlu0 %1536 }
 0x1d9   : > { %2524 = vst.msk [vmem:[#allocation2 + $0xc8] sm:$0xff] %vm1885_vm8, %v2410_v51 }
 0x1da   : > { %1648 = vst.msk [vmem:[#allocation2 + $0x120] sm:$0xff] %vm1635_vm7, %v1537_v15  ;;  %v11615_v49 = vpop.f32.mrf.mxu0 }
 0x1db   : > { %1898 = vst.msk [vmem:[#allocation2 + $0x120] sm:$0xff] %vm1885_vm8, %v1787_v2 }
 0x1dd   : > { %1794 = vrot.lane.b32.xlu2 %v11113_v54, %s10362_s29  ;;  %1090 = vperm.xlu1 %10253, %v926_v52   ;;  %v9857_v54 = vld [vmem:[%s10509_s15 + $0x80] sm:$0xff] }
 0x1de   : > { %1796 = vrot.lane.b32.xlu0 %v11159_v16, %s10362_s29  ;;  %8451 = vmatmul.msk.bf16.gmra.mxu0 %vm657_vm0, %v9857_v54 }
 0x1df   : > { %v1541_v14 = vpop.permute.xlu2 %1540  ;;  %v2244_v39 = vpop.permute.xlu1 %2243 }
 0x1e0   : > { %1650 = vst.msk [vmem:[#allocation2 + $0x150] sm:$0xff] %vm1635_vm7, %v1541_v14  ;;  %v2656_v37 = vpop.permute.xlu0 %2655 }
 0x1e1   : > { %2356 = vst.msk [vmem:[#allocation2 + $0xf8] sm:$0xff] %vm1635_vm7, %v2244_v39 }
 0x1e2   : > { %2770 = vst.msk [vmem:[#allocation2 + $0xc8] sm:$0xff] %vm2057_vm9, %v2656_v37 }
 0x1e5   : > { %1968 = vrot.lane.b32.xlu2 %v11270_v53, %s10364_s18  ;;  %1966 = vrot.lane.b32.xlu1 %v11218_v47, %s10364_s18 }
 0x1e6   : > { %2259 = vrot.lane.b32.xlu0 %v11331_v8, %s10363_s16 }
 0x1e7   : > { %v2660_v16 = vpop.permute.xlu2 %2659  ;;  %v1539_v45 = vpop.permute.xlu1 %1538 }
 0x1e8   : > { %1649 = vst.msk [vmem:[#allocation2 + $0x138] sm:$0xff] %vm1635_vm7, %v1539_v45  ;;  %v1959_v44 = vpop.permute.xlu0 %1958 }
 0x1e9   : > { %1899 = vst.msk [vmem:[#allocation2 + $0x138] sm:$0xff] %vm1885_vm8, %v1789_v10  ;;  %v2992_v21 = vld [vmem:[#allocation2 + $0xc8] sm:$0xff] }
 0x1ea   : > { %2070 = vst.msk [vmem:[#allocation2 + $0x120] sm:$0xff] %vm2057_vm9, %v1959_v44 }
 0x1ed   : > { %2429 = vrot.lane.b32.xlu2 %v11391_v7, %s10362_s29  ;;  %2261 = vrot.lane.b32.xlu1 %v11360_v56, %s10363_s16  ;;  %v3374_v56 = vadd.f32 %v11612_v26, %v3373_v17 }
 0x1ee   : > { %2431 = vrot.lane.b32.xlu0 %v11431_v42, %s10362_s29 }
 0x1ef   : > { %v2418_v8 = vpop.permute.xlu2 %2417  ;;  %v2658_v31 = vpop.permute.xlu1 %2657 }
 0x1f0   : > { %2771 = vst.msk [vmem:[#allocation2 + $0xe0] sm:$0xff] %vm2057_vm9, %v2658_v31  ;;  %v2414_v58 = vpop.permute.xlu0 %2413 }
 0x1f1   : > { %2526 = vst.msk [vmem:[#allocation2 + $0xf8] sm:$0xff] %vm1885_vm8, %v2414_v58  ;;  %v3003_v2 = vld [vmem:[#allocation2 + $0x120] sm:$0xff] }
 0x1f2   : > { %2772 = vst.msk [vmem:[#allocation2 + $0xf8] sm:$0xff] %vm2057_vm9, %v2660_v16 }
 0x1f5   : > { %2677 = vrot.lane.b32.xlu2 %v11436_v40, %s10364_s18  ;;  %2675 = vrot.lane.b32.xlu1 %v11394_v0, %s10364_s18  ;;  %v928_v0 = vld [vmem:[%s14903_s1 + $0xf8] sm:$0xff]  ;;  %v803_v40 = vpop.f32.mrf.mxu0 }
 0x1f6   : > { %1548 = vrot.lane.b32.xlu0 %v11221_v38, %s10363_s16  ;;  %v927_v38 = vld [vmem:[%s14903_s1 + $0xf0] sm:$0xff]  ;;  %v804_v35 = vadd.f32 %v11254_v41, %v803_v40 }
 0x1f7   : > { %v3486_v11 = vpop.f32.mrf.mxu2  ;;  %v2252_v33 = vpop.permute.xlu2 %2251  ;;  %v2995_v48 = vld [vmem:[#allocation2 + $0xe0] sm:$0xff] }
 0x1f8   : > { %v11624_v27 = vadd.f32 %v3486_v11, %v3374_v56  ;;  %2360 = vst.msk [vmem:[#allocation2 + $0x158] sm:$0xff] %vm1635_vm7, %v2252_v33  ;;  %v1961_v55 = vpop.permute.xlu1 %1960  ;;  %v2248_v4 = vpop.permute.xlu0 %2247  ;;  %v3103_v25 = vpack.c.bf16 %v2995_v48, %v2992_v21  ;;  %v878_v24 = vmax.f32 %v804_v35, 0.0  ;;  %v14947_v35 = vrot.slane %v11413_v61, 7 }
 0x1f9   : > { %2071 = vst.msk [vmem:[#allocation2 + $0x138] sm:$0xff] %vm2057_vm9, %v1961_v55  ;;  %v2998_v20 = vld [vmem:[#allocation2 + $0xf8] sm:$0xff] }
 0x1fa   : > { %2358 = vst.msk [vmem:[#allocation2 + $0x128] sm:$0xff] %vm1635_vm7, %v2248_v4  ;;  %3505 = vmatmul.bf16.gmra.mxu2 %v3103_v25 }
 0x1fb   : > { %2528 = vst.msk [vmem:[#allocation2 + $0x128] sm:$0xff] %vm1885_vm8, %v2418_v8 }
 0x1fd   : > { %1095 = vperm.xlu2 %10254, %v927_v38   ;;  %1550 = vrot.lane.b32.xlu1 %v11273_v23, %s10363_s16 }
 0x1fe   : > { %1100 = vperm.xlu0 %10252, %v928_v0  }
 0x1ff   : > { %v2666_v10 = vpop.permute.xlu2 %2665  ;;  %v11665_v52 = vpop.f32.mrf.mxu2 }
 0x200   : > { %v2416_v3 = vpop.permute.xlu1 %2415  ;;  %v2662_v1 = vpop.permute.xlu0 %2661  ;;  %v3006_v13 = vld [vmem:[#allocation2 + $0x138] sm:$0xff] }
 0x201   : > { %2527 = vst.msk [vmem:[#allocation2 + $0x110] sm:$0xff] %vm1885_vm8, %v2416_v3  ;;  %v3108_v19 = vpack.c.bf16 %v3006_v13, %v3003_v2 }
 0x202   : > { %2773 = vst.msk [vmem:[#allocation2 + $0x110] sm:$0xff] %vm2057_vm9, %v2662_v1  ;;  %v9858_v1 = vld [vmem:[%s10509_s15 + $0x88] sm:$0xff] }
 0x203   : > { %3402 = vmatmul.bf16.gmra.mxu1 %v3108_v19  ;;  %8452 = vmatmul.msk.bf16.gmra.mxu0 %vm657_vm0, %v9858_v1  ;;  %v11790_v1 = vld [vmem:[%s14905_s3] ss:$0 sm:$0xff] }
 0x205   : > { %1800 = vrot.lane.b32.xlu2 %v11270_v53, %s10362_s29  ;;  %1798 = vrot.lane.b32.xlu1 %v11218_v47, %s10362_s29  ;;  %v11660_v47 = vpop.f32.mrf.mxu1 }
 0x206   : > { %1970 = vrot.lane.b32.xlu0 %v11312_v18, %s10364_s18 }
 0x207   : > { %v1081_v23 = vpop.permute.xlu2 %1080 }
 0x208   : > { %v11647_v36 = vmul.f32 %v1081_v23, %v878_v24  ;;  %v2250_v9 = vpop.permute.xlu1 %2249  ;;  %v2420_v60 = vpop.permute.xlu0 %2419 }
 0x209   : > { %2359 = vst.msk [vmem:[#allocation2 + $0x140] sm:$0xff] %vm1635_vm7, %v2250_v9  ;;  %v3001_v46 = vld [vmem:[#allocation2 + $0x110] sm:$0xff] }
 0x20a   : > { %2124 = vst.msk [vmem:[#allocation2 + $0x248] sm:$0xff] %vm657_vm0, %v11647_v36  ;;  %v3106_v5 = vpack.c.bf16 %v3001_v46, %v2998_v20  ;;  %v1732_v2 = vrot.slane %v11647_v36, 7  ;;  %v1482_v13 = vrot.slane %v11647_v36, 6  ;;  %v1315_v20 = vrot.slane %v11647_v36, 5 }
 0x20b   : > { %2529 = vst.msk [vmem:[#allocation2 + $0x140] sm:$0xff] %vm1885_vm8, %v2420_v60 }
 0x20c   : > { %2775 = vst.msk [vmem:[#allocation2 + $0x140] sm:$0xff] %vm2057_vm9, %v2666_v10  ;;  %3510 = vmatmul.bf16.gmra.mxu2 %v3106_v5  ;;  %v2601_v5 = vrot.slane %v11647_v36, 2 }
 0x20d   : > { %2263 = vrot.lane.b32.xlu2 %v11391_v7, %s10363_s16  ;;  %1972 = vrot.lane.b32.xlu1 %v11341_v28, %s10364_s18  ;;  %v3378_v7 = vpop.f32.mrf.mxu1 }
 0x20e   : > { %2265 = vrot.lane.b32.xlu0 %v11431_v42, %s10363_s16  ;;  %v802_v42 = vadd.f32 %v11254_v41, %v11615_v49  ;;  %v3379_v44 = vadd.f32 %v11612_v26, %v3378_v7  ;;  %v2847_v41 = vrot.slane %v11647_v36, 3  ;;  %v2189_v49 = vrot.slane %v11647_v36, 1 }
 0x20f   : > { %v2424_v53 = vpop.permute.xlu2 %2423 }
 0x210   : > { %v2664_v51 = vpop.permute.xlu1 %2663  ;;  %v2254_v15 = vpop.permute.xlu0 %2253  ;;  %v877_v31 = vmax.f32 %v802_v42, 0.0  ;;  %v929_v42 = vld [vmem:[%s14903_s1 + $0x100] sm:$0xff] }
 0x211   : > { %2774 = vst.msk [vmem:[#allocation2 + $0x128] sm:$0xff] %vm2057_vm9, %v2664_v51 }
 0x212   : > { %2361 = vst.msk [vmem:[#allocation2 + $0x170] sm:$0xff] %vm1635_vm7, %v2254_v15 }
 0x213   : > { %2531 = vst.msk [vmem:[#allocation2 + $0x170] sm:$0xff] %vm1885_vm8, %v2424_v53  ;;  %v3007_v16 = vld [vmem:[#allocation2 + $0x140] sm:$0xff]  ;;  %v11741_v53 = vpop.f32.mrf.mxu3 }
 0x215   : > { %v11750_v15 = vpop.f32.mrf.mxu1 }
 0x217   : > { %v1963_v14 = vpop.permute.xlu2 %1962 }
 0x218   : > { %v2422_v39 = vpop.permute.xlu1 %2421  ;;  %v2668_v37 = vpop.permute.xlu0 %2667  ;;  %v3004_v54 = vld [vmem:[#allocation2 + $0x128] sm:$0xff] }
 0x219   : > { %2530 = vst.msk [vmem:[#allocation2 + $0x158] sm:$0xff] %vm1885_vm8, %v2422_v39  ;;  %v3109_v45 = vpack.c.bf16 %v3007_v16, %v3004_v54 }
 0x21a   : > { %2776 = vst.msk [vmem:[#allocation2 + $0x158] sm:$0xff] %vm2057_vm9, %v2668_v37 }
 0x21c   : > { %3515 = vmatmul.bf16.gmra.mxu2 %v3109_v45  ;;  %v3491_v8 = vpop.f32.mrf.mxu2 }
 0x21d   : > { %v11672_v58 = vadd.f32 %v3491_v8, %v3379_v44  ;;  %v9859_v44 = vld [vmem:[%s10509_s15 + $0x90] sm:$0xff]  ;;  %v11767_v8 = vpop.f32.mrf.mxu3 }
 0x21e   : > { %8453 = vmatmul.msk.bf16.gmra.mxu0 %vm657_vm0, %v9859_v44 }
 0x21f   : > { %v2258_v17 = vpop.permute.xlu2 %2257 }
 0x220   : > { %2363 = vst.msk [vmem:[#allocation2 + $0x1a0] sm:$0xff] %vm1635_vm7, %v2258_v17  ;;  %v1076_v56 = vpop.permute.xlu1 %1075  ;;  %v1543_v11 = vpop.permute.xlu0 %1542 }
 0x221   : > { %v1199_v33 = vmul.f32 %v1076_v56, %v877_v31  ;;  %1651 = vst.msk [vmem:[#allocation2 + $0x168] sm:$0xff] %vm1635_vm7, %v1543_v11  ;;  %v3010_v54 = vld [vmem:[#allocation2 + $0x158] sm:$0xff] }
 0x223   : > { %v2845_v21 = vrot.slane %v1199_v33, 3  ;;  %2123 = vst.msk [vmem:[#allocation2 + $0x230] sm:$0xff] %vm657_vm0, %v1199_v33  ;;  %v2187_v48 = vrot.slane %v1199_v33, 1  ;;  %v2599_v55 = vrot.slane %v1199_v33, 2  ;;  %v1730_v4 = vrot.slane %v1199_v33, 7 }
 0x224   : > { %v1480_v25 = vrot.slane %v1199_v33, 6  ;;  %v1313_v38 = vrot.slane %v1199_v33, 5  ;;  %v11764_v45 = vpop.f32.mrf.mxu2 }
 0x225   : > { %v2846_v0 = vsel %vm2803_vm5, %v2843_v34, %v2845_v21  ;;  %v2848_v40 = vsel %vm2803_vm5, %v2845_v21, %v2847_v41  ;;  %v11688_v10 = vsel %vm2141_vm4, %v2187_v48, %v2189_v49  ;;  %v11693_v3 = vsel %vm2141_vm4, %v2185_v30, %v2187_v48  ;;  %v806_v21 = vpop.f32.mrf.mxu0  ;;  %v3383_v48 = vpop.f32.mrf.mxu1 }
 0x226   : > { %2946 = vst.msk [vmem:[#allocation2 + $0x1f0] sm:$0xff] %vm657_vm0, %v2846_v0  ;;  %2435 = vrot.lane.b32.xlu2 %v11688_v10, %s10362_s29  ;;  %2433 = vrot.lane.b32.xlu1 %v11693_v3, %s10362_s29  ;;  %v2600_v34 = vsel %vm2557_vm6, %v2597_v50, %v2599_v55  ;;  %v11711_v19 = vsel %vm1678_vm1, %v14947_v35, %v1730_v4 }
 0x227   : > { %2947 = vst.msk [vmem:[#allocation2 + $0x208] sm:$0xff] %vm657_vm0, %v2848_v40  ;;  %2679 = vrot.lane.b32.xlu0 %v2600_v34, %s10364_s18  ;;  %v2672_v30 = vpop.permute.xlu2 %2671  ;;  %v11717_v50 = vsel %vm1428_vm2, %v1478_v63, %v1480_v25  ;;  %v11722_v9 = vsel %vm1678_vm1, %v1730_v4, %v1732_v2  ;;  %v11727_v60 = vsel %vm1428_vm2, %v1480_v25, %v1482_v13  ;;  %v11784_v34 = vpop.f32.mrf.mxu3 }
 0x228   : > { %v2670_v24 = vpop.permute.xlu1 %2669  ;;  %v1791_v23 = vpop.permute.xlu0 %1790  ;;  %v1314_v46 = vsel %vm1261_vm3, %v1311_v6, %v1313_v38  ;;  %v1316_v63 = vsel %vm1261_vm3, %v1313_v38, %v1315_v20  ;;  %v2602_v61 = vsel %vm2557_vm6, %v2599_v55, %v2601_v5  ;;  %v3384_v4 = vadd.f32 %v11612_v26, %v3383_v48 }
 0x229   : > { %2777 = vst.msk [vmem:[#allocation2 + $0x170] sm:$0xff] %vm2057_vm9, %v2670_v24 }
 0x22a   : > { %1900 = vst.msk [vmem:[#allocation2 + $0x150] sm:$0xff] %vm1885_vm8, %v1791_v23 }
 0x22b   : > { %2072 = vst.msk [vmem:[#allocation2 + $0x150] sm:$0xff] %vm2057_vm9, %v1963_v14 }
 0x22c   : > { %1411 = vst.msk [vmem:[#allocation2 + $0x258] sm:$0xff] %vm657_vm0, %v1314_v46 }
 0x22d   : > { %v3029_v51 = vld [vmem:[#allocation2 + $0x1f0] sm:$0xff]  ;;  %1412 = vst.msk [vmem:[#allocation2 + $0x270] sm:$0xff] %vm657_vm0, %v1316_v63  ;;  %v11800_v63 = vpop.f32.mrf.mxu1 }
 0x22e   : > { %1552 = vrot.lane.b32.xlu2 %v11315_v43, %s10363_s16  ;;  %2681 = vrot.lane.b32.xlu1 %v2602_v61, %s10364_s18  ;;  %v3032_v6 = vld [vmem:[#allocation2 + $0x208] sm:$0xff] }
 0x22f   : > { %1554 = vrot.lane.b32.xlu0 %v11344_v59, %s10363_s16  ;;  %v1547_v7 = vpop.permute.xlu2 %1546  ;;  %v3122_v14 = vpack.c.bf16 %v3032_v6, %v3029_v51  ;;  %v930_v59 = vld [vmem:[%s14903_s1 + $0x108] sm:$0xff] }
 0x230   : > { %1653 = vst.msk [vmem:[#allocation2 + $0x198] sm:$0xff] %vm1635_vm7, %v1547_v7  ;;  %v1793_v39 = vpop.permute.xlu1 %1792  ;;  %v1965_v37 = vpop.permute.xlu0 %1964  ;;  %v3013_v16 = vld [vmem:[#allocation2 + $0x170] sm:$0xff] }
 0x231   : > { %8540 = vmatmul.msk.bf16.gmra.mxu3 %vm657_vm0, %v3122_v14  ;;  %1901 = vst.msk [vmem:[#allocation2 + $0x168] sm:$0xff] %vm1885_vm8, %v1793_v39  ;;  %v3112_v43 = vpack.c.bf16 %v3013_v16, %v3010_v54 }
 0x232   : > { %2073 = vst.msk [vmem:[#allocation2 + $0x168] sm:$0xff] %vm2057_vm9, %v1965_v37  ;;  %v3009_v11 = vld [vmem:[#allocation2 + $0x150] sm:$0xff] }
 0x233   : > { %3520 = vmatmul.bf16.gmra.mxu2 %v3112_v43 }
 0x236   : > { %1110 = vperm.xlu2 %10254, %v930_v59   ;;  %1105 = vperm.xlu1 %10253, %v929_v42  }
 0x237   : > { %1802 = vrot.lane.b32.xlu0 %v11312_v18, %s10362_s29  ;;  %v1795_v31 = vpop.permute.xlu2 %1794 }
 0x238   : > { %v2256_v17 = vpop.permute.xlu1 %2255  ;;  %v2426_v56 = vpop.permute.xlu0 %2425 }
 0x239   : > { %2362 = vst.msk [vmem:[#allocation2 + $0x188] sm:$0xff] %vm1635_vm7, %v2256_v17  ;;  %v3012_v33 = vld [vmem:[#allocation2 + $0x168] sm:$0xff] }
 0x23a   : > { %2532 = vst.msk [vmem:[#allocation2 + $0x188] sm:$0xff] %vm1885_vm8, %v2426_v56  ;;  %v3111_v55 = vpack.c.bf16 %v3012_v33, %v3009_v11 }
 0x23b   : > { %2778 = vst.msk [vmem:[#allocation2 + $0x188] sm:$0xff] %vm2057_vm9, %v2672_v30  ;;  %v808_v30 = vpop.f32.mrf.mxu0 }
 0x23c   : > { %3407 = vmatmul.bf16.gmra.mxu1 %v3111_v55  ;;  %v809_v51 = vadd.f32 %v11790_v1, %v808_v30  ;;  %v3388_v55 = vpop.f32.mrf.mxu1 }
 0x23e   : > { %1974 = vrot.lane.b32.xlu2 %v11369_v22, %s10364_s18  ;;  %1804 = vrot.lane.b32.xlu1 %v11341_v28, %s10362_s29  ;;  %v3496_v18 = vpop.f32.mrf.mxu2  ;;  %v807_v28 = vadd.f32 %v11790_v1, %v806_v21  ;;  %v880_v42 = vmax.f32 %v809_v51, 0.0 }
 0x23f   : > { %1976 = vrot.lane.b32.xlu0 %v11400_v57, %s10364_s18  ;;  %v11782_v25 = vadd.f32 %v3496_v18, %v3384_v4  ;;  %v1969_v38 = vpop.permute.xlu2 %1968  ;;  %v3389_v18 = vadd.f32 %v11612_v26, %v3388_v55 }
 0x240   : > { %v2428_v0 = vpop.permute.xlu1 %2427  ;;  %v2674_v40 = vpop.permute.xlu0 %2673  ;;  %v879_v35 = vmax.f32 %v807_v28, 0.0 }
 0x241   : > { %2533 = vst.msk [vmem:[#allocation2 + $0x1a0] sm:$0xff] %vm1885_vm8, %v2428_v0 }
 0x242   : > { %2779 = vst.msk [vmem:[#allocation2 + $0x1a0] sm:$0xff] %vm2057_vm9, %v2674_v40  ;;  %v3016_v6 = vld [vmem:[#allocation2 + $0x188] sm:$0xff] }
 0x243   : > { %v811_v17 = vpop.f32.mrf.mxu0 }
 0x244   : > { %v812_v48 = vadd.f32 %v11790_v1, %v811_v17 }
 0x246   : > { %2269 = vrot.lane.b32.xlu2 %v11688_v10, %s10363_s16  ;;  %2267 = vrot.lane.b32.xlu1 %v11693_v3, %s10363_s16  ;;  %v11805_v10 = vpop.f32.mrf.mxu3  ;;  %v11819_v56 = vpop.f32.mrf.mxu2  ;;  %v881_v0 = vmax.f32 %v812_v48, 0.0 }
 0x247   : > { %v11798_v24 = vpop.permute.xlu2 %2429 }
 0x248   : > { %v1545_v23 = vpop.permute.xlu1 %1544  ;;  %v1086_v46 = vpop.permute.xlu0 %1085 }
 0x249   : > { %1652 = vst.msk [vmem:[#allocation2 + $0x180] sm:$0xff] %vm1635_vm7, %v1545_v23  ;;  %v1201_v61 = vmul.f32 %v1086_v46, %v879_v35  ;;  %v3019_v7 = vld [vmem:[#allocation2 + $0x1a0] sm:$0xff] }
 0x24a   : > { %1902 = vst.msk [vmem:[#allocation2 + $0x180] sm:$0xff] %vm1885_vm8, %v1795_v31  ;;  %v3115_v14 = vpack.c.bf16 %v3019_v7, %v3016_v6 }
 0x24b   : > { %v2849_v39 = vrot.slane %v1201_v61, 3  ;;  %2125 = vst.msk [vmem:[#allocation2 + $0x260] sm:$0xff] %vm657_vm0, %v1201_v61  ;;  %v2603_v3 = vrot.slane %v1201_v61, 2  ;;  %v2191_v37 = vrot.slane %v1201_v61, 1  ;;  %v1734_v54 = vrot.slane %v1201_v61, 7 }
 0x24c   : > { %3525 = vmatmul.bf16.gmra.mxu2 %v3115_v14  ;;  %v1484_v16 = vrot.slane %v1201_v61, 6  ;;  %v1317_v43 = vrot.slane %v1201_v61, 5 }
 0x24d   : > { %v2850_v59 = vsel %vm2803_vm5, %v2847_v41, %v2849_v39  ;;  %v2604_v44 = vsel %vm2557_vm6, %v2601_v5, %v2603_v3  ;;  %v11817_v31 = vsel %vm2141_vm4, %v2189_v49, %v2191_v37  ;;  %v11828_v41 = vsel %vm1678_vm1, %v1732_v2, %v1734_v54 }
 0x24e   : > { %2948 = vst.msk [vmem:[#allocation2 + $0x220] sm:$0xff] %vm657_vm0, %v2850_v59  ;;  %2683 = vrot.lane.b32.xlu2 %v2604_v44, %s10364_s18  ;;  %2437 = vrot.lane.b32.xlu0 %v11817_v31, %s10362_s29  ;;  %v11833_v49 = vsel %vm1428_vm2, %v1482_v13, %v1484_v16  ;;  %v1318_v11 = vsel %vm1261_vm3, %v1315_v20, %v1317_v43  ;;  %v11855_v30 = vpop.f32.mrf.mxu3 }
 0x24f   : > { %v11835_v5 = vpop.permute.xlu2 %2677  ;;  %1413 = vst.msk [vmem:[#allocation2 + $0x288] sm:$0xff] %vm657_vm0, %v1318_v11 }
 0x250   : > { %v1091_v33 = vpop.permute.xlu1 %1090  ;;  %v1797_v21 = vpop.permute.xlu0 %1796 }
 0x251   : > { %v11842_v2 = vmul.f32 %v1091_v33, %v880_v42  ;;  %1903 = vst.msk [vmem:[#allocation2 + $0x198] sm:$0xff] %vm1885_vm8, %v1797_v21  ;;  %v931_v42 = vld [vmem:[%s14903_s1 + $0x110] sm:$0xff] }
 0x252   : > { %2075 = vst.msk [vmem:[#allocation2 + $0x198] sm:$0xff] %vm2057_vm9, %v1969_v38 }
 0x253   : > { %v2851_v13 = vrot.slane %v11842_v2, 3  ;;  %2126 = vst.msk [vmem:[#allocation2 + $0x278] sm:$0xff] %vm657_vm0, %v11842_v2  ;;  %v2193_v36 = vrot.slane %v11842_v2, 1  ;;  %v2605_v20 = vrot.slane %v11842_v2, 2  ;;  %v1736_v4 = vrot.slane %v11842_v2, 7 }
 0x254   : > { %v1486_v40 = vrot.slane %v11842_v2, 6  ;;  %v1319_v28 = vrot.slane %v11842_v2, 5 }
 0x255   : > { %v2852_v38 = vsel %vm2803_vm5, %v2849_v39, %v2851_v13  ;;  %v11861_v35 = vsel %vm2141_vm4, %v2191_v37, %v2193_v36  ;;  %v2606_v23 = vsel %vm2557_vm6, %v2603_v3, %v2605_v20  ;;  %v11867_v46 = vsel %vm1678_vm1, %v1734_v54, %v1736_v4  ;;  %v3035_v44 = vld [vmem:[#allocation2 + $0x220] sm:$0xff] }
 0x256   : > { %2949 = vst.msk [vmem:[#allocation2 + $0x238] sm:$0xff] %vm657_vm0, %v2852_v38  ;;  %1558 = vrot.lane.b32.xlu2 %v11403_v29, %s10363_s16  ;;  %2439 = vrot.lane.b32.xlu1 %v11861_v35, %s10362_s29  ;;  %v3501_v61 = vpop.f32.mrf.mxu2  ;;  %v11875_v51 = vsel %vm1428_vm2, %v1484_v16, %v1486_v40  ;;  %v1320_v6 = vsel %vm1261_vm3, %v1317_v43, %v1319_v28  ;;  %v11919_v48 = vpop.f32.mrf.mxu3 }
 0x257   : > { %14948 = vst [vmem:[#allocation17_spill] sm:$0xff] %v11875_v51  ;;  %2685 = vrot.lane.b32.xlu0 %v2606_v23, %s10364_s18  ;;  %v11879_v7 = vadd.f32 %v3501_v61, %v3389_v18  ;;  %v1096_v14 = vpop.permute.xlu2 %1095 }
 0x258   : > { %1414 = vst.msk [vmem:[#allocation2 + $0x2a0] sm:$0xff] %vm657_vm0, %v1320_v6  ;;  %v11882_v39 = vmul.f32 %v1096_v14, %v881_v0  ;;  %v1967_v3 = vpop.permute.xlu1 %1966  ;;  %v2260_v29 = vpop.permute.xlu0 %2259 }
 0x259   : > { %2074 = vst.msk [vmem:[#allocation2 + $0x180] sm:$0xff] %vm2057_vm9, %v1967_v3  ;;  %v3018_v0 = vld [vmem:[#allocation2 + $0x198] sm:$0xff]  ;;  %v9860_v3 = vld [vmem:[%s10509_s15 + $0x98] sm:$0xff] }
 0x25a   : > { %v2853_v37 = vrot.slane %v11882_v39, 3  ;;  %2127 = vst.msk [vmem:[#allocation2 + $0x290] sm:$0xff] %vm657_vm0, %v11882_v39  ;;  %v1738_v54 = vrot.slane %v11882_v39, 7  ;;  %v1488_v16 = vrot.slane %v11882_v39, 6  ;;  %v1321_v43 = vrot.slane %v11882_v39, 5  ;;  %8454 = vmatmul.msk.bf16.gmra.mxu0 %vm657_vm0, %v9860_v3 }
 0x25b   : > { %2364 = vst.msk [vmem:[#allocation2 + $0x1b8] sm:$0xff] %vm1635_vm7, %v2260_v29  ;;  %v2195_v6 = vrot.slane %v11882_v39, 1 }
 0x25c   : > { %v2854_v59 = vsel %vm2803_vm5, %v2851_v13, %v2853_v37  ;;  %2534 = vst.msk [vmem:[#allocation2 + $0x1b8] sm:$0xff] %vm1885_vm8, %v11798_v24  ;;  %v11904_v11 = vsel %vm1678_vm1, %v1736_v4, %v1738_v54  ;;  %v11909_v33 = vsel %vm1428_vm2, %v1486_v40, %v1488_v16  ;;  %v1322_v24 = vsel %vm1261_vm3, %v1319_v28, %v1321_v43 }
 0x25d   : > { %2950 = vst.msk [vmem:[#allocation2 + $0x250] sm:$0xff] %vm657_vm0, %v2854_v59  ;;  %v3038_v17 = vld [vmem:[#allocation2 + $0x238] sm:$0xff] }
 0x25e   : > { %1806 = vrot.lane.b32.xlu2 %v11369_v22, %s10362_s29  ;;  %1556 = vrot.lane.b32.xlu1 %v11372_v62, %s10363_s16  ;;  %v3125_v21 = vpack.c.bf16 %v3038_v17, %v3035_v44  ;;  %1415 = vst.msk [vmem:[#allocation2 + $0x2b8] sm:$0xff] %vm657_vm0, %v1322_v24  ;;  %v932_v22 = vld [vmem:[%s14903_s1 + $0x118] sm:$0xff]  ;;  %v813_v62 = vpop.f32.mrf.mxu0  ;;  %v11952_v17 = vpop.f32.mrf.mxu1 }
 0x25f   : > { %1115 = vperm.xlu0 %10252, %v931_v42   ;;  %v1801_v55 = vpop.permute.xlu2 %1800  ;;  %v814_v61 = vadd.f32 %v11790_v1, %v813_v62 }
 0x260   : > { %v2262_v13 = vpop.permute.xlu1 %2261  ;;  %8541 = vmatmul.msk.bf16.gmra.mxu3 %vm657_vm0, %v3125_v21  ;;  %v2432_v4 = vpop.permute.xlu0 %2431  ;;  %v3015_v18 = vld [vmem:[#allocation2 + $0x180] sm:$0xff]  ;;  %v2607_v21 = vrot.slane %v11882_v39, 2 }
 0x261   : > { %2365 = vst.msk [vmem:[#allocation2 + $0x1d0] sm:$0xff] %vm1635_vm7, %v2262_v13  ;;  %v3114_v40 = vpack.c.bf16 %v3018_v0, %v3015_v18  ;;  %v882_v14 = vmax.f32 %v814_v61, 0.0 }
 0x262   : > { %2535 = vst.msk [vmem:[#allocation2 + $0x1d0] sm:$0xff] %vm1885_vm8, %v2432_v4 }
 0x263   : > { %2781 = vst.msk [vmem:[#allocation2 + $0x1d0] sm:$0xff] %vm2057_vm9, %v11835_v5  ;;  %3412 = vmatmul.bf16.gmra.mxu1 %v3114_v40  ;;  %v11934_v5 = vpop.f32.mrf.mxu3 }
 0x266   : > { %1980 = vrot.lane.b32.xlu2 %v11711_v19, %s10364_s18  ;;  %1120 = vperm.xlu1 %10253, %v932_v22   ;;  %v11970_v22 = vpop.f32.mrf.mxu2  ;;  %v816_v39 = vpop.f32.mrf.mxu0 }
 0x267   : > { %1808 = vrot.lane.b32.xlu0 %v11400_v57, %s10362_s29  ;;  %v2264_v28 = vpop.permute.xlu2 %2263  ;;  %v11943_v57 = vsel %vm2141_vm4, %v2193_v36, %v2195_v6 }
 0x268   : > { %2366 = vst.msk [vmem:[#allocation2 + $0x1e8] sm:$0xff] %vm1635_vm7, %v2264_v28  ;;  %v2676_v38 = vpop.permute.xlu1 %2675  ;;  %v1549_v23 = vpop.permute.xlu0 %1548 }
 0x269   : > { %2780 = vst.msk [vmem:[#allocation2 + $0x1b8] sm:$0xff] %vm2057_vm9, %v2676_v38 }
 0x26a   : > { %1654 = vst.msk [vmem:[#allocation2 + $0x1b0] sm:$0xff] %vm1635_vm7, %v1549_v23  ;;  %v3025_v44 = vld [vmem:[#allocation2 + $0x1d0] sm:$0xff] }
 0x26b   : > { %v11960_v13 = vpop.f32.mrf.mxu3 }
 0x26e   : > { %2441 = vrot.lane.b32.xlu2 %v11943_v57, %s10362_s29  ;;  %1978 = vrot.lane.b32.xlu1 %v11441_v32, %s10364_s18 }
 0x26f   : > { %2271 = vrot.lane.b32.xlu0 %v11817_v31, %s10363_s16 }
 0x270   : > { %v1551_v29 = vpop.permute.xlu1 %1550  ;;  %v1101_v59 = vpop.permute.xlu0 %1100  ;;  %v3022_v42 = vld [vmem:[#allocation2 + $0x1b8] sm:$0xff] }
 0x271   : > { %1655 = vst.msk [vmem:[#allocation2 + $0x1c8] sm:$0xff] %vm1635_vm7, %v1551_v29  ;;  %v11955_v36 = vmul.f32 %v1101_v59, %v882_v14  ;;  %v3118_v24 = vpack.c.bf16 %v3025_v44, %v3022_v42  ;;  %v2608_v29 = vsel %vm2557_vm6, %v2605_v20, %v2607_v21  ;;  %v3041_v59 = vld [vmem:[#allocation2 + $0x250] sm:$0xff]  ;;  %v934_v20 = vld [vmem:[%s14903_s1 + $0x128] sm:$0xff] }
 0x272   : > { %1905 = vst.msk [vmem:[#allocation2 + $0x1c8] sm:$0xff] %vm1885_vm8, %v1801_v55 }
 0x273   : > { %v2855_v31 = vrot.slane %v11955_v36, 3  ;;  %2128 = vst.msk [vmem:[#allocation2 + $0x2a8] sm:$0xff] %vm657_vm0, %v11955_v36  ;;  %3530 = vmatmul.bf16.gmra.mxu2 %v3118_v24  ;;  %v14928_v4 = vrot.slane %v11955_v36, 2  ;;  %v14929_v18 = vrot.slane %v11955_v36, 1  ;;  %v14927_v0 = vrot.slane %v11955_v36, 7  ;;  %v3619_v3 = vpop.f32.mrf.mxu3 }
 0x274   : > { %v14926_v40 = vrot.slane %v11955_v36, 6  ;;  %v14925_v55 = vrot.slane %v11955_v36, 5 }
 0x275   : > { %v2856_v62 = vsel %vm2803_vm5, %v2853_v37, %v2855_v31  ;;  %v2610_v28 = vsel %vm2557_vm6, %v2607_v21, %v14928_v4  ;;  %v2198_v38 = vsel %vm2141_vm4, %v2195_v6, %v14929_v18  ;;  %v11988_v23 = vsel %vm1678_vm1, %v1738_v54, %v14927_v0  ;;  %v3393_v6 = vpop.f32.mrf.mxu1 }
 0x276   : > { %14949 = vst [vmem:[#allocation18_spill] sm:$0xff] %v11988_v23  ;;  %2273 = vrot.lane.b32.xlu1 %v11861_v35, %s10363_s16  ;;  %2689 = vrot.lane.b32.xlu2 %v2610_v28, %s10364_s18  ;;  %v11999_v37 = vsel %vm1428_vm2, %v1488_v16, %v14926_v40  ;;  %v1324_v54 = vsel %vm1261_vm3, %v1321_v43, %v14925_v55  ;;  %v933_v16 = vld [vmem:[%s14903_s1 + $0x120] sm:$0xff] }
 0x277   : > { %2951 = vst.msk [vmem:[#allocation2 + $0x268] sm:$0xff] %vm657_vm0, %v2856_v62  ;;  %2443 = vrot.lane.b32.xlu0 %v2198_v38, %s10362_s29  ;;  %v3394_v14 = vadd.f32 %v11612_v26, %v3393_v6 }
 0x278   : > { %14950 = vst [vmem:[#allocation19_spill] sm:$0xff] %v11999_v37  ;;  %v1799_v35 = vpop.permute.xlu1 %1798  ;;  %v1971_v61 = vpop.permute.xlu0 %1970  ;;  %v14955_v37 = vrot.slane %v11955_v36, 6 }
 0x279   : > { %1416 = vst.msk [vmem:[#allocation2 + $0x2d0] sm:$0xff] %vm657_vm0, %v1324_v54 }
 0x27a   : > { %1904 = vst.msk [vmem:[#allocation2 + $0x1b0] sm:$0xff] %vm1885_vm8, %v1799_v35 }
 0x27b   : > { %2076 = vst.msk [vmem:[#allocation2 + $0x1b0] sm:$0xff] %vm2057_vm9, %v1971_v61  ;;  %v12033_v21 = vpop.f32.mrf.mxu3 }
 0x27d   : > { %v3506_v43 = vpop.f32.mrf.mxu2 }
 0x27e   : > { %v3044_v42 = vld [vmem:[#allocation2 + $0x268] sm:$0xff]  ;;  %v3507_v44 = vadd.f32 %v3506_v43, %v3394_v14  ;;  %2687 = vrot.lane.b32.xlu1 %v2608_v29, %s10364_s18  ;;  %1125 = vperm.xlu2 %10254, %v933_v16   ;;  %v12035_v16 = vpop.f32.mrf.mxu1 }
 0x27f   : > { %v3128_v24 = vpack.c.bf16 %v3044_v42, %v3041_v59  ;;  %1560 = vrot.lane.b32.xlu0 %v11447_v12, %s10363_s16  ;;  %v818_v12 = vpop.f32.mrf.mxu0 }
 0x280   : > { %v12020_v62 = vadd.f32 %v3619_v3, %v3507_v44  ;;  %v2436_v28 = vpop.permute.xlu2 %2435  ;;  %v1973_v54 = vpop.permute.xlu1 %1972  ;;  %v819_v43 = vadd.f32 %v11790_v1, %v818_v12 }
 0x281   : > { %8542 = vmatmul.msk.bf16.gmra.mxu3 %vm657_vm0, %v3128_v24  ;;  %2077 = vst.msk [vmem:[#allocation2 + $0x1c8] sm:$0xff] %vm2057_vm9, %v1973_v54  ;;  %v2266_v2 = vpop.permute.xlu0 %2265 }
 0x282   : > { %2367 = vst.msk [vmem:[#allocation2 + $0x200] sm:$0xff] %vm1635_vm7, %v2266_v2  ;;  %v3021_v61 = vld [vmem:[#allocation2 + $0x1b0] sm:$0xff] }
 0x283   : > { %2537 = vst.msk [vmem:[#allocation2 + $0x200] sm:$0xff] %vm1885_vm8, %v2436_v28  ;;  %v12047_v29 = vpop.f32.mrf.mxu3 }
 0x285   : > { %v12037_v14 = vpop.f32.mrf.mxu2 }
 0x286   : > { %1562 = vrot.lane.b32.xlu1 %v11717_v50, %s10363_s16  ;;  %1812 = vrot.lane.b32.xlu2 %v11711_v19, %s10362_s29  ;;  %v884_v50 = vmax.f32 %v819_v43, 0.0  ;;  %v12051_v42 = vpop.f32.mrf.mxu1 }
 0x287   : > { %1130 = vperm.xlu0 %10252, %v934_v20  }
 0x288   : > { %v1553_v35 = vpop.permute.xlu2 %1552  ;;  %v3024_v6 = vld [vmem:[#allocation2 + $0x1c8] sm:$0xff] }
 0x289   : > { %1656 = vst.msk [vmem:[#allocation2 + $0x1e0] sm:$0xff] %vm1635_vm7, %v1553_v35  ;;  %v3117_v3 = vpack.c.bf16 %v3024_v6, %v3021_v61  ;;  %v817_v35 = vadd.f32 %v11790_v1, %v816_v39 }
 0x28b   : > { %3417 = vmatmul.bf16.gmra.mxu1 %v3117_v3  ;;  %v12062_v28 = vpop.f32.mrf.mxu3  ;;  %v883_v3 = vmax.f32 %v817_v35, 0.0 }
 0x28e   : > { %1810 = vrot.lane.b32.xlu1 %v11441_v32, %s10362_s29  ;;  %2275 = vrot.lane.b32.xlu2 %v11943_v57, %s10363_s16  ;;  %v12064_v54 = vpop.f32.mrf.mxu1 }
 0x28f   : > { %1982 = vrot.lane.b32.xlu0 %v11722_v9, %s10364_s18  ;;  %v12053_v44 = vpop.f32.mrf.mxu2 }
 0x290   : > { %v1111_v19 = vpop.permute.xlu2 %1110 }
 0x291   : > { %v12049_v59 = vmul.f32 %v1111_v19, %v884_v50 }
 0x293   : > { %2130 = vst.msk [vmem:[#allocation2 + $0x2d8] sm:$0xff] %vm657_vm0, %v12049_v59  ;;  %v12072_v61 = vpop.f32.mrf.mxu3 }
 0x296   : > { %1984 = vrot.lane.b32.xlu1 %v11828_v41, %s10364_s18  ;;  %v12074_v6 = vpop.f32.mrf.mxu1 }
 0x297   : > { %2277 = vrot.lane.b32.xlu0 %v2198_v38, %s10363_s16  ;;  %v12066_v2 = vpop.f32.mrf.mxu2 }
 0x298   : > { %v1975_v32 = vpop.permute.xlu2 %1974  ;;  %v2434_v57 = vpop.permute.xlu1 %2433 }
 0x299   : > { %2536 = vst.msk [vmem:[#allocation2 + $0x1e8] sm:$0xff] %vm1885_vm8, %v2434_v57  ;;  %v2680_v24 = vpop.permute.xlu0 %2679 }
 0x29a   : > { %2782 = vst.msk [vmem:[#allocation2 + $0x1e8] sm:$0xff] %vm2057_vm9, %v2680_v24 }
 0x29f   : > { %v12076_v43 = vpop.f32.mrf.mxu2 }
 0x2a0   : > { %v2270_v20 = vpop.permute.xlu2 %2269  ;;  %v2682_v12 = vpop.permute.xlu1 %2681 }
 0x2a1   : > { %2369 = vst.msk [vmem:[#allocation2 + $0x230] sm:$0xff] %vm1635_vm7, %v2270_v20  ;;  %v1555_v38 = vpop.permute.xlu0 %1554  ;;  %v3028_v39 = vld [vmem:[#allocation2 + $0x1e8] sm:$0xff]  ;;  %v14931_v20 = vrot.slane %v12049_v59, 3 }
 0x2a2   : > { %2783 = vst.msk [vmem:[#allocation2 + $0x200] sm:$0xff] %vm2057_vm9, %v2682_v12 }
 0x2a3   : > { %1657 = vst.msk [vmem:[#allocation2 + $0x1f8] sm:$0xff] %vm1635_vm7, %v1555_v38  ;;  %v14930_v38 = vrot.slane %v12049_v59, 1 }
 0x2a8   : > { %v1106_v50 = vpop.permute.xlu1 %1105  ;;  %v12078_v19 = vpop.permute.xlu2 %2683 }
 0x2a9   : > { %v1205_v57 = vmul.f32 %v1106_v50, %v883_v3  ;;  %v1803_v24 = vpop.permute.xlu0 %1802  ;;  %v3031_v55 = vld [vmem:[#allocation2 + $0x200] sm:$0xff] }
 0x2aa   : > { %1906 = vst.msk [vmem:[#allocation2 + $0x1e0] sm:$0xff] %vm1885_vm8, %v1803_v24  ;;  %v3121_v12 = vpack.c.bf16 %v3031_v55, %v3028_v39  ;;  %v14951_v39 = vrot.slane %v11955_v36, 1 }
 0x2ab   : > { %v2857_v40 = vrot.slane %v1205_v57, 3  ;;  %2129 = vst.msk [vmem:[#allocation2 + $0x2c0] sm:$0xff] %vm657_vm0, %v1205_v57  ;;  %v2199_v35 = vrot.slane %v1205_v57, 1  ;;  %v2611_v0 = vrot.slane %v1205_v57, 2  ;;  %v1742_v4 = vrot.slane %v1205_v57, 7 }
 0x2ac   : > { %2078 = vst.msk [vmem:[#allocation2 + $0x1e0] sm:$0xff] %vm2057_vm9, %v1975_v32  ;;  %3535 = vmatmul.bf16.gmra.mxu2 %v3121_v12  ;;  %v1492_v3 = vrot.slane %v1205_v57, 6  ;;  %v1325_v50 = vrot.slane %v1205_v57, 5  ;;  %v9861_v57 = vld [vmem:[%s10509_s15 + $0xa0] sm:$0xff] }
 0x2ad   : > { %v2858_v18 = vsel %vm2803_vm5, %v2855_v31, %v2857_v40  ;;  %v2860_v55 = vsel %vm2803_vm5, %v2857_v40, %v14931_v20  ;;  %v12094_v24 = vsel %vm2141_vm4, %v2199_v35, %v14930_v38  ;;  %v12099_v32 = vsel %vm2141_vm4, %v14951_v39, %v2199_v35  ;;  %v12112_v20 = vpop.f32.mrf.mxu3  ;;  %v3405_v35 = vpop.f32.mrf.mxu1  ;;  %8455 = vmatmul.msk.bf16.gmra.mxu0 %vm657_vm0, %v9861_v57 }
 0x2ae   : > { %2952 = vst.msk [vmem:[#allocation2 + $0x280] sm:$0xff] %vm657_vm0, %v2858_v18  ;;  %2447 = vrot.lane.b32.xlu2 %v12094_v24, %s10362_s29  ;;  %2445 = vrot.lane.b32.xlu1 %v12099_v32, %s10362_s29  ;;  %v14952_v31 = vrot.slane %v11955_v36, 2  ;;  %v14953_v18 = vrot.slane %v11955_v36, 7  ;;  %v14957_v38 = vrot.slane %v12049_v59, 7 }
 0x2af   : > { %2953 = vst.msk [vmem:[#allocation2 + $0x298] sm:$0xff] %vm657_vm0, %v2860_v55 }
 0x2b0   : > { %v2612_v40 = vsel %vm2557_vm6, %v14952_v31, %v2611_v0  ;;  %v12119_v39 = vsel %vm1678_vm1, %v14953_v18, %v1742_v4  ;;  %v12124_v31 = vsel %vm1428_vm2, %v14955_v37, %v1492_v3  ;;  %v1805_v12 = vpop.permute.xlu1 %1804  ;;  %v1559_v23 = vpop.permute.xlu2 %1558  ;;  %v12130_v55 = vsel %vm1678_vm1, %v1742_v4, %v14957_v38 }
 0x2b1   : > { %2691 = vrot.lane.b32.xlu0 %v2612_v40, %s10364_s18  ;;  %14954 = vst [vmem:[#allocation20_spill] sm:$0xff] %v12119_v39  ;;  %v14958_v40 = vrot.slane %v12049_v59, 6  ;;  %v14934_v18 = vrot.slane %v12049_v59, 5  ;;  %v3518_v39 = vpop.f32.mrf.mxu2  ;;  %v1977_v37 = vpop.permute.xlu0 %1976  ;;  %v14935_v38 = vrot.slane %v12049_v59, 2 }
 0x2b2   : > { %14956 = vst [vmem:[#allocation21_spill] sm:$0xff] %v12124_v31  ;;  %v14960_v31 = vrot.slane %v11955_v36, 5 }
 0x2b3   : > { %v12135_v51 = vsel %vm1428_vm2, %v1492_v3, %v14958_v40  ;;  %1907 = vst.msk [vmem:[#allocation2 + $0x1f8] sm:$0xff] %vm1885_vm8, %v1805_v12  ;;  %v1328_v4 = vsel %vm1261_vm3, %v1325_v50, %v14934_v18  ;;  %v2614_v3 = vsel %vm2557_vm6, %v2611_v0, %v14935_v38 }
 0x2b4   : > { %14959 = vst [vmem:[#allocation22_spill] sm:$0xff] %v12135_v51  ;;  %v1326_v57 = vsel %vm1261_vm3, %v14960_v31, %v1325_v50 }
 0x2b5   : > { %1659 = vst.msk [vmem:[#allocation2 + $0x228] sm:$0xff] %vm1635_vm7, %v1559_v23  ;;  %v3047_v12 = vld [vmem:[#allocation2 + $0x280] sm:$0xff] }
 0x2b6   : > { %2079 = vst.msk [vmem:[#allocation2 + $0x1f8] sm:$0xff] %vm2057_vm9, %v1977_v37  ;;  %1564 = vrot.lane.b32.xlu2 %v11727_v60, %s10363_s16  ;;  %2693 = vrot.lane.b32.xlu1 %v2614_v3, %s10364_s18  ;;  %v3050_v36 = vld [vmem:[#allocation2 + $0x298] sm:$0xff]  ;;  %v3027_v37 = vld [vmem:[#allocation2 + $0x1e0] sm:$0xff]  ;;  %v821_v60 = vpop.f32.mrf.mxu0 }
 0x2b7   : > { %1417 = vst.msk [vmem:[#allocation2 + $0x2e8] sm:$0xff] %vm657_vm0, %v1326_v57  ;;  %v3131_v23 = vpack.c.bf16 %v3050_v36, %v3047_v12  ;;  %v935_v12 = vld [vmem:[%s14903_s1 + $0x130] sm:$0xff] }
 0x2b8   : > { %1418 = vst.msk [vmem:[#allocation2 + $0x300] sm:$0xff] %vm657_vm0, %v1328_v4  ;;  %v2268_v50 = vpop.permute.xlu1 %2267  ;;  %v12158_v31 = vpop.permute.xlu2 %1806 }
 0x2b9   : > { %1566 = vrot.lane.b32.xlu0 %v11833_v49, %s10363_s16  ;;  %v3521_v40 = vpop.f32.mrf.mxu2  ;;  %2368 = vst.msk [vmem:[#allocation2 + $0x218] sm:$0xff] %vm1635_vm7, %v2268_v50  ;;  %8543 = vmatmul.msk.bf16.gmra.mxu3 %vm657_vm0, %v3131_v23  ;;  %v3408_v0 = vpop.f32.mrf.mxu1  ;;  %v936_v49 = vld [vmem:[%s14903_s1 + $0x138] sm:$0xff]  ;;  %v9862_v23 = vld [vmem:[%s10509_s15 + $0xa8] sm:$0xff]  ;;  %v3406_v50 = vadd.f32 %v11612_v26, %v3405_v35  ;;  %v3401_v35 = vadd.f32 %v11612_v26, %v12064_v54 }
 0x2ba   : > { %v3634_v4 = vpop.f32.mrf.mxu3  ;;  %v3409_v36 = vadd.f32 %v11612_v26, %v3408_v0  ;;  %v3404_v0 = vadd.f32 %v11612_v26, %v12074_v6  ;;  %v3399_v6 = vadd.f32 %v11612_v26, %v12051_v42 }
 0x2bd   : > { %v3030_v57 = vld [vmem:[#allocation2 + $0x1f8] sm:$0xff]  ;;  %8456 = vmatmul.msk.bf16.gmra.mxu0 %vm657_vm0, %v9862_v23  ;;  %v3396_v23 = vadd.f32 %v11612_v26, %v12035_v16  ;;  %v3512_v16 = vadd.f32 %v12053_v44, %v3399_v6  ;;  %v822_v44 = vadd.f32 %v11790_v1, %v821_v60 }
 0x2be   : > { %v3120_v3 = vpack.c.bf16 %v3030_v57, %v3027_v37  ;;  %1140 = vperm.xlu2 %10254, %v936_v49   ;;  %1135 = vperm.xlu1 %10253, %v935_v12   ;;  %v3522_v37 = vadd.f32 %v3521_v40, %v3409_v36  ;;  %v3517_v40 = vadd.f32 %v12076_v43, %v3404_v0 }
 0x2bf   : > { %v3509_v43 = vadd.f32 %v12037_v14, %v3396_v23  ;;  %v3711_v23 = vmax.f32 %v12020_v62, 0.0 }
 0x2c0   : > { %3422 = vmatmul.bf16.gmra.mxu1 %v3120_v3  ;;  %v12173_v57 = vpop.permute.xlu2 %1980  ;;  %v2438_v18 = vpop.permute.xlu0 %2437  ;;  %v3519_v3 = vadd.f32 %v3518_v39, %v3406_v50  ;;  %v3635_v36 = vadd.f32 %v3634_v4, %v3522_v37  ;;  %v12205_v4 = vld [vmem:[%s14907_s5] ss:$0 sm:$0xff] }
 0x2c1   : > { %1814 = vrot.lane.b32.xlu0 %v11722_v9, %s10362_s29  ;;  %2538 = vst.msk [vmem:[#allocation2 + $0x218] sm:$0xff] %vm1885_vm8, %v2438_v18  ;;  %v3410_v38 = vpop.f32.mrf.mxu1  ;;  %v3523_v49 = vpop.f32.mrf.mxu2  ;;  %v3622_v0 = vadd.f32 %v12033_v21, %v3509_v43 }
 0x2c2   : > { %2784 = vst.msk [vmem:[#allocation2 + $0x218] sm:$0xff] %vm2057_vm9, %v12078_v19  ;;  %v3411_v9 = vadd.f32 %v11612_v26, %v3410_v38  ;;  %v823_v18 = vpop.f32.mrf.mxu0  ;;  %v3636_v51 = vpop.f32.mrf.mxu3  ;;  %v3514_v19 = vadd.f32 %v12066_v2, %v3401_v35  ;;  %v3632_v39 = vadd.f32 %v12112_v20, %v3519_v3  ;;  %v3630_v26 = vadd.f32 %v12072_v61, %v3517_v40 }
 0x2c3   : > { %v3717_v20 = vmax.f32 %v3635_v36, 0.0  ;;  %v3625_v3 = vadd.f32 %v12047_v29, %v3512_v16  ;;  %v3712_v40 = vmax.f32 %v3622_v0, 0.0  ;;  %v824_v6 = vadd.f32 %v11790_v1, %v823_v18 }
 0x2c4   : > { %v3524_v12 = vadd.f32 %v3523_v49, %v3411_v9  ;;  %v3627_v14 = vadd.f32 %v12062_v28, %v3514_v19  ;;  %v3716_v50 = vmax.f32 %v3632_v39, 0.0  ;;  %v3715_v9 = vmax.f32 %v3630_v26, 0.0 }
 0x2c5   : > { %v885_v49 = vmax.f32 %v822_v44, 0.0  ;;  %v3615_v18 = vadd.f32 %v11934_v5, %v11879_v7  ;;  %v3748_v43 = vpack.c.bf16 %v3712_v40, %v3711_v23  ;;  %v14961_v5 = vrot.slane %v12049_v59, 3 }
 0x2c6   : > { %1986 = vrot.lane.b32.xlu2 %v11867_v46, %s10364_s18  ;;  %1816 = vrot.lane.b32.xlu1 %v11828_v41, %s10362_s29  ;;  %v3637_v54 = vadd.f32 %v3636_v51, %v3524_v12  ;;  %v3391_v41 = vadd.f32 %v12205_v4, %v11952_v17  ;;  %v3386_v17 = vadd.f32 %v12205_v4, %v11800_v63  ;;  %v3714_v35 = vmax.f32 %v3627_v14, 0.0 }
 0x2c7   : > { %v3750_v28 = vpack.c.bf16 %v3716_v50, %v3715_v9  ;;  %v3381_v63 = vadd.f32 %v12205_v4, %v11750_v15  ;;  %v3713_v12 = vmax.f32 %v3625_v3, 0.0  ;;  %v14963_v44 = vrot.slane %v12049_v59, 1 }
 0x2c8   : > { %v12200_v42 = vpop.permute.xlu2 %2441  ;;  %v2440_v2 = vpop.permute.xlu1 %2439  ;;  %v3718_v38 = vmax.f32 %v3637_v54, 0.0  ;;  %v3504_v37 = vadd.f32 %v11970_v22, %v3391_v41  ;;  %v3376_v22 = vadd.f32 %v12205_v4, %v11660_v47  ;;  %v3499_v21 = vadd.f32 %v11819_v56, %v3386_v17 }
 0x2c9   : > { %1988 = vrot.lane.b32.xlu0 %v11904_v11, %s10364_s18  ;;  %2539 = vst.msk [vmem:[#allocation2 + $0x230] sm:$0xff] %vm1885_vm8, %v2440_v2  ;;  %v2686_v51 = vpop.permute.xlu0 %2685  ;;  %v3494_v15 = vadd.f32 %v11764_v45, %v3381_v63  ;;  %v14964_v50 = vrot.slane %v12049_v59, 7  ;;  %v14965_v0 = vrot.slane %v12049_v59, 6  ;;  %v14966_v9 = vrot.slane %v12049_v59, 5 }
 0x2ca   : > { %2785 = vst.msk [vmem:[#allocation2 + $0x230] sm:$0xff] %vm2057_vm9, %v2686_v51  ;;  %v3751_v61 = vpack.c.bf16 %v3718_v38, %v3717_v20  ;;  %v826_v60 = vpop.f32.mrf.mxu0  ;;  %v3617_v29 = vadd.f32 %v11960_v13, %v3504_v37  ;;  %v3034_v13 = vld [vmem:[#allocation2 + $0x218] sm:$0xff]  ;;  %v3612_v62 = vadd.f32 %v11919_v48, %v3499_v21  ;;  %v886_v20 = vmax.f32 %v824_v6, 0.0 }
 0x2cb   : > { %v827_v56 = vadd.f32 %v11790_v1, %v826_v60  ;;  %v14962_v51 = vrot.slane %v12049_v59, 2  ;;  %v3607_v59 = vadd.f32 %v11805_v10, %v3494_v15 }
 0x2cc   : > { %3945 = vmatpush.bf16.msrb.mxu3 %v3751_v61  ;;  %v3710_v16 = vmax.f32 %v3617_v29, 0.0 }
 0x2cd   : > { %v887_v48 = vmax.f32 %v827_v56, 0.0 }
 0x2ce   : > { %2281 = vrot.lane.b32.xlu2 %v12094_v24, %s10363_s16  ;;  %2279 = vrot.lane.b32.xlu1 %v12099_v32, %s10363_s16  ;;  %v3489_v32 = vadd.f32 %v11665_v52, %v3376_v22  ;;  %v3749_v52 = vpack.c.bf16 %v3714_v35, %v3713_v12 }
 0x2d0   : > { %v1557_v36 = vpop.permute.xlu1 %1556  ;;  %v12228_v24 = vpop.permute.xlu2 %2689  ;;  %3946 = vmatpush.bf16.msrb.mxu3 %v3750_v28  ;;  %v3709_v28 = vmax.f32 %v3615_v18, 0.0  ;;  %v12289_v40 = vadd.f32 %v11767_v8, %v3489_v32  ;;  %v3605_v8 = vadd.f32 %v11784_v34, %v11672_v58 }
 0x2d1   : > { %1658 = vst.msk [vmem:[#allocation2 + $0x210] sm:$0xff] %vm1635_vm7, %v1557_v36  ;;  %v1116_v47 = vpop.permute.xlu0 %1115  ;;  %v3037_v19 = vld [vmem:[#allocation2 + $0x230] sm:$0xff] }
 0x2d2   : > { %1908 = vst.msk [vmem:[#allocation2 + $0x210] sm:$0xff] %vm1885_vm8, %v12158_v31  ;;  %v12238_v39 = vmul.f32 %v1116_v47, %v885_v49  ;;  %v3124_v54 = vpack.c.bf16 %v3037_v19, %v3034_v13  ;;  %v3610_v49 = vadd.f32 %v11855_v30, %v11782_v25  ;;  %v3747_v63 = vpack.c.bf16 %v3710_v16, %v3709_v28 }
 0x2d3   : > { %v3708_v25 = vmax.f32 %v3612_v62, 0.0  ;;  %v3706_v19 = vmax.f32 %v3607_v59, 0.0 }
 0x2d4   : > { %v2861_v26 = vrot.slane %v12238_v39, 3  ;;  %2131 = vst.msk [vmem:[#allocation2 + $0x2f0] sm:$0xff] %vm657_vm0, %v12238_v39  ;;  %3540 = vmatmul.bf16.gmra.mxu2 %v3124_v54  ;;  %3947 = vmatpush.bf16.msrb.mxu3 %v3749_v52  ;;  %v2615_v45 = vrot.slane %v12238_v39, 2  ;;  %v2203_v31 = vrot.slane %v12238_v39, 1  ;;  %v1746_v2 = vrot.slane %v12238_v39, 7 }
 0x2d5   : > { %v1496_v38 = vrot.slane %v12238_v39, 6  ;;  %v1329_v7 = vrot.slane %v12238_v39, 5  ;;  %v3707_v32 = vmax.f32 %v3610_v49, 0.0 }
 0x2d6   : > { %v2862_v41 = vsel %vm2803_vm5, %v14961_v5, %v2861_v26  ;;  %v2616_v14 = vsel %vm2557_vm6, %v14962_v51, %v2615_v45  ;;  %v12260_v61 = vsel %vm2141_vm4, %v14963_v44, %v2203_v31  ;;  %v12265_v37 = vsel %vm1678_vm1, %v14964_v50, %v1746_v2 }
 0x2d7   : > { %2954 = vst.msk [vmem:[#allocation2 + $0x2b0] sm:$0xff] %vm657_vm0, %v2862_v41  ;;  %2695 = vrot.lane.b32.xlu2 %v2616_v14, %s10364_s18  ;;  %2449 = vrot.lane.b32.xlu0 %v12260_v61, %s10362_s29  ;;  %v12274_v3 = vsel %vm1428_vm2, %v14965_v0, %v1496_v38  ;;  %v1330_v17 = vsel %vm1261_vm3, %v14966_v9, %v1329_v7  ;;  %v3704_v41 = vmax.f32 %v12289_v40, 0.0  ;;  %v937_v14 = vld [vmem:[%s14903_s1 + $0x140] sm:$0xff]  ;;  %v828_v40 = vpop.f32.mrf.mxu0 }
 0x2d8   : > { %v1121_v60 = vpop.permute.xlu1 %1120  ;;  %v1126_v35 = vpop.permute.xlu2 %1125  ;;  %3948 = vmatpush.bf16.msrb.mxu3 %v3748_v43  ;;  %1419 = vst.msk [vmem:[#allocation2 + $0x318] sm:$0xff] %vm657_vm0, %v1330_v17  ;;  %v3746_v13 = vpack.c.bf16 %v3708_v25, %v3707_v32  ;;  %v3705_v43 = vmax.f32 %v3605_v8, 0.0  ;;  %v829_v25 = vadd.f32 %v11790_v1, %v828_v40  ;;  %v14969_v32 = vld [vmem:[#allocation18_spill] sm:$0xff] }
 0x2d9   : > { %v12284_v22 = vmul.f32 %v1121_v60, %v886_v20  ;;  %v12286_v21 = vmul.f32 %v1126_v35, %v887_v48  ;;  %v1809_v29 = vpop.permute.xlu0 %1808 }
 0x2da   : > { %1909 = vst.msk [vmem:[#allocation2 + $0x228] sm:$0xff] %vm1885_vm8, %v1809_v29  ;;  %v3745_v5 = vpack.c.bf16 %v3706_v19, %v3705_v43  ;;  %v14968_v29 = vld [vmem:[#allocation20_spill] sm:$0xff] }
 0x2db   : > { %v2863_v30 = vrot.slane %v12284_v22, 3  ;;  %2132 = vst.msk [vmem:[#allocation2 + $0x308] sm:$0xff] %vm657_vm0, %v12284_v22  ;;  %v2865_v12 = vrot.slane %v12286_v21, 3  ;;  %v2205_v36 = vrot.slane %v12284_v22, 1  ;;  %v2617_v23 = vrot.slane %v12284_v22, 2 }
 0x2dc   : > { %2133 = vst.msk [vmem:[#allocation2 + $0x320] sm:$0xff] %vm657_vm0, %v12286_v21  ;;  %3949 = vmatpush.bf16.msrb.mxu3 %v3747_v63  ;;  %v1748_v10 = vrot.slane %v12284_v22, 7  ;;  %v1750_v6 = vrot.slane %v12286_v21, 7  ;;  %v1500_v52 = vrot.slane %v12286_v21, 6  ;;  %v1331_v62 = vrot.slane %v12284_v22, 5 }
 0x2dd   : > { %v2864_v47 = vsel %vm2803_vm5, %v2861_v26, %v2863_v30  ;;  %v2866_v56 = vsel %vm2803_vm5, %v2863_v30, %v2865_v12  ;;  %2081 = vst.msk [vmem:[#allocation2 + $0x228] sm:$0xff] %vm2057_vm9, %v12173_v57  ;;  %v12314_v58 = vsel %vm2141_vm4, %v2203_v31, %v2205_v36  ;;  %v2618_v34 = vsel %vm2557_vm6, %v2615_v45, %v2617_v23 }
 0x2de   : > { %2955 = vst.msk [vmem:[#allocation2 + $0x2c8] sm:$0xff] %vm657_vm0, %v2864_v47  ;;  %2451 = vrot.lane.b32.xlu1 %v12314_v58, %s10362_s29  ;;  %v12323_v15 = vsel %vm1678_vm1, %v1746_v2, %v1748_v10  ;;  %v1498_v57 = vrot.slane %v12284_v22, 6  ;;  %v12333_v54 = vsel %vm1678_vm1, %v1748_v10, %v1750_v6  ;;  %v1333_v18 = vrot.slane %v12286_v21, 5  ;;  %v3053_v50 = vld [vmem:[#allocation2 + $0x2b0] sm:$0xff] }
 0x2df   : > { %2956 = vst.msk [vmem:[#allocation2 + $0x2e0] sm:$0xff] %vm657_vm0, %v2866_v56  ;;  %1570 = vrot.lane.b32.xlu2 %v11909_v33, %s10363_s16  ;;  %2697 = vrot.lane.b32.xlu0 %v2618_v34, %s10364_s18  ;;  %v3600_v45 = vadd.f32 %v11741_v53, %v11624_v27  ;;  %v1332_v27 = vsel %vm1261_vm3, %v1329_v7, %v1331_v62  ;;  %v3526_v53 = vpop.f32.mrf.mxu2  ;;  %v14967_v7 = vld [vmem:[#allocation17_spill] sm:$0xff]  ;;  %v2207_v30 = vrot.slane %v12286_v21, 1 }
 0x2e0   : > { %v1979_v16 = vpop.permute.xlu1 %1978  ;;  %v12338_v26 = vpop.permute.xlu2 %1812  ;;  %3950 = vmatpush.bf16.msrb.mxu3 %v3746_v13  ;;  %v12341_v33 = vsel %vm1428_vm2, %v1496_v38, %v1498_v57  ;;  %v12349_v20 = vsel %vm1428_vm2, %v1498_v57, %v1500_v52  ;;  %v1334_v48 = vsel %vm1261_vm3, %v1331_v62, %v1333_v18  ;;  %1420 = vst.msk [vmem:[#allocation2 + $0x330] sm:$0xff] %vm657_vm0, %v1332_v27  ;;  %v2619_v13 = vrot.slane %v12286_v21, 2 }
 0x2e1   : > { %2080 = vst.msk [vmem:[#allocation2 + $0x210] sm:$0xff] %vm2057_vm9, %v1979_v16  ;;  %v2272_v31 = vpop.permute.xlu0 %2271  ;;  %v3413_v2 = vpop.f32.mrf.mxu1  ;;  %v3703_v44 = vmax.f32 %v3600_v45, 0.0  ;;  %v12393_v8 = vsel %vm2141_vm4, %v2205_v36, %v2207_v30 }
 0x2e2   : > { %2370 = vst.msk [vmem:[#allocation2 + $0x248] sm:$0xff] %vm1635_vm7, %v2272_v31  ;;  %v3414_v38 = vadd.f32 %v12205_v4, %v3413_v2  ;;  %v831_v27 = vpop.f32.mrf.mxu0  ;;  %v2620_v21 = vsel %vm2557_vm6, %v2617_v23, %v2619_v13 }
 0x2e3   : > { %2540 = vst.msk [vmem:[#allocation2 + $0x248] sm:$0xff] %vm1885_vm8, %v12200_v42  ;;  %v3744_v0 = vpack.c.bf16 %v3704_v41, %v3703_v44  ;;  %v14970_v41 = vld [vmem:[#allocation19_spill] sm:$0xff] }
 0x2e4   : > { %v12362_v51 = vadd.f32 %v3526_v53, %v3414_v38  ;;  %3951 = vmatpush.bf16.msrb.mxu3 %v3745_v5  ;;  %1421 = vst.msk [vmem:[#allocation2 + $0x348] sm:$0xff] %vm657_vm0, %v1334_v48  ;;  %v3036_v28 = vld [vmem:[#allocation2 + $0x228] sm:$0xff] }
 0x2e5   : > { %v3056_v39 = vld [vmem:[#allocation2 + $0x2c8] sm:$0xff] }
 0x2e6   : > { %1568 = vrot.lane.b32.xlu1 %v14967_v7, %s10363_s16  ;;  %v3134_v42 = vpack.c.bf16 %v3056_v39, %v3053_v50 }
 0x2e7   : > { %1818 = vrot.lane.b32.xlu2 %v11867_v46, %s10362_s29  ;;  %1145 = vperm.xlu0 %10252, %v937_v14   ;;  %v938_v46 = vld [vmem:[%s14903_s1 + $0x148] sm:$0xff]  ;;  %v12457_v5 = vpop.f32.mrf.mxu2 }
 0x2e8   : > { %v2274_v9 = vpop.permute.xlu1 %2273  ;;  %v2276_v17 = vpop.permute.xlu2 %2275  ;;  %8544 = vmatmul.msk.bf16.gmra.mxu3 %vm657_vm0, %v3134_v42  ;;  %v3033_v49 = vld [vmem:[#allocation2 + $0x210] sm:$0xff] }
 0x2e9   : > { %2371 = vst.msk [vmem:[#allocation2 + $0x260] sm:$0xff] %vm1635_vm7, %v2274_v9  ;;  %v2444_v60 = vpop.permute.xlu0 %2443  ;;  %3952 = vmatpush.bf16.msrb.mxu3 %v3744_v0  ;;  %v3123_v35 = vpack.c.bf16 %v3036_v28, %v3033_v49  ;;  %v12453_v48 = vpop.f32.mrf.mxu1  ;;  %v940_v0 = vld [vmem:[%s14903_s1 + $0x158] sm:$0xff]  ;;  %v14971_v9 = vld [vmem:[#allocation21_spill] sm:$0xff] }
 0x2ea   : > { %2372 = vst.msk [vmem:[#allocation2 + $0x278] sm:$0xff] %vm1635_vm7, %v2276_v17  ;;  %v833_v17 = vpop.f32.mrf.mxu0 }
 0x2eb   : > { %2541 = vst.msk [vmem:[#allocation2 + $0x260] sm:$0xff] %vm1885_vm8, %v2444_v60  ;;  %3427 = vmatmul.bf16.gmra.mxu1 %v3123_v35 }
 0x2ec   : > { %2787 = vst.msk [vmem:[#allocation2 + $0x260] sm:$0xff] %vm2057_vm9, %v12228_v24  ;;  %v888_v24 = vmax.f32 %v829_v25, 0.0 }
 0x2ee   : > { %1150 = vperm.xlu1 %10253, %v938_v46   ;;  %v12486_v46 = vld [vmem:[%s14905_s3] ss:$0 sm:$0xff] }
 0x2ef   : > { %1992 = vrot.lane.b32.xlu2 %v14968_v29, %s10364_s18  ;;  %1820 = vrot.lane.b32.xlu0 %v11904_v11, %s10362_s29  ;;  %v9863_v11 = vld [vmem:[%s10509_s15 + $0xb0] sm:$0xff]  ;;  %v834_v40 = vadd.f32 %v12486_v46, %v833_v17 }
 0x2f0   : > { %v2688_v59 = vpop.permute.xlu1 %2687  ;;  %8457 = vmatmul.msk.bf16.gmra.mxu0 %vm657_vm0, %v9863_v11  ;;  %v832_v11 = vadd.f32 %v12486_v46, %v831_v27 }
 0x2f1   : > { %2786 = vst.msk [vmem:[#allocation2 + $0x248] sm:$0xff] %vm2057_vm9, %v2688_v59  ;;  %v1561_v63 = vpop.permute.xlu0 %1560  ;;  %v890_v59 = vmax.f32 %v834_v40, 0.0 }
 0x2f2   : > { %1660 = vst.msk [vmem:[#allocation2 + $0x240] sm:$0xff] %vm1635_vm7, %v1561_v63 }
 0x2f3   : > { %v3043_v47 = vld [vmem:[#allocation2 + $0x260] sm:$0xff] }
 0x2f6   : > { %1990 = vrot.lane.b32.xlu1 %v14969_v32, %s10364_s18  ;;  %v3531_v23 = vpop.f32.mrf.mxu2 }
 0x2f7   : > { %2453 = vrot.lane.b32.xlu2 %v12393_v8, %s10362_s29  ;;  %2283 = vrot.lane.b32.xlu0 %v12260_v61, %s10363_s16 }
 0x2f8   : > { %v1563_v10 = vpop.permute.xlu1 %1562  ;;  %v3040_v1 = vld [vmem:[#allocation2 + $0x248] sm:$0xff] }
 0x2f9   : > { %1661 = vst.msk [vmem:[#allocation2 + $0x258] sm:$0xff] %vm1635_vm7, %v1563_v10  ;;  %v1131_v56 = vpop.permute.xlu0 %1130  ;;  %v3127_v34 = vpack.c.bf16 %v3043_v47, %v3040_v1  ;;  %v889_v1 = vmax.f32 %v832_v11, 0.0 }
 0x2fa   : > { %1911 = vst.msk [vmem:[#allocation2 + $0x258] sm:$0xff] %vm1885_vm8, %v12338_v26  ;;  %v12406_v36 = vmul.f32 %v1131_v56, %v888_v24 }
 0x2fb   : > { %3545 = vmatmul.bf16.gmra.mxu2 %v3127_v34 }
 0x2fc   : > { %v2867_v61 = vrot.slane %v12406_v36, 3  ;;  %2134 = vst.msk [vmem:[#allocation2 + $0x338] sm:$0xff] %vm657_vm0, %v12406_v36  ;;  %v2621_v19 = vrot.slane %v12406_v36, 2  ;;  %v2209_v57 = vrot.slane %v12406_v36, 1  ;;  %v1752_v62 = vrot.slane %v12406_v36, 7 }
 0x2fd   : > { %v1502_v43 = vrot.slane %v12406_v36, 6  ;;  %v1335_v16 = vrot.slane %v12406_v36, 5 }
 0x2fe   : > { %v2868_v26 = vsel %vm2803_vm5, %v2865_v12, %v2867_v61  ;;  %2285 = vrot.lane.b32.xlu1 %v12314_v58, %s10363_s16  ;;  %v2622_v45 = vsel %vm2557_vm6, %v2619_v13, %v2621_v19  ;;  %v2210_v31 = vsel %vm2141_vm4, %v2207_v30, %v2209_v57  ;;  %v12435_v2 = vsel %vm1678_vm1, %v1750_v6, %v1752_v62 }
 0x2ff   : > { %2957 = vst.msk [vmem:[#allocation2 + $0x2f8] sm:$0xff] %vm657_vm0, %v2868_v26  ;;  %2701 = vrot.lane.b32.xlu2 %v2622_v45, %s10364_s18  ;;  %2455 = vrot.lane.b32.xlu0 %v2210_v31, %s10362_s29  ;;  %v12445_v12 = vsel %vm1428_vm2, %v1500_v52, %v1502_v43  ;;  %v1336_v6 = vsel %vm1261_vm3, %v1333_v18, %v1335_v16  ;;  %v939_v52 = vld [vmem:[%s14903_s1 + $0x150] sm:$0xff]  ;;  %v3059_v18 = vld [vmem:[#allocation2 + $0x2e0] sm:$0xff] }
 0x300   : > { %v1811_v58 = vpop.permute.xlu1 %1810  ;;  %1422 = vst.msk [vmem:[#allocation2 + $0x360] sm:$0xff] %vm657_vm0, %v1336_v6 }
 0x301   : > { %1910 = vst.msk [vmem:[#allocation2 + $0x240] sm:$0xff] %vm1885_vm8, %v1811_v58  ;;  %v1983_v38 = vpop.permute.xlu0 %1982 }
 0x302   : > { %2082 = vst.msk [vmem:[#allocation2 + $0x240] sm:$0xff] %vm2057_vm9, %v1983_v38 }
 0x306   : > { %2699 = vrot.lane.b32.xlu1 %v2620_v21, %s10364_s18  ;;  %v3062_v53 = vld [vmem:[#allocation2 + $0x2f8] sm:$0xff] }
 0x307   : > { %1155 = vperm.xlu2 %10254, %v939_v52   ;;  %1572 = vrot.lane.b32.xlu0 %v14970_v41, %s10363_s16  ;;  %v3137_v14 = vpack.c.bf16 %v3062_v53, %v3059_v18  ;;  %v12516_v53 = vpop.f32.mrf.mxu2 }
 0x308   : > { %v1985_v44 = vpop.permute.xlu1 %1984  ;;  %v2448_v50 = vpop.permute.xlu2 %2447 }
 0x309   : > { %2083 = vst.msk [vmem:[#allocation2 + $0x258] sm:$0xff] %vm2057_vm9, %v1985_v44  ;;  %8545 = vmatmul.msk.bf16.gmra.mxu3 %vm657_vm0, %v3137_v14  ;;  %v2278_v39 = vpop.permute.xlu0 %2277  ;;  %v3418_v7 = vpop.f32.mrf.mxu1  ;;  %v3039_v28 = vld [vmem:[#allocation2 + $0x240] sm:$0xff] }
 0x30a   : > { %2373 = vst.msk [vmem:[#allocation2 + $0x290] sm:$0xff] %vm1635_vm7, %v2278_v39  ;;  %v3419_v22 = vadd.f32 %v12205_v4, %v3418_v7 }
 0x30b   : > { %2543 = vst.msk [vmem:[#allocation2 + $0x290] sm:$0xff] %vm1885_vm8, %v2448_v50 }
 0x30c   : > { %v12473_v42 = vadd.f32 %v3531_v23, %v3419_v22 }
 0x30e   : > { %1574 = vrot.lane.b32.xlu1 %v14971_v9, %s10363_s16 }
 0x30f   : > { %1824 = vrot.lane.b32.xlu2 %v14968_v29, %s10362_s29  ;;  %1160 = vperm.xlu0 %10252, %v940_v0  }
 0x310   : > { %v1565_v49 = vpop.permute.xlu2 %1564  ;;  %v3042_v60 = vld [vmem:[#allocation2 + $0x258] sm:$0xff] }
 0x311   : > { %1662 = vst.msk [vmem:[#allocation2 + $0x270] sm:$0xff] %vm1635_vm7, %v1565_v49  ;;  %v3126_v35 = vpack.c.bf16 %v3042_v60, %v3039_v28 }
 0x313   : > { %3432 = vmatmul.bf16.gmra.mxu1 %v3126_v35 }
 0x316   : > { %1822 = vrot.lane.b32.xlu1 %v14969_v32, %s10362_s29 }
 0x317   : > { %2287 = vrot.lane.b32.xlu2 %v12393_v8, %s10363_s16  ;;  %1994 = vrot.lane.b32.xlu0 %v12130_v55, %s10364_s18 }
 0x318   : > { %v1141_v29 = vpop.permute.xlu2 %1140 }
 0x319   : > { %v12495_v63 = vmul.f32 %v1141_v29, %v890_v59 }
 0x31b   : > { %2136 = vst.msk [vmem:[#allocation2 + $0x368] sm:$0xff] %vm657_vm0, %v12495_v63  ;;  %v2871_v6 = vrot.slane %v12495_v63, 3  ;;  %v2213_v38 = vrot.slane %v12495_v63, 1  ;;  %v1756_v14 = vrot.slane %v12495_v63, 7  ;;  %v1506_v23 = vrot.slane %v12495_v63, 6 }
 0x31c   : > { %v1339_v49 = vrot.slane %v12495_v63, 5  ;;  %v2625_v59 = vrot.slane %v12495_v63, 2 }
 0x31e   : > { %1996 = vrot.lane.b32.xlu1 %v12265_v37, %s10364_s18 }
 0x31f   : > { %2289 = vrot.lane.b32.xlu0 %v2210_v31, %s10363_s16  ;;  %v12510_v31 = vpop.f32.mrf.mxu1 }
 0x320   : > { %v1987_v25 = vpop.permute.xlu2 %1986  ;;  %v2446_v30 = vpop.permute.xlu1 %2445 }
 0x321   : > { %2542 = vst.msk [vmem:[#allocation2 + $0x278] sm:$0xff] %vm1885_vm8, %v2446_v30  ;;  %v14972_v30 = vld [vmem:[#allocation22_spill] sm:$0xff] }
 0x323   : > { %v2692_v24 = vpop.permute.xlu0 %2691 }
 0x324   : > { %2788 = vst.msk [vmem:[#allocation2 + $0x278] sm:$0xff] %vm2057_vm9, %v2692_v24 }
 0x328   : > { %v2282_v8 = vpop.permute.xlu2 %2281  ;;  %v2694_v32 = vpop.permute.xlu1 %2693 }
 0x329   : > { %2375 = vst.msk [vmem:[#allocation2 + $0x2c0] sm:$0xff] %vm1635_vm7, %v2282_v8 }
 0x32a   : > { %2789 = vst.msk [vmem:[#allocation2 + $0x290] sm:$0xff] %vm2057_vm9, %v2694_v32 }
 0x32b   : > { %v1567_v10 = vpop.permute.xlu0 %1566  ;;  %v3046_v26 = vld [vmem:[#allocation2 + $0x278] sm:$0xff] }
 0x32c   : > { %1663 = vst.msk [vmem:[#allocation2 + $0x288] sm:$0xff] %vm1635_vm7, %v1567_v10 }
 0x32f   : > { %v3536_v29 = vpop.f32.mrf.mxu2 }
 0x330   : > { %v1136_v47 = vpop.permute.xlu1 %1135 }
 0x331   : > { %v1211_v56 = vmul.f32 %v1136_v47, %v889_v1  ;;  %v12508_v34 = vpop.permute.xlu2 %2695  ;;  %v3049_v45 = vld [vmem:[#allocation2 + $0x290] sm:$0xff] }
 0x332   : > { %v3130_v58 = vpack.c.bf16 %v3049_v45, %v3046_v26  ;;  %v836_v26 = vpop.f32.mrf.mxu0 }
 0x333   : > { %v1815_v13 = vpop.permute.xlu0 %1814  ;;  %v2869_v52 = vrot.slane %v1211_v56, 3  ;;  %2135 = vst.msk [vmem:[#allocation2 + $0x350] sm:$0xff] %vm657_vm0, %v1211_v56  ;;  %v2211_v27 = vrot.slane %v1211_v56, 1  ;;  %v2623_v21 = vrot.slane %v1211_v56, 2  ;;  %v1754_v18 = vrot.slane %v1211_v56, 7 }
 0x334   : > { %1912 = vst.msk [vmem:[#allocation2 + $0x270] sm:$0xff] %vm1885_vm8, %v1815_v13  ;;  %3550 = vmatmul.bf16.gmra.mxu2 %v3130_v58  ;;  %v1504_v41 = vrot.slane %v1211_v56, 6  ;;  %v1337_v44 = vrot.slane %v1211_v56, 5  ;;  %v942_v56 = vld [vmem:[%s14903_s1 + $0x168] sm:$0xff]  ;;  %v941_v13 = vld [vmem:[%s14903_s1 + $0x160] sm:$0xff] }
 0x335   : > { %2084 = vst.msk [vmem:[#allocation2 + $0x270] sm:$0xff] %vm2057_vm9, %v1987_v25  ;;  %v2870_v50 = vsel %vm2803_vm5, %v2867_v61, %v2869_v52  ;;  %v2872_v39 = vsel %vm2803_vm5, %v2869_v52, %v2871_v6  ;;  %v12529_v7 = vsel %vm2141_vm4, %v2211_v27, %v2213_v38  ;;  %v12534_v22 = vsel %vm2141_vm4, %v2209_v57, %v2211_v27 }
 0x336   : > { %2958 = vst.msk [vmem:[#allocation2 + $0x310] sm:$0xff] %vm657_vm0, %v2870_v50  ;;  %2459 = vrot.lane.b32.xlu2 %v12529_v7, %s10362_s29  ;;  %2457 = vrot.lane.b32.xlu1 %v12534_v22, %s10362_s29  ;;  %v2624_v61 = vsel %vm2557_vm6, %v2621_v19, %v2623_v21  ;;  %v12550_v57 = vsel %vm1678_vm1, %v1752_v62, %v1754_v18 }
 0x337   : > { %2959 = vst.msk [vmem:[#allocation2 + $0x328] sm:$0xff] %vm657_vm0, %v2872_v39  ;;  %2703 = vrot.lane.b32.xlu0 %v2624_v61, %s10364_s18  ;;  %v12555_v0 = vsel %vm1428_vm2, %v1502_v43, %v1504_v41  ;;  %v12560_v19 = vsel %vm1678_vm1, %v1754_v18, %v1756_v14  ;;  %v12565_v17 = vsel %vm1428_vm2, %v1504_v41, %v1506_v23 }
 0x338   : > { %v1817_v9 = vpop.permute.xlu1 %1816  ;;  %v1338_v43 = vsel %vm1261_vm3, %v1335_v16, %v1337_v44  ;;  %v1340_v35 = vsel %vm1261_vm3, %v1337_v44, %v1339_v49  ;;  %v2626_v36 = vsel %vm2557_vm6, %v2623_v21, %v2625_v59  ;;  %v837_v21 = vadd.f32 %v12486_v46, %v836_v26 }
 0x339   : > { %1913 = vst.msk [vmem:[#allocation2 + $0x288] sm:$0xff] %vm1885_vm8, %v1817_v9  ;;  %v1571_v62 = vpop.permute.xlu2 %1570 }
 0x33a   : > { %1665 = vst.msk [vmem:[#allocation2 + $0x2b8] sm:$0xff] %vm1635_vm7, %v1571_v62  ;;  %v838_v58 = vpop.f32.mrf.mxu0 }
 0x33b   : > { %v1989_v28 = vpop.permute.xlu0 %1988  ;;  %1423 = vst.msk [vmem:[#allocation2 + $0x378] sm:$0xff] %vm657_vm0, %v1338_v43  ;;  %v839_v41 = vadd.f32 %v12486_v46, %v838_v58 }
 0x33c   : > { %2085 = vst.msk [vmem:[#allocation2 + $0x288] sm:$0xff] %vm2057_vm9, %v1989_v28  ;;  %v3045_v10 = vld [vmem:[#allocation2 + $0x270] sm:$0xff] }
 0x33d   : > { %v3423_v60 = vpop.f32.mrf.mxu1  ;;  %v3065_v16 = vld [vmem:[#allocation2 + $0x310] sm:$0xff]  ;;  %1424 = vst.msk [vmem:[#allocation2 + $0x390] sm:$0xff] %vm657_vm0, %v1340_v35 }
 0x33e   : > { %v3424_v40 = vadd.f32 %v12205_v4, %v3423_v60  ;;  %1576 = vrot.lane.b32.xlu2 %v14972_v30, %s10363_s16  ;;  %2705 = vrot.lane.b32.xlu1 %v2626_v36, %s10364_s18  ;;  %v3068_v24 = vld [vmem:[#allocation2 + $0x328] sm:$0xff]  ;;  %v892_v60 = vmax.f32 %v839_v41, 0.0 }
 0x33f   : > { %1578 = vrot.lane.b32.xlu0 %v12274_v3, %s10363_s16  ;;  %v3140_v8 = vpack.c.bf16 %v3068_v24, %v3065_v16 }
 0x340   : > { %v12580_v25 = vadd.f32 %v3536_v29, %v3424_v40  ;;  %v2280_v32 = vpop.permute.xlu1 %2279 }
 0x341   : > { %2374 = vst.msk [vmem:[#allocation2 + $0x2a8] sm:$0xff] %vm1635_vm7, %v2280_v32  ;;  %v1819_v11 = vpop.permute.xlu2 %1818  ;;  %8546 = vmatmul.msk.bf16.gmra.mxu3 %vm657_vm0, %v3140_v8 }
 0x343   : > { %v3048_v1 = vld [vmem:[#allocation2 + $0x288] sm:$0xff] }
 0x344   : > { %v3129_v47 = vpack.c.bf16 %v3048_v1, %v3045_v10  ;;  %v12664_v10 = vpop.f32.mrf.mxu2 }
 0x345   : > { %v12659_v24 = vpop.f32.mrf.mxu1 }
 0x346   : > { %3437 = vmatmul.bf16.gmra.mxu1 %v3129_v47  ;;  %1170 = vperm.xlu2 %10254, %v942_v56  }
 0x347   : > { %1165 = vperm.xlu1 %10253, %v941_v13   ;;  %1826 = vrot.lane.b32.xlu0 %v12130_v55, %s10362_s29 }
 0x349   : > { %v12601_v3 = vpop.permute.xlu2 %1992  ;;  %v2450_v45 = vpop.permute.xlu0 %2449 }
 0x34a   : > { %2544 = vst.msk [vmem:[#allocation2 + $0x2a8] sm:$0xff] %vm1885_vm8, %v2450_v45 }
 0x34b   : > { %2790 = vst.msk [vmem:[#allocation2 + $0x2a8] sm:$0xff] %vm2057_vm9, %v12508_v34  ;;  %v891_v34 = vmax.f32 %v837_v21, 0.0 }
 0x34e   : > { %1998 = vrot.lane.b32.xlu2 %v12323_v15, %s10364_s18 }
 0x34f   : > { %1828 = vrot.lane.b32.xlu1 %v12265_v37, %s10362_s29  ;;  %2000 = vrot.lane.b32.xlu0 %v12333_v54, %s10364_s18  ;;  %v841_v37 = vpop.f32.mrf.mxu0 }
 0x350   : > { %v2452_v52 = vpop.permute.xlu1 %2451 }
 0x351   : > { %v12612_v55 = vpop.permute.xlu2 %2453  ;;  %2545 = vst.msk [vmem:[#allocation2 + $0x2c0] sm:$0xff] %vm1885_vm8, %v2452_v52  ;;  %v2698_v27 = vpop.permute.xlu0 %2697 }
 0x352   : > { %2791 = vst.msk [vmem:[#allocation2 + $0x2c0] sm:$0xff] %vm2057_vm9, %v2698_v27  ;;  %v3052_v39 = vld [vmem:[#allocation2 + $0x2a8] sm:$0xff] }
 0x356   : > { %2293 = vrot.lane.b32.xlu2 %v12529_v7, %s10363_s16  ;;  %v842_v7 = vadd.f32 %v12486_v46, %v841_v37 }
 0x357   : > { %2291 = vrot.lane.b32.xlu1 %v12534_v22, %s10363_s16 }
 0x358   : > { %v1569_v18 = vpop.permute.xlu1 %1568  ;;  %v893_v36 = vmax.f32 %v842_v7, 0.0  ;;  %v3541_v7 = vpop.f32.mrf.mxu2 }
 0x359   : > { %1664 = vst.msk [vmem:[#allocation2 + $0x2a0] sm:$0xff] %vm1635_vm7, %v1569_v18  ;;  %v12623_v44 = vpop.permute.xlu2 %2701  ;;  %v1146_v50 = vpop.permute.xlu0 %1145  ;;  %v3055_v61 = vld [vmem:[#allocation2 + $0x2c0] sm:$0xff] }
 0x35a   : > { %1914 = vst.msk [vmem:[#allocation2 + $0x2a0] sm:$0xff] %vm1885_vm8, %v1819_v11  ;;  %v12626_v9 = vmul.f32 %v1146_v50, %v891_v34  ;;  %v3133_v62 = vpack.c.bf16 %v3055_v61, %v3052_v39 }
 0x35c   : > { %v2873_v22 = vrot.slane %v12626_v9, 3  ;;  %2137 = vst.msk [vmem:[#allocation2 + $0x380] sm:$0xff] %vm657_vm0, %v12626_v9  ;;  %3555 = vmatmul.bf16.gmra.mxu2 %v3133_v62  ;;  %v2627_v28 = vrot.slane %v12626_v9, 2  ;;  %v2215_v43 = vrot.slane %v12626_v9, 1  ;;  %v1508_v35 = vrot.slane %v12626_v9, 6 }
 0x35d   : > { %v1341_v40 = vrot.slane %v12626_v9, 5 }
 0x35e   : > { %v2874_v29 = vsel %vm2803_vm5, %v2871_v6, %v2873_v22  ;;  %v2628_v16 = vsel %vm2557_vm6, %v2625_v59, %v2627_v28  ;;  %v12645_v30 = vsel %vm2141_vm4, %v2213_v38, %v2215_v43  ;;  %v12654_v6 = vsel %vm1428_vm2, %v1506_v23, %v1508_v35 }
 0x35f   : > { %2960 = vst.msk [vmem:[#allocation2 + $0x340] sm:$0xff] %vm657_vm0, %v2874_v29  ;;  %2707 = vrot.lane.b32.xlu2 %v2628_v16, %s10364_s18  ;;  %2461 = vrot.lane.b32.xlu0 %v12645_v30, %s10362_s29  ;;  %v1342_v59 = vsel %vm1261_vm3, %v1339_v49, %v1341_v40 }
 0x360   : > { %v1151_v38 = vpop.permute.xlu1 %1150  ;;  %1425 = vst.msk [vmem:[#allocation2 + $0x3a8] sm:$0xff] %vm657_vm0, %v1342_v59 }
 0x361   : > { %v12662_v8 = vmul.f32 %v1151_v38, %v892_v60  ;;  %v1156_v32 = vpop.permute.xlu2 %1155  ;;  %v1821_v11 = vpop.permute.xlu0 %1820 }
 0x362   : > { %v12666_v1 = vmul.f32 %v1156_v32, %v893_v36  ;;  %1915 = vst.msk [vmem:[#allocation2 + $0x2b8] sm:$0xff] %vm1885_vm8, %v1821_v11 }
 0x363   : > { %2138 = vst.msk [vmem:[#allocation2 + $0x398] sm:$0xff] %vm657_vm0, %v12662_v8  ;;  %v2875_v23 = vrot.slane %v12662_v8, 3  ;;  %v2217_v49 = vrot.slane %v12662_v8, 1  ;;  %v2629_v47 = vrot.slane %v12662_v8, 2  ;;  %v1760_v56 = vrot.slane %v12662_v8, 7 }
 0x364   : > { %v2877_v13 = vrot.slane %v12666_v1, 3  ;;  %2139 = vst.msk [vmem:[#allocation2 + $0x3b0] sm:$0xff] %vm657_vm0, %v12666_v1  ;;  %v1930_v26 = vrot.slane %v12666_v1, 7  ;;  %v1510_v21 = vrot.slane %v12662_v8, 6  ;;  %v1343_v34 = vrot.slane %v12662_v8, 5 }
 0x365   : > { %v2876_v45 = vsel %vm2803_vm5, %v2873_v22, %v2875_v23  ;;  %2087 = vst.msk [vmem:[#allocation2 + $0x2b8] sm:$0xff] %vm2057_vm9, %v12601_v3  ;;  %v2218_v58 = vsel %vm2141_vm4, %v2215_v43, %v2217_v49  ;;  %v2630_v52 = vsel %vm2557_vm6, %v2627_v28, %v2629_v47  ;;  %v2631_v38 = vrot.slane %v12666_v1, 2 }
 0x366   : > { %v2878_v27 = vsel %vm2803_vm5, %v2875_v23, %v2877_v13  ;;  %2961 = vst.msk [vmem:[#allocation2 + $0x358] sm:$0xff] %vm657_vm0, %v2876_v45  ;;  %2463 = vrot.lane.b32.xlu1 %v2218_v58, %s10362_s29  ;;  %v12703_v3 = vsel %vm1678_vm1, %v1760_v56, %v1930_v26  ;;  %v12707_v41 = vsel %vm1428_vm2, %v1508_v35, %v1510_v21  ;;  %v3071_v22 = vld [vmem:[#allocation2 + $0x340] sm:$0xff] }
 0x367   : > { %2962 = vst.msk [vmem:[#allocation2 + $0x370] sm:$0xff] %vm657_vm0, %v2878_v27  ;;  %1582 = vrot.lane.b32.xlu2 %v12349_v20, %s10363_s16  ;;  %2709 = vrot.lane.b32.xlu0 %v2630_v52, %s10364_s18  ;;  %v1344_v61 = vsel %vm1261_vm3, %v1341_v40, %v1343_v34  ;;  %v12753_v52 = vpop.f32.mrf.mxu3 }
 0x368   : > { %v1991_v37 = vpop.permute.xlu1 %1990  ;;  %v3428_v18 = vpop.f32.mrf.mxu1  ;;  %1427 = vst.msk [vmem:[#allocation2 + $0x3c0] sm:$0xf] %vm1426_vm10, %v1344_v61 }
 0x369   : > { %2086 = vst.msk [vmem:[#allocation2 + $0x2a0] sm:$0xff] %vm2057_vm9, %v1991_v37  ;;  %v1825_v50 = vpop.permute.xlu2 %1824  ;;  %v2284_v20 = vpop.permute.xlu0 %2283  ;;  %v3429_v39 = vadd.f32 %v12205_v4, %v3428_v18 }
 0x36a   : > { %2376 = vst.msk [vmem:[#allocation2 + $0x2d8] sm:$0xff] %vm1635_vm7, %v2284_v20 }
 0x36b   : > { %2546 = vst.msk [vmem:[#allocation2 + $0x2d8] sm:$0xff] %vm1885_vm8, %v12612_v55  ;;  %v12715_v62 = vadd.f32 %v3541_v7, %v3429_v39 }
 0x36c   : > { %v3054_v35 = vld [vmem:[#allocation2 + $0x2b8] sm:$0xff] }
 0x36d   : > { %v3074_v28 = vld [vmem:[#allocation2 + $0x358] sm:$0xff] }
 0x36e   : > { %1580 = vrot.lane.b32.xlu1 %v12341_v33, %s10363_s16  ;;  %v3143_v43 = vpack.c.bf16 %v3074_v28, %v3071_v22  ;;  %v3077_v28 = vld [vmem:[#allocation2 + $0x370] sm:$0xff] }
 0x36f   : > { %2002 = vrot.lane.b32.xlu2 %v12435_v2, %s10364_s18  ;;  %1830 = vrot.lane.b32.xlu0 %v12323_v15, %s10362_s29  ;;  %v843_v15 = vpop.f32.mrf.mxu0 }
 0x370   : > { %v2286_v60 = vpop.permute.xlu1 %2285  ;;  %8547 = vmatmul.msk.bf16.gmra.mxu3 %vm657_vm0, %v3143_v43  ;;  %v3051_v55 = vld [vmem:[#allocation2 + $0x2a0] sm:$0xff]  ;;  %v844_v59 = vadd.f32 %v12486_v46, %v843_v15  ;;  %v12787_v61 = vpop.f32.mrf.mxu1 }
 0x371   : > { %2377 = vst.msk [vmem:[#allocation2 + $0x2f0] sm:$0xff] %vm1635_vm7, %v2286_v60  ;;  %v2288_v40 = vpop.permute.xlu2 %2287  ;;  %v2456_v29 = vpop.permute.xlu0 %2455  ;;  %v3132_v36 = vpack.c.bf16 %v3054_v35, %v3051_v55 }
 0x372   : > { %2378 = vst.msk [vmem:[#allocation2 + $0x308] sm:$0xff] %vm1635_vm7, %v2288_v40  ;;  %v894_v32 = vmax.f32 %v844_v59, 0.0 }
 0x373   : > { %2547 = vst.msk [vmem:[#allocation2 + $0x2f0] sm:$0xff] %vm1885_vm8, %v2456_v29  ;;  %3442 = vmatmul.bf16.gmra.mxu1 %v3132_v36  ;;  %v1758_v36 = vrot.slane %v12626_v9, 7 }
 0x374   : > { %2793 = vst.msk [vmem:[#allocation2 + $0x2f0] sm:$0xff] %vm2057_vm9, %v12623_v44  ;;  %v2219_v44 = vrot.slane %v12666_v1, 1  ;;  %v12791_v1 = vpop.f32.mrf.mxu3 }
 0x376   : > { %1832 = vrot.lane.b32.xlu1 %v12333_v54, %s10362_s29  ;;  %v2632_v54 = vsel %vm2557_vm6, %v2629_v47, %v2631_v38  ;;  %v12748_v11 = vsel %vm2141_vm4, %v2217_v49, %v2219_v44 }
 0x377   : > { %2297 = vrot.lane.b32.xlu2 %v2218_v58, %s10363_s16  ;;  %2004 = vrot.lane.b32.xlu0 %v12550_v57, %s10364_s18  ;;  %v846_v22 = vpop.f32.mrf.mxu0 }
 0x378   : > { %v2700_v33 = vpop.permute.xlu1 %2699 }
 0x379   : > { %2792 = vst.msk [vmem:[#allocation2 + $0x2d8] sm:$0xff] %vm2057_vm9, %v2700_v33  ;;  %v1573_v16 = vpop.permute.xlu0 %1572  ;;  %v12816_v33 = vsel %vm1678_vm1, %v1756_v14, %v1758_v36 }
 0x37a   : > { %1666 = vst.msk [vmem:[#allocation2 + $0x2d0] sm:$0xff] %vm1635_vm7, %v1573_v16 }
 0x37b   : > { %v3061_v58 = vld [vmem:[#allocation2 + $0x2f0] sm:$0xff] }
 0x37e   : > { %2295 = vrot.lane.b32.xlu1 %v12645_v30, %s10363_s16 }
 0x37f   : > { %2711 = vrot.lane.b32.xlu2 %v2632_v54, %s10364_s18  ;;  %2465 = vrot.lane.b32.xlu0 %v12748_v11, %s10362_s29  ;;  %v848_v16 = vpop.f32.mrf.mxu0 }
 0x380   : > { %v1575_v23 = vpop.permute.xlu1 %1574  ;;  %v3058_v45 = vld [vmem:[#allocation2 + $0x2d8] sm:$0xff]  ;;  %v849_v63 = vadd.f32 %v12486_v46, %v848_v16 }
 0x381   : > { %1667 = vst.msk [vmem:[#allocation2 + $0x2e8] sm:$0xff] %vm1635_vm7, %v1575_v23  ;;  %v1161_v47 = vpop.permute.xlu0 %1160  ;;  %v3136_v27 = vpack.c.bf16 %v3061_v58, %v3058_v45 }
 0x382   : > { %1917 = vst.msk [vmem:[#allocation2 + $0x2e8] sm:$0xff] %vm1885_vm8, %v1825_v50  ;;  %v12757_v30 = vmul.f32 %v1161_v47, %v894_v32  ;;  %v896_v14 = vmax.f32 %v849_v63, 0.0 }
 0x383   : > { %3560 = vmatmul.bf16.gmra.mxu2 %v3136_v27 }
 0x384   : > { %v2879_v49 = vrot.slane %v12757_v30, 3  ;;  %v2633_v21 = vrot.slane %v12757_v30, 2  ;;  %v12762_v34 = vrot.slane %v12757_v30, 1  ;;  %2140 = vst.msk [vmem:[#allocation2 + $0x3c8] sm:$0xf] %vm1426_vm10, %v12757_v30  ;;  %v1932_v37 = vrot.slane %v12757_v30, 7 }
 0x386   : > { %v2880_v18 = vsel %vm2803_vm5, %v2877_v13, %v2879_v49  ;;  %v2634_v50 = vsel %vm2557_vm6, %v2631_v38, %v2633_v21  ;;  %v2222_v20 = vsel %vm2141_vm4, %v2219_v44, %v12762_v34  ;;  %v12780_v39 = vsel %vm1678_vm1, %v1930_v26, %v1932_v37  ;;  %v12793_v26 = vpop.f32.mrf.mxu2 }
 0x387   : > { %2963 = vst.msk [vmem:[#allocation2 + $0x388] sm:$0xff] %vm657_vm0, %v2880_v18  ;;  %1586 = vrot.lane.b32.xlu2 %v12555_v0, %s10363_s16  ;;  %2713 = vrot.lane.b32.xlu0 %v2634_v50, %s10364_s18 }
 0x388   : > { %2467 = vrot.lane.b32.xlu1 %v2222_v20, %s10362_s29  ;;  %v1823_v13 = vpop.permute.xlu1 %1822 }
 0x389   : > { %1916 = vst.msk [vmem:[#allocation2 + $0x2d0] sm:$0xff] %vm1885_vm8, %v1823_v13  ;;  %v1995_v7 = vpop.permute.xlu0 %1994 }
 0x38a   : > { %2088 = vst.msk [vmem:[#allocation2 + $0x2d0] sm:$0xff] %vm2057_vm9, %v1995_v7 }
 0x38e   : > { %v3080_v43 = vld [vmem:[#allocation2 + $0x388] sm:$0xff]  ;;  %v3546_v15 = vpop.f32.mrf.mxu2 }
 0x38f   : > { %2006 = vrot.lane.b32.xlu2 %v12560_v19, %s10364_s18  ;;  %1834 = vrot.lane.b32.xlu0 %v12435_v2, %s10362_s29  ;;  %v3146_v0 = vpack.c.bf16 %v3080_v43, %v3077_v28 }
 0x390   : > { %1584 = vrot.lane.b32.xlu1 %v12445_v12, %s10363_s16  ;;  %v1997_v60 = vpop.permute.xlu1 %1996  ;;  %v2460_v55 = vpop.permute.xlu2 %2459 }
 0x391   : > { %2089 = vst.msk [vmem:[#allocation2 + $0x2e8] sm:$0xff] %vm2057_vm9, %v1997_v60  ;;  %8548 = vmatmul.msk.bf16.gmra.mxu3 %vm657_vm0, %v3146_v0  ;;  %v2290_v35 = vpop.permute.xlu0 %2289  ;;  %v3433_v40 = vpop.f32.mrf.mxu1  ;;  %v3057_v59 = vld [vmem:[#allocation2 + $0x2d0] sm:$0xff] }
 0x392   : > { %2379 = vst.msk [vmem:[#allocation2 + $0x320] sm:$0xff] %vm1635_vm7, %v2290_v35  ;;  %v3434_v29 = vadd.f32 %v12205_v4, %v3433_v40  ;;  %v12809_v12 = vpop.f32.mrf.mxu3 }
 0x393   : > { %2549 = vst.msk [vmem:[#allocation2 + $0x320] sm:$0xff] %vm1885_vm8, %v2460_v55 }
 0x394   : > { %v12807_v2 = vadd.f32 %v3546_v15, %v3434_v29 }
 0x397   : > { %2008 = vrot.lane.b32.xlu0 %v12816_v33, %s10364_s18  ;;  %2301 = vrot.lane.b32.xlu2 %v2222_v20, %s10363_s16  ;;  %v847_v20 = vadd.f32 %v12486_v46, %v846_v22 }
 0x398   : > { %1836 = vrot.lane.b32.xlu1 %v12550_v57, %s10362_s29  ;;  %v1577_v4 = vpop.permute.xlu2 %1576  ;;  %v3060_v38 = vld [vmem:[#allocation2 + $0x2e8] sm:$0xff] }
 0x399   : > { %1668 = vst.msk [vmem:[#allocation2 + $0x300] sm:$0xff] %vm1635_vm7, %v1577_v4  ;;  %v3135_v44 = vpack.c.bf16 %v3060_v38, %v3057_v59  ;;  %v895_v13 = vmax.f32 %v847_v20, 0.0 }
 0x39a   : > { %v12825_v32 = vpop.f32.mrf.mxu3 }
 0x39b   : > { %3447 = vmatmul.bf16.gmra.mxu1 %v3135_v44 }
 0x3a0   : > { %2299 = vrot.lane.b32.xlu1 %v12748_v11, %s10363_s16  ;;  %v1171_v54 = vpop.permute.xlu2 %1170 }
 0x3a1   : > { %v12829_v23 = vmul.f32 %v1171_v54, %v896_v14 }
 0x3a2   : > { %v12833_v45 = vpop.f32.mrf.mxu3 }
 0x3a3   : > { %v2883_v57 = vrot.slane %v12829_v23, 3  ;;  %v2391_v46 = vrot.slane %v12829_v23, 1  ;;  %v2637_v30 = vrot.slane %v12829_v23, 2 }
 0x3a5   : > { %2966 = vst.msk [vmem:[#allocation2 + $0x3d0] sm:$0xf] %vm1426_vm10, %v2883_v57 }
 0x3a8   : > { %v1999_v58 = vpop.permute.xlu2 %1998  ;;  %v2458_v47 = vpop.permute.xlu1 %2457 }
 0x3a9   : > { %2548 = vst.msk [vmem:[#allocation2 + $0x308] sm:$0xff] %vm1885_vm8, %v2458_v47  ;;  %v2704_v27 = vpop.permute.xlu0 %2703 }
 0x3aa   : > { %2794 = vst.msk [vmem:[#allocation2 + $0x308] sm:$0xff] %vm2057_vm9, %v2704_v27  ;;  %v12838_v50 = vpop.f32.mrf.mxu3 }
 0x3ac   : > { %v3089_v8 = vld [vmem:[#allocation2 + $0x3d0] sm:$0xf] }
 0x3b0   : > { %v2294_v37 = vpop.permute.xlu2 %2293  ;;  %v2706_v18 = vpop.permute.xlu1 %2705 }
 0x3b1   : > { %2381 = vst.msk [vmem:[#allocation2 + $0x350] sm:$0xff] %vm1635_vm7, %v2294_v37  ;;  %v1579_v11 = vpop.permute.xlu0 %1578  ;;  %v3064_v60 = vld [vmem:[#allocation2 + $0x308] sm:$0xff] }
 0x3b2   : > { %2795 = vst.msk [vmem:[#allocation2 + $0x320] sm:$0xff] %vm2057_vm9, %v2706_v18  ;;  %v12843_v35 = vpop.f32.mrf.mxu3 }
 0x3b3   : > { %1669 = vst.msk [vmem:[#allocation2 + $0x318] sm:$0xff] %vm1635_vm7, %v1579_v11 }
 0x3b9   : > { %v1166_v7 = vpop.permute.xlu1 %1165  ;;  %v2708_v43 = vpop.permute.xlu2 %2707  ;;  %v3067_v55 = vld [vmem:[#allocation2 + $0x320] sm:$0xff] }
 0x3ba   : > { %v1217_v28 = vmul.f32 %v1166_v7, %v895_v13  ;;  %v1827_v0 = vpop.permute.xlu0 %1826  ;;  %v3139_v40 = vpack.c.bf16 %v3067_v55, %v3064_v60 }
 0x3bb   : > { %1918 = vst.msk [vmem:[#allocation2 + $0x300] sm:$0xff] %vm1885_vm8, %v1827_v0 }
 0x3bc   : > { %v2389_v29 = vrot.slane %v1217_v28, 1  ;;  %v2635_v15 = vrot.slane %v1217_v28, 2  ;;  %v2881_v16 = vrot.slane %v1217_v28, 3  ;;  %2090 = vst.msk [vmem:[#allocation2 + $0x300] sm:$0xff] %vm2057_vm9, %v1999_v58  ;;  %3565 = vmatmul.bf16.gmra.mxu2 %v3139_v40 }
 0x3be   : > { %v2882_v22 = vsel %vm2803_vm5, %v2879_v49, %v2881_v16  ;;  %v2884_v4 = vsel %vm2803_vm5, %v2881_v16, %v2883_v57  ;;  %v2390_v59 = vsel %vm2141_vm4, %v12762_v34, %v2389_v29  ;;  %v2636_v38 = vsel %vm2557_vm6, %v2633_v21, %v2635_v15  ;;  %v12867_v21 = vpop.f32.mrf.mxu3  ;;  %v12920_v16 = vpop.f32.mrf.mxu1 }
 0x3bf   : > { %2964 = vst.msk [vmem:[#allocation2 + $0x3a0] sm:$0xff] %vm657_vm0, %v2882_v22  ;;  %2469 = vrot.lane.b32.xlu0 %v2390_v59, %s10362_s29  ;;  %2715 = vrot.lane.b32.xlu2 %v2636_v38, %s10364_s18  ;;  %v2392_v44 = vsel %vm2141_vm4, %v2389_v29, %v2391_v46  ;;  %v2638_v54 = vsel %vm2557_vm6, %v2635_v15, %v2637_v30  ;;  %v12918_v15 = vpop.f32.mrf.mxu2 }
 0x3c0   : > { %2965 = vst.msk [vmem:[#allocation2 + $0x3b8] sm:$0xff] %vm657_vm0, %v2884_v4  ;;  %2471 = vrot.lane.b32.xlu1 %v2392_v44, %s10362_s29 }
 0x3c1   : > { %v1829_v49 = vpop.permute.xlu1 %1828  ;;  %v1583_v63 = vpop.permute.xlu2 %1582 }
 0x3c2   : > { %1919 = vst.msk [vmem:[#allocation2 + $0x318] sm:$0xff] %vm1885_vm8, %v1829_v49  ;;  %v2001_v14 = vpop.permute.xlu0 %2000 }
 0x3c3   : > { %1671 = vst.msk [vmem:[#allocation2 + $0x348] sm:$0xff] %vm1635_vm7, %v1583_v63  ;;  %v3063_v37 = vld [vmem:[#allocation2 + $0x300] sm:$0xff] }
 0x3c4   : > { %2091 = vst.msk [vmem:[#allocation2 + $0x318] sm:$0xff] %vm2057_vm9, %v2001_v14 }
 0x3c6   : > { %v3083_v57 = vld [vmem:[#allocation2 + $0x3a0] sm:$0xff]  ;;  %v12877_v20 = vpop.f32.mrf.mxu3  ;;  %v3438_v63 = vpop.f32.mrf.mxu1 }
 0x3c7   : > { %2717 = vrot.lane.b32.xlu0 %v2638_v54, %s10364_s18  ;;  %1590 = vrot.lane.b32.xlu2 %v12654_v6, %s10363_s16  ;;  %v3086_v58 = vld [vmem:[#allocation2 + $0x3b8] sm:$0xff]  ;;  %v1761_v6 = vsel %vm1678_vm1, %v1758_v36, %v1760_v56  ;;  %v3551_v49 = vpop.f32.mrf.mxu2 }
 0x3c8   : > { %1588 = vrot.lane.b32.xlu1 %v12565_v17, %s10363_s16  ;;  %v3149_v47 = vpack.c.bf16 %v3086_v58, %v3083_v57 }
 0x3c9   : > { %v2292_v27 = vpop.permute.xlu1 %2291  ;;  %v2003_v23 = vpop.permute.xlu2 %2002 }
 0x3ca   : > { %2380 = vst.msk [vmem:[#allocation2 + $0x338] sm:$0xff] %vm1635_vm7, %v2292_v27  ;;  %8549 = vmatmul.msk.bf16.gmra.mxu3 %vm657_vm0, %v3149_v47 }
 0x3cb   : > { %v3066_v18 = vld [vmem:[#allocation2 + $0x318] sm:$0xff] }
 0x3cc   : > { %v3138_v11 = vpack.c.bf16 %v3066_v18, %v3063_v37 }
 0x3ce   : > { %3452 = vmatmul.bf16.gmra.mxu1 %v3138_v11  ;;  %v12892_v9 = vpop.f32.mrf.mxu3  ;;  %v3440_v58 = vpop.f32.mrf.mxu1 }
 0x3cf   : > { %1838 = vrot.lane.b32.xlu0 %v12560_v19, %s10362_s29  ;;  %2010 = vrot.lane.b32.xlu2 %v1761_v6, %s10364_s18  ;;  %v3152_v19 = vpack.c.bf16 %v3089_v8, %v3089_v8  ;;  %v3553_v57 = vpop.f32.mrf.mxu2 }
 0x3d0   : > { %1840 = vrot.lane.b32.xlu1 %v12816_v33, %s10362_s29 }
 0x3d1   : > { %v2298_v17 = vpop.permute.xlu2 %2297  ;;  %v2462_v13 = vpop.permute.xlu0 %2461 }
 0x3d2   : > { %2383 = vst.msk [vmem:[#allocation2 + $0x380] sm:$0xff] %vm1635_vm7, %v2298_v17 }
 0x3d3   : > { %2550 = vst.msk [vmem:[#allocation2 + $0x338] sm:$0xff] %vm1885_vm8, %v2462_v13 }
 0x3d4   : > { %2796 = vst.msk [vmem:[#allocation2 + $0x338] sm:$0xff] %vm2057_vm9, %v2708_v43 }
 0x3d6   : > { %v12902_v7 = vpop.f32.mrf.mxu3 }
 0x3d7   : > { %2012 = vrot.lane.b32.xlu0 %v12703_v3, %s10364_s18  ;;  %2473 = vrot.lane.b32.xlu2 %v2391_v46, %s10362_s29 }
 0x3d8   : > { %2303 = vrot.lane.b32.xlu1 %v12762_v34, %s10363_s16  ;;  %v2464_v56 = vpop.permute.xlu1 %2463 }
 0x3d9   : > { %v2712_v36 = vpop.permute.xlu2 %2711  ;;  %2551 = vst.msk [vmem:[#allocation2 + $0x350] sm:$0xff] %vm1885_vm8, %v2464_v56  ;;  %v2710_v33 = vpop.permute.xlu0 %2709 }
 0x3da   : > { %8550 = vmatmul.msk.bf16.gmra.mxu3 %vm657_vm0, %v3152_v19  ;;  %2797 = vst.msk [vmem:[#allocation2 + $0x350] sm:$0xff] %vm2057_vm9, %v2710_v33 }
 0x3db   : > { %v3070_v43 = vld [vmem:[#allocation2 + $0x338] sm:$0xff] }
 0x3de   : > { %v12914_v55 = vpop.f32.mrf.mxu3 }
 0x3df   : > { %2719 = vrot.lane.b32.xlu0 %v2637_v30, %s10364_s18  ;;  %1842 = vrot.lane.b32.xlu2 %v1761_v6, %s10362_s29  ;;  %v3556_v6 = vpop.f32.mrf.mxu2 }
 0x3e0   : > { %1592 = vrot.lane.b32.xlu1 %v12707_v41, %s10363_s16  ;;  %v1581_v3 = vpop.permute.xlu1 %1580  ;;  %s8230_s16 = scalar_lea.hbm %s14915_s13, %s10462_s17 }
 0x3e1   : > { %v1587_v34 = vpop.permute.xlu2 %1586  ;;  %1670 = vst.msk [vmem:[#allocation2 + $0x330] sm:$0xff] %vm1635_vm7, %v1581_v3  ;;  %v1831_v28 = vpop.permute.xlu0 %1830  ;;  %v3073_v0 = vld [vmem:[#allocation2 + $0x350] sm:$0xff]  ;;  %s8234_s24 = sshll.u32 %s8230_s16, 4  ;;  %s8235_s24 = int_to_ptr.hbm [resolvable:$true] %s8234_s24 }
 0x3e2   : > { %1673 = vst.msk [vmem:[#allocation2 + $0x378] sm:$0xff] %vm1635_vm7, %v1587_v34  ;;  %v3142_v60 = vpack.c.bf16 %v3073_v0, %v3070_v43 }
 0x3e3   : > { %1920 = vst.msk [vmem:[#allocation2 + $0x330] sm:$0xff] %vm1885_vm8, %v1831_v28 }
 0x3e4   : > { %2092 = vst.msk [vmem:[#allocation2 + $0x330] sm:$0xff] %vm2057_vm9, %v2003_v23  ;;  %3570 = vmatmul.bf16.gmra.mxu2 %v3142_v60 }
 0x3e6   : > { %v12922_v46 = vpop.f32.mrf.mxu3 }
 0x3e7   : > { %2014 = vrot.lane.b32.xlu0 %v12780_v39, %s10364_s18  ;;  %v3558_v56 = vpop.f32.mrf.mxu2  ;;  %s463_s18 = scalar_lea.vmem [#allocation5], %s14846_s28 }
 0x3e8   : > { %v1833_v41 = vpop.permute.xlu1 %1832  ;;  %s8232_s15 = sshll.u32 %s463_s18, 4  ;;  %s8233_s15 = int_to_ptr.vmem [resolvable:$true] %s8232_s15 }
 0x3e9   : > { %v2007_v40 = vpop.permute.xlu2 %2006  ;;  %1921 = vst.msk [vmem:[#allocation2 + $0x348] sm:$0xff] %vm1885_vm8, %v1833_v41  ;;  %v2005_v29 = vpop.permute.xlu0 %2004 }
 0x3ea   : > { %2093 = vst.msk [vmem:[#allocation2 + $0x348] sm:$0xff] %vm2057_vm9, %v2005_v29 }
 0x3eb   : > { %v3069_v59 = vld [vmem:[#allocation2 + $0x330] sm:$0xff] }
 0x3ee   : > { %v3671_v54 = vpop.f32.mrf.mxu3 }
 0x3f0   : > { %v2296_v22 = vpop.permute.xlu1 %2295  ;;  %v3443_v17 = vpop.f32.mrf.mxu1 }
 0x3f1   : > { %2382 = vst.msk [vmem:[#allocation2 + $0x368] sm:$0xff] %vm1635_vm7, %v2296_v22  ;;  %v2302_v4 = vpop.permute.xlu2 %2301  ;;  %v2466_v39 = vpop.permute.xlu0 %2465  ;;  %v3072_v38 = vld [vmem:[#allocation2 + $0x348] sm:$0xff] }
 0x3f2   : > { %2385 = vst.msk [vmem:[#allocation2 + $0x3b0] sm:$0xff] %vm1635_vm7, %v2302_v4  ;;  %v3141_v44 = vpack.c.bf16 %v3072_v38, %v3069_v59 }
 0x3f3   : > { %2552 = vst.msk [vmem:[#allocation2 + $0x368] sm:$0xff] %vm1885_vm8, %v2466_v39 }
 0x3f4   : > { %2798 = vst.msk [vmem:[#allocation2 + $0x368] sm:$0xff] %vm2057_vm9, %v2712_v36  ;;  %3457 = vmatmul.bf16.gmra.mxu1 %v3141_v44 }
 0x3f6   : > { %v3674_v23 = vpop.f32.mrf.mxu3 }
 0x3f8   : > { %v3445_v36 = vpop.f32.mrf.mxu1 }
 0x3f9   : > { %v2714_v14 = vpop.permute.xlu0 %2713 }
 0x3fa   : > { %v2468_v30 = vpop.permute.xlu1 %2467 }
 0x3fb   : > { %2553 = vst.msk [vmem:[#allocation2 + $0x380] sm:$0xff] %vm1885_vm8, %v2468_v30  ;;  %v3076_v37 = vld [vmem:[#allocation2 + $0x368] sm:$0xff] }
 0x3fc   : > { %2799 = vst.msk [vmem:[#allocation2 + $0x380] sm:$0xff] %vm2057_vm9, %v2714_v14 }
 0x3fe   : > { %v3676_v19 = vpop.f32.mrf.mxu3 }
 0x401   : > { %v1835_v47 = vpop.permute.xlu0 %1834 }
 0x402   : > { %v1585_v27 = vpop.permute.xlu1 %1584 }
 0x403   : > { %1672 = vst.msk [vmem:[#allocation2 + $0x360] sm:$0xff] %vm1635_vm7, %v1585_v27  ;;  %v3079_v18 = vld [vmem:[#allocation2 + $0x380] sm:$0xff] }
 0x404   : > { %1922 = vst.msk [vmem:[#allocation2 + $0x360] sm:$0xff] %vm1885_vm8, %v1835_v47  ;;  %v3145_v11 = vpack.c.bf16 %v3079_v18, %v3076_v37 }
 0x405   : > { %2094 = vst.msk [vmem:[#allocation2 + $0x360] sm:$0xff] %vm2057_vm9, %v2007_v40  ;;  %v12941_v40 = vld [vmem:[%s14907_s5] ss:$0 sm:$0xff] }
 0x406   : > { %3575 = vmatmul.bf16.gmra.mxu2 %v3145_v11  ;;  %v12936_v43 = vpop.f32.mrf.mxu3  ;;  %v3561_v0 = vpop.f32.mrf.mxu2  ;;  %v3446_v22 = vadd.f32 %v12941_v40, %v3445_v36  ;;  %v3444_v39 = vadd.f32 %v12941_v40, %v3443_v17  ;;  %v3441_v14 = vadd.f32 %v12941_v40, %v3440_v58  ;;  %v3439_v37 = vadd.f32 %v12941_v40, %v3438_v63 }
 0x408   : > { %v3559_v30 = vadd.f32 %v3558_v56, %v3446_v22  ;;  %v3557_v18 = vadd.f32 %v3556_v6, %v3444_v39  ;;  %v3554_v17 = vadd.f32 %v3553_v57, %v3441_v14 }
 0x409   : > { %v2009_v13 = vpop.permute.xlu0 %2008 }
 0x40a   : > { %v1837_v8 = vpop.permute.xlu1 %1836  ;;  %v3670_v56 = vadd.f32 %v12922_v46, %v3557_v18 }
 0x40b   : > { %1923 = vst.msk [vmem:[#allocation2 + $0x378] sm:$0xff] %vm1885_vm8, %v1837_v8  ;;  %v3436_v8 = vadd.f32 %v12941_v40, %v12920_v16 }
 0x40c   : > { %2095 = vst.msk [vmem:[#allocation2 + $0x378] sm:$0xff] %vm2057_vm9, %v2009_v13  ;;  %v3075_v3 = vld [vmem:[#allocation2 + $0x360] sm:$0xff]  ;;  %v3731_v16 = vmax.f32 %v3670_v56, 0.0 }
 0x40d   : > { %v3549_v63 = vadd.f32 %v12918_v15, %v3436_v8  ;;  %v3660_v15 = vadd.f32 %v12877_v20, %v12807_v2 }
 0x40e   : > { %v12945_v4 = vpop.f32.mrf.mxu3  ;;  %v3563_v27 = vpop.f32.mrf.mxu2 }
 0x40f   : > { %v3727_v2 = vmax.f32 %v3660_v15, 0.0 }
 0x412   : > { %v2300_v33 = vpop.permute.xlu1 %2299 }
 0x413   : > { %2384 = vst.msk [vmem:[#allocation2 + $0x398] sm:$0xff] %vm1635_vm7, %v2300_v33  ;;  %v3078_v34 = vld [vmem:[#allocation2 + $0x378] sm:$0xff]  ;;  %v3672_v33 = vadd.f32 %v3671_v54, %v3559_v30  ;;  %v3650_v30 = vadd.f32 %v12833_v45, %v12580_v25 }
 0x414   : > { %v3144_v28 = vpack.c.bf16 %v3078_v34, %v3075_v3  ;;  %v3552_v3 = vadd.f32 %v3551_v49, %v3439_v37  ;;  %v3426_v49 = vadd.f32 %v12941_v40, %v12659_v24  ;;  %v3645_v37 = vadd.f32 %v12809_v12, %v12473_v42 }
 0x416   : > { %3462 = vmatmul.bf16.gmra.mxu1 %v3144_v28  ;;  %v3431_v28 = vadd.f32 %v12941_v40, %v12787_v61  ;;  %v3665_v54 = vadd.f32 %v12902_v7, %v3552_v3  ;;  %v3662_v61 = vadd.f32 %v12892_v9, %v3549_v63  ;;  %v3539_v7 = vadd.f32 %v12664_v10, %v3426_v49 }
 0x417   : > { %v3416_v10 = vadd.f32 %v12941_v40, %v12453_v48 }
 0x418   : > { %v3448_v41 = vpop.f32.mrf.mxu1  ;;  %v3544_v46 = vadd.f32 %v12793_v26, %v3431_v28  ;;  %v3728_v26 = vmax.f32 %v3662_v61, 0.0 }
 0x419   : > { %v2716_v60 = vpop.permute.xlu2 %2715  ;;  %v3449_v29 = vadd.f32 %v12941_v40, %v3448_v41  ;;  %v3667_v41 = vadd.f32 %v12914_v55, %v3554_v17  ;;  %v3421_v55 = vadd.f32 %v12941_v40, %v12510_v31  ;;  %v3655_v31 = vadd.f32 %v12843_v35, %v12715_v62 }
 0x41a   : > { %v3756_v9 = vpack.c.bf16 %v3728_v26, %v3727_v2 }
 0x41b   : > { %v3562_v59 = vadd.f32 %v3561_v0, %v3449_v29  ;;  %v12957_v0 = vpop.f32.mrf.mxu3  ;;  %v3729_v29 = vmax.f32 %v3665_v54, 0.0  ;;  %v3534_v20 = vadd.f32 %v12516_v53, %v3421_v55  ;;  %v3725_v14 = vmax.f32 %v3655_v31, 0.0 }
 0x41d   : > { %v3675_v13 = vadd.f32 %v3674_v23, %v3562_v59  ;;  %v3732_v23 = vmax.f32 %v3672_v33, 0.0  ;;  %v3657_v59 = vadd.f32 %v12867_v21, %v3544_v46  ;;  %v3652_v21 = vadd.f32 %v12838_v50, %v3539_v7 }
 0x41e   : > { %v3647_v48 = vadd.f32 %v12825_v32, %v3534_v20  ;;  %v3723_v50 = vmax.f32 %v3650_v30, 0.0 }
 0x41f   : > { %v3733_v34 = vmax.f32 %v3675_v13, 0.0  ;;  %v3758_v57 = vpack.c.bf16 %v3732_v23, %v3731_v16  ;;  %v3724_v35 = vmax.f32 %v3652_v21, 0.0  ;;  %v3640_v13 = vadd.f32 %v12753_v52, %v12362_v51 }
 0x420   : > { %v3450_v44 = vpop.f32.mrf.mxu1  ;;  %v3722_v45 = vmax.f32 %v3647_v48, 0.0 }
 0x421   : > { %v1591_v38 = vpop.permute.xlu2 %1590  ;;  %v3451_v47 = vadd.f32 %v12941_v40, %v3450_v44  ;;  %v3726_v44 = vmax.f32 %v3657_v59, 0.0  ;;  %v3754_v25 = vpack.c.bf16 %v3724_v35, %v3723_v50  ;;  %v3719_v42 = vmax.f32 %v3640_v13, 0.0 }
 0x422   : > { %1675 = vst.msk [vmem:[#allocation2 + $0x3a8] sm:$0xff] %vm1635_vm7, %v1591_v38 }
 0x423   : > { %v3564_v11 = vadd.f32 %v3563_v27, %v3451_v47  ;;  %v12973_v38 = vpop.f32.mrf.mxu3  ;;  %v3529_v47 = vadd.f32 %v12457_v5, %v3416_v10  ;;  %v3755_v62 = vpack.c.bf16 %v3726_v44, %v3725_v14 }
 0x425   : > { %v3677_v36 = vadd.f32 %v3676_v19, %v3564_v11  ;;  %v3730_v19 = vmax.f32 %v3667_v41, 0.0  ;;  %v3642_v5 = vadd.f32 %v12791_v1, %v3529_v47  ;;  %v3721_v11 = vmax.f32 %v3645_v37, 0.0  ;;  %v9884_v37 = vld [vmem:[%s14908_s6 + $0x4] sm:$0xf] }
 0x427   : > { %v3734_v58 = vmax.f32 %v3677_v36, 0.0  ;;  %v3757_v24 = vpack.c.bf16 %v3730_v19, %v3729_v29  ;;  %v3753_v3 = vpack.c.bf16 %v3722_v45, %v3721_v11 }
 0x429   : > { %v3759_v6 = vpack.c.bf16 %v3734_v58, %v3733_v34  ;;  %v2011_v18 = vpop.permute.xlu2 %2010  ;;  %v3720_v34 = vmax.f32 %v3642_v5, 0.0 }
 0x42b   : > { %3994 = vmatpush.bf16.msrb.mxu1 %v3759_v6  ;;  %v12988_v53 = vpop.f32.mrf.mxu3  ;;  %v3752_v12 = vpack.c.bf16 %v3720_v34, %v3719_v42  ;;  %v9888_v34 = vld [vmem:[%s14908_s6 + $0x20] sm:$0xf0] }
 0x42f   : > { %3995 = vmatpush.bf16.msrb.mxu1 %v3758_v57 }
 0x431   : > { %v2470_v22 = vpop.permute.xlu0 %2469  ;;  %v2474_v51 = vpop.permute.xlu2 %2473 }
 0x432   : > { %v2472_v39 = vpop.permute.xlu1 %2471  ;;  %2554 = vst.msk [vmem:[#allocation2 + $0x398] sm:$0xff] %vm1885_vm8, %v2470_v22 }
 0x433   : > { %2555 = vst.msk [vmem:[#allocation2 + $0x3b0] sm:$0xff] %vm1885_vm8, %v2472_v39  ;;  %3996 = vmatpush.bf16.msrb.mxu1 %v3757_v24  ;;  %v12999_v1 = vpop.f32.mrf.mxu3 }
 0x434   : > { %2800 = vst.msk [vmem:[#allocation2 + $0x398] sm:$0xff] %vm2057_vm9, %v2716_v60 }
 0x437   : > { %3997 = vmatpush.bf16.msrb.mxu1 %v3756_v9 }
 0x439   : > { %v2718_v60 = vpop.permute.xlu0 %2717  ;;  %v1843_v57 = vpop.permute.xlu2 %1842 }
 0x43a   : > { %v1589_v27 = vpop.permute.xlu1 %1588  ;;  %2801 = vst.msk [vmem:[#allocation2 + $0x3b0] sm:$0xff] %vm2057_vm9, %v2718_v60 }
 0x43b   : > { %1674 = vst.msk [vmem:[#allocation2 + $0x390] sm:$0xff] %vm1635_vm7, %v1589_v27  ;;  %3998 = vmatpush.bf16.msrb.mxu1 %v3755_v62  ;;  %v3082_v8 = vld [vmem:[#allocation2 + $0x398] sm:$0xff]  ;;  %v9885_v62 = vld [vmem:[%s14908_s6 + $0x8] sm:$0xf0]  ;;  %vm4159_vm7 = vcmask 519168  }
 0x43c   : > { %v8553_v27 = vld [vmem:[%s14908_s6] sm:$0xf] }
 0x43d   : > { %v8554_v35 = vor.u32 %v9885_v62, %v8553_v27  ;;  %v8589_v62 = vld [vmem:[%s14908_s6 + $0x48] sm:$0xf] }
 0x43f   : > { %3999 = vmatpush.bf16.msrb.mxu1 %v3754_v25  ;;  %v3566_v63 = vpop.f32.mrf.mxu2  ;;  %3953 = vmatmul.bf16.vlgmr.msrb.gmra.mxu3 %v8554_v35  ;;  %v8555_v25 = vld [vmem:[%s14908_s6 + $0xc] sm:$0xf0]  ;;  %v9894_v35 = vld [vmem:[%s14908_s6 + $0x50] sm:$0xf0] }
 0x441   : > { %v1839_v32 = vpop.permute.xlu0 %1838  ;;  %v3085_v17 = vld [vmem:[#allocation2 + $0x3b0] sm:$0xff] }
 0x442   : > { %v1841_v36 = vpop.permute.xlu1 %1840  ;;  %1924 = vst.msk [vmem:[#allocation2 + $0x390] sm:$0xff] %vm1885_vm8, %v1839_v32  ;;  %v3148_v33 = vpack.c.bf16 %v3085_v17, %v3082_v8 }
 0x443   : > { %1925 = vst.msk [vmem:[#allocation2 + $0x3a8] sm:$0xff] %vm1885_vm8, %v1841_v36  ;;  %4000 = vmatpush.bf16.msrb.mxu1 %v3753_v3  ;;  %v8565_v3 = vld [vmem:[%s14908_s6 + $0x18] sm:$0xf]  ;;  %vm4227_vm8 = vcmask 1048064  }
 0x444   : > { %2096 = vst.msk [vmem:[#allocation2 + $0x390] sm:$0xff] %vm2057_vm9, %v2011_v18  ;;  %3580 = vmatmul.bf16.gmra.mxu2 %v3148_v33  ;;  %v8558_v18 = vor.u32 %v9884_v37, %v8555_v25  ;;  %v8590_v37 = vor.u32 %v9894_v35, %v8589_v62 }
 0x447   : > { %4001 = vmatpush.bf16.msrb.mxu1 %v3752_v12  ;;  %v3568_v24 = vpop.f32.mrf.mxu2 }
 0x449   : > { %v2013_v52 = vpop.permute.xlu0 %2012 }
 0x44a   : > { %v2304_v58 = vpop.permute.xlu1 %2303  ;;  %2097 = vst.msk [vmem:[#allocation2 + $0x3a8] sm:$0xff] %vm2057_vm9, %v2013_v52 }
 0x44b   : > { %2386 = vst.msk [vmem:[#allocation2 + $0x3c8] sm:$0xf] %vm1676_vm11, %v2304_v58  ;;  %v3453_v56 = vpop.f32.mrf.mxu1  ;;  %v3081_v16 = vld [vmem:[#allocation2 + $0x390] sm:$0xff] }
 0x44c   : > { %v3454_v28 = vadd.f32 %v12941_v40, %v3453_v56  ;;  %2556 = vst.msk [vmem:[#allocation2 + $0x3c8] sm:$0xf] %vm1926_vm12, %v2474_v51 }
 0x44d   : > { %v13005_v6 = vpop.f32.mrf.mxu3 }
 0x44e   : > { %v13007_v23 = vadd.f32 %v3566_v63, %v3454_v28 }
 0x451   : > { %v2720_v41 = vpop.permute.xlu0 %2719  ;;  %v3084_v54 = vld [vmem:[#allocation2 + $0x3a8] sm:$0xff] }
 0x452   : > { %v1593_v49 = vpop.permute.xlu1 %1592  ;;  %2802 = vst.msk [vmem:[#allocation2 + $0x3c8] sm:$0xf] %vm2098_vm13, %v2720_v41  ;;  %v3147_v46 = vpack.c.bf16 %v3084_v54, %v3081_v16  ;;  %v8566_v16 = vor.u32 %v9888_v34, %v8565_v3  ;;  %v8603_v3 = vld [vmem:[%s14908_s6 + $0x6c] sm:$0xf0] }
 0x453   : > { %1677 = vst.msk [vmem:[#allocation2 + $0x3c0] sm:$0xf] %vm1676_vm11, %v1593_v49  ;;  %v3455_v26 = vpop.f32.mrf.mxu1 }
 0x454   : > { %1927 = vst.msk [vmem:[#allocation2 + $0x3c0] sm:$0xf] %vm1926_vm12, %v1843_v57  ;;  %3467 = vmatmul.bf16.gmra.mxu1 %v3147_v46  ;;  %v3456_v49 = vadd.f32 %v12941_v40, %v3455_v26  ;;  %3958 = vmatmul.bf16.gmra.mxu3 %v8566_v16  ;;  %v8625_v16 = vld [vmem:[%s14908_s6 + $0x90] sm:$0xf] }
 0x455   : > { %v3696_v19 = vpop.f32.mrf.mxu3 }
 0x459   : > { %v2015_v61 = vpop.permute.xlu0 %2014  ;;  %v3088_v29 = vld [vmem:[#allocation2 + $0x3c8] sm:$0xf] }
 0x45a   : > { %2099 = vst.msk [vmem:[#allocation2 + $0x3c0] sm:$0xf] %vm2098_vm13, %v2015_v61  ;;  %v3151_v15 = vpack.c.bf16 %v3088_v29, %v3088_v29 }
 0x45c   : > { %3585 = vmatmul.bf16.gmra.mxu2 %v3151_v15 }
 0x45d   : > { %v3699_v55 = vpop.f32.mrf.mxu3 }
 0x461   : > { %v3087_v22 = vld [vmem:[#allocation2 + $0x3c0] sm:$0xf] }
 0x462   : > { %v3150_v7 = vpack.c.bf16 %v3087_v22, %v3087_v22  ;;  %v3569_v22 = vadd.f32 %v3568_v24, %v3456_v49  ;;  %v8609_v49 = vld [vmem:[%s14908_s6 + $0x68] sm:$0xf] }
 0x464   : > { %3472 = vmatmul.bf16.gmra.mxu1 %v3150_v7  ;;  %v3682_v24 = vadd.f32 %v12945_v4, %v3569_v22  ;;  %v8561_v4 = vld [vmem:[%s14908_s6 + $0x8] sm:$0xf]  ;;  %v9901_v22 = vld [vmem:[%s14908_s6 + $0x88] sm:$0xf0] }
 0x465   : > { %v3701_v39 = vpop.f32.mrf.mxu3 }
 0x467   : > { %v3571_v59 = vpop.f32.mrf.mxu2 }
 0x46f   : > { %v3573_v31 = vpop.f32.mrf.mxu2 }
 0x471   : > { %v3458_v2 = vpop.f32.mrf.mxu1 }
 0x472   : > { %v3459_v56 = vadd.f32 %v12941_v40, %v3458_v2 }
 0x474   : > { %4002 = vmatmul.bf16.vlgmr.msrb.gmra.mxu1 %v8558_v18  ;;  %v3572_v15 = vadd.f32 %v3571_v59, %v3459_v56 }
 0x476   : > { %v3685_v59 = vadd.f32 %v12957_v0, %v3572_v15  ;;  %v8627_v15 = vld [vmem:[%s14908_s6 + $0x9c] sm:$0xf0] }
 0x479   : > { %v3460_v10 = vpop.f32.mrf.mxu1 }
 0x47a   : > { %v3461_v42 = vadd.f32 %v12941_v40, %v3460_v10  ;;  %v3680_v10 = vadd.f32 %v12936_v43, %v13007_v23  ;;  %v9886_v43 = vld [vmem:[%s14908_s6 + $0x10] sm:$0xf0] }
 0x47c   : > { %v3574_v46 = vadd.f32 %v3573_v31, %v3461_v42  ;;  %v8613_v42 = vld [vmem:[%s14908_s6 + $0x78] sm:$0xf] }
 0x489   : > { %v3576_v20 = vpop.f32.mrf.mxu2 }
 0x491   : > { %v3578_v44 = vpop.f32.mrf.mxu2 }
 0x493   : > { %v3463_v9 = vpop.f32.mrf.mxu1 }
 0x494   : > { %v3464_v17 = vadd.f32 %v12941_v40, %v3463_v9  ;;  %v9891_v9 = vld [vmem:[%s14908_s6 + $0x38] sm:$0xf0] }
 0x496   : > { %v3577_v28 = vadd.f32 %v3576_v20, %v3464_v17  ;;  %v8577_v20 = vld [vmem:[%s14908_s6 + $0x30] sm:$0xf] }
 0x497   : > { %v8578_v23 = vor.u32 %v9891_v9, %v8577_v20  ;;  %v9907_v20 = vld [vmem:[%s14908_s6 + $0xb8] sm:$0xf0] }
 0x499   : > { %3963 = vmatmul.bf16.gmra.mxu3 %v8578_v23 }
 0x49b   : > { %v3465_v21 = vpop.f32.mrf.mxu1 }
 0x49c   : > { %v3466_v13 = vadd.f32 %v12941_v40, %v3465_v21  ;;  %v3735_v21 = vmax.f32 %v3680_v10, 0.0  ;;  %v8645_v10 = vld [vmem:[%s14908_s6 + $0xb0] sm:$0xf] }
 0x49e   : > { %v3579_v12 = vadd.f32 %v3578_v44, %v3466_v13  ;;  %v3736_v44 = vmax.f32 %v3682_v24, 0.0  ;;  %v9897_v13 = vld [vmem:[%s14908_s6 + $0x68] sm:$0xf0] }
 0x4a0   : > { %v3692_v61 = vadd.f32 %v12999_v1, %v3579_v12  ;;  %v8567_v1 = vld [vmem:[%s14908_s6 + $0x24] sm:$0xf0]  ;;  %v9900_v12 = vld [vmem:[%s14908_s6 + $0x80] sm:$0xf0] }
 0x4a2   : > { %v3740_v39 = vmax.f32 %v3692_v61, 0.0 }
 0x4a9   : > { %3968 = vmatmul.bf16.gmra.mxu3 %v8590_v37 }
 0x4c2   : > { %v3954_v24 = vpop.f32.mrf.mxu3 }
 0x4c7   : > { %v3581_v14 = vpop.f32.mrf.mxu2 }
 0x4ca   : > { %v3956_v9 = vpop.f32.mrf.mxu3 }
 0x4cf   : > { %v3583_v60 = vpop.f32.mrf.mxu2 }
 0x4d1   : > { %v3468_v30 = vpop.f32.mrf.mxu1 }
 0x4d2   : > { %v3469_v45 = vadd.f32 %v12941_v40, %v3468_v30  ;;  %v8562_v30 = vor.u32 %v9886_v43, %v8561_v4 }
 0x4d4   : > { %v3582_v36 = vadd.f32 %v3581_v14, %v3469_v45  ;;  %v3760_v14 = vpack.c.bf16 %v3736_v44, %v3735_v21  ;;  %v9893_v45 = vld [vmem:[%s14908_s6 + $0x4c] sm:$0xf]  ;;  %v8646_v44 = vor.u32 %v9907_v20, %v8645_v10 }
 0x4d6   : > { %v3695_v41 = vadd.f32 %v13005_v6, %v3582_v36  ;;  %v3687_v6 = vadd.f32 %v12973_v38, %v3574_v46  ;;  %v3737_v38 = vmax.f32 %v3685_v59, 0.0  ;;  %v9898_v46 = vld [vmem:[%s14908_s6 + $0x70] sm:$0xf0]  ;;  %v8633_v59 = vld [vmem:[%s14908_s6 + $0x98] sm:$0xf] }
 0x4d7   : > { %v8610_v61 = vor.u32 %v9898_v46, %v8609_v49  ;;  %v3959_v21 = vpop.f32.mrf.mxu3 }
 0x4d8   : > { %v3738_v31 = vmax.f32 %v3687_v6, 0.0  ;;  %v9906_v6 = vld [vmem:[%s14908_s6 + $0xb0] sm:$0xf0] }
 0x4d9   : > { %v3470_v47 = vpop.f32.mrf.mxu1 }
 0x4da   : > { %v3471_v48 = vadd.f32 %v12941_v40, %v3470_v47  ;;  %v3761_v0 = vpack.c.bf16 %v3738_v31, %v3737_v38  ;;  %v8579_v47 = vld [vmem:[%s14908_s6 + $0x3c] sm:$0xf0] }
 0x4dc   : > { %v3584_v32 = vadd.f32 %v3583_v60, %v3471_v48  ;;  %v9890_v60 = vld [vmem:[%s14908_s6 + $0x34] sm:$0xf]  ;;  %v8573_v48 = vld [vmem:[%s14908_s6 + $0x20] sm:$0xf] }
 0x4dd   : > { %v8582_v27 = vor.u32 %v9890_v60, %v8579_v47 }
 0x4de   : > { %v3697_v52 = vadd.f32 %v3696_v19, %v3584_v32  ;;  %v3741_v19 = vmax.f32 %v3695_v41, 0.0  ;;  %v8585_v32 = vld [vmem:[%s14908_s6 + $0x38] sm:$0xf] }
 0x4df   : > { %v3586_v50 = vpop.f32.mrf.mxu2  ;;  %v3961_v23 = vpop.f32.mrf.mxu3 }
 0x4e0   : > { %v3742_v57 = vmax.f32 %v3697_v52, 0.0  ;;  %v9895_v52 = vld [vmem:[%s14908_s6 + $0x58] sm:$0xf0] }
 0x4e1   : > { %v3473_v5 = vpop.f32.mrf.mxu1 }
 0x4e2   : > { %v3474_v11 = vadd.f32 %v12941_v40, %v3473_v5  ;;  %v3763_v7 = vpack.c.bf16 %v3742_v57, %v3741_v19  ;;  %v9887_v40 = vld [vmem:[%s14908_s6 + $0x1c] sm:$0xf]  ;;  %v8591_v5 = vld [vmem:[%s14908_s6 + $0x54] sm:$0xf0] }
 0x4e3   : > { %v8570_v2 = vor.u32 %v9887_v40, %v8567_v1  ;;  %v8594_v18 = vor.u32 %v9893_v45, %v8591_v5  ;;  %v9905_v1 = vld [vmem:[%s14908_s6 + $0xac] sm:$0xf] }
 0x4e4   : > { %v3587_v8 = vadd.f32 %v3586_v50, %v3474_v11  ;;  %v9889_v50 = vld [vmem:[%s14908_s6 + $0x28] sm:$0xf0]  ;;  %v8601_v11 = vld [vmem:[%s14908_s6 + $0x60] sm:$0xf] }
 0x4e5   : > { %4007 = vmatmul.bf16.gmra.mxu1 %v8570_v2  ;;  %v8574_v25 = vor.u32 %v9889_v50, %v8573_v48  ;;  %v8602_v17 = vor.u32 %v9897_v13, %v8601_v11  ;;  %v9904_v2 = vld [vmem:[%s14908_s6 + $0xa0] sm:$0xf0] }
 0x4e6   : > { %v3700_v33 = vadd.f32 %v3699_v55, %v3587_v8  ;;  %v3690_v55 = vadd.f32 %v12988_v53, %v3577_v28  ;;  %v9892_v8 = vld [vmem:[%s14908_s6 + $0x40] sm:$0xf0]  ;;  %v9899_v28 = vld [vmem:[%s14908_s6 + $0x7c] sm:$0xf]  ;;  %v8634_v31 = vor.u32 %v9904_v2, %v8633_v59 }
 0x4e7   : > { %v3588_v51 = vpop.f32.mrf.mxu2  ;;  %v8586_v36 = vor.u32 %v9892_v8, %v8585_v32  ;;  %3973 = vmatmul.bf16.gmra.mxu3 %v8602_v17  ;;  %v9943_v17 = vld [vmem:[%s14909_s7 + $0x118] sm:$0xff] }
 0x4e8   : > { %v3743_v58 = vmax.f32 %v3700_v33, 0.0  ;;  %v3739_v26 = vmax.f32 %v3690_v55, 0.0  ;;  %v9896_v33 = vld [vmem:[%s14908_s6 + $0x64] sm:$0xf]  ;;  %v8597_v51 = vld [vmem:[%s14908_s6 + $0x50] sm:$0xf] }
 0x4e9   : > { %v3475_v63 = vpop.f32.mrf.mxu1  ;;  %v8606_v34 = vor.u32 %v9896_v33, %v8603_v3  ;;  %v8598_v56 = vor.u32 %v9895_v52, %v8597_v51  ;;  %v8621_v55 = vld [vmem:[%s14908_s6 + $0x80] sm:$0xf] }
 0x4ea   : > { %v3764_v54 = vpack.c.bf16 %v3743_v58, %v3743_v58  ;;  %v3762_v53 = vpack.c.bf16 %v3740_v39, %v3739_v26  ;;  %v8614_v58 = vor.u32 %v9900_v12, %v8613_v42  ;;  %v8615_v63 = vld [vmem:[%s14908_s6 + $0x84] sm:$0xf0]  ;;  %v8639_v26 = vld [vmem:[%s14908_s6 + $0xb4] sm:$0xf0]  ;;  %v9942_v42 = vld [vmem:[%s14909_s7 + $0x110] sm:$0xff] }
 0x4eb   : > { %v8618_v41 = vor.u32 %v9899_v28, %v8615_v63  ;;  %v8637_v39 = vld [vmem:[%s14908_s6 + $0xa8] sm:$0xf] }
 0x4ec   : > { %v3943_v29 = vsel %vm1428_vm2, %v3764_v54, 0  ;;  %v9903_v54 = vld [vmem:[%s14908_s6 + $0x98] sm:$0xf0]  ;;  %v8638_v40 = vor.u32 %v9906_v6, %v8637_v39  ;;  %v9941_v63 = vld [vmem:[%s14909_s7 + $0x108] sm:$0xff] }
 0x4ed   : > { %4046 = vmatpush.bf16.msrb.mxu2 %v3943_v29  ;;  %v8626_v57 = vor.u32 %v9903_v54, %v8625_v16  ;;  %v9902_v29 = vld [vmem:[%s14908_s6 + $0x94] sm:$0xf] }
 0x4ee   : > { %v8630_v19 = vor.u32 %v9902_v29, %v8627_v15 }
 0x4f1   : > { %4047 = vmatpush.bf16.msrb.mxu2 %v3763_v7  ;;  %v8622_v7 = vor.u32 %v9901_v22, %v8621_v55  ;;  %v4003_v38 = vpop.f32.mrf.mxu1 }
 0x4f5   : > { %4048 = vmatpush.bf16.msrb.mxu2 %v3762_v53  ;;  %4012 = vmatmul.bf16.gmra.mxu1 %v8582_v27  ;;  %v8642_v53 = vor.u32 %v9905_v1, %v8639_v26 }
 0x4f7   : > { %3978 = vmatmul.bf16.gmra.mxu3 %v8614_v58 }
 0x4f9   : > { %4049 = vmatpush.bf16.msrb.mxu2 %v3761_v0  ;;  %v4005_v0 = vpop.f32.mrf.mxu1 }
 0x4fa   : > { %v4006_v62 = vadd.f32 %v4005_v0, %v3956_v9 }
 0x4fd   : > { %4050 = vmatpush.bf16.msrb.mxu2 %v3760_v14 }
 0x500   : > { %8647 = vmatmul.msk.bf16.vlgmr.msrb.gmra.mxu2 %vm3917_vm14, %v8562_v30  ;;  %v4004_v30 = vadd.f32 %v4003_v38, %v3954_v24 }
 0x501   : > { %5178 = vmatpush.bf16.msra.mxu2 %v9943_v17 }
 0x505   : > { %4017 = vmatmul.bf16.gmra.mxu1 %v8594_v18  ;;  %5179 = vmatpush.bf16.msra.mxu2 %v9942_v42 }
 0x507   : > { %3983 = vmatmul.bf16.gmra.mxu3 %v8626_v57  ;;  %v9940_v57 = vld [vmem:[%s14909_s7 + $0x100] sm:$0xff] }
 0x509   : > { %5180 = vmatpush.bf16.msra.mxu2 %v9941_v63 }
 0x50d   : > { %5181 = vmatpush.bf16.msra.mxu2 %v9940_v57 }
 0x510   : > { %8648 = vmatmul.msk.bf16.gmra.mxu2 %vm3917_vm14, %v8574_v25 }
 0x515   : > { %4022 = vmatmul.bf16.gmra.mxu1 %v8606_v34 }
 0x517   : > { %3988 = vmatmul.bf16.gmra.mxu3 %v8638_v40 }
 0x51c   : > { %v3964_v60 = vpop.f32.mrf.mxu3 }
 0x520   : > { %8649 = vmatmul.msk.bf16.gmra.mxu2 %vm3917_vm14, %v8586_v36 }
 0x524   : > { %v3966_v33 = vpop.f32.mrf.mxu3 }
 0x525   : > { %4027 = vmatmul.bf16.gmra.mxu1 %v8618_v41 }
 0x52c   : > { %v3969_v46 = vpop.f32.mrf.mxu3 }
 0x530   : > { %8650 = vmatmul.msk.bf16.gmra.mxu2 %vm3917_vm14, %v8598_v56 }
 0x534   : > { %v3971_v38 = vpop.f32.mrf.mxu3 }
 0x535   : > { %4032 = vmatmul.bf16.gmra.mxu1 %v8630_v19 }
 0x540   : > { %8651 = vmatmul.msk.bf16.gmra.mxu2 %vm3917_vm14, %v8610_v61 }
 0x545   : > { %4037 = vmatmul.bf16.gmra.mxu1 %v8642_v53 }
 0x550   : > { %8652 = vmatmul.msk.bf16.gmra.mxu2 %vm3917_vm14, %v8622_v7 }
 0x560   : > { %8653 = vmatmul.msk.bf16.gmra.mxu2 %vm3917_vm14, %v8634_v31 }
 0x562   : > { %v4008_v4 = vpop.f32.mrf.mxu1 }
 0x563   : > { %v4009_v11 = vadd.f32 %v4008_v4, %v3959_v21 }
 0x56a   : > { %v4010_v43 = vpop.f32.mrf.mxu1 }
 0x56b   : > { %v4011_v41 = vadd.f32 %v4010_v43, %v3961_v23 }
 0x570   : > { %8654 = vmatmul.msk.bf16.gmra.mxu2 %vm3917_vm14, %v8646_v44 }
 0x572   : > { %v4013_v47 = vpop.f32.mrf.mxu1 }
 0x573   : > { %v4014_v22 = vadd.f32 %v4013_v47, %v3964_v60 }
 0x57a   : > { %v13188_v36 = vpop.f32.mrf.mxu1 }
 0x582   : > { %v4018_v49 = vpop.f32.mrf.mxu1 }
 0x583   : > { %v4052_v14 = vpop.f32.mrf.mxu2 }
 0x584   : > { %v4053_v27 = vadd.f32 %v4052_v14, %v4004_v30  ;;  %v4016_v30 = vadd.f32 %v13188_v36, %v3966_v33 }
 0x586   : > { %v4106_v50 = vrot.slane %v4053_v27, 5  ;;  %v4161_v37 = vrot.slane %v4053_v27, 6  ;;  %v4242_v25 = vrot.slane %v4053_v27, 7 }
 0x58a   : > { %v4020_v24 = vpop.f32.mrf.mxu1 }
 0x58b   : > { %v4054_v35 = vpop.f32.mrf.mxu2  ;;  %v4021_v57 = vadd.f32 %v4020_v24, %v3971_v38 }
 0x58c   : > { %v4055_v48 = vadd.f32 %v4054_v35, %v4006_v62 }
 0x58e   : > { %v4107_v45 = vrot.slane %v4055_v48, 5  ;;  %v4162_v5 = vrot.slane %v4055_v48, 6  ;;  %v4243_v18 = vrot.slane %v4055_v48, 7 }
 0x590   : > { %v4163_v13 = vsel %vm1428_vm2, %v4161_v37, %v4162_v5  ;;  %v4108_v32 = vsel %vm1261_vm3, %v4106_v50, %v4107_v45  ;;  %v4244_v8 = vsel %vm1678_vm1, %v4242_v25, %v4243_v18  ;;  %v4019_v50 = vadd.f32 %v4018_v49, %v3969_v46 }
 0x591   : > { %4188 = vrot.lane.b32.xlu1 %v4163_v13, %s10362_s29  ;;  %4147 = vst.msk [vmem:[#allocation3] sm:$0xff] %vm4146_vm15, %v4108_v32 }
 0x592   : > { %4282 = vst.msk [vmem:[#allocation3 + $0x8] sm:$0xff] %vm4146_vm15, %v4244_v8 }
 0x593   : > { %v4057_v3 = vpop.f32.mrf.mxu2 }
 0x594   : > { %v4058_v34 = vadd.f32 %v4057_v3, %v4009_v11 }
 0x596   : > { %4350 = vst.msk [vmem:[#allocation3 + $0x10] sm:$0xff] %vm4146_vm15, %v4058_v34  ;;  %v4164_v12 = vrot.slane %v4058_v34, 6  ;;  %v4245_v51 = vrot.slane %v4058_v34, 7  ;;  %v4109_v52 = vrot.slane %v4058_v34, 5  ;;  %v4363_v15 = vrot.slane %v4058_v34, 1 }
 0x598   : > { %v4165_v58 = vsel %vm1428_vm2, %v4162_v5, %v4164_v12  ;;  %v4110_v56 = vsel %vm1261_vm3, %v4107_v45, %v4109_v52  ;;  %v13198_v28 = vsel %vm1678_vm1, %v4243_v18, %v4245_v51  ;;  %v3974_v5 = vpop.f32.mrf.mxu3  ;;  %v4023_v18 = vpop.f32.mrf.mxu1 }
 0x599   : > { %4190 = vrot.lane.b32.xlu2 %v4165_v58, %s10362_s29  ;;  %4148 = vst.msk [vmem:[#allocation3 + $0x28] sm:$0xff] %vm4146_vm15, %v4110_v56 }
 0x59a   : > { %4283 = vst.msk [vmem:[#allocation3 + $0x30] sm:$0xff] %vm4146_vm15, %v13198_v28 }
 0x59b   : > { %v4059_v16 = vpop.f32.mrf.mxu2 }
 0x59c   : > { %v4060_v54 = vadd.f32 %v4059_v16, %v4011_v41 }
 0x59e   : > { %4351 = vst.msk [vmem:[#allocation3 + $0x38] sm:$0xff] %vm4146_vm15, %v4060_v54  ;;  %v4166_v61 = vrot.slane %v4060_v54, 6  ;;  %v4247_v29 = vrot.slane %v4060_v54, 7  ;;  %v4364_v19 = vrot.slane %v4060_v54, 1  ;;  %v4111_v55 = vrot.slane %v4060_v54, 5 }
 0x59f   : > { %v4546_v59 = vrot.slane %v4060_v54, 3  ;;  %v4469_v2 = vrot.slane %v4060_v54, 2 }
 0x5a0   : > { %v4167_v7 = vsel %vm1428_vm2, %v4164_v12, %v4166_v61  ;;  %v13213_v39 = vsel %vm1678_vm1, %v4245_v51, %v4247_v29  ;;  %v13216_v6 = vsel %vm2141_vm4, %v4363_v15, %v4364_v19  ;;  %v4112_v40 = vsel %vm1261_vm3, %v4109_v52, %v4111_v55 }
 0x5a1   : > { %4192 = vrot.lane.b32.xlu0 %v4167_v7, %s10362_s29  ;;  %4284 = vst.msk [vmem:[#allocation3 + $0x58] sm:$0xff] %vm4146_vm15, %v13213_v39 }
 0x5a2   : > { %4149 = vst.msk [vmem:[#allocation3 + $0x50] sm:$0xff] %vm4146_vm15, %v4112_v40 }
 0x5a3   : > { %v4062_v1 = vpop.f32.mrf.mxu2 }
 0x5a4   : > { %v4063_v26 = vadd.f32 %v4062_v1, %v4014_v22 }
 0x5a6   : > { %v4547_v53 = vrot.slane %v4063_v26, 3  ;;  %4352 = vst.msk [vmem:[#allocation3 + $0x60] sm:$0xff] %vm4146_vm15, %v4063_v26  ;;  %v4168_v31 = vrot.slane %v4063_v26, 6  ;;  %v4470_v10 = vrot.slane %v4063_v26, 2  ;;  %v4113_v20 = vrot.slane %v4063_v26, 5 }
 0x5a7   : > { %v4366_v9 = vrot.slane %v4063_v26, 1  ;;  %v4249_v0 = vrot.slane %v4063_v26, 7  ;;  %v4024_v26 = vadd.f32 %v4023_v18, %v3974_v5 }
 0x5a8   : > { %v4548_v44 = vsel %vm2803_vm5, %v4546_v59, %v4547_v53  ;;  %v4169_v21 = vsel %vm1428_vm2, %v4166_v61, %v4168_v31  ;;  %v13227_v4 = vsel %vm2557_vm6, %v4469_v2, %v4470_v10  ;;  %v4114_v43 = vsel %vm1261_vm3, %v4111_v55, %v4113_v20  ;;  %v4025_v61 = vpop.f32.mrf.mxu1 }
 0x5a9   : > { %4584 = vst.msk [vmem:[#allocation3 + $0x20] sm:$0xff] %vm4146_vm15, %v4548_v44  ;;  %4194 = vrot.lane.b32.xlu1 %v4169_v21, %s10362_s29  ;;  %v13233_v23 = vsel %vm2141_vm4, %v4364_v19, %v4366_v9  ;;  %v13236_v14 = vsel %vm1678_vm1, %v4247_v29, %v4249_v0  ;;  %v3976_v29 = vpop.f32.mrf.mxu3 }
 0x5aa   : > { %4150 = vst.msk [vmem:[#allocation3 + $0x78] sm:$0xff] %vm4146_vm15, %v4114_v43 }
 0x5ab   : > { %v4064_v60 = vpop.f32.mrf.mxu2  ;;  %4456 = vst.msk [vmem:[#allocation3 + $0x18] sm:$0xff] %vm4146_vm15, %v13233_v23 }
 0x5ac   : > { %v4065_v47 = vadd.f32 %v4064_v60, %v4016_v30  ;;  %4285 = vst.msk [vmem:[#allocation3 + $0x80] sm:$0xff] %vm4146_vm15, %v13236_v14 }
 0x5ae   : > { %v4549_v27 = vrot.slane %v4065_v47, 3  ;;  %4353 = vst.msk [vmem:[#allocation3 + $0x88] sm:$0xff] %vm4146_vm15, %v4065_v47  ;;  %v4170_v62 = vrot.slane %v4065_v47, 6  ;;  %v4472_v35 = vrot.slane %v4065_v47, 2  ;;  %v4115_v48 = vrot.slane %v4065_v47, 5 }
 0x5af   : > { %v4251_v37 = vrot.slane %v4065_v47, 7  ;;  %v4368_v25 = vrot.slane %v4065_v47, 1 }
 0x5b0   : > { %v4550_v45 = vsel %vm2803_vm5, %v4547_v53, %v4549_v27  ;;  %v4171_v11 = vsel %vm1428_vm2, %v4168_v31, %v4170_v62  ;;  %v13248_v13 = vsel %vm2557_vm6, %v4470_v10, %v4472_v35  ;;  %v4116_v32 = vsel %vm1261_vm3, %v4113_v20, %v4115_v48  ;;  %v4601_v16 = vld [vmem:[#allocation3 + $0x20] sm:$0xff]  ;;  %v4028_v44 = vpop.f32.mrf.mxu1 }
 0x5b1   : > { %4585 = vst.msk [vmem:[#allocation3 + $0x48] sm:$0xff] %vm4146_vm15, %v4550_v45  ;;  %4196 = vrot.lane.b32.xlu2 %v4171_v11, %s10362_s29  ;;  %v13254_v8 = vsel %vm1678_vm1, %v4249_v0, %v4251_v37  ;;  %v13257_v17 = vsel %vm2141_vm4, %v4366_v9, %v4368_v25  ;;  %v3979_v21 = vpop.f32.mrf.mxu3  ;;  %v9915_v45 = vld [vmem:[%s14909_s7 + $0x38] sm:$0xff] }
 0x5b2   : > { %4151 = vst.msk [vmem:[#allocation3 + $0xa0] sm:$0xff] %vm4146_vm15, %v4116_v32  ;;  %v4026_v32 = vadd.f32 %v4025_v61, %v3976_v29  ;;  %5010 = vmatpush.bf16.msrb.mxu0 %v9915_v45  ;;  %v9914_v29 = vld [vmem:[%s14909_s7 + $0x30] sm:$0xff] }
 0x5b3   : > { %v4067_v36 = vpop.f32.mrf.mxu2  ;;  %4286 = vst.msk [vmem:[#allocation3 + $0xa8] sm:$0xff] %vm4146_vm15, %v13254_v8 }
 0x5b4   : > { %v4068_v33 = vadd.f32 %v4067_v36, %v4019_v50  ;;  %4457 = vst.msk [vmem:[#allocation3 + $0x40] sm:$0xff] %vm4146_vm15, %v13257_v17 }
 0x5b6   : > { %v4551_v3 = vrot.slane %v4068_v33, 3  ;;  %4354 = vst.msk [vmem:[#allocation3 + $0xb0] sm:$0xff] %vm4146_vm15, %v4068_v33  ;;  %v4172_v34 = vrot.slane %v4068_v33, 6  ;;  %v4117_v42 = vrot.slane %v4068_v33, 5  ;;  %v4474_v12 = vrot.slane %v4068_v33, 2  ;;  %5011 = vmatpush.bf16.msrb.mxu0 %v9914_v29 }
 0x5b7   : > { %v4370_v51 = vrot.slane %v4068_v33, 1  ;;  %v4253_v52 = vrot.slane %v4068_v33, 7 }
 0x5b8   : > { %v4552_v58 = vsel %vm2803_vm5, %v4549_v27, %v4551_v3  ;;  %v4173_v56 = vsel %vm1428_vm2, %v4170_v62, %v4172_v34  ;;  %v4118_v63 = vsel %vm1261_vm3, %v4115_v48, %v4117_v42  ;;  %v13269_v41 = vsel %vm2557_vm6, %v4472_v35, %v4474_v12  ;;  %v4606_v54 = vld [vmem:[#allocation3 + $0x48] sm:$0xff] }
 0x5b9   : > { %4586 = vst.msk [vmem:[#allocation3 + $0x70] sm:$0xff] %vm4146_vm15, %v4552_v58  ;;  %4198 = vrot.lane.b32.xlu0 %v4173_v56, %s10362_s29  ;;  %v13274_v49 = vsel %vm2141_vm4, %v4368_v25, %v4370_v51  ;;  %v4666_v46 = vpack.c.bf16 %v4606_v54, %v4601_v16  ;;  %v13278_v15 = vsel %vm1678_vm1, %v4251_v37, %v4253_v52 }
 0x5ba   : > { %4152 = vst.msk [vmem:[#allocation3 + $0xc8] sm:$0xff] %vm4146_vm15, %v4118_v63  ;;  %v4029_v56 = vadd.f32 %v4028_v44, %v3979_v21 }
 0x5bb   : > { %v4069_v19 = vpop.f32.mrf.mxu2  ;;  %4458 = vst.msk [vmem:[#allocation3 + $0x68] sm:$0xff] %vm4146_vm15, %v13274_v49  ;;  %8799 = vmatmul.msk.bf16.vlgmr.msra.gmra.mxu2 %vm4146_vm15, %v4666_v46 }
 0x5bc   : > { %v4070_v55 = vadd.f32 %v4069_v19, %v4021_v57  ;;  %4287 = vst.msk [vmem:[#allocation3 + $0xd0] sm:$0xff] %vm4146_vm15, %v13278_v15 }
 0x5be   : > { %v4553_v22 = vrot.slane %v4070_v55, 3  ;;  %4355 = vst.msk [vmem:[#allocation3 + $0xd8] sm:$0xff] %vm4146_vm15, %v4070_v55  ;;  %v4174_v7 = vrot.slane %v4070_v55, 6  ;;  %v4119_v40 = vrot.slane %v4070_v55, 5  ;;  %v4476_v1 = vrot.slane %v4070_v55, 2 }
 0x5bf   : > { %v4255_v59 = vrot.slane %v4070_v55, 7  ;;  %v4372_v2 = vrot.slane %v4070_v55, 1 }
 0x5c0   : > { %v4554_v53 = vsel %vm2803_vm5, %v4551_v3, %v4553_v22  ;;  %v4175_v31 = vsel %vm1428_vm2, %v4172_v34, %v4174_v7  ;;  %v4120_v24 = vsel %vm1261_vm3, %v4117_v42, %v4119_v40  ;;  %v13290_v38 = vsel %vm2557_vm6, %v4474_v12, %v4476_v1  ;;  %v4611_v11 = vld [vmem:[#allocation3 + $0x70] sm:$0xff]  ;;  %v4030_v42 = vpop.f32.mrf.mxu1 }
 0x5c1   : > { %4587 = vst.msk [vmem:[#allocation3 + $0x98] sm:$0xff] %vm4146_vm15, %v4554_v53  ;;  %4200 = vrot.lane.b32.xlu1 %v4175_v31, %s10362_s29  ;;  %v13295_v10 = vsel %vm1678_vm1, %v4253_v52, %v4255_v59  ;;  %v13298_v20 = vsel %vm2141_vm4, %v4370_v51, %v4372_v2  ;;  %v3981_v51 = vpop.f32.mrf.mxu3  ;;  %v9912_v53 = vld [vmem:[%s14909_s7 + $0x20] sm:$0xff] }
 0x5c2   : > { %4153 = vst.msk [vmem:[#allocation3 + $0xf0] sm:$0xff] %vm4146_vm15, %v4120_v24 }
 0x5c3   : > { %v4072_v9 = vpop.f32.mrf.mxu2  ;;  %4288 = vst.msk [vmem:[#allocation3 + $0xf8] sm:$0xff] %vm4146_vm15, %v13295_v10 }
 0x5c4   : > { %v4073_v0 = vadd.f32 %v4072_v9, %v4024_v26  ;;  %4459 = vst.msk [vmem:[#allocation3 + $0x90] sm:$0xff] %vm4146_vm15, %v13298_v20 }
 0x5c6   : > { %v4555_v43 = vrot.slane %v4073_v0, 3  ;;  %4356 = vst.msk [vmem:[#allocation3 + $0x100] sm:$0xff] %vm4146_vm15, %v4073_v0  ;;  %v4176_v30 = vrot.slane %v4073_v0, 6  ;;  %v4121_v60 = vrot.slane %v4073_v0, 5  ;;  %v4478_v47 = vrot.slane %v4073_v0, 2 }
 0x5c7   : > { %v4257_v27 = vrot.slane %v4073_v0, 7  ;;  %v4374_v62 = vrot.slane %v4073_v0, 1 }
 0x5c8   : > { %v4556_v35 = vsel %vm2803_vm5, %v4553_v22, %v4555_v43  ;;  %v4177_v48 = vsel %vm1428_vm2, %v4174_v7, %v4176_v30  ;;  %v4122_v50 = vsel %vm1261_vm3, %v4119_v40, %v4121_v60  ;;  %v13310_v37 = vsel %vm2557_vm6, %v4476_v1, %v4478_v47  ;;  %v4616_v25 = vld [vmem:[#allocation3 + $0x98] sm:$0xff]  ;;  %v9913_v7 = vld [vmem:[%s14909_s7 + $0x28] sm:$0xff]  ;;  %v4033_v44 = vpop.f32.mrf.mxu1 }
 0x5c9   : > { %4588 = vst.msk [vmem:[#allocation3 + $0xc0] sm:$0xff] %vm4146_vm15, %v4556_v35  ;;  %4202 = vrot.lane.b32.xlu2 %v4177_v48, %s10362_s29  ;;  %v13318_v5 = vsel %vm2141_vm4, %v4372_v2, %v4374_v62  ;;  %v13321_v18 = vsel %vm1678_vm1, %v4255_v59, %v4257_v27  ;;  %v4671_v36 = vpack.c.bf16 %v4616_v25, %v4611_v11  ;;  %v3984_v21 = vpop.f32.mrf.mxu3  ;;  %v9911_v25 = vld [vmem:[%s14909_s7 + $0x18] sm:$0xff] }
 0x5ca   : > { %4154 = vst.msk [vmem:[#allocation3 + $0x118] sm:$0xff] %vm4146_vm15, %v4122_v50  ;;  %5012 = vmatpush.bf16.msrb.mxu0 %v9913_v7  ;;  %v4031_v35 = vadd.f32 %v4030_v42, %v3981_v51 }
 0x5cb   : > { %v4074_v33 = vpop.f32.mrf.mxu2  ;;  %4460 = vst.msk [vmem:[#allocation3 + $0xb8] sm:$0xff] %vm4146_vm15, %v13318_v5  ;;  %8800 = vmatmul.msk.bf16.gmra.mxu2 %vm4146_vm15, %v4671_v36 }
 0x5cc   : > { %v4075_v3 = vadd.f32 %v4074_v33, %v4026_v32  ;;  %4289 = vst.msk [vmem:[#allocation3 + $0x120] sm:$0xff] %vm4146_vm15, %v13321_v18 }
 0x5ce   : > { %v4557_v34 = vrot.slane %v4075_v3, 3  ;;  %4357 = vst.msk [vmem:[#allocation3 + $0x128] sm:$0xff] %vm4146_vm15, %v4075_v3  ;;  %v4178_v12 = vrot.slane %v4075_v3, 6  ;;  %v4123_v52 = vrot.slane %v4075_v3, 5  ;;  %v4480_v58 = vrot.slane %v4075_v3, 2  ;;  %5013 = vmatpush.bf16.msrb.mxu0 %v9912_v53 }
 0x5cf   : > { %v4259_v63 = vrot.slane %v4075_v3, 7  ;;  %v4376_v16 = vrot.slane %v4075_v3, 1  ;;  %v4034_v3 = vadd.f32 %v4033_v44, %v3984_v21 }
 0x5d0   : > { %v4558_v54 = vsel %vm2803_vm5, %v4555_v43, %v4557_v34  ;;  %v4179_v46 = vsel %vm1428_vm2, %v4176_v30, %v4178_v12  ;;  %v4124_v57 = vsel %vm1261_vm3, %v4121_v60, %v4123_v52  ;;  %v13334_v61 = vsel %vm2557_vm6, %v4478_v47, %v4480_v58 }
 0x5d1   : > { %4589 = vst.msk [vmem:[#allocation3 + $0xe8] sm:$0xff] %vm4146_vm15, %v4558_v54  ;;  %4204 = vrot.lane.b32.xlu0 %v4179_v46, %s10362_s29  ;;  %v13342_v19 = vsel %vm1678_vm1, %v4257_v27, %v4259_v63  ;;  %v13345_v55 = vsel %vm2141_vm4, %v4374_v62, %v4376_v16  ;;  %v4621_v62 = vld [vmem:[#allocation3 + $0xc0] sm:$0xff]  ;;  %v3986_v54 = vpop.f32.mrf.mxu3  ;;  %v4035_v46 = vpop.f32.mrf.mxu1 }
 0x5d2   : > { %4155 = vst.msk [vmem:[#allocation3 + $0x140] sm:$0xff] %vm4146_vm15, %v4124_v57  ;;  %5014 = vmatpush.bf16.msrb.mxu0 %v9911_v25 }
 0x5d3   : > { %v4077_v22 = vpop.f32.mrf.mxu2  ;;  %4290 = vst.msk [vmem:[#allocation3 + $0x148] sm:$0xff] %vm4146_vm15, %v13342_v19 }
 0x5d4   : > { %v4078_v40 = vadd.f32 %v4077_v22, %v4029_v56  ;;  %4461 = vst.msk [vmem:[#allocation3 + $0xe0] sm:$0xff] %vm4146_vm15, %v13345_v55  ;;  %v9909_v22 = vld [vmem:[%s14909_s7 + $0x8] sm:$0xff] }
 0x5d6   : > { %v4559_v1 = vrot.slane %v4078_v40, 3  ;;  %4358 = vst.msk [vmem:[#allocation3 + $0x150] sm:$0xff] %vm4146_vm15, %v4078_v40  ;;  %v4180_v26 = vrot.slane %v4078_v40, 6  ;;  %v4125_v59 = vrot.slane %v4078_v40, 5  ;;  %v4482_v2 = vrot.slane %v4078_v40, 2 }
 0x5d7   : > { %v4261_v31 = vrot.slane %v4078_v40, 7  ;;  %v4378_v24 = vrot.slane %v4078_v40, 1 }
 0x5d8   : > { %v4560_v9 = vsel %vm2803_vm5, %v4557_v34, %v4559_v1  ;;  %v4181_v0 = vsel %vm1428_vm2, %v4178_v12, %v4180_v26  ;;  %v4126_v43 = vsel %vm1261_vm3, %v4123_v52, %v4125_v59  ;;  %v13363_v30 = vsel %vm2557_vm6, %v4480_v58, %v4482_v2  ;;  %v4626_v60 = vld [vmem:[#allocation3 + $0xe8] sm:$0xff]  ;;  %v9910_v34 = vld [vmem:[%s14909_s7 + $0x10] sm:$0xff] }
 0x5d9   : > { %4590 = vst.msk [vmem:[#allocation3 + $0x110] sm:$0xff] %vm4146_vm15, %v4560_v9  ;;  %4206 = vrot.lane.b32.xlu1 %v4181_v0, %s10362_s29  ;;  %v13368_v47 = vsel %vm2141_vm4, %v4376_v16, %v4378_v24  ;;  %v13371_v27 = vsel %vm1678_vm1, %v4259_v63, %v4261_v31  ;;  %v4676_v48 = vpack.c.bf16 %v4626_v60, %v4621_v62 }
 0x5da   : > { %4156 = vst.msk [vmem:[#allocation3 + $0x168] sm:$0xff] %vm4146_vm15, %v4126_v43  ;;  %5015 = vmatpush.bf16.msrb.mxu0 %v9910_v34 }
 0x5db   : > { %v4079_v50 = vpop.f32.mrf.mxu2  ;;  %4462 = vst.msk [vmem:[#allocation3 + $0x108] sm:$0xff] %vm4146_vm15, %v13368_v47  ;;  %8801 = vmatmul.msk.bf16.gmra.mxu2 %vm4146_vm15, %v4676_v48  ;;  %v4038_v48 = vpop.f32.mrf.mxu1 }
 0x5dc   : > { %v4080_v45 = vadd.f32 %v4079_v50, %v4031_v35  ;;  %4291 = vst.msk [vmem:[#allocation3 + $0x170] sm:$0xff] %vm4146_vm15, %v13371_v27  ;;  %v4036_v35 = vadd.f32 %v4035_v46, %v3986_v54  ;;  %v3989_v50 = vpop.f32.mrf.mxu3 }
 0x5de   : > { %v4561_v11 = vrot.slane %v4080_v45, 3  ;;  %4359 = vst.msk [vmem:[#allocation3 + $0x178] sm:$0xff] %vm4146_vm15, %v4080_v45  ;;  %v4182_v32 = vrot.slane %v4080_v45, 6  ;;  %v4127_v36 = vrot.slane %v4080_v45, 5  ;;  %v4484_v33 = vrot.slane %v4080_v45, 2  ;;  %5016 = vmatpush.bf16.msrb.mxu0 %v9909_v22 }
 0x5df   : > { %v4263_v42 = vrot.slane %v4080_v45, 7  ;;  %v4380_v12 = vrot.slane %v4080_v45, 1 }
 0x5e0   : > { %v4562_v51 = vsel %vm2803_vm5, %v4559_v1, %v4561_v11  ;;  %v4183_v52 = vsel %vm1428_vm2, %v4180_v26, %v4182_v32  ;;  %v4128_v58 = vsel %vm1261_vm3, %v4125_v59, %v4127_v36  ;;  %v13390_v56 = vsel %vm2557_vm6, %v4482_v2, %v4484_v33  ;;  %v9908_v59 = vld [vmem:[%s14909_s7] sm:$0xff]  ;;  %v4631_v44 = vld [vmem:[#allocation3 + $0x110] sm:$0xff] }
 0x5e1   : > { %4591 = vst.msk [vmem:[#allocation3 + $0x138] sm:$0xff] %vm4146_vm15, %v4562_v51  ;;  %4208 = vrot.lane.b32.xlu2 %v4183_v52, %s10362_s29  ;;  %v13395_v63 = vsel %vm1678_vm1, %v4261_v31, %v4263_v42  ;;  %v13398_v16 = vsel %vm2141_vm4, %v4378_v24, %v4380_v12 }
 0x5e2   : > { %4157 = vst.msk [vmem:[#allocation3 + $0x190] sm:$0xff] %vm4146_vm15, %v4128_v58  ;;  %5017 = vmatpush.bf16.msrb.mxu0 %v9908_v59 }
 0x5e3   : > { %v4082_v57 = vpop.f32.mrf.mxu2  ;;  %4292 = vst.msk [vmem:[#allocation3 + $0x198] sm:$0xff] %vm4146_vm15, %v13395_v63 }
 0x5e4   : > { %v4083_v29 = vadd.f32 %v4082_v57, %v4034_v3  ;;  %4463 = vst.msk [vmem:[#allocation3 + $0x130] sm:$0xff] %vm4146_vm15, %v13398_v16  ;;  %v3991_v22 = vpop.f32.mrf.mxu3 }
 0x5e6   : > { %v4563_v7 = vrot.slane %v4083_v29, 3  ;;  %4360 = vst.msk [vmem:[#allocation3 + $0x1a0] sm:$0xff] %vm4146_vm15, %v4083_v29  ;;  %v4184_v40 = vrot.slane %v4083_v29, 6  ;;  %v4129_v1 = vrot.slane %v4083_v29, 5  ;;  %v4486_v26 = vrot.slane %v4083_v29, 2 }
 0x5e7   : > { %v4265_v2 = vrot.slane %v4083_v29, 7  ;;  %v4382_v53 = vrot.slane %v4083_v29, 1  ;;  %v4040_v29 = vpop.f32.mrf.mxu1 }
 0x5e8   : > { %v4564_v31 = vsel %vm2803_vm5, %v4561_v11, %v4563_v7  ;;  %v4185_v24 = vsel %vm1428_vm2, %v4182_v32, %v4184_v40  ;;  %v4130_v9 = vsel %vm1261_vm3, %v4127_v36, %v4129_v1  ;;  %v13416_v0 = vsel %vm2557_vm6, %v4484_v33, %v4486_v26  ;;  %v4636_v21 = vld [vmem:[#allocation3 + $0x138] sm:$0xff] }
 0x5e9   : > { %4592 = vst.msk [vmem:[#allocation3 + $0x160] sm:$0xff] %vm4146_vm15, %v4564_v31  ;;  %4210 = vrot.lane.b32.xlu0 %v4185_v24, %s10362_s29  ;;  %4298 = vrot.lane.b32.xlu2 %v13198_v28, %s10362_s29  ;;  %v13423_v43 = vsel %vm2141_vm4, %v4380_v12, %v4382_v53  ;;  %v13426_v60 = vsel %vm1678_vm1, %v4263_v42, %v4265_v2 }
 0x5ea   : > { %v4681_v62 = vpack.c.bf16 %v4636_v21, %v4631_v44  ;;  %4158 = vst.msk [vmem:[#allocation3 + $0x1b8] sm:$0xff] %vm4146_vm15, %v4130_v9  ;;  %v4039_v33 = vadd.f32 %v4038_v48, %v3989_v50 }
 0x5eb   : > { %v4084_v25 = vpop.f32.mrf.mxu2  ;;  %4464 = vst.msk [vmem:[#allocation3 + $0x158] sm:$0xff] %vm4146_vm15, %v13423_v43 }
 0x5ec   : > { %v4085_v45 = vadd.f32 %v4084_v25, %v4036_v35  ;;  %4293 = vst.msk [vmem:[#allocation3 + $0x1c0] sm:$0xff] %vm4146_vm15, %v13426_v60  ;;  %8802 = vmatmul.msk.bf16.gmra.mxu2 %vm4146_vm15, %v4681_v62 }
 0x5ee   : > { %4361 = vst.msk [vmem:[#allocation3 + $0x1c8] sm:$0xff] %vm4146_vm15, %v4085_v45  ;;  %v4186_v28 = vrot.slane %v4085_v45, 6  ;;  %v4131_v11 = vrot.slane %v4085_v45, 5  ;;  %v4488_v32 = vrot.slane %v4085_v45, 2  ;;  %v4565_v36 = vrot.slane %v4085_v45, 3 }
 0x5ef   : > { %v4267_v3 = vrot.slane %v4085_v45, 7  ;;  %v4384_v34 = vrot.slane %v4085_v45, 1 }
 0x5f0   : > { %v4187_v42 = vsel %vm1428_vm2, %v4184_v40, %v4186_v28  ;;  %v4132_v12 = vsel %vm1261_vm3, %v4129_v1, %v4131_v11  ;;  %v13438_v51 = vsel %vm2557_vm6, %v4486_v26, %v4488_v32  ;;  %v4566_v52 = vsel %vm2803_vm5, %v4563_v7, %v4565_v36  ;;  %v4641_v24 = vld [vmem:[#allocation3 + $0x160] sm:$0xff]  ;;  %v9939_v28 = vld [vmem:[%s14909_s7 + $0xf8] sm:$0xff] }
 0x5f1   : > { %4212 = vrot.lane.b32.xlu1 %v4187_v42, %s10362_s29  ;;  %4300 = vrot.lane.b32.xlu0 %v13213_v39, %s10362_s29  ;;  %4160 = vst.msk [vmem:[#allocation3 + $0x1e0] sm:$0xf] %vm4159_vm7, %v4132_v12  ;;  %v13446_v58 = vsel %vm1678_vm1, %v4265_v2, %v4267_v3  ;;  %v13452_v54 = vsel %vm2141_vm4, %v4382_v53, %v4384_v34  ;;  %v9919_v11 = vld [vmem:[%s14909_s7 + $0x58] sm:$0xff] }
 0x5f2   : > { %4390 = vrot.lane.b32.xlu2 %v13233_v23, %s10362_s29  ;;  %4593 = vst.msk [vmem:[#allocation3 + $0x188] sm:$0xff] %vm4146_vm15, %v4566_v52  ;;  %v4041_v26 = vadd.f32 %v4040_v29, %v3991_v22  ;;  %5133 = vmatpush.bf16.msra.mxu1 %v9939_v28  ;;  %v9917_v52 = vld [vmem:[%s14909_s7 + $0x48] sm:$0xff]  ;;  %v9916_v29 = vld [vmem:[%s14909_s7 + $0x40] sm:$0xff] }
 0x5f3   : > { %v4191_v46 = vpop.permute.xlu2 %4190  ;;  %v4087_v57 = vpop.f32.mrf.mxu2  ;;  %4294 = vst.msk [vmem:[#allocation3 + $0x1e8] sm:$0xf] %vm4159_vm7, %v13446_v58 }
 0x5f4   : > { %4229 = vst.msk [vmem:[#allocation3 + $0x28] sm:$0xff] %vm4227_vm8, %v4191_v46  ;;  %v13457_v39 = vadd.f32 %v4087_v57, %v4039_v33  ;;  %v9918_v33 = vld [vmem:[%s14909_s7 + $0x50] sm:$0xff]  ;;  %v9928_v57 = vld [vmem:[%s14909_s7 + $0xa0] sm:$0xff] }
 0x5f5   : > { %4465 = vst.msk [vmem:[#allocation3 + $0x180] sm:$0xff] %vm4146_vm15, %v13452_v54 }
 0x5f6   : > { %v4567_v23 = vrot.slane %v13457_v39, 3  ;;  %4362 = vst.msk [vmem:[#allocation3 + $0x1f0] sm:$0xf] %vm4159_vm7, %v13457_v39  ;;  %v4490_v7 = vrot.slane %v13457_v39, 2  ;;  %v13466_v40 = vrot.slane %v13457_v39, 1  ;;  %v4296_v1 = vrot.slane %v13457_v39, 7 }
 0x5f8   : > { %v4568_v59 = vsel %vm2803_vm5, %v4565_v36, %v4567_v23  ;;  %v13473_v2 = vsel %vm2557_vm6, %v4488_v32, %v4490_v7  ;;  %v13477_v53 = vsel %vm2141_vm4, %v4384_v34, %v13466_v40  ;;  %v13480_v31 = vsel %vm1678_vm1, %v4267_v3, %v4296_v1  ;;  %v9931_v32 = vld [vmem:[%s14909_s7 + $0xb8] sm:$0xff]  ;;  %v9938_v36 = vld [vmem:[%s14909_s7 + $0xf0] sm:$0xff]  ;;  %v9937_v34 = vld [vmem:[%s14909_s7 + $0xe8] sm:$0xff] }
 0x5f9   : > { %4388 = vrot.lane.b32.xlu1 %v13216_v6, %s10362_s29  ;;  %4494 = vrot.lane.b32.xlu0 %v13227_v4, %s10362_s29  ;;  %4594 = vst.msk [vmem:[#allocation3 + $0x1b0] sm:$0xff] %vm4146_vm15, %v4568_v59  ;;  %v4646_v9 = vld [vmem:[#allocation3 + $0x188] sm:$0xff]  ;;  %v9930_v3 = vld [vmem:[%s14909_s7 + $0xb0] sm:$0xff]  ;;  %vm4240_vm1 = vcmask 1043968  }
 0x5fa   : > { %4302 = vrot.lane.b32.xlu2 %v13236_v14, %s10362_s29  ;;  %4466 = vst.msk [vmem:[#allocation3 + $0x1a8] sm:$0xff] %vm4146_vm15, %v13477_v53  ;;  %v4686_v44 = vpack.c.bf16 %v4646_v9, %v4641_v24  ;;  %5092 = vmatpush.bf16.msra.mxu0 %v9931_v32  ;;  %v9934_v59 = vld [vmem:[%s14909_s7 + $0xd0] sm:$0xff]  ;;  %v9925_v24 = vld [vmem:[%s14909_s7 + $0x88] sm:$0xff] }
 0x5fb   : > { %v4089_v21 = vpop.f32.mrf.mxu2  ;;  %v4602_v50 = vld [vmem:[#allocation3 + $0x28] sm:$0xff]  ;;  %5134 = vmatpush.bf16.msra.mxu1 %v9938_v36 }
 0x5fc   : > { %v13491_v62 = vadd.f32 %v4089_v21, %v4041_v26  ;;  %8803 = vmatmul.msk.bf16.gmra.mxu2 %vm4146_vm15, %v4686_v44  ;;  %v9927_v26 = vld [vmem:[%s14909_s7 + $0x98] sm:$0xff]  ;;  %v9932_v44 = vld [vmem:[%s14909_s7 + $0xc0] sm:$0xff] }
 0x5fd   : > { %v9924_v21 = vld [vmem:[%s14909_s7 + $0x80] sm:$0xff] }
 0x5fe   : > { %v4569_v6 = vrot.slane %v13491_v62, 3  ;;  %v4492_v42 = vrot.slane %v13491_v62, 2  ;;  %5093 = vmatpush.bf16.msra.mxu0 %v9930_v3 }
 0x5ff   : > { %5135 = vmatpush.bf16.msra.mxu1 %v9937_v34 }
 0x600   : > { %v4570_v4 = vsel %vm2803_vm5, %v4567_v23, %v4569_v6  ;;  %4596 = vst.msk [vmem:[#allocation3 + $0x200] sm:$0xf] %vm4159_vm7, %v4569_v6  ;;  %v4651_v35 = vld [vmem:[#allocation3 + $0x1b0] sm:$0xff]  ;;  %v4493_v46 = vsel %vm2557_vm6, %v4490_v7, %v4492_v42  ;;  %v9935_v7 = vld [vmem:[%s14909_s7 + $0xd8] sm:$0xff]  ;;  %vm8208_vm6 = vcmask 73728  }
 0x601   : > { %4496 = vrot.lane.b32.xlu1 %v13248_v13, %s10362_s29  ;;  %4304 = vrot.lane.b32.xlu0 %v13254_v8, %s10362_s29  ;;  %4595 = vst.msk [vmem:[#allocation3 + $0x1d8] sm:$0xff] %vm4146_vm15, %v4570_v4 }
 0x602   : > { %4394 = vrot.lane.b32.xlu2 %v13274_v49, %s10362_s29 }
 0x603   : > { %v4189_v14 = vpop.permute.xlu1 %4188 }
 0x604   : > { %4228 = vst.msk [vmem:[#allocation3] sm:$0xff] %vm4227_vm8, %v4189_v14 }
 0x608   : > { %v4656_v48 = vld [vmem:[#allocation3 + $0x1d8] sm:$0xff] }
 0x609   : > { %4392 = vrot.lane.b32.xlu1 %v13257_v17, %s10362_s29  ;;  %4498 = vrot.lane.b32.xlu0 %v13269_v41, %s10362_s29  ;;  %v4691_v13 = vpack.c.bf16 %v4656_v48, %v4651_v35 }
 0x60a   : > { %4306 = vrot.lane.b32.xlu2 %v13278_v15, %s10362_s29 }
 0x60b   : > { %v4597_v8 = vld [vmem:[#allocation3] sm:$0xff]  ;;  %v4197_v25 = vpop.permute.xlu2 %4196 }
 0x60c   : > { %v4662_v45 = vpack.c.bf16 %v4602_v50, %v4597_v8  ;;  %4232 = vst.msk [vmem:[#allocation3 + $0xa0] sm:$0xff] %vm4227_vm8, %v4197_v25  ;;  %8804 = vmatmul.msk.bf16.gmra.mxu2 %vm4146_vm15, %v4691_v13 }
 0x60e   : > { %5018 = vmatmul.bf16.vlgmr.msrb.gmra.mxu0 %v4662_v45 }
 0x611   : > { %4500 = vrot.lane.b32.xlu1 %v13290_v38, %s10362_s29  ;;  %4308 = vrot.lane.b32.xlu0 %v13295_v10, %s10362_s29 }
 0x612   : > { %4398 = vrot.lane.b32.xlu2 %v13318_v5, %s10362_s29 }
 0x613   : > { %v4193_v17 = vpop.permute.xlu0 %4192 }
 0x614   : > { %4230 = vst.msk [vmem:[#allocation3 + $0x50] sm:$0xff] %vm4227_vm8, %v4193_v17 }
 0x619   : > { %4396 = vrot.lane.b32.xlu1 %v13298_v20, %s10362_s29  ;;  %4502 = vrot.lane.b32.xlu0 %v13310_v37, %s10362_s29  ;;  %v4617_v37 = vld [vmem:[#allocation3 + $0xa0] sm:$0xff] }
 0x61a   : > { %4310 = vrot.lane.b32.xlu2 %v13321_v18, %s10362_s29 }
 0x61b   : > { %v4195_v41 = vpop.permute.xlu1 %4194  ;;  %v4607_v49 = vld [vmem:[#allocation3 + $0x50] sm:$0xff] }
 0x61c   : > { %4231 = vst.msk [vmem:[#allocation3 + $0x78] sm:$0xff] %vm4227_vm8, %v4195_v41 }
 0x621   : > { %4504 = vrot.lane.b32.xlu1 %v13334_v61, %s10362_s29  ;;  %4312 = vrot.lane.b32.xlu0 %v13342_v19, %s10362_s29  ;;  %v9923_v19 = vld [vmem:[%s14909_s7 + $0x78] sm:$0xff] }
 0x622   : > { %4402 = vrot.lane.b32.xlu2 %v13368_v47, %s10362_s29  ;;  %5051 = vmatpush.bf16.msra.mxu3 %v9923_v19  ;;  %v9921_v47 = vld [vmem:[%s14909_s7 + $0x68] sm:$0xff] }
 0x623   : > { %v4612_v15 = vld [vmem:[#allocation3 + $0x78] sm:$0xff]  ;;  %v4203_v38 = vpop.permute.xlu2 %4202 }
 0x624   : > { %v4667_v10 = vpack.c.bf16 %v4612_v15, %v4607_v49  ;;  %4235 = vst.msk [vmem:[#allocation3 + $0x118] sm:$0xff] %vm4227_vm8, %v4203_v38 }
 0x626   : > { %5022 = vmatmul.bf16.gmra.mxu0 %v4667_v10 }
 0x629   : > { %4400 = vrot.lane.b32.xlu1 %v13345_v55, %s10362_s29  ;;  %4506 = vrot.lane.b32.xlu0 %v13363_v30, %s10362_s29  ;;  %v9922_v55 = vld [vmem:[%s14909_s7 + $0x70] sm:$0xff] }
 0x62a   : > { %4314 = vrot.lane.b32.xlu2 %v13371_v27, %s10362_s29  ;;  %5052 = vmatpush.bf16.msra.mxu3 %v9922_v55 }
 0x62b   : > { %v4199_v20 = vpop.permute.xlu0 %4198 }
 0x62c   : > { %4233 = vst.msk [vmem:[#allocation3 + $0xc8] sm:$0xff] %vm4227_vm8, %v4199_v20 }
 0x62e   : > { %5053 = vmatpush.bf16.msra.mxu3 %v9921_v47 }
 0x631   : > { %4508 = vrot.lane.b32.xlu1 %v13390_v56, %s10362_s29  ;;  %4316 = vrot.lane.b32.xlu0 %v13395_v63, %s10362_s29  ;;  %v9920_v56 = vld [vmem:[%s14909_s7 + $0x60] sm:$0xff] }
 0x632   : > { %4406 = vrot.lane.b32.xlu2 %v13423_v43, %s10362_s29  ;;  %5054 = vmatpush.bf16.msra.mxu3 %v9920_v56 }
 0x633   : > { %v4622_v5 = vld [vmem:[#allocation3 + $0xc8] sm:$0xff]  ;;  %v4201_v18 = vpop.permute.xlu1 %4200 }
 0x634   : > { %v4672_v61 = vpack.c.bf16 %v4622_v5, %v4617_v37  ;;  %4234 = vst.msk [vmem:[#allocation3 + $0xf0] sm:$0xff] %vm4227_vm8, %v4201_v18 }
 0x636   : > { %5027 = vmatmul.bf16.gmra.mxu0 %v4672_v61  ;;  %5055 = vmatpush.bf16.msra.mxu3 %v9919_v11 }
 0x639   : > { %4404 = vrot.lane.b32.xlu1 %v13398_v16, %s10362_s29  ;;  %4510 = vrot.lane.b32.xlu0 %v13416_v0, %s10362_s29  ;;  %v4632_v16 = vld [vmem:[#allocation3 + $0x118] sm:$0xff] }
 0x63a   : > { %4318 = vrot.lane.b32.xlu2 %v13426_v60, %s10362_s29  ;;  %5056 = vmatpush.bf16.msra.mxu3 %v9918_v33 }
 0x63b   : > { %v4209_v30 = vpop.permute.xlu2 %4208  ;;  %v4627_v63 = vld [vmem:[#allocation3 + $0xf0] sm:$0xff] }
 0x63c   : > { %4238 = vst.msk [vmem:[#allocation3 + $0x190] sm:$0xff] %vm4227_vm8, %v4209_v30  ;;  %v4677_v60 = vpack.c.bf16 %v4632_v16, %v4627_v63 }
 0x63e   : > { %v5183_v27 = vpop.f32.mrf.mxu2  ;;  %5057 = vmatpush.bf16.msra.mxu3 %v9917_v52 }
 0x641   : > { %4512 = vrot.lane.b32.xlu1 %v13438_v51, %s10362_s29  ;;  %4320 = vrot.lane.b32.xlu0 %v13446_v58, %s10362_s29  ;;  %v9929_v51 = vld [vmem:[%s14909_s7 + $0xa8] sm:$0xff] }
 0x642   : > { %4410 = vrot.lane.b32.xlu2 %v13477_v53, %s10362_s29  ;;  %5094 = vmatpush.bf16.msra.mxu0 %v9929_v51  ;;  %v9933_v53 = vld [vmem:[%s14909_s7 + $0xc8] sm:$0xff] }
 0x643   : > { %v4205_v0 = vpop.permute.xlu0 %4204  ;;  %v4299_v43 = vpop.permute.xlu2 %4298  ;;  %5058 = vmatpush.bf16.msra.mxu3 %v9916_v29  ;;  %v4647_v6 = vld [vmem:[#allocation3 + $0x190] sm:$0xff] }
 0x644   : > { %4236 = vst.msk [vmem:[#allocation3 + $0x140] sm:$0xff] %vm4227_vm8, %v4205_v0 }
 0x645   : > { %4337 = vst.msk [vmem:[#allocation3 + $0x8] sm:$0xff] %vm4227_vm8, %v4299_v43 }
 0x646   : > { %5032 = vmatmul.bf16.gmra.mxu0 %v4677_v60  ;;  %v4441_v60 = vrot.slane %v13491_v62, 1 }
 0x647   : > { %5095 = vmatpush.bf16.msra.mxu0 %v9928_v57 }
 0x648   : > { %4468 = vst.msk [vmem:[#allocation3 + $0x1f8] sm:$0xf] %vm4159_vm7, %v4441_v60 }
 0x649   : > { %4408 = vrot.lane.b32.xlu1 %v13452_v54, %s10362_s29  ;;  %4514 = vrot.lane.b32.xlu0 %v13473_v2, %s10362_s29  ;;  %v9936_v54 = vld [vmem:[%s14909_s7 + $0xe0] sm:$0xff]  ;;  %v9926_v2 = vld [vmem:[%s14909_s7 + $0x90] sm:$0xff] }
 0x64a   : > { %4322 = vrot.lane.b32.xlu2 %v13480_v31, %s10362_s29  ;;  %5136 = vmatpush.bf16.msra.mxu1 %v9936_v54 }
 0x64b   : > { %v4207_v12 = vpop.permute.xlu1 %4206  ;;  %v4637_v22 = vld [vmem:[#allocation3 + $0x140] sm:$0xff]  ;;  %5096 = vmatpush.bf16.msra.mxu0 %v9927_v26 }
 0x64c   : > { %4237 = vst.msk [vmem:[#allocation3 + $0x168] sm:$0xff] %vm4227_vm8, %v4207_v12  ;;  %v4391_v58 = vpop.permute.xlu2 %4390  ;;  %v4598_v25 = vld [vmem:[#allocation3 + $0x8] sm:$0xff] }
 0x64d   : > { %4428 = vst.msk [vmem:[#allocation3 + $0x38] sm:$0xff] %vm4227_vm8, %v4391_v58 }
 0x64e   : > { %5137 = vmatpush.bf16.msra.mxu1 %v9935_v7 }
 0x64f   : > { %5097 = vmatpush.bf16.msra.mxu0 %v9926_v2 }
 0x651   : > { %4516 = vrot.lane.b32.xlu1 %v4493_v46, %s10362_s29  ;;  %4412 = vrot.lane.b32.xlu0 %v13466_v40, %s10362_s29 }
 0x652   : > { %5138 = vmatpush.bf16.msra.mxu1 %v9934_v59 }
 0x653   : > { %v4642_v39 = vld [vmem:[#allocation3 + $0x168] sm:$0xff]  ;;  %5098 = vmatpush.bf16.msra.mxu0 %v9925_v24 }
 0x654   : > { %v4682_v23 = vpack.c.bf16 %v4642_v39, %v4637_v22  ;;  %v4303_v1 = vpop.permute.xlu2 %4302  ;;  %v4604_v63 = vld [vmem:[#allocation3 + $0x38] sm:$0xff] }
 0x655   : > { %4339 = vst.msk [vmem:[#allocation3 + $0x58] sm:$0xff] %vm4227_vm8, %v4303_v1 }
 0x656   : > { %5037 = vmatmul.bf16.gmra.mxu0 %v4682_v23  ;;  %5139 = vmatpush.bf16.msra.mxu1 %v9933_v53 }
 0x657   : > { %5099 = vmatpush.bf16.msra.mxu0 %v9924_v21 }
 0x659   : > { %4518 = vrot.lane.b32.xlu1 %v4492_v42, %s10362_s29 }
 0x65a   : > { %5140 = vmatpush.bf16.msra.mxu1 %v9932_v44 }
 0x65b   : > { %v4211_v31 = vpop.permute.xlu0 %4210 }
 0x65c   : > { %4239 = vst.msk [vmem:[#allocation3 + $0x1b8] sm:$0xff] %vm4227_vm8, %v4211_v31  ;;  %v4395_v9 = vpop.permute.xlu2 %4394  ;;  %v4608_v55 = vld [vmem:[#allocation3 + $0x58] sm:$0xff] }
 0x65d   : > { %4430 = vst.msk [vmem:[#allocation3 + $0x88] sm:$0xff] %vm4227_vm8, %v4395_v9 }
 0x663   : > { %v4652_v4 = vld [vmem:[#allocation3 + $0x1b8] sm:$0xff]  ;;  %v4213_v14 = vpop.permute.xlu1 %4212  ;;  %v4301_v35 = vpop.permute.xlu0 %4300 }
 0x664   : > { %v4687_v48 = vpack.c.bf16 %v4652_v4, %v4647_v6  ;;  %4241 = vst.msk [vmem:[#allocation3 + $0x1e0] sm:$0xf] %vm4240_vm1, %v4213_v14  ;;  %v4307_v13 = vpop.permute.xlu2 %4306  ;;  %v4614_v58 = vld [vmem:[#allocation3 + $0x88] sm:$0xff] }
 0x665   : > { %4338 = vst.msk [vmem:[#allocation3 + $0x30] sm:$0xff] %vm4227_vm8, %v4301_v35  ;;  %v4442_v35 = vsel %vm2141_vm4, %v13466_v40, %v4441_v60 }
 0x666   : > { %5042 = vmatmul.bf16.gmra.mxu0 %v4687_v48  ;;  %4341 = vst.msk [vmem:[#allocation3 + $0xa8] sm:$0xff] %vm4227_vm8, %v4307_v13 }
 0x667   : > { %4467 = vst.msk [vmem:[#allocation3 + $0x1d0] sm:$0xff] %vm4146_vm15, %v4442_v35 }
 0x66b   : > { %v4389_v8 = vpop.permute.xlu1 %4388  ;;  %v4495_v50 = vpop.permute.xlu0 %4494  ;;  %v4657_v49 = vld [vmem:[#allocation3 + $0x1e0] sm:$0xf] }
 0x66c   : > { %4427 = vst.msk [vmem:[#allocation3 + $0x10] sm:$0xff] %vm4227_vm8, %v4389_v8  ;;  %v4603_v45 = vld [vmem:[#allocation3 + $0x30] sm:$0xff]  ;;  %v4399_v17 = vpop.permute.xlu2 %4398  ;;  %v4692_v10 = vpack.c.bf16 %v4657_v49, %v4657_v49 }
 0x66d   : > { %4533 = vst.msk [vmem:[#allocation3 + $0x18] sm:$0xff] %vm4227_vm8, %v4495_v50  ;;  %v4663_v41 = vpack.c.bf16 %v4603_v45, %v4598_v25  ;;  %v4618_v42 = vld [vmem:[#allocation3 + $0xa8] sm:$0xff] }
 0x66e   : > { %4432 = vst.msk [vmem:[#allocation3 + $0xd8] sm:$0xff] %vm4227_vm8, %v4399_v17 }
 0x66f   : > { %5059 = vmatmul.bf16.vlgmr.msra.gmra.mxu3 %v4663_v41 }
 0x673   : > { %v4497_v15 = vpop.permute.xlu1 %4496  ;;  %v4305_v38 = vpop.permute.xlu0 %4304  ;;  %v4599_v56 = vld [vmem:[#allocation3 + $0x10] sm:$0xff] }
 0x674   : > { %4534 = vst.msk [vmem:[#allocation3 + $0x40] sm:$0xff] %vm4227_vm8, %v4497_v15  ;;  %v4311_v20 = vpop.permute.xlu2 %4310  ;;  %v4600_v37 = vld [vmem:[#allocation3 + $0x18] sm:$0xff]  ;;  %v4664_v43 = vpack.c.bf16 %v4604_v63, %v4599_v56 }
 0x675   : > { %4340 = vst.msk [vmem:[#allocation3 + $0x80] sm:$0xff] %vm4227_vm8, %v4305_v38  ;;  %v4624_v44 = vld [vmem:[#allocation3 + $0xd8] sm:$0xff] }
 0x676   : > { %5047 = vmatmul.bf16.gmra.mxu0 %v4692_v10  ;;  %4343 = vst.msk [vmem:[#allocation3 + $0xf8] sm:$0xff] %vm4227_vm8, %v4311_v20 }
 0x67b   : > { %v4605_v5 = vld [vmem:[#allocation3 + $0x40] sm:$0xff]  ;;  %v4393_v18 = vpop.permute.xlu1 %4392  ;;  %v4499_v61 = vpop.permute.xlu0 %4498 }
 0x67c   : > { %v4665_v19 = vpack.c.bf16 %v4605_v5, %v4600_v37  ;;  %4429 = vst.msk [vmem:[#allocation3 + $0x60] sm:$0xff] %vm4227_vm8, %v4393_v18  ;;  %v4613_v30 = vld [vmem:[#allocation3 + $0x80] sm:$0xff]  ;;  %v4403_v47 = vpop.permute.xlu2 %4402 }
 0x67d   : > { %4535 = vst.msk [vmem:[#allocation3 + $0x68] sm:$0xff] %vm4227_vm8, %v4499_v61  ;;  %v4668_v27 = vpack.c.bf16 %v4613_v30, %v4608_v55  ;;  %v4628_v59 = vld [vmem:[#allocation3 + $0xf8] sm:$0xff] }
 0x67e   : > { %5141 = vmatmul.bf16.vlgmr.msra.gmra.mxu1 %v4665_v19  ;;  %4434 = vst.msk [vmem:[#allocation3 + $0x128] sm:$0xff] %vm4227_vm8, %v4403_v47 }
 0x67f   : > { %5063 = vmatmul.bf16.gmra.mxu3 %v4668_v27 }
 0x683   : > { %v4501_v16 = vpop.permute.xlu1 %4500  ;;  %v4309_v0 = vpop.permute.xlu0 %4308  ;;  %v4609_v52 = vld [vmem:[#allocation3 + $0x60] sm:$0xff] }
 0x684   : > { %4536 = vst.msk [vmem:[#allocation3 + $0x90] sm:$0xff] %vm4227_vm8, %v4501_v16  ;;  %v4315_v28 = vpop.permute.xlu2 %4314  ;;  %v4610_v32 = vld [vmem:[#allocation3 + $0x68] sm:$0xff]  ;;  %v4669_v46 = vpack.c.bf16 %v4614_v58, %v4609_v52  ;;  %v4661_v52 = vld [vmem:[#allocation3 + $0x200] sm:$0xf] }
 0x685   : > { %4342 = vst.msk [vmem:[#allocation3 + $0xd0] sm:$0xff] %vm4227_vm8, %v4309_v0  ;;  %v4634_v38 = vld [vmem:[#allocation3 + $0x128] sm:$0xff]  ;;  %v4696_v58 = vpack.c.bf16 %v4661_v52, %v4661_v52 }
 0x686   : > { %5100 = vmatmul.bf16.vlgmr.msra.gmra.mxu0 %v4664_v43  ;;  %4345 = vst.msk [vmem:[#allocation3 + $0x148] sm:$0xff] %vm4227_vm8, %v4315_v28 }
 0x687   : > { %8805 = vmatmul.msk.bf16.gmra.mxu2 %vm4146_vm15, %v4696_v58 }
 0x68b   : > { %v5019_v11 = vpop.f32.mrf.mxu0  ;;  %v4615_v36 = vld [vmem:[#allocation3 + $0x90] sm:$0xff]  ;;  %v4397_v33 = vpop.permute.xlu1 %4396 }
 0x68c   : > { %v4670_v3 = vpack.c.bf16 %v4615_v36, %v4610_v32  ;;  %4431 = vst.msk [vmem:[#allocation3 + $0xb0] sm:$0xff] %vm4227_vm8, %v4397_v33  ;;  %v4503_v34 = vpop.permute.xlu0 %4502  ;;  %v4623_v62 = vld [vmem:[#allocation3 + $0xd0] sm:$0xff]  ;;  %v4407_v12 = vpop.permute.xlu2 %4406 }
 0x68d   : > { %4537 = vst.msk [vmem:[#allocation3 + $0xb8] sm:$0xff] %vm4227_vm8, %v4503_v34  ;;  %v4673_v51 = vpack.c.bf16 %v4623_v62, %v4618_v42  ;;  %v4638_v17 = vld [vmem:[#allocation3 + $0x148] sm:$0xff] }
 0x68e   : > { %5145 = vmatmul.bf16.gmra.mxu1 %v4670_v3  ;;  %4436 = vst.msk [vmem:[#allocation3 + $0x178] sm:$0xff] %vm4227_vm8, %v4407_v12 }
 0x68f   : > { %5068 = vmatmul.bf16.gmra.mxu3 %v4673_v51 }
 0x693   : > { %v4505_v54 = vpop.permute.xlu1 %4504  ;;  %v13677_v22 = vpop.f32.mrf.mxu0  ;;  %v4619_v24 = vld [vmem:[#allocation3 + $0xb0] sm:$0xff] }
 0x694   : > { %4538 = vst.msk [vmem:[#allocation3 + $0xe0] sm:$0xff] %vm4227_vm8, %v4505_v54  ;;  %v4313_v57 = vpop.permute.xlu0 %4312  ;;  %v4319_v29 = vpop.permute.xlu2 %4318  ;;  %v4620_v23 = vld [vmem:[#allocation3 + $0xb8] sm:$0xff]  ;;  %v4674_v6 = vpack.c.bf16 %v4624_v44, %v4619_v24 }
 0x695   : > { %4344 = vst.msk [vmem:[#allocation3 + $0x120] sm:$0xff] %vm4227_vm8, %v4313_v57  ;;  %v4644_v0 = vld [vmem:[#allocation3 + $0x178] sm:$0xff] }
 0x696   : > { %5104 = vmatmul.bf16.gmra.mxu0 %v4669_v46  ;;  %4347 = vst.msk [vmem:[#allocation3 + $0x198] sm:$0xff] %vm4227_vm8, %v4319_v29 }
 0x69b   : > { %v4401_v39 = vpop.permute.xlu1 %4400  ;;  %v4625_v7 = vld [vmem:[#allocation3 + $0xe0] sm:$0xff] }
 0x69c   : > { %4433 = vst.msk [vmem:[#allocation3 + $0x100] sm:$0xff] %vm4227_vm8, %v4401_v39  ;;  %v4675_v1 = vpack.c.bf16 %v4625_v7, %v4620_v23  ;;  %v4507_v26 = vpop.permute.xlu0 %4506  ;;  %v4633_v2 = vld [vmem:[#allocation3 + $0x120] sm:$0xff]  ;;  %v4411_v53 = vpop.permute.xlu2 %4410 }
 0x69d   : > { %4539 = vst.msk [vmem:[#allocation3 + $0x108] sm:$0xff] %vm4227_vm8, %v4507_v26  ;;  %v4678_v31 = vpack.c.bf16 %v4633_v2, %v4628_v59  ;;  %v4648_v47 = vld [vmem:[#allocation3 + $0x198] sm:$0xff]  ;;  %v5184_v39 = vpop.f32.mrf.mxu2 }
 0x69e   : > { %5150 = vmatmul.bf16.gmra.mxu1 %v4675_v1  ;;  %4438 = vst.msk [vmem:[#allocation3 + $0x1c8] sm:$0xff] %vm4227_vm8, %v4411_v53 }
 0x69f   : > { %5073 = vmatmul.bf16.gmra.mxu3 %v4678_v31  ;;  %v13719_v31 = vld [vmem:[%s14910_s8] ss:$0 sm:$0xff] }
 0x6a0   : > { %v5021_v24 = vadd.f32 %v13719_v31, %v13677_v22 }
 0x6a3   : > { %v13682_v9 = vpop.f32.mrf.mxu0  ;;  %v4509_v21 = vpop.permute.xlu1 %4508  ;;  %v4629_v15 = vld [vmem:[#allocation3 + $0x100] sm:$0xff] }
 0x6a4   : > { %4540 = vst.msk [vmem:[#allocation3 + $0x130] sm:$0xff] %vm4227_vm8, %v4509_v21  ;;  %v4317_v4 = vpop.permute.xlu0 %4316  ;;  %v4323_v14 = vpop.permute.xlu2 %4322  ;;  %v4630_v8 = vld [vmem:[#allocation3 + $0x108] sm:$0xff]  ;;  %v4679_v20 = vpack.c.bf16 %v4634_v38, %v4629_v15 }
 0x6a5   : > { %4346 = vst.msk [vmem:[#allocation3 + $0x170] sm:$0xff] %vm4227_vm8, %v4317_v4  ;;  %v4654_v62 = vld [vmem:[#allocation3 + $0x1c8] sm:$0xff]  ;;  %v5187_v59 = vpop.f32.mrf.mxu2 }
 0x6a6   : > { %5109 = vmatmul.bf16.gmra.mxu0 %v4674_v6  ;;  %4349 = vst.msk [vmem:[#allocation3 + $0x1e8] sm:$0xf] %vm4240_vm1, %v4323_v14 }
 0x6ab   : > { %v13690_v48 = vpop.f32.mrf.mxu0  ;;  %v4405_v13 = vpop.permute.xlu1 %4404  ;;  %v4635_v50 = vld [vmem:[#allocation3 + $0x130] sm:$0xff] }
 0x6ac   : > { %4435 = vst.msk [vmem:[#allocation3 + $0x150] sm:$0xff] %vm4227_vm8, %v4405_v13  ;;  %v4680_v25 = vpack.c.bf16 %v4635_v50, %v4630_v8  ;;  %v4511_v45 = vpop.permute.xlu0 %4510  ;;  %v4643_v41 = vld [vmem:[#allocation3 + $0x170] sm:$0xff]  ;;  %v5024_v8 = vadd.f32 %v13719_v31, %v13682_v9  ;;  %v10151_v9 = vld [vmem:[%s14911_s9 + $0x678] sm:$0xff] }
 0x6ad   : > { %4541 = vst.msk [vmem:[#allocation3 + $0x158] sm:$0xff] %vm4227_vm8, %v4511_v45  ;;  %v4683_v49 = vpack.c.bf16 %v4643_v41, %v4638_v17  ;;  %v4658_v28 = vld [vmem:[#allocation3 + $0x1e8] sm:$0xf]  ;;  %v5189_v35 = vpop.f32.mrf.mxu2 }
 0x6ae   : > { %5155 = vmatmul.bf16.gmra.mxu1 %v4680_v25  ;;  %v4693_v3 = vpack.c.bf16 %v4658_v28, %v4658_v28 }
 0x6af   : > { %5078 = vmatmul.bf16.gmra.mxu3 %v4683_v49 }
 0x6b3   : > { %v13694_v40 = vpop.f32.mrf.mxu0  ;;  %v4513_v10 = vpop.permute.xlu1 %4512  ;;  %v4639_v63 = vld [vmem:[#allocation3 + $0x150] sm:$0xff] }
 0x6b4   : > { %4542 = vst.msk [vmem:[#allocation3 + $0x180] sm:$0xff] %vm4227_vm8, %v4513_v10  ;;  %v4321_v37 = vpop.permute.xlu0 %4320  ;;  %v4640_v61 = vld [vmem:[#allocation3 + $0x158] sm:$0xff]  ;;  %v4684_v60 = vpack.c.bf16 %v4644_v0, %v4639_v63  ;;  %v5231_v10 = vlaneseq }
 0x6b5   : > { %4348 = vst.msk [vmem:[#allocation3 + $0x1c0] sm:$0xff] %vm4227_vm8, %v4321_v37  ;;  %v5192_v22 = vpop.f32.mrf.mxu2 }
 0x6b6   : > { %5114 = vmatmul.bf16.gmra.mxu0 %v4679_v20  ;;  %v5026_v20 = vadd.f32 %v13719_v31, %v13690_v48  ;;  %vm13732_vm2 = vcmp.lt.s32.totalorder %v5231_v10, 64  ;;  %vm5242_vm3 = vcmp.ge.s32.totalorder %v5231_v10, 64  ;;  %vm5243_vm4 = vcmp.lt.s32.totalorder %v5231_v10, 128 }
 0x6b7   : > { %vm13832_vm5 = vmand %vm5242_vm3, %vm5243_vm4 }
 0x6bb   : > { %v13698_v5 = vpop.f32.mrf.mxu0  ;;  %v4409_v18 = vpop.permute.xlu1 %4408  ;;  %v4645_v19 = vld [vmem:[#allocation3 + $0x180] sm:$0xff] }
 0x6bc   : > { %4437 = vst.msk [vmem:[#allocation3 + $0x1a0] sm:$0xff] %vm4227_vm8, %v4409_v18  ;;  %v4685_v55 = vpack.c.bf16 %v4645_v19, %v4640_v61  ;;  %v4515_v30 = vpop.permute.xlu0 %4514  ;;  %v4653_v27 = vld [vmem:[#allocation3 + $0x1c0] sm:$0xff] }
 0x6bd   : > { %4543 = vst.msk [vmem:[#allocation3 + $0x1a8] sm:$0xff] %vm4227_vm8, %v4515_v30  ;;  %v4688_v56 = vpack.c.bf16 %v4653_v27, %v4648_v47  ;;  %v13742_v0 = vpop.f32.mrf.mxu2 }
 0x6be   : > { %5160 = vmatmul.bf16.gmra.mxu1 %v4685_v55 }
 0x6bf   : > { %5083 = vmatmul.bf16.gmra.mxu3 %v4688_v56  ;;  %v5029_v56 = vadd.f32 %v13719_v31, %v13694_v40 }
 0x6c3   : > { %v13702_v16 = vpop.f32.mrf.mxu0  ;;  %v4517_v43 = vpop.permute.xlu1 %4516  ;;  %v4649_v34 = vld [vmem:[#allocation3 + $0x1a0] sm:$0xff] }
 0x6c4   : > { %4544 = vst.msk [vmem:[#allocation3 + $0x1d0] sm:$0xff] %vm4227_vm8, %v4517_v43  ;;  %v4650_v32 = vld [vmem:[#allocation3 + $0x1a8] sm:$0xff]  ;;  %v4689_v12 = vpack.c.bf16 %v4654_v62, %v4649_v34  ;;  %v5034_v43 = vadd.f32 %v13719_v31, %v13702_v16 }
 0x6c5   : > { %v13757_v52 = vpop.f32.mrf.mxu2 }
 0x6c6   : > { %5119 = vmatmul.bf16.gmra.mxu0 %v4684_v60 }
 0x6cb   : > { %v13705_v11 = vpop.f32.mrf.mxu0  ;;  %v4655_v36 = vld [vmem:[#allocation3 + $0x1d0] sm:$0xff] }
 0x6cc   : > { %v4690_v33 = vpack.c.bf16 %v4655_v36, %v4650_v32 }
 0x6ce   : > { %5165 = vmatmul.bf16.gmra.mxu1 %v4690_v33 }
 0x6cf   : > { %5088 = vmatmul.bf16.gmra.mxu3 %v4693_v3 }
 0x6d3   : > { %v13707_v42 = vpop.f32.mrf.mxu0 }
 0x6d6   : > { %5124 = vmatmul.bf16.gmra.mxu0 %v4689_v12 }
 0x6db   : > { %v13709_v51 = vpop.f32.mrf.mxu0 }
 0x6e3   : > { %v13712_v54 = vpop.f32.mrf.mxu0 }
 0x6eb   : > { %v13714_v46 = vpop.f32.mrf.mxu0 }
 0x6f2   : > { %v5060_v57 = vpop.f32.mrf.mxu3 }
 0x6f3   : > { %v5048_v29 = vpop.f32.mrf.mxu0 }
 0x6fa   : > { %v5061_v23 = vpop.f32.mrf.mxu3 }
 0x6fb   : > { %v5049_v7 = vpop.f32.mrf.mxu0  ;;  %v5142_v1 = vpop.f32.mrf.mxu1  ;;  %v5062_v44 = vadd.f32 %v5061_v23, %v5021_v24  ;;  %v5039_v23 = vadd.f32 %v13719_v31, %v13707_v42 }
 0x702   : > { %v5064_v26 = vpop.f32.mrf.mxu3 }
 0x703   : > { %v5101_v2 = vpop.f32.mrf.mxu0  ;;  %v5143_v53 = vpop.f32.mrf.mxu1  ;;  %v5065_v45 = vadd.f32 %v5064_v26, %v5024_v8 }
 0x70a   : > { %v5066_v21 = vpop.f32.mrf.mxu3 }
 0x70b   : > { %v5102_v6 = vpop.f32.mrf.mxu0  ;;  %v5146_v4 = vpop.f32.mrf.mxu1  ;;  %v5067_v61 = vadd.f32 %v5066_v21, %v5026_v20 }
 0x70c   : > { %v5103_v14 = vadd.f32 %v5102_v6, %v5062_v44 }
 0x70e   : > { %v5144_v13 = vadd.f32 %v5143_v53, %v5103_v14  ;;  %v13778_v53 = vpop.f32.mrf.mxu2 }
 0x710   : > { %v5185_v50 = vadd.f32 %v5184_v39, %v5144_v13 }
 0x712   : > { %v5215_v25 = vmax.f32 %v5185_v50, 0.0  ;;  %v5069_v17 = vpop.f32.mrf.mxu3 }
 0x713   : > { %v5105_v41 = vpop.f32.mrf.mxu0  ;;  %v5148_v49 = vpop.f32.mrf.mxu1  ;;  %v5070_v28 = vadd.f32 %v5069_v17, %v5029_v56  ;;  %v5046_v56 = vadd.f32 %v13719_v31, %v13714_v46 }
 0x714   : > { %5227 = vst [vmem:[#allocation1] sm:$0xff] %v5215_v25  ;;  %v5106_v15 = vadd.f32 %v5105_v41, %v5065_v45  ;;  %v4413_v45 = vpop.permute.xlu0 %4412  ;;  %v4519_v17 = vpop.permute.xlu1 %4518 }
 0x715   : > { %4439 = vst.msk [vmem:[#allocation3 + $0x1f0] sm:$0xf] %vm4240_vm1, %v4413_v45 }
 0x716   : > { %v5147_v38 = vadd.f32 %v5146_v4, %v5106_v15  ;;  %v13789_v6 = vpop.f32.mrf.mxu2  ;;  %v5044_v4 = vadd.f32 %v13719_v31, %v13712_v54  ;;  %4545 = vst.msk [vmem:[#allocation3 + $0x1f8] sm:$0xf] %vm4240_vm1, %v4519_v17 }
 0x718   : > { %v5188_v37 = vadd.f32 %v5187_v59, %v5147_v38 }
 0x71a   : > { %v13727_v18 = vmax.f32 %v5188_v37, 0.0  ;;  %v13729_v19 = vpop.f32.mrf.mxu3 }
 0x71b   : > { %v5229_v55 = vld [vmem:[#allocation1 + $0x3] ss:$9 sm:$0xff]  ;;  %v5107_v30 = vpop.f32.mrf.mxu0  ;;  %v5151_v47 = vpop.f32.mrf.mxu1 }
 0x71c   : > { %5236 = vst [vmem:[#allocation1] sm:$0xff] %v5215_v25  ;;  %v5108_v27 = vadd.f32 %v5107_v30, %v5067_v61  ;;  %5264 = vrot.lane.b32.xlu1 %v13727_v18, %s10362_s29  ;;  %v4659_v15 = vld [vmem:[#allocation3 + $0x1f0] sm:$0xf] }
 0x71d   : > { %5235 = vst.msk [vmem:[#allocation4] sm:$0x1] %vm13732_vm2, %v5229_v55  ;;  %v4660_v20 = vld [vmem:[#allocation3 + $0x1f8] sm:$0xf] }
 0x71e   : > { %v5149_v48 = vadd.f32 %v5148_v49, %v5108_v27 }
 0x720   : > { %v5190_v63 = vadd.f32 %v5189_v35, %v5149_v48 }
 0x722   : > { %v13746_v60 = vmax.f32 %v5190_v63, 0.0  ;;  %v5074_v32 = vpop.f32.mrf.mxu3 }
 0x723   : > { %v5238_v36 = vld [vmem:[#allocation1 + $0x4] ss:$9 sm:$0xff]  ;;  %v5110_v33 = vpop.f32.mrf.mxu0  ;;  %v13748_v3 = vpop.f32.mrf.mxu1  ;;  %v13750_v34 = vadd.f32 %v5074_v32, %v5034_v43 }
 0x724   : > { %5246 = vst [vmem:[#allocation1] sm:$0xff] %v5215_v25  ;;  %5239 = vrot.lane.b32.xlu2 %v5238_v36, %s10362_s29  ;;  %v5111_v40 = vadd.f32 %v5110_v33, %v5070_v28  ;;  %5298 = vrot.lane.b32.xlu1 %v13746_v60, %s10362_s29 }
 0x726   : > { %v5152_v62 = vadd.f32 %v5151_v47, %v5111_v40  ;;  %v4695_v47 = vpack.c.bf16 %v4660_v20, %v4660_v20 }
 0x728   : > { %v5193_v12 = vadd.f32 %v5192_v22, %v5152_v62  ;;  %v4694_v22 = vpack.c.bf16 %v4659_v15, %v4659_v15  ;;  %5170 = vmatmul.bf16.gmra.mxu1 %v4695_v47  ;;  %v9950_v47 = vld [vmem:[%s14911_s9 + $0x30] sm:$0xff] }
 0x72a   : > { %v13755_v16 = vmax.f32 %v5193_v12, 0.0  ;;  %v13759_v58 = vpop.f32.mrf.mxu3  ;;  %5129 = vmatmul.bf16.gmra.mxu0 %v4694_v22  ;;  %v5031_v22 = vadd.f32 %v13719_v31, %v13698_v5  ;;  %v9951_v5 = vld [vmem:[%s14911_s9 + $0x38] sm:$0xff] }
 0x72b   : > { %v5248_v57 = vld [vmem:[#allocation1 + $0x5] ss:$9 sm:$0xff]  ;;  %v13761_v29 = vpop.f32.mrf.mxu0  ;;  %v13763_v39 = vpop.f32.mrf.mxu1  ;;  %7757 = vmatpush.bf16.msrb.mxu3 %v9951_v5 }
 0x72c   : > { %5251 = vst [vmem:[#allocation1] sm:$0xff] %v5215_v25  ;;  %5332 = vrot.lane.b32.xlu1 %v13755_v16, %s10362_s29 }
 0x72d   : > { %5250 = vst.msk [vmem:[#allocation4 + $0x1] sm:$0x1] %vm13732_vm2, %v5248_v57 }
 0x72f   : > { %7758 = vmatpush.bf16.msrb.mxu3 %v9950_v47 }
 0x732   : > { %v5079_v7 = vpop.f32.mrf.mxu3 }
 0x733   : > { %v5253_v1 = vld [vmem:[#allocation1 + $0x6] ss:$9 sm:$0xff]  ;;  %v13771_v26 = vpop.f32.mrf.mxu0  ;;  %v13773_v59 = vadd.f32 %v5079_v7, %v5039_v23  ;;  %v13776_v2 = vpop.f32.mrf.mxu1 }
 0x734   : > { %5258 = vst [vmem:[#allocation1] sm:$0xff] %v5215_v25  ;;  %5254 = vrot.lane.b32.xlu0 %v5253_v1, %s10362_s29  ;;  %v13800_v25 = vpop.f32.mrf.mxu2 }
 0x73a   : > { %v13780_v24 = vpop.f32.mrf.mxu3 }
 0x73b   : > { %v5260_v44 = vld [vmem:[#allocation1 + $0x7] ss:$9 sm:$0xff]  ;;  %v13782_v21 = vpop.f32.mrf.mxu0  ;;  %v13787_v42 = vpop.f32.mrf.mxu1 }
 0x73c   : > { %5268 = vst [vmem:[#allocation1] sm:$0xff] %v13727_v18  ;;  %v13808_v38 = vpop.f32.mrf.mxu2 }
 0x73d   : > { %5262 = vst.msk [vmem:[#allocation4 + $0x2] sm:$0x1] %vm13732_vm2, %v5260_v44 }
 0x742   : > { %v5084_v14 = vpop.f32.mrf.mxu3 }
 0x743   : > { %v5270_v35 = vld [vmem:[#allocation1 + $0x1] ss:$9 sm:$0xff]  ;;  %v13793_v13 = vpop.f32.mrf.mxu0  ;;  %v5085_v8 = vadd.f32 %v5084_v14, %v5044_v4  ;;  %v13798_v50 = vpop.f32.mrf.mxu1 }
 0x744   : > { %5273 = vst [vmem:[#allocation1] sm:$0xff] %v13727_v18  ;;  %v5209_v33 = vpop.f32.mrf.mxu2 }
 0x745   : > { %5272 = vst.msk [vmem:[#allocation4 + $0x3] sm:$0x1] %vm13732_vm2, %v5270_v35 }
 0x74a   : > { %v5086_v41 = vpop.f32.mrf.mxu3 }
 0x74b   : > { %v5275_v54 = vld [vmem:[#allocation1 + $0x2] ss:$9 sm:$0xff]  ;;  %v13803_v49 = vpop.f32.mrf.mxu0  ;;  %v5166_v30 = vpop.f32.mrf.mxu1  ;;  %v5087_v63 = vadd.f32 %v5086_v41, %v5046_v56 }
 0x74c   : > { %5280 = vst [vmem:[#allocation1] sm:$0xff] %v13727_v18  ;;  %5276 = vrot.lane.b32.xlu2 %v5275_v54, %s10362_s29  ;;  %v5212_v23 = vpop.f32.mrf.mxu2  ;;  %v9974_v56 = vld [vmem:[%s14911_s9 + $0xf0] sm:$0xff] }
 0x74d   : > { %v9972_v23 = vld [vmem:[%s14911_s9 + $0xe0] sm:$0xff] }
 0x752   : > { %v5089_v37 = vpop.f32.mrf.mxu3 }
 0x753   : > { %v5282_v61 = vld [vmem:[#allocation1 + $0x5] ss:$9 sm:$0xff]  ;;  %v5125_v55 = vpop.f32.mrf.mxu0  ;;  %v5168_v40 = vpop.f32.mrf.mxu1  ;;  %v5072_v37 = vadd.f32 %v13729_v19, %v5031_v22 }
 0x754   : > { %5285 = vst [vmem:[#allocation1] sm:$0xff] %v13727_v18  ;;  %v5126_v27 = vadd.f32 %v5125_v55, %v5085_v8  ;;  %v5213_v7 = vpop.f32.mrf.mxu2  ;;  %v9959_v19 = vld [vmem:[%s14911_s9 + $0x78] sm:$0xff] }
 0x755   : > { %5284 = vst.msk [vmem:[#allocation4 + $0x4] sm:$0x1] %vm13732_vm2, %v5282_v61  ;;  %v5113_v61 = vadd.f32 %v13761_v29, %v5072_v37  ;;  %v9967_v29 = vld [vmem:[%s14911_s9 + $0xb8] sm:$0xff]  ;;  %7770 = vmatpush.bf16.msrb.mxu0 %v9959_v19  ;;  %v9944_v37 = vld [vmem:[%s14911_s9] sm:$0xff] }
 0x756   : > { %v13813_v48 = vadd.f32 %v5166_v30, %v5126_v27  ;;  %v9958_v27 = vld [vmem:[%s14911_s9 + $0x70] sm:$0xff]  ;;  %7783 = vmatpush.bf16.msrb.mxu1 %v9967_v29  ;;  %v9947_v7 = vld [vmem:[%s14911_s9 + $0x18] sm:$0xff] }
 0x757   : > { %v5154_v55 = vadd.f32 %v13748_v3, %v5113_v61  ;;  %v9952_v61 = vld [vmem:[%s14911_s9 + $0x40] sm:$0xff]  ;;  %v9991_v29 = vld [vmem:[%s14911_s9 + $0x178] sm:$0xff] }
 0x759   : > { %v5195_v3 = vadd.f32 %v13742_v0, %v5154_v55  ;;  %v9966_v0 = vld [vmem:[%s14911_s9 + $0xb0] sm:$0xff]  ;;  %7771 = vmatpush.bf16.msrb.mxu0 %v9958_v27  ;;  %v9983_v55 = vld [vmem:[%s14911_s9 + $0x138] sm:$0xff] }
 0x75a   : > { %v5090_v43 = vpop.f32.mrf.mxu3  ;;  %7784 = vmatpush.bf16.msrb.mxu1 %v9966_v0  ;;  %v10007_v27 = vld [vmem:[%s14911_s9 + $0x1f8] sm:$0xff]  ;;  %v5121_v0 = vadd.f32 %v13793_v13, %v13773_v59  ;;  %v5041_v13 = vadd.f32 %v13719_v31, %v13709_v51  ;;  %v9997_v51 = vld [vmem:[%s14911_s9 + $0x1a8] sm:$0xff] }
 0x75b   : > { %v5287_v28 = vld [vmem:[#allocation1 + $0x6] ss:$9 sm:$0xff]  ;;  %v5127_v32 = vpop.f32.mrf.mxu0 }
 0x75c   : > { %5292 = vst [vmem:[#allocation1] sm:$0xff] %v13727_v18  ;;  %5288 = vrot.lane.b32.xlu0 %v5287_v28, %s10362_s29  ;;  %v5128_v36 = vadd.f32 %v5127_v32, %v5087_v63  ;;  %v13898_v63 = vmax.f32 %v5195_v3, 0.0  ;;  %v9949_v28 = vld [vmem:[%s14911_s9 + $0x28] sm:$0xff]  ;;  %v9999_v3 = vld [vmem:[%s14911_s9 + $0x1b8] sm:$0xff] }
 0x75d   : > { %v9957_v32 = vld [vmem:[%s14911_s9 + $0x68] sm:$0xff]  ;;  %7759 = vmatpush.bf16.msrb.mxu3 %v9949_v28  ;;  %v9998_v28 = vld [vmem:[%s14911_s9 + $0x1b0] sm:$0xff] }
 0x75e   : > { %v5169_v62 = vadd.f32 %v5168_v40, %v5128_v36  ;;  %v9965_v36 = vld [vmem:[%s14911_s9 + $0xa8] sm:$0xff]  ;;  %7772 = vmatpush.bf16.msrb.mxu0 %v9957_v32  ;;  %v9948_v40 = vld [vmem:[%s14911_s9 + $0x20] sm:$0xff] }
 0x75f   : > { %7785 = vmatpush.bf16.msrb.mxu1 %v9965_v36  ;;  %v5162_v36 = vadd.f32 %v13787_v42, %v5121_v0  ;;  %v5082_v42 = vadd.f32 %v13780_v24, %v5041_v13  ;;  %v9988_v24 = vld [vmem:[%s14911_s9 + $0x160] sm:$0xff] }
 0x760   : > { %v13819_v12 = vadd.f32 %v5209_v33, %v5169_v62  ;;  %v9973_v33 = vld [vmem:[%s14911_s9 + $0xe8] sm:$0xff]  ;;  %v9956_v62 = vld [vmem:[%s14911_s9 + $0x60] sm:$0xff] }
 0x761   : > { %7760 = vmatpush.bf16.msrb.mxu3 %v9948_v40  ;;  %v9989_v40 = vld [vmem:[%s14911_s9 + $0x168] sm:$0xff] }
 0x762   : > { %7773 = vmatpush.bf16.msrb.mxu0 %v9956_v62 }
 0x763   : > { %v5294_v57 = vld [vmem:[#allocation1 + $0x7] ss:$9 sm:$0xff] }
 0x764   : > { %5302 = vst [vmem:[#allocation1] sm:$0xff] %v13746_v60 }
 0x765   : > { %5296 = vst.msk [vmem:[#allocation4 + $0x5] sm:$0x1] %vm13732_vm2, %v5294_v57  ;;  %v9964_v57 = vld [vmem:[%s14911_s9 + $0xa0] sm:$0xff]  ;;  %7761 = vmatpush.bf16.msrb.mxu3 %v9947_v7 }
 0x766   : > { %7786 = vmatpush.bf16.msrb.mxu1 %v9964_v57  ;;  %v9980_v7 = vld [vmem:[%s14911_s9 + $0x120] sm:$0xff] }
 0x76b   : > { %v5304_v46 = vld [vmem:[#allocation1 + $0x1] ss:$9 sm:$0xff] }
 0x76c   : > { %5307 = vst [vmem:[#allocation1] sm:$0xff] %v13746_v60 }
 0x76d   : > { %5306 = vst.msk [vmem:[#allocation4 + $0x6] sm:$0x1] %vm13732_vm2, %v5304_v46 }
 0x773   : > { %v5309_v18 = vld [vmem:[#allocation1 + $0x2] ss:$9 sm:$0xff] }
 0x774   : > { %5314 = vst [vmem:[#allocation1] sm:$0xff] %v13746_v60  ;;  %5310 = vrot.lane.b32.xlu2 %v5309_v18, %s10362_s29  ;;  %v9955_v18 = vld [vmem:[%s14911_s9 + $0x58] sm:$0xff] }
 0x775   : > { %7774 = vmatpush.bf16.msrb.mxu0 %v9955_v18  ;;  %v9996_v18 = vld [vmem:[%s14911_s9 + $0x1a0] sm:$0xff] }
 0x77b   : > { %v5316_v1 = vld [vmem:[#allocation1 + $0x3] ss:$9 sm:$0xff] }
 0x77c   : > { %5319 = vst [vmem:[#allocation1] sm:$0xff] %v13746_v60 }
 0x77d   : > { %5318 = vst.msk [vmem:[#allocation4 + $0x7] sm:$0x1] %vm13732_vm2, %v5316_v1  ;;  %v9963_v1 = vld [vmem:[%s14911_s9 + $0x98] sm:$0xff] }
 0x77e   : > { %v5240_v4 = vpop.permute.xlu2 %5239  ;;  %7787 = vmatpush.bf16.msrb.mxu1 %v9963_v1 }
 0x77f   : > { %5245 = vst.msk [vmem:[#allocation4] sm:$0x1] %vm13832_vm5, %v5240_v4  ;;  %v9971_v4 = vld [vmem:[%s14911_s9 + $0xd8] sm:$0xff] }
 0x783   : > { %v5321_v14 = vld [vmem:[#allocation1 + $0x4] ss:$9 sm:$0xff] }
 0x784   : > { %5326 = vst [vmem:[#allocation1] sm:$0xff] %v13746_v60  ;;  %5322 = vrot.lane.b32.xlu0 %v5321_v14, %s10362_s29  ;;  %v5116_v14 = vadd.f32 %v13771_v26, %v13750_v34  ;;  %v9970_v34 = vld [vmem:[%s14911_s9 + $0xd0] sm:$0xff]  ;;  %v5036_v26 = vadd.f32 %v13719_v31, %v13705_v11  ;;  %v9953_v11 = vld [vmem:[%s14911_s9 + $0x48] sm:$0xff] }
 0x785   : > { %v10005_v31 = vld [vmem:[%s14911_s9 + $0x1e8] sm:$0xff] }
 0x78b   : > { %v5328_v10 = vld [vmem:[#allocation1 + $0x7] ss:$9 sm:$0xff] }
 0x78c   : > { %5336 = vst [vmem:[#allocation1] sm:$0xff] %v13755_v16 }
 0x78d   : > { %5330 = vst.msk [vmem:[#allocation4 + $0x8] sm:$0x1] %vm13732_vm2, %v5328_v10  ;;  %v9946_v10 = vld [vmem:[%s14911_s9 + $0x10] sm:$0xff] }
 0x78e   : > { %v5265_v35 = vpop.permute.xlu1 %5264  ;;  %7762 = vmatpush.bf16.msrb.mxu3 %v9946_v10  ;;  %v9987_v10 = vld [vmem:[%s14911_s9 + $0x158] sm:$0xff] }
 0x78f   : > { %5267 = vst.msk [vmem:[#allocation4 + $0x2] sm:$0x1] %vm13832_vm5, %v5265_v35  ;;  %v9954_v35 = vld [vmem:[%s14911_s9 + $0x50] sm:$0xff] }
 0x790   : > { %7775 = vmatpush.bf16.msrb.mxu0 %v9954_v35  ;;  %v10003_v35 = vld [vmem:[%s14911_s9 + $0x1d8] sm:$0xff] }
 0x793   : > { %v5338_v8 = vld [vmem:[#allocation1 + $0x1] ss:$9 sm:$0xff] }
 0x794   : > { %5341 = vst [vmem:[#allocation1] sm:$0xff] %v13755_v16  ;;  %7776 = vmatpush.bf16.msrb.mxu0 %v9953_v11 }
 0x795   : > { %5340 = vst.msk [vmem:[#allocation4 + $0x9] sm:$0x1] %vm13732_vm2, %v5338_v8  ;;  %v9962_v8 = vld [vmem:[%s14911_s9 + $0x90] sm:$0xff] }
 0x796   : > { %v5299_v45 = vpop.permute.xlu1 %5298  ;;  %7788 = vmatpush.bf16.msrb.mxu1 %v9962_v8 }
 0x797   : > { %5301 = vst.msk [vmem:[#allocation4 + $0x5] sm:$0x1] %vm13832_vm5, %v5299_v45  ;;  %v5157_v45 = vadd.f32 %v13763_v39, %v5116_v14  ;;  %v9961_v39 = vld [vmem:[%s14911_s9 + $0x88] sm:$0xff]  ;;  %v9979_v14 = vld [vmem:[%s14911_s9 + $0x118] sm:$0xff] }
 0x798   : > { %7777 = vmatpush.bf16.msrb.mxu0 %v9952_v61 }
 0x79a   : > { %7789 = vmatpush.bf16.msrb.mxu1 %v9961_v39  ;;  %v9993_v39 = vld [vmem:[%s14911_s9 + $0x188] sm:$0xff] }
 0x79b   : > { %v5343_v60 = vld [vmem:[#allocation1 + $0x2] ss:$9 sm:$0xff] }
 0x79c   : > { %5348 = vst [vmem:[#allocation1] sm:$0xff] %v13755_v16  ;;  %5344 = vrot.lane.b32.xlu2 %v5343_v60, %s10362_s29  ;;  %7822 = vmatpush.bf16.msra.mxu0 %v9991_v29 }
 0x79e   : > { %v5333_v17 = vpop.permute.xlu1 %5332 }
 0x79f   : > { %5335 = vst.msk [vmem:[#allocation4 + $0x8] sm:$0x1] %vm13832_vm5, %v5333_v17  ;;  %v5077_v17 = vadd.f32 %v13759_v58, %v5036_v26  ;;  %v9969_v58 = vld [vmem:[%s14911_s9 + $0xc8] sm:$0xff]  ;;  %v9986_v26 = vld [vmem:[%s14911_s9 + $0x150] sm:$0xff] }
 0x7a3   : > { %v5350_v41 = vld [vmem:[#allocation1 + $0x3] ss:$9 sm:$0xff] }
 0x7a4   : > { %5353 = vst [vmem:[#allocation1] sm:$0xff] %v13755_v16 }
 0x7a5   : > { %5352 = vst.msk [vmem:[#allocation4 + $0xa] sm:$0x1] %vm13732_vm2, %v5350_v41  ;;  %v9945_v41 = vld [vmem:[%s14911_s9 + $0x8] sm:$0xff] }
 0x7a6   : > { %v5277_v54 = vpop.permute.xlu2 %5276  ;;  %v5255_v15 = vpop.permute.xlu0 %5254  ;;  %7763 = vmatpush.bf16.msrb.mxu3 %v9945_v41  ;;  %v9985_v41 = vld [vmem:[%s14911_s9 + $0x148] sm:$0xff] }
 0x7a7   : > { %5279 = vst.msk [vmem:[#allocation4 + $0x3] sm:$0x1] %vm13832_vm5, %v5277_v54  ;;  %v5198_v54 = vadd.f32 %v13757_v52, %v5157_v45  ;;  %v9960_v52 = vld [vmem:[%s14911_s9 + $0x80] sm:$0xff]  ;;  %v9994_v45 = vld [vmem:[%s14911_s9 + $0x190] sm:$0xff] }
 0x7a8   : > { %5257 = vst.msk [vmem:[#allocation4 + $0x1] sm:$0x1] %vm13832_vm5, %v5255_v15  ;;  %v5118_v15 = vadd.f32 %v13782_v21, %v5077_v17  ;;  %v9968_v21 = vld [vmem:[%s14911_s9 + $0xc0] sm:$0xff]  ;;  %7790 = vmatpush.bf16.msrb.mxu1 %v9960_v52  ;;  %v9977_v17 = vld [vmem:[%s14911_s9 + $0x108] sm:$0xff] }
 0x7a9   : > { %v13994_v5 = vmax.f32 %v5198_v54, 0.0  ;;  %v9976_v54 = vld [vmem:[%s14911_s9 + $0x100] sm:$0xff] }
 0x7aa   : > { %v5159_v19 = vadd.f32 %v13776_v2, %v5118_v15  ;;  %7764 = vmatpush.bf16.msrb.mxu3 %v9944_v37  ;;  %v9984_v15 = vld [vmem:[%s14911_s9 + $0x140] sm:$0xff] }
 0x7ab   : > { %v5355_v20 = vld [vmem:[#allocation1 + $0x4] ss:$9 sm:$0xff] }
 0x7ac   : > { %5360 = vst [vmem:[#allocation1] sm:$0xff] %v13755_v16  ;;  %5356 = vrot.lane.b32.xlu0 %v5355_v20, %s10362_s29  ;;  %v5200_v2 = vadd.f32 %v13778_v53, %v5159_v19  ;;  %7835 = vmatpush.bf16.msra.mxu1 %v9999_v3  ;;  %v10006_v53 = vld [vmem:[%s14911_s9 + $0x1f0] sm:$0xff] }
 0x7ae   : > { %7809 = vmatpush.bf16.msra.mxu3 %v9983_v55  ;;  %v14028_v32 = vmax.f32 %v5200_v2, 0.0 }
 0x7b0   : > { %7836 = vmatpush.bf16.msra.mxu1 %v9998_v28 }
 0x7b3   : > { %v5362_v30 = vld [vmem:[#allocation1 + $0x5] ss:$9 sm:$0xff] }
 0x7b4   : > { %5365 = vst [vmem:[#allocation1] sm:$0xff] %v13755_v16  ;;  %v9975_v16 = vld [vmem:[%s14911_s9 + $0xf8] sm:$0xff]  ;;  %7837 = vmatpush.bf16.msra.mxu1 %v9997_v51 }
 0x7b5   : > { %5364 = vst.msk [vmem:[#allocation4 + $0xb] sm:$0x1] %vm13732_vm2, %v5362_v30  ;;  %7796 = vmatpush.bf16.msrb.mxu2 %v9975_v16  ;;  %v5130_v30 = vpop.f32.mrf.mxu0  ;;  %v5171_v16 = vpop.f32.mrf.mxu1 }
 0x7b8   : > { %7838 = vmatpush.bf16.msra.mxu1 %v9996_v18  ;;  %v10030_v18 = vld [vmem:[%s14911_s9 + $0x2b0] sm:$0xff] }
 0x7b9   : > { %7797 = vmatpush.bf16.msrb.mxu2 %v9974_v56  ;;  %v9982_v56 = vld [vmem:[%s14911_s9 + $0x130] sm:$0xff] }
 0x7ba   : > { %7810 = vmatpush.bf16.msra.mxu3 %v9982_v56 }
 0x7bb   : > { %v5367_v43 = vld [vmem:[#allocation1 + $0x6] ss:$9 sm:$0xff] }
 0x7bc   : > { %5373 = vst [vmem:[#allocation1] sm:$0xff] %v13898_v63  ;;  %5368 = vrot.lane.b32.xlu1 %v5367_v43, %s10362_s29  ;;  %v9990_v43 = vld [vmem:[%s14911_s9 + $0x170] sm:$0xff] }
 0x7bd   : > { %7798 = vmatpush.bf16.msrb.mxu2 %v9973_v33  ;;  %v5131_v59 = vpop.f32.mrf.mxu0  ;;  %7823 = vmatpush.bf16.msra.mxu0 %v9990_v43  ;;  %v9981_v33 = vld [vmem:[%s14911_s9 + $0x128] sm:$0xff]  ;;  %v5172_v62 = vpop.f32.mrf.mxu1 }
 0x7be   : > { %7811 = vmatpush.bf16.msra.mxu3 %v9981_v33 }
 0x7c1   : > { %7799 = vmatpush.bf16.msrb.mxu2 %v9972_v23  ;;  %v5203_v23 = vadd.f32 %v13789_v6, %v5162_v36  ;;  %7824 = vmatpush.bf16.msra.mxu0 %v9989_v40  ;;  %v10004_v6 = vld [vmem:[%s14911_s9 + $0x1e0] sm:$0xff] }
 0x7c2   : > { %7812 = vmatpush.bf16.msra.mxu3 %v9980_v7  ;;  %v10014_v7 = vld [vmem:[%s14911_s9 + $0x230] sm:$0xff] }
 0x7c3   : > { %v5375_v46 = vld [vmem:[#allocation1 + $0x1] ss:$9 sm:$0xff] }
 0x7c4   : > { %5378 = vst [vmem:[#allocation1] sm:$0xff] %v13898_v63 }
 0x7c5   : > { %5377 = vst.msk [vmem:[#allocation4 + $0xc] sm:$0x1] %vm13732_vm2, %v5375_v46  ;;  %7800 = vmatpush.bf16.msrb.mxu2 %v9971_v4  ;;  %v5123_v46 = vadd.f32 %v13803_v49, %v5082_v42  ;;  %v14062_v49 = vmax.f32 %v5203_v23, 0.0  ;;  %7825 = vmatpush.bf16.msra.mxu0 %v9988_v24  ;;  %v10031_v42 = vld [vmem:[%s14911_s9 + $0x2b8] sm:$0xff]  ;;  %v10022_v24 = vld [vmem:[%s14911_s9 + $0x270] sm:$0xff] }
 0x7c6   : > { %7813 = vmatpush.bf16.msra.mxu3 %v9979_v14  ;;  %v10039_v23 = vld [vmem:[%s14911_s9 + $0x2f8] sm:$0xff]  ;;  %v10021_v14 = vld [vmem:[%s14911_s9 + $0x268] sm:$0xff] }
 0x7c7   : > { %v5164_v1 = vadd.f32 %v13798_v50, %v5123_v46  ;;  %v9995_v50 = vld [vmem:[%s14911_s9 + $0x198] sm:$0xff] }
 0x7c8   : > { %7839 = vmatpush.bf16.msra.mxu1 %v9995_v50  ;;  %v10037_v50 = vld [vmem:[%s14911_s9 + $0x2e8] sm:$0xff] }
 0x7c9   : > { %7801 = vmatpush.bf16.msrb.mxu2 %v9970_v34  ;;  %v5205_v8 = vadd.f32 %v13800_v25, %v5164_v1  ;;  %7826 = vmatpush.bf16.msra.mxu0 %v9987_v10  ;;  %v9978_v34 = vld [vmem:[%s14911_s9 + $0x110] sm:$0xff]  ;;  %v10029_v10 = vld [vmem:[%s14911_s9 + $0x2a8] sm:$0xff] }
 0x7ca   : > { %v10002_v25 = vld [vmem:[%s14911_s9 + $0x1d0] sm:$0xff]  ;;  %7814 = vmatpush.bf16.msra.mxu3 %v9978_v34  ;;  %v10012_v34 = vld [vmem:[%s14911_s9 + $0x220] sm:$0xff] }
 0x7cb   : > { %v5380_v60 = vld [vmem:[#allocation1 + $0x2] ss:$9 sm:$0xff] }
 0x7cc   : > { %5385 = vst [vmem:[#allocation1] sm:$0xff] %v13898_v63  ;;  %5381 = vrot.lane.b32.xlu2 %v5380_v60, %s10362_s29  ;;  %v14095_v60 = vmax.f32 %v5205_v8, 0.0  ;;  %7840 = vmatpush.bf16.msra.mxu1 %v9994_v45  ;;  %v10028_v45 = vld [vmem:[%s14911_s9 + $0x2a0] sm:$0xff] }
 0x7cd   : > { %7802 = vmatpush.bf16.msrb.mxu2 %v9969_v58  ;;  %7827 = vmatpush.bf16.msra.mxu0 %v9986_v26  ;;  %v10001_v58 = vld [vmem:[%s14911_s9 + $0x1c8] sm:$0xff]  ;;  %v10020_v26 = vld [vmem:[%s14911_s9 + $0x260] sm:$0xff] }
 0x7ce   : > { %v5311_v22 = vpop.permute.xlu2 %5310  ;;  %v5289_v20 = vpop.permute.xlu0 %5288  ;;  %7815 = vmatpush.bf16.msra.mxu3 %v9977_v17 }
 0x7cf   : > { %5313 = vst.msk [vmem:[#allocation4 + $0x6] sm:$0x1] %vm13832_vm5, %v5311_v22  ;;  %v9992_v22 = vld [vmem:[%s14911_s9 + $0x180] sm:$0xff] }
 0x7d0   : > { %5291 = vst.msk [vmem:[#allocation4 + $0x4] sm:$0x1] %vm13832_vm5, %v5289_v20  ;;  %7841 = vmatpush.bf16.msra.mxu1 %v9993_v39  ;;  %v10027_v39 = vld [vmem:[%s14911_s9 + $0x298] sm:$0xff] }
 0x7d1   : > { %7803 = vmatpush.bf16.msrb.mxu2 %v9968_v21  ;;  %7828 = vmatpush.bf16.msra.mxu0 %v9985_v41  ;;  %v10011_v41 = vld [vmem:[%s14911_s9 + $0x218] sm:$0xff] }
 0x7d2   : > { %7816 = vmatpush.bf16.msra.mxu3 %v9976_v54 }
 0x7d3   : > { %v5387_v47 = vld [vmem:[#allocation1 + $0x3] ss:$9 sm:$0xff] }
 0x7d4   : > { %5390 = vst [vmem:[#allocation1] sm:$0xff] %v13898_v63  ;;  %5415 = vrot.lane.b32.xlu2 %v13994_v5, %s10362_s29  ;;  %7842 = vmatpush.bf16.msra.mxu1 %v9992_v22  ;;  %v10018_v22 = vld [vmem:[%s14911_s9 + $0x250] sm:$0xff] }
 0x7d5   : > { %5389 = vst.msk [vmem:[#allocation4 + $0xd] sm:$0x1] %vm13732_vm2, %v5387_v47  ;;  %7848 = vmatpush.bf16.msra.mxu2 %v10007_v27  ;;  %7829 = vmatpush.bf16.msra.mxu0 %v9984_v15  ;;  %v10010_v15 = vld [vmem:[%s14911_s9 + $0x210] sm:$0xff] }
 0x7d9   : > { %7849 = vmatpush.bf16.msra.mxu2 %v10006_v53 }
 0x7db   : > { %v5392_v57 = vld [vmem:[#allocation1 + $0x4] ss:$9 sm:$0xff] }
 0x7dc   : > { %5449 = vrot.lane.b32.xlu2 %v14028_v32, %s10362_s29  ;;  %5393 = vrot.lane.b32.xlu0 %v5392_v57, %s10362_s29  ;;  %5397 = vst [vmem:[#allocation1] sm:$0xff] %v13898_v63 }
 0x7dd   : > { %7850 = vmatpush.bf16.msra.mxu2 %v10005_v31  ;;  %v10015_v31 = vld [vmem:[%s14911_s9 + $0x238] sm:$0xff] }
 0x7e1   : > { %7851 = vmatpush.bf16.msra.mxu2 %v10004_v6  ;;  %v10038_v6 = vld [vmem:[%s14911_s9 + $0x2f0] sm:$0xff] }
 0x7e3   : > { %v5399_v4 = vld [vmem:[#allocation1 + $0x5] ss:$9 sm:$0xff] }
 0x7e4   : > { %5483 = vrot.lane.b32.xlu2 %v14062_v49, %s10362_s29  ;;  %5402 = vst [vmem:[#allocation1] sm:$0xff] %v13898_v63 }
 0x7e5   : > { %5401 = vst.msk [vmem:[#allocation4 + $0xe] sm:$0x1] %vm13732_vm2, %v5399_v4  ;;  %7852 = vmatpush.bf16.msra.mxu2 %v10003_v35  ;;  %v10013_v4 = vld [vmem:[%s14911_s9 + $0x228] sm:$0xff] }
 0x7e9   : > { %7853 = vmatpush.bf16.msra.mxu2 %v10002_v25  ;;  %v10036_v25 = vld [vmem:[%s14911_s9 + $0x2e0] sm:$0xff] }
 0x7eb   : > { %v5404_v11 = vld [vmem:[#allocation1 + $0x6] ss:$9 sm:$0xff] }
 0x7ec   : > { %5517 = vrot.lane.b32.xlu2 %v14095_v60, %s10362_s29  ;;  %5409 = vst [vmem:[#allocation1] sm:$0xff] %v13898_v63  ;;  %5405 = vrot.lane.b32.xlu1 %v5404_v11, %s10362_s29  ;;  %v10000_v63 = vld [vmem:[%s14911_s9 + $0x1c0] sm:$0xff]  ;;  %v10019_v11 = vld [vmem:[%s14911_s9 + $0x258] sm:$0xff] }
 0x7ed   : > { %7854 = vmatpush.bf16.msra.mxu2 %v10001_v58  ;;  %v10035_v58 = vld [vmem:[%s14911_s9 + $0x2d8] sm:$0xff] }
 0x7f1   : > { %7855 = vmatpush.bf16.msra.mxu2 %v10000_v63  ;;  %v10026_v63 = vld [vmem:[%s14911_s9 + $0x290] sm:$0xff] }
 0x7f3   : > { %v5411_v20 = vld [vmem:[#allocation1 + $0x7] ss:$9 sm:$0xff] }
 0x7f4   : > { %5419 = vst [vmem:[#allocation1] sm:$0xff] %v13994_v5 }
 0x7f5   : > { %5413 = vst.msk [vmem:[#allocation4 + $0xf] sm:$0x1] %vm13732_vm2, %v5411_v20  ;;  %v10034_v20 = vld [vmem:[%s14911_s9 + $0x2d0] sm:$0xff] }
 0x7f6   : > { %v5323_v37 = vpop.permute.xlu0 %5322  ;;  %v5345_v61 = vpop.permute.xlu2 %5344 }
 0x7f7   : > { %5325 = vst.msk [vmem:[#allocation4 + $0x7] sm:$0x1] %vm13832_vm5, %v5323_v37 }
 0x7f8   : > { %5347 = vst.msk [vmem:[#allocation4 + $0x9] sm:$0x1] %vm13832_vm5, %v5345_v61  ;;  %v10009_v61 = vld [vmem:[%s14911_s9 + $0x208] sm:$0xff] }
 0x7fb   : > { %v5421_v52 = vld [vmem:[#allocation1 + $0x3] ss:$9 sm:$0xff] }
 0x7fc   : > { %5424 = vst [vmem:[#allocation1] sm:$0xff] %v13994_v5 }
 0x7fd   : > { %5423 = vst.msk [vmem:[#allocation4 + $0x10] sm:$0x1] %vm13732_vm2, %v5421_v52  ;;  %v10017_v52 = vld [vmem:[%s14911_s9 + $0x248] sm:$0xff] }
 0x7fe   : > { %v5604_v21 = vld [vmem:[#allocation4] sm:$0xff] }
 0x7ff   : > { %v5612_v55 = vperm.slane %v5604_v21, 0  ;;  %v5613_v30 = vperm.slane %v5604_v21, 1  ;;  %v5614_v19 = vperm.slane %v5604_v21, 2  ;;  %v5615_v29 = vperm.slane %v5604_v21, 3 }
 0x800   : > { %v5616_v56 = vperm.slane %v5604_v21, 4  ;;  %v5617_v43 = vperm.slane %v5604_v21, 5  ;;  %v5618_v28 = vperm.slane %v5604_v21, 6  ;;  %v5619_v53 = vperm.slane %v5604_v21, 7  ;;  %v10025_v21 = vld [vmem:[%s14911_s9 + $0x288] sm:$0xff] }
 0x801   : > { %v5676_v3 = vpack.c.bf16 %v5612_v55, %v5612_v55  ;;  %v5677_v16 = vpack.c.bf16 %v5613_v30, %v5613_v30  ;;  %v5678_v47 = vpack.c.bf16 %v5614_v19, %v5614_v19  ;;  %v5679_v27 = vpack.c.bf16 %v5615_v29, %v5615_v29  ;;  %v10033_v55 = vld [vmem:[%s14911_s9 + $0x2c8] sm:$0xff]  ;;  %v10016_v30 = vld [vmem:[%s14911_s9 + $0x240] sm:$0xff] }
 0x802   : > { %v5680_v59 = vpack.c.bf16 %v5616_v56, %v5616_v56  ;;  %v5681_v13 = vpack.c.bf16 %v5617_v43, %v5617_v43  ;;  %v5682_v36 = vpack.c.bf16 %v5618_v28, %v5618_v28  ;;  %v5683_v33 = vpack.c.bf16 %v5619_v53, %v5619_v53  ;;  %v10024_v19 = vld [vmem:[%s14911_s9 + $0x280] sm:$0xff]  ;;  %v10046_v56 = vld [vmem:[%s14911_s9 + $0x330] sm:$0xff] }
 0x803   : > { %7765 = vmatmul.bf16.vlgmr.msrb.gmra.mxu3 %v5676_v3  ;;  %7778 = vmatmul.bf16.vlgmr.msrb.gmra.mxu0 %v5677_v16  ;;  %v5426_v2 = vld [vmem:[#allocation1 + $0x4] ss:$9 sm:$0xff] }
 0x804   : > { %7791 = vmatmul.bf16.vlgmr.msrb.gmra.mxu1 %v5678_v47  ;;  %7804 = vmatmul.bf16.vlgmr.msrb.gmra.mxu2 %v5679_v27  ;;  %5431 = vst [vmem:[#allocation1] sm:$0xff] %v13994_v5  ;;  %v10032_v29 = vld [vmem:[%s14911_s9 + $0x2c0] sm:$0xff]  ;;  %v10047_v3 = vld [vmem:[%s14911_s9 + $0x338] sm:$0xff]  ;;  %v10054_v43 = vld [vmem:[%s14911_s9 + $0x370] sm:$0xff] }
 0x805   : > { %5427 = vrot.lane.b32.xlu0 %v5426_v2, %s10362_s29  ;;  %7861 = vmatpush.bf16.msrb.mxu3 %v10015_v31  ;;  %v10055_v16 = vld [vmem:[%s14911_s9 + $0x378] sm:$0xff]  ;;  %v10062_v28 = vld [vmem:[%s14911_s9 + $0x3b0] sm:$0xff]  ;;  %v10060_v31 = vld [vmem:[%s14911_s9 + $0x3a0] sm:$0xff] }
 0x806   : > { %7887 = vmatpush.bf16.msrb.mxu1 %v10031_v42  ;;  %7900 = vmatpush.bf16.msrb.mxu2 %v10039_v23  ;;  %v10063_v47 = vld [vmem:[%s14911_s9 + $0x3b8] sm:$0xff]  ;;  %v10070_v53 = vld [vmem:[%s14911_s9 + $0x3f0] sm:$0xff] }
 0x807   : > { %v10071_v27 = vld [vmem:[%s14911_s9 + $0x3f8] sm:$0xff] }
 0x808   : > { %v10043_v42 = vld [vmem:[%s14911_s9 + $0x318] sm:$0xff] }
 0x809   : > { %7862 = vmatpush.bf16.msrb.mxu3 %v10014_v7  ;;  %v10051_v23 = vld [vmem:[%s14911_s9 + $0x358] sm:$0xff] }
 0x80a   : > { %7888 = vmatpush.bf16.msrb.mxu1 %v10030_v18  ;;  %7901 = vmatpush.bf16.msrb.mxu2 %v10038_v6  ;;  %v10067_v7 = vld [vmem:[%s14911_s9 + $0x3d8] sm:$0xff]  ;;  %v10042_v18 = vld [vmem:[%s14911_s9 + $0x310] sm:$0xff] }
 0x80b   : > { %v5433_v0 = vld [vmem:[#allocation1 + $0x5] ss:$9 sm:$0xff] }
 0x80c   : > { %5436 = vst [vmem:[#allocation1] sm:$0xff] %v13994_v5  ;;  %v10050_v6 = vld [vmem:[%s14911_s9 + $0x350] sm:$0xff] }
 0x80d   : > { %5435 = vst.msk [vmem:[#allocation4 + $0x11] sm:$0x1] %vm13732_vm2, %v5433_v0  ;;  %7863 = vmatpush.bf16.msrb.mxu3 %v10013_v4  ;;  %v10066_v4 = vld [vmem:[%s14911_s9 + $0x3d0] sm:$0xff] }
 0x80e   : > { %7889 = vmatpush.bf16.msrb.mxu1 %v10029_v10  ;;  %7902 = vmatpush.bf16.msrb.mxu2 %v10037_v50  ;;  %v10049_v10 = vld [vmem:[%s14911_s9 + $0x348] sm:$0xff] }
 0x80f   : > { %v10057_v50 = vld [vmem:[%s14911_s9 + $0x388] sm:$0xff] }
 0x811   : > { %7864 = vmatpush.bf16.msrb.mxu3 %v10012_v34  ;;  %v10048_v34 = vld [vmem:[%s14911_s9 + $0x340] sm:$0xff] }
 0x812   : > { %7890 = vmatpush.bf16.msrb.mxu1 %v10028_v45  ;;  %7903 = vmatpush.bf16.msrb.mxu2 %v10036_v25  ;;  %v10056_v45 = vld [vmem:[%s14911_s9 + $0x380] sm:$0xff] }
 0x813   : > { %7817 = vmatmul.bf16.vlgmr.msra.gmra.mxu3 %v5680_v59  ;;  %7830 = vmatmul.bf16.vlgmr.msra.gmra.mxu0 %v5681_v13  ;;  %v5438_v40 = vld [vmem:[#allocation1 + $0x6] ss:$9 sm:$0xff] }
 0x814   : > { %7843 = vmatmul.bf16.vlgmr.msra.gmra.mxu1 %v5682_v36  ;;  %7856 = vmatmul.bf16.vlgmr.msra.gmra.mxu2 %v5683_v33  ;;  %5443 = vst [vmem:[#allocation1] sm:$0xff] %v13994_v5  ;;  %v10023_v5 = vld [vmem:[%s14911_s9 + $0x278] sm:$0xff]  ;;  %v10045_v59 = vld [vmem:[%s14911_s9 + $0x328] sm:$0xff]  ;;  %v10064_v25 = vld [vmem:[%s14911_s9 + $0x3c0] sm:$0xff] }
 0x815   : > { %5439 = vrot.lane.b32.xlu1 %v5438_v40, %s10362_s29  ;;  %7874 = vmatpush.bf16.msrb.mxu0 %v10023_v5  ;;  %v10053_v13 = vld [vmem:[%s14911_s9 + $0x368] sm:$0xff]  ;;  %v10068_v5 = vld [vmem:[%s14911_s9 + $0x3e0] sm:$0xff] }
 0x816   : > { %7865 = vmatpush.bf16.msrb.mxu3 %v10011_v41  ;;  %7891 = vmatpush.bf16.msrb.mxu1 %v10027_v39  ;;  %v10061_v36 = vld [vmem:[%s14911_s9 + $0x3a8] sm:$0xff] }
 0x817   : > { %7904 = vmatpush.bf16.msrb.mxu2 %v10035_v58  ;;  %v10069_v33 = vld [vmem:[%s14911_s9 + $0x3e8] sm:$0xff] }
 0x819   : > { %7875 = vmatpush.bf16.msrb.mxu0 %v10022_v24 }
 0x81a   : > { %7866 = vmatpush.bf16.msrb.mxu3 %v10010_v15  ;;  %7892 = vmatpush.bf16.msrb.mxu1 %v10026_v63 }
 0x81b   : > { %v5445_v62 = vld [vmem:[#allocation1 + $0x7] ss:$9 sm:$0xff]  ;;  %7905 = vmatpush.bf16.msrb.mxu2 %v10034_v20 }
 0x81c   : > { %5453 = vst [vmem:[#allocation1] sm:$0xff] %v14028_v32 }
 0x81d   : > { %5447 = vst.msk [vmem:[#allocation4 + $0x12] sm:$0x1] %vm13732_vm2, %v5445_v62  ;;  %7876 = vmatpush.bf16.msrb.mxu0 %v10021_v14  ;;  %v10044_v62 = vld [vmem:[%s14911_s9 + $0x320] sm:$0xff]  ;;  %v10041_v14 = vld [vmem:[%s14911_s9 + $0x308] sm:$0xff] }
 0x81e   : > { %v5357_v57 = vpop.permute.xlu0 %5356  ;;  %7867 = vmatpush.bf16.msrb.mxu3 %v10009_v61  ;;  %7893 = vmatpush.bf16.msrb.mxu1 %v10025_v21 }
 0x81f   : > { %5359 = vst.msk [vmem:[#allocation4 + $0xa] sm:$0x1] %vm13832_vm5, %v5357_v57  ;;  %7906 = vmatpush.bf16.msrb.mxu2 %v10033_v55  ;;  %v10052_v57 = vld [vmem:[%s14911_s9 + $0x360] sm:$0xff] }
 0x821   : > { %7877 = vmatpush.bf16.msrb.mxu0 %v10020_v26 }
 0x822   : > { %7894 = vmatpush.bf16.msrb.mxu1 %v10024_v19 }
 0x823   : > { %v5455_v51 = vld [vmem:[#allocation1 + $0x1] ss:$9 sm:$0xff]  ;;  %7907 = vmatpush.bf16.msrb.mxu2 %v10032_v29 }
 0x824   : > { %5458 = vst [vmem:[#allocation1] sm:$0xff] %v14028_v32 }
 0x825   : > { %5457 = vst.msk [vmem:[#allocation4 + $0x13] sm:$0x1] %vm13732_vm2, %v5455_v51  ;;  %7878 = vmatpush.bf16.msrb.mxu0 %v10019_v11 }
 0x826   : > { %v5382_v46 = vpop.permute.xlu2 %5381  ;;  %7939 = vmatpush.bf16.msra.mxu1 %v10063_v47 }
 0x827   : > { %5384 = vst.msk [vmem:[#allocation4 + $0xc] sm:$0x1] %vm13832_vm5, %v5382_v46  ;;  %7952 = vmatpush.bf16.msra.mxu2 %v10071_v27  ;;  %v10059_v46 = vld [vmem:[%s14911_s9 + $0x398] sm:$0xff] }
 0x829   : > { %7879 = vmatpush.bf16.msrb.mxu0 %v10018_v22 }
 0x82a   : > { %7940 = vmatpush.bf16.msra.mxu1 %v10062_v28 }
 0x82b   : > { %v5460_v1 = vld [vmem:[#allocation1 + $0x2] ss:$9 sm:$0xff]  ;;  %7953 = vmatpush.bf16.msra.mxu2 %v10070_v53 }
 0x82c   : > { %5461 = vrot.lane.b32.xlu0 %v5460_v1, %s10362_s29  ;;  %5465 = vst [vmem:[#allocation1] sm:$0xff] %v14028_v32  ;;  %v10058_v1 = vld [vmem:[%s14911_s9 + $0x390] sm:$0xff] }
 0x82d   : > { %7880 = vmatpush.bf16.msrb.mxu0 %v10017_v52 }
 0x82e   : > { %v5416_v35 = vpop.permute.xlu2 %5415  ;;  %v5369_v8 = vpop.permute.xlu1 %5368  ;;  %7941 = vmatpush.bf16.msra.mxu1 %v10061_v36 }
 0x82f   : > { %5418 = vst.msk [vmem:[#allocation4 + $0xf] sm:$0x1] %vm13832_vm5, %v5416_v35  ;;  %7954 = vmatpush.bf16.msra.mxu2 %v10069_v33  ;;  %v10065_v35 = vld [vmem:[%s14911_s9 + $0x3c8] sm:$0xff] }
 0x830   : > { %5371 = vst.msk [vmem:[#allocation4 + $0xb] sm:$0x1] %vm13832_vm5, %v5369_v8  ;;  %v10040_v8 = vld [vmem:[%s14911_s9 + $0x300] sm:$0xff] }
 0x831   : > { %7881 = vmatpush.bf16.msrb.mxu0 %v10016_v30 }
 0x832   : > { %7942 = vmatpush.bf16.msra.mxu1 %v10060_v31 }
 0x833   : > { %v5467_v17 = vld [vmem:[#allocation1 + $0x5] ss:$9 sm:$0xff]  ;;  %7955 = vmatpush.bf16.msra.mxu2 %v10068_v5 }
 0x834   : > { %5470 = vst [vmem:[#allocation1] sm:$0xff] %v14028_v32 }
 0x835   : > { %5469 = vst.msk [vmem:[#allocation4 + $0x14] sm:$0x1] %vm13732_vm2, %v5467_v17  ;;  %7926 = vmatpush.bf16.msra.mxu0 %v10055_v16 }
 0x836   : > { %v5450_v54 = vpop.permute.xlu2 %5449  ;;  %7943 = vmatpush.bf16.msra.mxu1 %v10059_v46 }
 0x837   : > { %5452 = vst.msk [vmem:[#allocation4 + $0x12] sm:$0x1] %vm13832_vm5, %v5450_v54  ;;  %7956 = vmatpush.bf16.msra.mxu2 %v10067_v7 }
 0x839   : > { %7927 = vmatpush.bf16.msra.mxu0 %v10054_v43 }
 0x83a   : > { %7944 = vmatpush.bf16.msra.mxu1 %v10058_v1 }
 0x83b   : > { %v5472_v37 = vld [vmem:[#allocation1 + $0x6] ss:$9 sm:$0xff]  ;;  %7957 = vmatpush.bf16.msra.mxu2 %v10066_v4 }
 0x83c   : > { %5473 = vrot.lane.b32.xlu1 %v5472_v37, %s10362_s29  ;;  %5477 = vst [vmem:[#allocation1] sm:$0xff] %v14028_v32  ;;  %v10008_v32 = vld [vmem:[%s14911_s9 + $0x200] sm:$0xff] }
 0x83d   : > { %7868 = vmatpush.bf16.msrb.mxu3 %v10008_v32  ;;  %7928 = vmatpush.bf16.msra.mxu0 %v10053_v13 }
 0x83e   : > { %v5484_v0 = vpop.permute.xlu2 %5483  ;;  %7945 = vmatpush.bf16.msra.mxu1 %v10057_v50 }
 0x83f   : > { %7958 = vmatpush.bf16.msra.mxu2 %v10065_v35  ;;  %v10079_v35 = vld [vmem:[%s14911_s9 + $0x438] sm:$0xff] }
 0x841   : > { %7913 = vmatpush.bf16.msra.mxu3 %v10047_v3  ;;  %7929 = vmatpush.bf16.msra.mxu0 %v10052_v57 }
 0x842   : > { %7946 = vmatpush.bf16.msra.mxu1 %v10056_v45  ;;  %v10078_v45 = vld [vmem:[%s14911_s9 + $0x430] sm:$0xff] }
 0x843   : > { %v5479_v2 = vld [vmem:[#allocation1 + $0x7] ss:$9 sm:$0xff]  ;;  %7959 = vmatpush.bf16.msra.mxu2 %v10064_v25 }
 0x844   : > { %5481 = vst.msk [vmem:[#allocation4 + $0x15] sm:$0x1] %vm13732_vm2, %v5479_v2  ;;  %v10086_v25 = vld [vmem:[%s14911_s9 + $0x470] sm:$0xff] }
 0x845   : > { %5486 = vst.msk [vmem:[#allocation4 + $0x15] sm:$0x1] %vm13832_vm5, %v5484_v0  ;;  %7914 = vmatpush.bf16.msra.mxu3 %v10046_v56  ;;  %7930 = vmatpush.bf16.msra.mxu0 %v10051_v23  ;;  %v6220_v56 = vld [vmem:[%s14912_s10] sm:$0x1] }
 0x846   : > { %5487 = vst [vmem:[#allocation1] sm:$0xff] %v14062_v49  ;;  %v5518_v52 = vpop.permute.xlu2 %5517 }
 0x849   : > { %7915 = vmatpush.bf16.msra.mxu3 %v10045_v59  ;;  %7931 = vmatpush.bf16.msra.mxu0 %v10050_v6 }
 0x84d   : > { %v5489_v40 = vld [vmem:[#allocation1 + $0x1] ss:$9 sm:$0xff]  ;;  %7916 = vmatpush.bf16.msra.mxu3 %v10044_v62  ;;  %7932 = vmatpush.bf16.msra.mxu0 %v10049_v10  ;;  %v5208_v10 = vadd.f32 %v13808_v38, %v13813_v48 }
 0x84e   : > { %5492 = vst [vmem:[#allocation1] sm:$0xff] %v14062_v49  ;;  %v5394_v51 = vpop.permute.xlu0 %5393  ;;  %v10103_v38 = vld [vmem:[%s14911_s9 + $0x4f8] sm:$0xff] }
 0x84f   : > { %5491 = vst.msk [vmem:[#allocation4 + $0x16] sm:$0x1] %vm13732_vm2, %v5489_v40 }
 0x850   : > { %5396 = vst.msk [vmem:[#allocation4 + $0xd] sm:$0x1] %vm13832_vm5, %v5394_v51 }
 0x851   : > { %7917 = vmatpush.bf16.msra.mxu3 %v10043_v42  ;;  %7933 = vmatpush.bf16.msra.mxu0 %v10048_v34  ;;  %v10095_v34 = vld [vmem:[%s14911_s9 + $0x4b8] sm:$0xff] }
 0x855   : > { %v5494_v24 = vld [vmem:[#allocation1 + $0x2] ss:$9 sm:$0xff]  ;;  %7918 = vmatpush.bf16.msra.mxu3 %v10042_v18 }
 0x856   : > { %5499 = vst [vmem:[#allocation1] sm:$0xff] %v14062_v49  ;;  %5495 = vrot.lane.b32.xlu0 %v5494_v24, %s10362_s29 }
 0x859   : > { %7919 = vmatpush.bf16.msra.mxu3 %v10041_v14 }
 0x85d   : > { %v5501_v26 = vld [vmem:[#allocation1 + $0x3] ss:$9 sm:$0xff]  ;;  %7920 = vmatpush.bf16.msra.mxu3 %v10040_v8 }
 0x85e   : > { %5504 = vst [vmem:[#allocation1] sm:$0xff] %v14062_v49  ;;  %v5406_v17 = vpop.permute.xlu1 %5405  ;;  %v10087_v8 = vld [vmem:[%s14911_s9 + $0x478] sm:$0xff] }
 0x85f   : > { %5503 = vst.msk [vmem:[#allocation4 + $0x17] sm:$0x1] %vm13732_vm2, %v5501_v26 }
 0x860   : > { %5408 = vst.msk [vmem:[#allocation4 + $0xe] sm:$0x1] %vm13832_vm5, %v5406_v17  ;;  %v10094_v17 = vld [vmem:[%s14911_s9 + $0x4b0] sm:$0xff] }
 0x865   : > { %v5506_v41 = vld [vmem:[#allocation1 + $0x4] ss:$9 sm:$0xff] }
 0x866   : > { %5511 = vst [vmem:[#allocation1] sm:$0xff] %v14062_v49  ;;  %5507 = vrot.lane.b32.xlu1 %v5506_v41, %s10362_s29  ;;  %v14428_v41 = vmax.f32 %v5208_v10, 0.0  ;;  %v10107_v10 = vld [vmem:[%s14911_s9 + $0x518] sm:$0xff] }
 0x867   : > { %v5605_v11 = vld [vmem:[#allocation4 + $0x8] sm:$0xff] }
 0x868   : > { %v5620_v39 = vperm.slane %v5605_v11, 0  ;;  %v5621_v58 = vperm.slane %v5605_v11, 1  ;;  %v5622_v54 = vperm.slane %v5605_v11, 2  ;;  %v5623_v15 = vperm.slane %v5605_v11, 3 }
 0x869   : > { %v5624_v49 = vperm.slane %v5605_v11, 4  ;;  %v5625_v21 = vperm.slane %v5605_v11, 5  ;;  %v5626_v30 = vperm.slane %v5605_v11, 6  ;;  %v5627_v19 = vperm.slane %v5605_v11, 7  ;;  %v10102_v11 = vld [vmem:[%s14911_s9 + $0x4f0] sm:$0xff] }
 0x86a   : > { %v5684_v22 = vpack.c.bf16 %v5620_v39, %v5620_v39  ;;  %v5685_v63 = vpack.c.bf16 %v5621_v58, %v5621_v58  ;;  %v5686_v20 = vpack.c.bf16 %v5622_v54, %v5622_v54  ;;  %v5687_v37 = vpack.c.bf16 %v5623_v15, %v5623_v15  ;;  %v10077_v58 = vld [vmem:[%s14911_s9 + $0x428] sm:$0xff] }
 0x86b   : > { %v5688_v29 = vpack.c.bf16 %v5624_v49, %v5624_v49  ;;  %v5689_v3 = vpack.c.bf16 %v5625_v21, %v5625_v21  ;;  %v5690_v16 = vpack.c.bf16 %v5626_v30, %v5626_v30  ;;  %v5691_v47 = vpack.c.bf16 %v5627_v19, %v5627_v19  ;;  %v10085_v54 = vld [vmem:[%s14911_s9 + $0x468] sm:$0xff]  ;;  %v10075_v49 = vld [vmem:[%s14911_s9 + $0x418] sm:$0xff]  ;;  %v10074_v19 = vld [vmem:[%s14911_s9 + $0x410] sm:$0xff] }
 0x86c   : > { %7869 = vmatmul.bf16.vlgmr.msrb.gmra.mxu3 %v5684_v22  ;;  %7882 = vmatmul.bf16.vlgmr.msrb.gmra.mxu0 %v5685_v63  ;;  %v10093_v15 = vld [vmem:[%s14911_s9 + $0x4a8] sm:$0xff]  ;;  %v10076_v63 = vld [vmem:[%s14911_s9 + $0x420] sm:$0xff]  ;;  %v10083_v21 = vld [vmem:[%s14911_s9 + $0x458] sm:$0xff] }
 0x86d   : > { %v5513_v61 = vld [vmem:[#allocation1 + $0x7] ss:$9 sm:$0xff]  ;;  %7895 = vmatmul.bf16.vlgmr.msrb.gmra.mxu1 %v5686_v20  ;;  %7908 = vmatmul.bf16.vlgmr.msrb.gmra.mxu2 %v5687_v37 }
 0x86e   : > { %5515 = vst.msk [vmem:[#allocation4 + $0x18] sm:$0x1] %vm13732_vm2, %v5513_v61  ;;  %7965 = vmatpush.bf16.msrb.mxu3 %v10079_v35  ;;  %7978 = vmatpush.bf16.msrb.mxu0 %v10087_v8  ;;  %v10101_v22 = vld [vmem:[%s14911_s9 + $0x4e8] sm:$0xff]  ;;  %v10084_v20 = vld [vmem:[%s14911_s9 + $0x460] sm:$0xff]  ;;  %v10115_v35 = vld [vmem:[%s14911_s9 + $0x558] sm:$0xff] }
 0x86f   : > { %5520 = vst.msk [vmem:[#allocation4 + $0x18] sm:$0x1] %vm13832_vm5, %v5518_v52  ;;  %7991 = vmatpush.bf16.msrb.mxu1 %v10095_v34  ;;  %8004 = vmatpush.bf16.msrb.mxu2 %v10103_v38  ;;  %v10092_v37 = vld [vmem:[%s14911_s9 + $0x4a0] sm:$0xff]  ;;  %v10123_v8 = vld [vmem:[%s14911_s9 + $0x598] sm:$0xff]  ;;  %v10114_v38 = vld [vmem:[%s14911_s9 + $0x550] sm:$0xff] }
 0x870   : > { %5521 = vst [vmem:[#allocation1] sm:$0xff] %v14095_v60  ;;  %v10100_v61 = vld [vmem:[%s14911_s9 + $0x4e0] sm:$0xff]  ;;  %v10131_v34 = vld [vmem:[%s14911_s9 + $0x5d8] sm:$0xff] }
 0x872   : > { %7966 = vmatpush.bf16.msrb.mxu3 %v10078_v45  ;;  %7979 = vmatpush.bf16.msrb.mxu0 %v10086_v25  ;;  %v10130_v45 = vld [vmem:[%s14911_s9 + $0x5d0] sm:$0xff]  ;;  %v10105_v25 = vld [vmem:[%s14911_s9 + $0x508] sm:$0xff] }
 0x873   : > { %7992 = vmatpush.bf16.msrb.mxu1 %v10094_v17  ;;  %8005 = vmatpush.bf16.msrb.mxu2 %v10102_v11  ;;  %v10113_v17 = vld [vmem:[%s14911_s9 + $0x548] sm:$0xff] }
 0x874   : > { %v10121_v11 = vld [vmem:[%s14911_s9 + $0x588] sm:$0xff] }
 0x876   : > { %7967 = vmatpush.bf16.msrb.mxu3 %v10077_v58  ;;  %7980 = vmatpush.bf16.msrb.mxu0 %v10085_v54  ;;  %v10104_v54 = vld [vmem:[%s14911_s9 + $0x500] sm:$0xff] }
 0x877   : > { %v5523_v55 = vld [vmem:[#allocation1 + $0x1] ss:$9 sm:$0xff]  ;;  %v5428_v32 = vpop.permute.xlu0 %5427  ;;  %7993 = vmatpush.bf16.msrb.mxu1 %v10093_v15  ;;  %8006 = vmatpush.bf16.msrb.mxu2 %v10101_v22 }
 0x878   : > { %5525 = vst.msk [vmem:[#allocation4 + $0x19] sm:$0x1] %vm13732_vm2, %v5523_v55  ;;  %v10091_v55 = vld [vmem:[%s14911_s9 + $0x498] sm:$0xff]  ;;  %v10112_v15 = vld [vmem:[%s14911_s9 + $0x540] sm:$0xff] }
 0x879   : > { %5526 = vst [vmem:[#allocation1] sm:$0xff] %v14095_v60  ;;  %v10120_v22 = vld [vmem:[%s14911_s9 + $0x580] sm:$0xff] }
 0x87a   : > { %5430 = vst.msk [vmem:[#allocation4 + $0x10] sm:$0x1] %vm13832_vm5, %v5428_v32  ;;  %7968 = vmatpush.bf16.msrb.mxu3 %v10076_v63  ;;  %7981 = vmatpush.bf16.msrb.mxu0 %v10084_v20  ;;  %v10099_v32 = vld [vmem:[%s14911_s9 + $0x4d8] sm:$0xff] }
 0x87b   : > { %7994 = vmatpush.bf16.msrb.mxu1 %v10092_v37  ;;  %8007 = vmatpush.bf16.msrb.mxu2 %v10100_v61 }
 0x87c   : > { %7921 = vmatmul.bf16.vlgmr.msra.gmra.mxu3 %v5688_v29  ;;  %7934 = vmatmul.bf16.vlgmr.msra.gmra.mxu0 %v5689_v3  ;;  %v10082_v29 = vld [vmem:[%s14911_s9 + $0x450] sm:$0xff] }
 0x87d   : > { %7947 = vmatmul.bf16.vlgmr.msra.gmra.mxu1 %v5690_v16  ;;  %7960 = vmatmul.bf16.vlgmr.msra.gmra.mxu2 %v5691_v47  ;;  %v10090_v3 = vld [vmem:[%s14911_s9 + $0x490] sm:$0xff] }
 0x87e   : > { %7969 = vmatpush.bf16.msrb.mxu3 %v10075_v49  ;;  %7982 = vmatpush.bf16.msrb.mxu0 %v10083_v21  ;;  %v10098_v16 = vld [vmem:[%s14911_s9 + $0x4d0] sm:$0xff] }
 0x87f   : > { %7995 = vmatpush.bf16.msrb.mxu1 %v10091_v55  ;;  %8008 = vmatpush.bf16.msrb.mxu2 %v10099_v32 }
 0x880   : > { %v5528_v27 = vld [vmem:[#allocation1 + $0x2] ss:$9 sm:$0xff]  ;;  %v7779_v2 = vpop.f32.mrf.mxu0 }
 0x881   : > { %5529 = vrot.lane.b32.xlu0 %v5528_v27, %s10362_s29  ;;  %5533 = vst [vmem:[#allocation1] sm:$0xff] %v14095_v60  ;;  %v7792_v0 = vpop.f32.mrf.mxu1  ;;  %v10073_v27 = vld [vmem:[%s14911_s9 + $0x408] sm:$0xff] }
 0x882   : > { %7970 = vmatpush.bf16.msrb.mxu3 %v10074_v19  ;;  %7983 = vmatpush.bf16.msrb.mxu0 %v10082_v29  ;;  %v10143_v29 = vld [vmem:[%s14911_s9 + $0x638] sm:$0xff] }
 0x883   : > { %7996 = vmatpush.bf16.msrb.mxu1 %v10090_v3  ;;  %8009 = vmatpush.bf16.msrb.mxu2 %v10098_v16  ;;  %v10159_v3 = vld [vmem:[%s14911_s9 + $0x6b8] sm:$0xff] }
 0x886   : > { %v7766_v43 = vpop.f32.mrf.mxu3  ;;  %7971 = vmatpush.bf16.msrb.mxu3 %v10073_v27 }
 0x887   : > { %v7767_v28 = vadd.f32 %v7766_v43, %v6220_v56  ;;  %v7805_v53 = vpop.f32.mrf.mxu2  ;;  %v5440_v59 = vpop.permute.xlu1 %5439  ;;  %v10097_v56 = vld [vmem:[%s14911_s9 + $0x4c8] sm:$0xff]  ;;  %v10072_v43 = vld [vmem:[%s14911_s9 + $0x400] sm:$0xff] }
 0x888   : > { %v5535_v13 = vld [vmem:[#allocation1 + $0x3] ss:$9 sm:$0xff]  ;;  %5442 = vst.msk [vmem:[#allocation4 + $0x11] sm:$0x1] %vm13832_vm5, %v5440_v59  ;;  %v7781_v36 = vpop.f32.mrf.mxu0  ;;  %8010 = vmatpush.bf16.msrb.mxu2 %v10097_v56 }
 0x889   : > { %5537 = vst.msk [vmem:[#allocation4 + $0x1a] sm:$0x1] %vm13732_vm2, %v5535_v13  ;;  %v7780_v33 = vadd.f32 %v7779_v2, %v7767_v28  ;;  %v7794_v40 = vpop.f32.mrf.mxu1  ;;  %v10081_v2 = vld [vmem:[%s14911_s9 + $0x448] sm:$0xff]  ;;  %v10080_v28 = vld [vmem:[%s14911_s9 + $0x440] sm:$0xff]  ;;  %v5225_v13 = vmax.f32 %v13819_v12, 0.0  ;;  %v10111_v36 = vld [vmem:[%s14911_s9 + $0x538] sm:$0xff] }
 0x88a   : > { %5538 = vst [vmem:[#allocation1] sm:$0xff] %v14095_v60  ;;  %7984 = vmatpush.bf16.msrb.mxu0 %v10081_v2  ;;  %v10096_v59 = vld [vmem:[%s14911_s9 + $0x4c0] sm:$0xff]  ;;  %7972 = vmatpush.bf16.msrb.mxu3 %v10072_v43  ;;  %v10110_v12 = vld [vmem:[%s14911_s9 + $0x530] sm:$0xff] }
 0x88b   : > { %v7793_v62 = vadd.f32 %v7792_v0, %v7780_v33  ;;  %v10089_v0 = vld [vmem:[%s14911_s9 + $0x488] sm:$0xff]  ;;  %v10119_v33 = vld [vmem:[%s14911_s9 + $0x578] sm:$0xff]  ;;  %v10142_v2 = vld [vmem:[%s14911_s9 + $0x630] sm:$0xff] }
 0x88c   : > { %7997 = vmatpush.bf16.msrb.mxu1 %v10089_v0  ;;  %8011 = vmatpush.bf16.msrb.mxu2 %v10096_v59  ;;  %v10150_v0 = vld [vmem:[%s14911_s9 + $0x670] sm:$0xff] }
 0x88d   : > { %v7806_v57 = vadd.f32 %v7805_v53, %v7793_v62  ;;  %v10088_v53 = vld [vmem:[%s14911_s9 + $0x480] sm:$0xff]  ;;  %v10127_v62 = vld [vmem:[%s14911_s9 + $0x5b8] sm:$0xff]  ;;  %v10158_v56 = vld [vmem:[%s14911_s9 + $0x6b0] sm:$0xff] }
 0x88e   : > { %v7768_v51 = vpop.f32.mrf.mxu3  ;;  %7985 = vmatpush.bf16.msrb.mxu0 %v10080_v28  ;;  %8017 = vmatpush.bf16.msra.mxu3 %v10111_v36  ;;  %v10166_v43 = vld [vmem:[%s14911_s9 + $0x6f0] sm:$0xff]  ;;  %v10141_v28 = vld [vmem:[%s14911_s9 + $0x628] sm:$0xff] }
 0x88f   : > { %v7807_v31 = vpop.f32.mrf.mxu2  ;;  %v10118_v51 = vld [vmem:[%s14911_s9 + $0x570] sm:$0xff] }
 0x890   : > { %v7831_v5 = vpop.f32.mrf.mxu0  ;;  %7998 = vmatpush.bf16.msrb.mxu1 %v10088_v53  ;;  %v10126_v31 = vld [vmem:[%s14911_s9 + $0x5b0] sm:$0xff]  ;;  %v10149_v53 = vld [vmem:[%s14911_s9 + $0x668] sm:$0xff] }
 0x891   : > { %v5540_v42 = vld [vmem:[#allocation1 + $0x4] ss:$9 sm:$0xff]  ;;  %v7844_v23 = vpop.f32.mrf.mxu1 }
 0x892   : > { %5545 = vst [vmem:[#allocation1] sm:$0xff] %v14095_v60  ;;  %5541 = vrot.lane.b32.xlu1 %v5540_v42, %s10362_s29  ;;  %8030 = vmatpush.bf16.msra.mxu0 %v10119_v33  ;;  %v10109_v42 = vld [vmem:[%s14911_s9 + $0x528] sm:$0xff] }
 0x893   : > { %8018 = vmatpush.bf16.msra.mxu3 %v10110_v12  ;;  %v10157_v33 = vld [vmem:[%s14911_s9 + $0x6a8] sm:$0xff] }
 0x894   : > { %8043 = vmatpush.bf16.msra.mxu1 %v10127_v62 }
 0x896   : > { %v7818_v46 = vpop.f32.mrf.mxu3  ;;  %8031 = vmatpush.bf16.msra.mxu0 %v10118_v51 }
 0x897   : > { %v7819_v7 = vadd.f32 %v7818_v46, %v7806_v57  ;;  %v7857_v24 = vpop.f32.mrf.mxu2  ;;  %v10135_v57 = vld [vmem:[%s14911_s9 + $0x5f8] sm:$0xff]  ;;  %v10125_v46 = vld [vmem:[%s14911_s9 + $0x5a8] sm:$0xff]  ;;  %8019 = vmatpush.bf16.msra.mxu3 %v10109_v42 }
 0x898   : > { %v7833_v18 = vpop.f32.mrf.mxu0  ;;  %8056 = vmatpush.bf16.msra.mxu2 %v10135_v57  ;;  %8044 = vmatpush.bf16.msra.mxu1 %v10126_v31 }
 0x899   : > { %v5547_v6 = vld [vmem:[#allocation1 + $0x5] ss:$9 sm:$0xff]  ;;  %v7832_v1 = vadd.f32 %v7831_v5, %v7819_v7  ;;  %v7846_v4 = vpop.f32.mrf.mxu1 }
 0x89a   : > { %5549 = vst.msk [vmem:[#allocation4 + $0x1b] sm:$0x1] %vm13732_vm2, %v5547_v6  ;;  %v10134_v5 = vld [vmem:[%s14911_s9 + $0x5f0] sm:$0xff]  ;;  %v10133_v7 = vld [vmem:[%s14911_s9 + $0x5e8] sm:$0xff]  ;;  %v10108_v18 = vld [vmem:[%s14911_s9 + $0x520] sm:$0xff] }
 0x89b   : > { %5550 = vst [vmem:[#allocation1] sm:$0xff] %v14095_v60  ;;  %v7845_v14 = vadd.f32 %v7844_v23, %v7832_v1  ;;  %v10117_v23 = vld [vmem:[%s14911_s9 + $0x568] sm:$0xff]  ;;  %v10116_v6 = vld [vmem:[%s14911_s9 + $0x560] sm:$0xff]  ;;  %8020 = vmatpush.bf16.msra.mxu3 %v10108_v18 }
 0x89c   : > { %8057 = vmatpush.bf16.msra.mxu2 %v10134_v5  ;;  %8032 = vmatpush.bf16.msra.mxu0 %v10117_v23  ;;  %v10124_v1 = vld [vmem:[%s14911_s9 + $0x5a0] sm:$0xff] }
 0x89d   : > { %v14403_v50 = vadd.f32 %v7857_v24, %v7845_v14  ;;  %8045 = vmatpush.bf16.msra.mxu1 %v10125_v46  ;;  %v10132_v4 = vld [vmem:[%s14911_s9 + $0x5e0] sm:$0xff] }
 0x89e   : > { %v5462_v26 = vpop.permute.xlu0 %5461  ;;  %v7820_v60 = vpop.f32.mrf.mxu3 }
 0x89f   : > { %5464 = vst.msk [vmem:[#allocation4 + $0x13] sm:$0x1] %vm13832_vm5, %v5462_v26  ;;  %v7859_v48 = vpop.f32.mrf.mxu2  ;;  %8021 = vmatpush.bf16.msra.mxu3 %v10107_v10  ;;  %v10106_v60 = vld [vmem:[%s14911_s9 + $0x510] sm:$0xff] }
 0x8a0   : > { %8058 = vmatpush.bf16.msra.mxu2 %v10133_v7  ;;  %8033 = vmatpush.bf16.msra.mxu0 %v10116_v6  ;;  %v10122_v48 = vld [vmem:[%s14911_s9 + $0x590] sm:$0xff] }
 0x8a1   : > { %8046 = vmatpush.bf16.msra.mxu1 %v10124_v1 }
 0x8a2   : > { %v5552_v39 = vld [vmem:[#allocation1 + $0x6] ss:$9 sm:$0xff] }
 0x8a3   : > { %5553 = vrot.lane.b32.xlu2 %v5552_v39, %s10362_s29  ;;  %5558 = vst [vmem:[#allocation1] sm:$0xff] %v14428_v41  ;;  %8022 = vmatpush.bf16.msra.mxu3 %v10106_v60  ;;  %v10129_v39 = vld [vmem:[%s14911_s9 + $0x5c8] sm:$0xff] }
 0x8a4   : > { %8059 = vmatpush.bf16.msra.mxu2 %v10132_v4  ;;  %8034 = vmatpush.bf16.msra.mxu0 %v10115_v35  ;;  %v10156_v4 = vld [vmem:[%s14911_s9 + $0x6a0] sm:$0xff] }
 0x8a5   : > { %8047 = vmatpush.bf16.msra.mxu1 %v10123_v8 }
 0x8a7   : > { %8023 = vmatpush.bf16.msra.mxu3 %v10105_v25 }
 0x8a8   : > { %8060 = vmatpush.bf16.msra.mxu2 %v10131_v34  ;;  %8035 = vmatpush.bf16.msra.mxu0 %v10114_v38 }
 0x8a9   : > { %8048 = vmatpush.bf16.msra.mxu1 %v10122_v48 }
 0x8aa   : > { %v5560_v52 = vld [vmem:[#allocation1 + $0x1] ss:$9 sm:$0xff] }
 0x8ab   : > { %5562 = vst.msk [vmem:[#allocation4 + $0x1c] sm:$0x1] %vm13732_vm2, %v5560_v52  ;;  %8024 = vmatpush.bf16.msra.mxu3 %v10104_v54 }
 0x8ac   : > { %5563 = vst [vmem:[#allocation1] sm:$0xff] %v14428_v41  ;;  %8061 = vmatpush.bf16.msra.mxu2 %v10130_v45  ;;  %8036 = vmatpush.bf16.msra.mxu0 %v10113_v17 }
 0x8ad   : > { %8049 = vmatpush.bf16.msra.mxu1 %v10121_v11 }
 0x8ae   : > { %v5474_v30 = vpop.permute.xlu1 %5473 }
 0x8af   : > { %5476 = vst.msk [vmem:[#allocation4 + $0x14] sm:$0x1] %vm13832_vm5, %v5474_v30 }
 0x8b0   : > { %8062 = vmatpush.bf16.msra.mxu2 %v10129_v39  ;;  %8037 = vmatpush.bf16.msra.mxu0 %v10112_v15 }
 0x8b1   : > { %8050 = vmatpush.bf16.msra.mxu1 %v10120_v22  ;;  %v10139_v22 = vld [vmem:[%s14911_s9 + $0x618] sm:$0xff] }
 0x8b3   : > { %v5565_v47 = vld [vmem:[#allocation1 + $0x2] ss:$9 sm:$0xff] }
 0x8b4   : > { %5566 = vrot.lane.b32.xlu0 %v5565_v47, %s10362_s29  ;;  %5570 = vst [vmem:[#allocation1] sm:$0xff] %v14428_v41  ;;  %v10167_v47 = vld [vmem:[%s14911_s9 + $0x6f8] sm:$0xff] }
 0x8bb   : > { %v5572_v40 = vld [vmem:[#allocation1 + $0x3] ss:$9 sm:$0xff] }
 0x8bc   : > { %5574 = vst.msk [vmem:[#allocation4 + $0x1d] sm:$0x1] %vm13732_vm2, %v5572_v40  ;;  %5600 = vrot.lane.b32.xlu0 %v5225_v13, %s10362_s29  ;;  %v10165_v40 = vld [vmem:[%s14911_s9 + $0x6e8] sm:$0xff] }
 0x8bd   : > { %5575 = vst [vmem:[#allocation1] sm:$0xff] %v14428_v41 }
 0x8c4   : > { %v5577_v24 = vld [vmem:[#allocation1 + $0x4] ss:$9 sm:$0xff] }
 0x8c5   : > { %5578 = vrot.lane.b32.xlu1 %v5577_v24, %s10362_s29  ;;  %5582 = vst [vmem:[#allocation1] sm:$0xff] %v14428_v41  ;;  %v10140_v24 = vld [vmem:[%s14911_s9 + $0x620] sm:$0xff] }
 0x8c8   : > { %v5496_v14 = vpop.permute.xlu0 %5495 }
 0x8c9   : > { %5498 = vst.msk [vmem:[#allocation4 + $0x16] sm:$0x1] %vm13832_vm5, %v5496_v14  ;;  %v10164_v14 = vld [vmem:[%s14911_s9 + $0x6e0] sm:$0xff] }
 0x8cc   : > { %v5584_v26 = vld [vmem:[#allocation1 + $0x5] ss:$9 sm:$0xff] }
 0x8cd   : > { %5587 = vst [vmem:[#allocation1] sm:$0xff] %v14428_v41 }
 0x8ce   : > { %5586 = vst.msk [vmem:[#allocation4 + $0x1e] sm:$0x1] %vm13732_vm2, %v5584_v26 }
 0x8d4   : > { %v5589_v58 = vld [vmem:[#allocation1 + $0x6] ss:$9 sm:$0xff] }
 0x8d5   : > { %5590 = vrot.lane.b32.xlu2 %v5589_v58, %s10362_s29  ;;  %5594 = vst [vmem:[#allocation1] sm:$0xff] %v14428_v41  ;;  %v10128_v41 = vld [vmem:[%s14911_s9 + $0x5c0] sm:$0xff]  ;;  %s10279_s29 = sshra.s32 %s8235_s24, 4  ;;  %s10280_s29 = int_to_ptr.hbm [resolvable:$true] %s10279_s29 }
 0x8d6   : > { %8063 = vmatpush.bf16.msra.mxu2 %v10128_v41  ;;  %v10147_v41 = vld [vmem:[%s14911_s9 + $0x658] sm:$0xff]  ;;  %s10281_s26 = scalar_lea.hbm %s10280_s29, 1  ;;  %p10286_p0 = scmp.lt.s32.totalorder %s10280_s29, %s14915_s13 }
 0x8d7   : > { %p10282_p11 = scmp.ne.s32.totalorder %s10280_s29, %s10281_s26  ;;  %p10287_p1 = scmp.lt.s32.totalorder %s10285_s22, %s10281_s26 }
 0x8d8   : > { %v5508_v63 = vpop.permute.xlu1 %5507 }
 0x8d9   : > { %5510 = vst.msk [vmem:[#allocation4 + $0x17] sm:$0x1] %vm13832_vm5, %v5508_v63  ;;  %v10155_v63 = vld [vmem:[%s14911_s9 + $0x698] sm:$0xff]  ;;  %p10283_p12 = pnand %p10282_p11, %p10479_p5  ;;  %p10288_p2 = por %p10287_p1, %p10286_p0 }
 0x8db   : > { %p10284_p13 = pneg %p10283_p12 }
 0x8dc   : > { %v5596_v20 = vld [vmem:[#allocation1 + $0x7] ss:$9 sm:$0xff] }
 0x8dd   : > { %5598 = vst.msk [vmem:[#allocation4 + $0x1f] sm:$0x1] %vm13732_vm2, %v5596_v20  ;;  %p10289_p3 = pnand %p10288_p2, %p10284_p13 }
 0x8e0   : > { %v5606_v37 = vld [vmem:[#allocation4 + $0x10] sm:$0xff] }
 0x8e1   : > { %v5628_v61 = vperm.slane %v5606_v37, 0  ;;  %v5629_v52 = vperm.slane %v5606_v37, 1  ;;  %v5630_v49 = vperm.slane %v5606_v37, 2  ;;  %v5631_v21 = vperm.slane %v5606_v37, 3 }
 0x8e2   : > { %v5632_v13 = vperm.slane %v5606_v37, 4  ;;  %v5633_v36 = vperm.slane %v5606_v37, 5  ;;  %v5634_v12 = vperm.slane %v5606_v37, 6  ;;  %v5635_v51 = vperm.slane %v5606_v37, 7  ;;  %v10163_v37 = vld [vmem:[%s14911_s9 + $0x6d8] sm:$0xff] }
 0x8e3   : > { %v5692_v55 = vpack.c.bf16 %v5628_v61, %v5628_v61  ;;  %v5693_v32 = vpack.c.bf16 %v5629_v52, %v5629_v52  ;;  %v5694_v30 = vpack.c.bf16 %v5630_v49, %v5630_v49  ;;  %v5695_v19 = vpack.c.bf16 %v5631_v21, %v5631_v21  ;;  %v10138_v61 = vld [vmem:[%s14911_s9 + $0x610] sm:$0xff] }
 0x8e4   : > { %v5696_v46 = vpack.c.bf16 %v5632_v13, %v5632_v13  ;;  %v5697_v7 = vpack.c.bf16 %v5633_v36, %v5633_v36  ;;  %v5698_v6 = vpack.c.bf16 %v5634_v12, %v5634_v12  ;;  %v5699_v1 = vpack.c.bf16 %v5635_v51, %v5635_v51  ;;  %v10146_v52 = vld [vmem:[%s14911_s9 + $0x650] sm:$0xff]  ;;  %v10181_v13 = vld [vmem:[%s14911_s9 + $0x768] sm:$0xff]  ;;  %v10196_v12 = vld [vmem:[%s14911_s9 + $0x7e0] sm:$0xff] }
 0x8e5   : > { %7973 = vmatmul.bf16.vlgmr.msrb.gmra.mxu3 %v5692_v55  ;;  %7986 = vmatmul.bf16.vlgmr.msrb.gmra.mxu0 %v5693_v32  ;;  %v10154_v49 = vld [vmem:[%s14911_s9 + $0x690] sm:$0xff]  ;;  %v10137_v55 = vld [vmem:[%s14911_s9 + $0x608] sm:$0xff]  ;;  %v10171_v51 = vld [vmem:[%s14911_s9 + $0x718] sm:$0xff] }
 0x8e6   : > { %7999 = vmatmul.bf16.vlgmr.msrb.gmra.mxu1 %v5694_v30  ;;  %8012 = vmatmul.bf16.vlgmr.msrb.gmra.mxu2 %v5695_v19  ;;  %v10162_v21 = vld [vmem:[%s14911_s9 + $0x6d0] sm:$0xff]  ;;  %v10145_v32 = vld [vmem:[%s14911_s9 + $0x648] sm:$0xff] }
 0x8e7   : > { %8069 = vmatpush.bf16.msrb.mxu3 %v10143_v29  ;;  %8082 = vmatpush.bf16.msrb.mxu0 %v10151_v9  ;;  %v10153_v30 = vld [vmem:[%s14911_s9 + $0x688] sm:$0xff]  ;;  %v10136_v29 = vld [vmem:[%s14911_s9 + $0x600] sm:$0xff] }
 0x8e8   : > { %8095 = vmatpush.bf16.msrb.mxu1 %v10159_v3  ;;  %8108 = vmatpush.bf16.msrb.mxu2 %v10167_v47  ;;  %v10161_v19 = vld [vmem:[%s14911_s9 + $0x6c8] sm:$0xff]  ;;  %v10144_v9 = vld [vmem:[%s14911_s9 + $0x640] sm:$0xff]  ;;  %v10175_v47 = vld [vmem:[%s14911_s9 + $0x738] sm:$0xff] }
 0x8e9   : > { %v7883_v16 = vpop.f32.mrf.mxu0  ;;  %v10152_v3 = vld [vmem:[%s14911_s9 + $0x680] sm:$0xff]  ;;  %v10189_v36 = vld [vmem:[%s14911_s9 + $0x7a8] sm:$0xff] }
 0x8ea   : > { %v7896_v27 = vpop.f32.mrf.mxu1 }
 0x8eb   : > { %8070 = vmatpush.bf16.msrb.mxu3 %v10142_v2  ;;  %8083 = vmatpush.bf16.msrb.mxu0 %v10150_v0  ;;  %v10191_v2 = vld [vmem:[%s14911_s9 + $0x7b8] sm:$0xff] }
 0x8ec   : > { %8096 = vmatpush.bf16.msrb.mxu1 %v10158_v56  ;;  %8109 = vmatpush.bf16.msrb.mxu2 %v10166_v43  ;;  %v10199_v0 = vld [vmem:[%s14911_s9 + $0x7f8] sm:$0xff]  ;;  %v10174_v56 = vld [vmem:[%s14911_s9 + $0x730] sm:$0xff] }
 0x8ed   : > { %v10182_v43 = vld [vmem:[%s14911_s9 + $0x770] sm:$0xff] }
 0x8ef   : > { %v7870_v59 = vpop.f32.mrf.mxu3  ;;  %8071 = vmatpush.bf16.msrb.mxu3 %v10141_v28  ;;  %8084 = vmatpush.bf16.msrb.mxu0 %v10149_v53  ;;  %v10190_v28 = vld [vmem:[%s14911_s9 + $0x7b0] sm:$0xff] }
 0x8f0   : > { %v7871_v62 = vadd.f32 %v7870_v59, %v14403_v50  ;;  %v7909_v57 = vpop.f32.mrf.mxu2  ;;  %8097 = vmatpush.bf16.msrb.mxu1 %v10157_v33  ;;  %8110 = vmatpush.bf16.msrb.mxu2 %v10165_v40  ;;  %v10148_v50 = vld [vmem:[%s14911_s9 + $0x660] sm:$0xff]  ;;  %v10198_v53 = vld [vmem:[%s14911_s9 + $0x7f0] sm:$0xff]  ;;  %v10173_v59 = vld [vmem:[%s14911_s9 + $0x728] sm:$0xff] }
 0x8f1   : > { %v7885_v31 = vpop.f32.mrf.mxu0  ;;  %v10197_v33 = vld [vmem:[%s14911_s9 + $0x7e8] sm:$0xff]  ;;  %v10172_v40 = vld [vmem:[%s14911_s9 + $0x720] sm:$0xff] }
 0x8f2   : > { %v7884_v5 = vadd.f32 %v7883_v16, %v7871_v62  ;;  %v7898_v42 = vpop.f32.mrf.mxu1  ;;  %v10160_v16 = vld [vmem:[%s14911_s9 + $0x6c0] sm:$0xff]  ;;  %v10179_v31 = vld [vmem:[%s14911_s9 + $0x758] sm:$0xff] }
 0x8f3   : > { %v5530_v23 = vpop.permute.xlu0 %5529  ;;  %8072 = vmatpush.bf16.msrb.mxu3 %v10140_v24  ;;  %8085 = vmatpush.bf16.msrb.mxu0 %v10148_v50  ;;  %v10180_v62 = vld [vmem:[%s14911_s9 + $0x760] sm:$0xff]  ;;  %v10195_v42 = vld [vmem:[%s14911_s9 + $0x7d8] sm:$0xff]  ;;  %v10186_v24 = vld [vmem:[%s14911_s9 + $0x790] sm:$0xff] }
 0x8f4   : > { %5532 = vst.msk [vmem:[#allocation4 + $0x19] sm:$0x1] %vm13832_vm5, %v5530_v23  ;;  %v7897_v18 = vadd.f32 %v7896_v27, %v7884_v5  ;;  %8098 = vmatpush.bf16.msrb.mxu1 %v10156_v4  ;;  %8111 = vmatpush.bf16.msrb.mxu2 %v10164_v14  ;;  %v10183_v27 = vld [vmem:[%s14911_s9 + $0x778] sm:$0xff]  ;;  %v10194_v50 = vld [vmem:[%s14911_s9 + $0x7d0] sm:$0xff]  ;;  %v10193_v4 = vld [vmem:[%s14911_s9 + $0x7c8] sm:$0xff] }
 0x8f5   : > { %8025 = vmatmul.bf16.vlgmr.msra.gmra.mxu3 %v5696_v46  ;;  %8038 = vmatmul.bf16.vlgmr.msra.gmra.mxu0 %v5697_v7  ;;  %v10187_v5 = vld [vmem:[%s14911_s9 + $0x798] sm:$0xff]  ;;  %v10170_v46 = vld [vmem:[%s14911_s9 + $0x710] sm:$0xff] }
 0x8f6   : > { %v7910_v10 = vadd.f32 %v7909_v57, %v7897_v18  ;;  %8051 = vmatmul.bf16.vlgmr.msra.gmra.mxu1 %v5698_v6  ;;  %8064 = vmatmul.bf16.vlgmr.msra.gmra.mxu2 %v5699_v1  ;;  %v10188_v57 = vld [vmem:[%s14911_s9 + $0x7a0] sm:$0xff]  ;;  %v10178_v7 = vld [vmem:[%s14911_s9 + $0x750] sm:$0xff]  ;;  %v10169_v18 = vld [vmem:[%s14911_s9 + $0x708] sm:$0xff] }
 0x8f7   : > { %v7872_v35 = vpop.f32.mrf.mxu3  ;;  %8073 = vmatpush.bf16.msrb.mxu3 %v10139_v22  ;;  %8086 = vmatpush.bf16.msrb.mxu0 %v10147_v41  ;;  %v10177_v6 = vld [vmem:[%s14911_s9 + $0x748] sm:$0xff] }
 0x8f8   : > { %v7911_v8 = vpop.f32.mrf.mxu2  ;;  %8099 = vmatpush.bf16.msrb.mxu1 %v10155_v63  ;;  %8112 = vmatpush.bf16.msrb.mxu2 %v10163_v37  ;;  %v10185_v1 = vld [vmem:[%s14911_s9 + $0x788] sm:$0xff]  ;;  %v10168_v35 = vld [vmem:[%s14911_s9 + $0x700] sm:$0xff] }
 0x8f9   : > { %v7935_v34 = vpop.f32.mrf.mxu0  ;;  %v10176_v8 = vld [vmem:[%s14911_s9 + $0x740] sm:$0xff] }
 0x8fa   : > { %v7948_v26 = vpop.f32.mrf.mxu1 }
 0x8fb   : > { %8074 = vmatpush.bf16.msrb.mxu3 %v10138_v61  ;;  %8087 = vmatpush.bf16.msrb.mxu0 %v10146_v52 }
 0x8fc   : > { %8100 = vmatpush.bf16.msrb.mxu1 %v10154_v49  ;;  %8113 = vmatpush.bf16.msrb.mxu2 %v10162_v21 }
 0x8fd   : > { %v5554_v60 = vpop.permute.xlu2 %5553 }
 0x8fe   : > { %5556 = vst.msk [vmem:[#allocation4 + $0x1b] sm:$0x1] %vm13832_vm5, %v5554_v60 }
 0x8ff   : > { %v7922_v38 = vpop.f32.mrf.mxu3  ;;  %8075 = vmatpush.bf16.msrb.mxu3 %v10137_v55  ;;  %8088 = vmatpush.bf16.msrb.mxu0 %v10145_v32 }
 0x900   : > { %v7923_v48 = vadd.f32 %v7922_v38, %v7910_v10  ;;  %v7961_v45 = vpop.f32.mrf.mxu2  ;;  %8101 = vmatpush.bf16.msrb.mxu1 %v10153_v30  ;;  %8114 = vmatpush.bf16.msrb.mxu2 %v10161_v19 }
 0x901   : > { %v7937_v25 = vpop.f32.mrf.mxu0 }
 0x902   : > { %v7936_v17 = vadd.f32 %v7935_v34, %v7923_v48  ;;  %v7950_v11 = vpop.f32.mrf.mxu1  ;;  %v10184_v34 = vld [vmem:[%s14911_s9 + $0x780] sm:$0xff] }
 0x903   : > { %8076 = vmatpush.bf16.msrb.mxu3 %v10136_v29  ;;  %8089 = vmatpush.bf16.msrb.mxu0 %v10144_v9 }
 0x904   : > { %v7949_v39 = vadd.f32 %v7948_v26, %v7936_v17  ;;  %v5542_v58 = vpop.permute.xlu1 %5541  ;;  %8102 = vmatpush.bf16.msrb.mxu1 %v10152_v3  ;;  %8115 = vmatpush.bf16.msrb.mxu2 %v10160_v16  ;;  %v10192_v26 = vld [vmem:[%s14911_s9 + $0x7c0] sm:$0xff] }
 0x905   : > { %5544 = vst.msk [vmem:[#allocation4 + $0x1a] sm:$0x1] %vm13832_vm5, %v5542_v58 }
 0x906   : > { %v14683_v54 = vadd.f32 %v7961_v45, %v7949_v39 }
 0x907   : > { %v7924_v15 = vpop.f32.mrf.mxu3  ;;  %8121 = vmatpush.bf16.msra.mxu3 %v10175_v47  ;;  %8134 = vmatpush.bf16.msra.mxu0 %v10183_v27 }
 0x908   : > { %v7963_v20 = vpop.f32.mrf.mxu2  ;;  %8147 = vmatpush.bf16.msra.mxu1 %v10191_v2  ;;  %8160 = vmatpush.bf16.msra.mxu2 %v10199_v0 }
 0x90b   : > { %8122 = vmatpush.bf16.msra.mxu3 %v10174_v56  ;;  %8135 = vmatpush.bf16.msra.mxu0 %v10182_v43 }
 0x90c   : > { %8148 = vmatpush.bf16.msra.mxu1 %v10190_v28  ;;  %8161 = vmatpush.bf16.msra.mxu2 %v10198_v53 }
 0x90f   : > { %8123 = vmatpush.bf16.msra.mxu3 %v10173_v59  ;;  %8136 = vmatpush.bf16.msra.mxu0 %v10181_v13 }
 0x910   : > { %8149 = vmatpush.bf16.msra.mxu1 %v10189_v36  ;;  %8162 = vmatpush.bf16.msra.mxu2 %v10197_v33 }
 0x913   : > { %8124 = vmatpush.bf16.msra.mxu3 %v10172_v40  ;;  %8137 = vmatpush.bf16.msra.mxu0 %v10180_v62  ;;  %v10201_v62 = vld [vmem:[%s14913_s11 + $0x8] sm:$0xff] }
 0x914   : > { %8150 = vmatpush.bf16.msra.mxu1 %v10188_v57  ;;  %8163 = vmatpush.bf16.msra.mxu2 %v10196_v12  ;;  %v10200_v57 = vld [vmem:[%s14913_s11] sm:$0xff] }
 0x917   : > { %8125 = vmatpush.bf16.msra.mxu3 %v10171_v51  ;;  %8138 = vmatpush.bf16.msra.mxu0 %v10179_v31 }
 0x918   : > { %8151 = vmatpush.bf16.msra.mxu1 %v10187_v5  ;;  %8164 = vmatpush.bf16.msra.mxu2 %v10195_v42 }
 0x91b   : > { %8126 = vmatpush.bf16.msra.mxu3 %v10170_v46  ;;  %8139 = vmatpush.bf16.msra.mxu0 %v10178_v7 }
 0x91c   : > { %8152 = vmatpush.bf16.msra.mxu1 %v10186_v24  ;;  %8165 = vmatpush.bf16.msra.mxu2 %v10194_v50 }
 0x91f   : > { %8127 = vmatpush.bf16.msra.mxu3 %v10169_v18  ;;  %8140 = vmatpush.bf16.msra.mxu0 %v10177_v6 }
 0x920   : > { %8153 = vmatpush.bf16.msra.mxu1 %v10185_v1  ;;  %8166 = vmatpush.bf16.msra.mxu2 %v10193_v4 }
 0x923   : > { %8128 = vmatpush.bf16.msra.mxu3 %v10168_v35  ;;  %8141 = vmatpush.bf16.msra.mxu0 %v10176_v8 }
 0x924   : > { %8154 = vmatpush.bf16.msra.mxu1 %v10184_v34  ;;  %8167 = vmatpush.bf16.msra.mxu2 %v10192_v26 }
 0x926   : > { %v5567_v23 = vpop.permute.xlu0 %5566 }
 0x927   : > { %5569 = vst.msk [vmem:[#allocation4 + $0x1c] sm:$0x1] %vm13832_vm5, %v5567_v23 }
 0x92e   : > { %v5601_v14 = vpop.permute.xlu0 %5600 }
 0x92f   : > { %5603 = vst.msk [vmem:[#allocation4 + $0x1f] sm:$0x1] %vm13832_vm5, %v5601_v14  ;;  %v5591_v10 = vpop.permute.xlu2 %5590 }
 0x930   : > { %5593 = vst.msk [vmem:[#allocation4 + $0x1e] sm:$0x1] %vm13832_vm5, %v5591_v10 }
 0x937   : > { %v5579_v60 = vpop.permute.xlu1 %5578 }
 0x938   : > { %5581 = vst.msk [vmem:[#allocation4 + $0x1d] sm:$0x1] %vm13832_vm5, %v5579_v60 }
 0x93f   : > { %v5607_v38 = vld [vmem:[#allocation4 + $0x18] sm:$0xff] }
 0x940   : > { %v5636_v48 = vperm.slane %v5607_v38, 0  ;;  %v5637_v45 = vperm.slane %v5607_v38, 1  ;;  %v5638_v25 = vperm.slane %v5607_v38, 2  ;;  %v5639_v17 = vperm.slane %v5607_v38, 3 }
 0x941   : > { %v5640_v22 = vperm.slane %v5607_v38, 4  ;;  %v5641_v41 = vperm.slane %v5607_v38, 5  ;;  %v5642_v63 = vperm.slane %v5607_v38, 6  ;;  %v5643_v20 = vperm.slane %v5607_v38, 7 }
 0x942   : > { %v5700_v11 = vpack.c.bf16 %v5636_v48, %v5636_v48  ;;  %v5701_v39 = vpack.c.bf16 %v5637_v45, %v5637_v45  ;;  %v5702_v58 = vpack.c.bf16 %v5638_v25, %v5638_v25  ;;  %v5703_v15 = vpack.c.bf16 %v5639_v17, %v5639_v17 }
 0x943   : > { %v5704_v37 = vpack.c.bf16 %v5640_v22, %v5640_v22  ;;  %v5705_v44 = vpack.c.bf16 %v5641_v41, %v5641_v41  ;;  %v5706_v61 = vpack.c.bf16 %v5642_v63, %v5642_v63  ;;  %v5707_v52 = vpack.c.bf16 %v5643_v20, %v5643_v20 }
 0x944   : > { %8077 = vmatmul.bf16.vlgmr.msrb.gmra.mxu3 %v5700_v11  ;;  %8090 = vmatmul.bf16.vlgmr.msrb.gmra.mxu0 %v5701_v39  ;;  %v8179_v11 = vld [vmem:[%s14914_s12] sm:$0x1] }
 0x945   : > { %8103 = vmatmul.bf16.vlgmr.msrb.gmra.mxu1 %v5702_v58  ;;  %8116 = vmatmul.bf16.vlgmr.msrb.gmra.mxu2 %v5703_v15 }
 0x946   : > { %8201 = vmatpush.bf16.msrb.mxu3 %v10201_v62 }
 0x94a   : > { %8202 = vmatpush.bf16.msrb.mxu3 %v10200_v57 }
 0x954   : > { %8129 = vmatmul.bf16.vlgmr.msra.gmra.mxu3 %v5704_v37  ;;  %8142 = vmatmul.bf16.vlgmr.msra.gmra.mxu0 %v5705_v44 }
 0x955   : > { %8155 = vmatmul.bf16.vlgmr.msra.gmra.mxu1 %v5706_v61  ;;  %8168 = vmatmul.bf16.vlgmr.msra.gmra.mxu2 %v5707_v52 }
 0x962   : > { %v7987_v49 = vpop.f32.mrf.mxu0 }
 0x963   : > { %v8000_v21 = vpop.f32.mrf.mxu1 }
 0x968   : > { %v7974_v55 = vpop.f32.mrf.mxu3 }
 0x969   : > { %v7975_v32 = vadd.f32 %v7974_v55, %v14683_v54  ;;  %v8013_v30 = vpop.f32.mrf.mxu2 }
 0x96a   : > { %v7989_v19 = vpop.f32.mrf.mxu0 }
 0x96b   : > { %v7988_v29 = vadd.f32 %v7987_v49, %v7975_v32  ;;  %v8002_v9 = vpop.f32.mrf.mxu1 }
 0x96d   : > { %v8001_v3 = vadd.f32 %v8000_v21, %v7988_v29 }
 0x96f   : > { %v8014_v16 = vadd.f32 %v8013_v30, %v8001_v3 }
 0x970   : > { %v7976_v47 = vpop.f32.mrf.mxu3 }
 0x971   : > { %v8015_v27 = vpop.f32.mrf.mxu2 }
 0x972   : > { %v8039_v2 = vpop.f32.mrf.mxu0 }
 0x973   : > { %v8052_v0 = vpop.f32.mrf.mxu1 }
 0x978   : > { %v8026_v56 = vpop.f32.mrf.mxu3 }
 0x979   : > { %v8027_v43 = vadd.f32 %v8026_v56, %v8014_v16  ;;  %v8065_v28 = vpop.f32.mrf.mxu2 }
 0x97a   : > { %v8041_v53 = vpop.f32.mrf.mxu0 }
 0x97b   : > { %v8040_v59 = vadd.f32 %v8039_v2, %v8027_v43  ;;  %v8054_v13 = vpop.f32.mrf.mxu1 }
 0x97d   : > { %v8053_v36 = vadd.f32 %v8052_v0, %v8040_v59 }
 0x97f   : > { %v8066_v33 = vadd.f32 %v8065_v28, %v8053_v36 }
 0x980   : > { %v8028_v40 = vpop.f32.mrf.mxu3 }
 0x981   : > { %v8067_v54 = vpop.f32.mrf.mxu2 }
 0x9c1   : > { %v8091_v12 = vpop.f32.mrf.mxu0 }
 0x9c2   : > { %v8104_v51 = vpop.f32.mrf.mxu1 }
 0x9c7   : > { %v8078_v31 = vpop.f32.mrf.mxu3 }
 0x9c8   : > { %v8117_v5 = vpop.f32.mrf.mxu2  ;;  %v8079_v23 = vadd.f32 %v8078_v31, %v8066_v33 }
 0x9c9   : > { %v8093_v42 = vpop.f32.mrf.mxu0 }
 0x9ca   : > { %v8106_v46 = vpop.f32.mrf.mxu1  ;;  %v8092_v7 = vadd.f32 %v8091_v12, %v8079_v23 }
 0x9cc   : > { %v8105_v6 = vadd.f32 %v8104_v51, %v8092_v7 }
 0x9ce   : > { %v8118_v4 = vadd.f32 %v8117_v5, %v8105_v6 }
 0x9cf   : > { %v8080_v24 = vpop.f32.mrf.mxu3 }
 0x9d0   : > { %v8119_v50 = vpop.f32.mrf.mxu2 }
 0x9d1   : > { %v8143_v18 = vpop.f32.mrf.mxu0 }
 0x9d2   : > { %v8156_v1 = vpop.f32.mrf.mxu1 }
 0x9d7   : > { %v8130_v14 = vpop.f32.mrf.mxu3 }
 0x9d8   : > { %v8131_v10 = vadd.f32 %v8130_v14, %v8118_v4  ;;  %v8169_v35 = vpop.f32.mrf.mxu2 }
 0x9d9   : > { %v8145_v8 = vpop.f32.mrf.mxu0 }
 0x9da   : > { %v8144_v34 = vadd.f32 %v8143_v18, %v8131_v10  ;;  %v8158_v26 = vpop.f32.mrf.mxu1 }
 0x9dc   : > { %v8157_v60 = vadd.f32 %v8156_v1, %v8144_v34 }
 0x9de   : > { %v8170_v38 = vadd.f32 %v8169_v35, %v8157_v60 }
 0x9df   : > { %v8132_v48 = vpop.f32.mrf.mxu3 }
 0x9e0   : > { %v8173_v45 = vmax.f32 %v8170_v38, 0.0  ;;  %v8171_v25 = vpop.f32.mrf.mxu2 }
 0x9e2   : > { %v8174_v17 = vpack.c.bf16 %v8173_v45, %v8173_v45 }
 0x9e4   : > { %9838 = vmatmul.msk.bf16.vlgmr.msrb.gmra.mxu3 %vm657_vm0, %v8174_v17 }
 0xa67   : > { %v8204_v39 = vpop.f32.mrf.mxu3 }
 0xa68   : > { %v8205_v58 = vadd.f32 %v8204_v39, %v8179_v11 }
 0xa6a   : > { %v8210_v15 = vmul.f32 1.442695, %v8205_v58  ;;  %8209 = vst.msk [vmem:[%s463_s18] sm:$0x1] %vm8208_vm6, %v8205_v58 }
 0xa6b   : > { %10292 = shalt.err (!%p10289_p3)
}
 0xa6c   : > { %10203 = dma.vmem_to_hbm [thread:$0]  (%p10479_p5), %s8233_s15, 16, %s8235_s24, %s8218_s25   ;;  %10258 = vpow2.f32 %v8210_v15 }
 0xa6d   : > { %s10365_s16 = smov 118   ;;  %s8243_s29 = scalar_lea.hbm %s14916_s14, %s10462_s17 }
 0xa6e   : > { %s469_s26 = scalar_lea.vmem [#allocation7], %s14846_s28  ;;  %s8247_s22 = sshll.u32 %s8243_s29, 4  ;;  %s8248_s22 = int_to_ptr.hbm [resolvable:$true] %s8247_s22 }
 0xa6f   : > { %v8206_v22 = vpop.f32.mrf.mxu3  ;;  %s8245_s20 = sshll.u32 %s469_s26, 4  ;;  %s8222_s21 = scalar_lea.sflag [#allocation8], %s14846_s28  ;;  %s8246_s20 = int_to_ptr.vmem [resolvable:$true] %s8245_s20 }
 0xa70   : > { %s10307_s15 = sshra.s32 %s8248_s22, 4  ;;  %s10313_s17 = scalar_lea.hbm %s14916_s14, 2  ;;  %s10308_s15 = int_to_ptr.hbm [resolvable:$true] %s10307_s15 }
 0xa71   : > { %s10309_s24 = scalar_lea.hbm %s10308_s15, 1  ;;  %p10314_p9 = scmp.lt.s32.totalorder %s10308_s15, %s14916_s14 }
 0xa72   : > { %v10259_v41 = vpop.eup %10258  ;;  %p10310_p4 = scmp.ne.s32.totalorder %s10308_s15, %s10309_s24  ;;  %p10315_p10 = scmp.lt.s32.totalorder %s10313_s17, %s10309_s24 }
 0xa73   : > { %8213 = vrot.lane.b32.xlu1 %v10259_v41, %s10365_s16 }
 0xa74   : > { %p10311_p7 = pnand %p10310_p4, %p10479_p5  ;;  %p10316_p11 = por %p10315_p10, %p10314_p9 }
 0xa76   : > { %p10312_p8 = pneg %p10311_p7 }
 0xa78   : > { %p10317_p12 = pnand %p10316_p11, %p10312_p8 }
 0xae5   : > { %v8214_v63 = vpop.permute.xlu1 %8213 }
 0xae6   : > { %8216 = vst.msk [vmem:[%s469_s26] sm:$0x1] %vm8208_vm6, %v8214_v63 }
 0xae7   : > { %10320 = shalt.err (!%p10317_p12)
}
 0xae8   : > { %10204 = dma.vmem_to_hbm [thread:$0]  (%p10479_p5), %s8246_s20, 16, %s8248_s22, %s8222_s21  }
 0xae9 PF: > { %s14977_s28 = sld [smem:[#allocation13_spill]] }
 0xaea   : > { %s14978_s27 = sld [smem:[#allocation11_spill]] }
 0xaef   : > { %p10214_p13 = scmp.ge.s32.totalorder %s14977_s28, 2 }
 0xaf0   : > { %s8259_s26 = sand.u32 1, %s14978_s27  }
 0xaf1   : > { %p10208_p0 = pnand %p10214_p13, %p10483_p6  ;;  %s8260_s25 = scalar_lea.sflag [#allocation6], %s8259_s26 }
 0xaf3   : > { %p10209_p1 = pneg %p10208_p0 }
 0xaf5   : > { %10338 = dma.done.wait (%p10209_p1), %s8260_s25, 16  }
 0xaf6   : > { %10340 = vsyncadd (%p10209_p1), %s8260_s25, 4294967280  ;;  %s8269_s15 = scalar_lea.sflag [#allocation8], %s8259_s26 }
 0xaf7   : > { %10342 = dma.done.wait (%p10209_p1), %s8269_s15, 16  }
 0xaf8   : > { %10344 = vsyncadd (%p10209_p1), %s8269_s15, 4294967280  ;;  %s14980_s16 = sld [smem:[#allocation14_spill]]  ;;  %s14983_s29 = smov %s10351_s30 }
 0xaf9   : > { %s14981_s24 = sld [smem:[#allocation12_spill]] }
 0xafa   : > { %s14982_s15 = sld [smem:[#allocation15_spill]] }
 0xafe   : > { %p28_p5 = scmp.ge.s32.totalorder %s14980_s16, 4  }
 0xaff   : > { %s14984_s30 = smov %s14981_s24 }
 0xb00   :  { %30 = sbr.rel (!%p28_p5) target bundleno = 5 (0x5), region = 180 }
 0xb05   :  { %8274 = vsyncpa [#allocation6], 1 }
 0xb06   :  { %8276 = vsyncpa [#allocation6 + $0x1], 1 }
 0xb07   :  { %8277 = vsyncpa [#allocation8], 1 }
 0xb08   :  { %8279 = vsyncpa [#allocation8 + $0x1], 1 }

</bundles_post_ra>
